<compile_context>
chip_gen: v7x
topology: tpu7x:2x2x1
jax: 0.10.0
libtpu: 0.0.40
codegen_flags: <defaults>
</compile_context>

<pallas_src>
import jax
import jax.numpy as jnp
from jax.experimental import pallas as pl
from jax.experimental.pallas import tpu as pltpu


_RADIO_DIM = 1781       # Radiomic_encoder(num_features=1781)
_RADIO_PAD = 1792       # 14 * 128 (lane-dense K)
_RADIO_FEAT = 512       # Radio_encoder output width (fc_radio input)
_VIS_FEAT = 400         # 3D ResNet output width (fc_vis input)
_VIS_FEAT_PAD = 512     # lane-padded
_FUSE_DIM = 256         # fc_vis / fc_radio output width == token count for CrossAttention
_NUM_CLASSES = 2
_CLS_PAD = 128          # lane-padded logits (sliced back to 2 in the wrapper)


def _round_up(x, m):
    return ((x + m - 1) // m) * m


# ---------------------------------------------------------------------------
# Single fused kernel: encoders -> fc layers -> cross-attention -> classifier
# ---------------------------------------------------------------------------
def _fused_forward_kernel(radio_ref, img_ref,
                          w_renc_ref, w_venc_ref,
                          w_fcr_ref, b_fcr_ref,
                          w_fcv_ref, b_fcv_ref,
                          attn_ref,
                          w_cls_ref, b_cls_ref,
                          out_ref):
    f32 = jnp.float32
    bf16 = jnp.bfloat16
    B = radio_ref.shape[0]

    # ---- encoders (stand-ins for the external Resnet / Radiomic_encoder) ----
    # TODO(synk): get_pretrained_Vision_Encoder / Radiomic_encoder internals are external;
    #             Linear(+ReLU) stand-ins with the correct output widths (400 / 512) are used.
    r_feat = jnp.maximum(
        jnp.dot(radio_ref[...].astype(bf16), w_renc_ref[...],
                preferred_element_type=f32), 0.0)                    # [B, 512]
    v_feat = jnp.maximum(
        jnp.dot(img_ref[...].astype(bf16), w_venc_ref[...],
                preferred_element_type=f32), 0.0)                    # [B, 512] (lanes >=400 are 0)

    # ---- fc_radio / fc_vis (exact: Linear with bias) -------------------------
    rf = jnp.dot(r_feat.astype(bf16), w_fcr_ref[...],
                 preferred_element_type=f32) + b_fcr_ref[...]        # [B, 256]
    vf = jnp.dot(v_feat.astype(bf16), w_fcv_ref[...],
                 preferred_element_type=f32) + b_fcv_ref[...]        # [B, 256]

    # ---- CrossAttention(input_dim=1) over 256 tokens of dim 1 ----------------
    # TODO(synk): CrossAttention internals are external; stand-in = single-head scaled
    #             dot-product attention (query = radio, key/value = vision) with
    #             Linear(1,1) q/k/v/out projections passed as lane-broadcast rows.
    ap = attn_ref[...]                                               # (8, 256) f32
    q = rf * ap[0:1, :] + ap[1:2, :]                                 # [B, 256]
    k = vf * ap[2:3, :] + ap[3:4, :]                                 # [B, 256]
    v = vf * ap[4:5, :] + ap[5:6, :]                                 # [B, 256]

    q_t = jnp.transpose(q)                                           # [256, B]: queries -> sublanes
    ctx_cols = []
    for b in range(B):                                               # B is tiny & static: unrolled
        qc = q_t[:, b:b + 1]                                         # [256, 1]
        kr = k[b:b + 1, :]                                           # [1, 256]
        vr = v[b:b + 1, :]                                           # [1, 256]
        s = qc * kr                                                  # [256, 256]; scale = 1/sqrt(1)
        m = jnp.max(s, axis=-1, keepdims=True)
        e = jnp.exp(s - m)
        p = e / jnp.sum(e, axis=-1, keepdims=True)                   # softmax over keys (lanes)
        ctx_cols.append(jnp.sum(p * vr, axis=-1, keepdims=True))     # [256, 1]
    ctx = jnp.transpose(jnp.concatenate(ctx_cols, axis=1))           # [B, 256]
    g = ctx * ap[6:7, :] + ap[7:8, :]                                # output Linear(1,1)

    # ---- permute(0,2,1) -> [B,1,256]; classify head (stand-in, lane-padded) --
    # TODO(synk): DenseNet(layer_num=(6,12,24,16), growth_rate=32, classes=2) is external;
    #             stand-in = Linear(256 -> 2), logits lane-padded to 128 columns.
    logits = jnp.dot(g.astype(bf16), w_cls_ref[...],
                     preferred_element_type=f32) + b_cls_ref[...]    # [B, 128]
    out_ref[...] = logits.astype(out_ref.dtype)


# ---------------------------------------------------------------------------
# Wrapper: pad inputs to lane-dense shapes, run the single pallas_call, slice logits
# ---------------------------------------------------------------------------
def _forward_impl(params, radio, img):
    B = radio.shape[0]
    radio_pad_dim = params["w_renc"].shape[0]
    img_pad_dim = params["w_venc"].shape[0]

    radio_f = radio.astype(jnp.float32)
    radio_f = jnp.pad(radio_f, ((0, 0), (0, radio_pad_dim - radio_f.shape[1])))
    img_flat = img.reshape(B, -1).astype(jnp.float32)
    img_flat = jnp.pad(img_flat, ((0, 0), (0, img_pad_dim - img_flat.shape[1])))

    in_specs = [pl.BlockSpec(memory_space=pltpu.MemorySpace.VMEM) for _ in range(11)]
    logits_pad = pl.pallas_call(
        _fused_forward_kernel,
        out_shape=jax.ShapeDtypeStruct((B, _CLS_PAD), jnp.float32),
        in_specs=in_specs,
        out_specs=pl.BlockSpec(memory_space=pltpu.MemorySpace.VMEM),
    )(radio_f, img_flat,
      params["w_renc"], params["w_venc"],
      params["w_fc_radio"], params["b_fc_radio"],
      params["w_fc_vis"], params["b_fc_vis"],
      params["attn_params"],
      params["w_cls"], params["b_cls"])
    return logits_pad[:, :_NUM_CLASSES]                              # [B, 2]


two_model_forward = jax.jit(_forward_impl)


# ---------------------------------------------------------------------------
# Parameter construction (bf16 weights, zero-padded to lane-dense shapes)
# ---------------------------------------------------------------------------
def init_params(key, img_flat_dim):
    ks = jax.random.split(key, 9)
    s = 0.02
    img_pad = _round_up(img_flat_dim, 128)

    # Radio_encoder stand-in: Linear(1781 -> 512), K rows zero-padded to 1792.
    w_renc = s * jax.random.normal(ks[0], (_RADIO_DIM, _RADIO_FEAT), jnp.float32)
    w_renc = jnp.pad(w_renc, ((0, _RADIO_PAD - _RADIO_DIM), (0, 0))).astype(jnp.bfloat16)

    # Vision encoder stand-in: Linear(img_flat -> 400), output cols zero-padded to 512.
    w_venc = s * jax.random.normal(ks[1], (img_flat_dim, _VIS_FEAT), jnp.float32)
    w_venc = jnp.pad(w_venc, ((0, img_pad - img_flat_dim),
                              (0, _VIS_FEAT_PAD - _VIS_FEAT))).astype(jnp.bfloat16)

    # fc_radio: Linear(512, 256) with bias (exact).
    w_fcr = (s * jax.random.normal(ks[2], (_RADIO_FEAT, _FUSE_DIM), jnp.float32)
             ).astype(jnp.bfloat16)
    b_fcr = s * jax.random.normal(ks[3], (1, _FUSE_DIM), jnp.float32)

    # fc_vis: Linear(400, 256) with bias (exact); K rows zero-padded 400 -> 512.
    w_fcv = s * jax.random.normal(ks[4], (_VIS_FEAT, _FUSE_DIM), jnp.float32)
    w_fcv = jnp.pad(w_fcv, ((0, _VIS_FEAT_PAD - _VIS_FEAT), (0, 0))).astype(jnp.bfloat16)
    b_fcv = s * jax.random.normal(ks[5], (1, _FUSE_DIM), jnp.float32)

    # CrossAttention(input_dim=1) stand-in: scalar Linear(1,1) q/k/v/out projections,
    # materialised as lane-broadcast rows (rows 0..7 = wq,bq,wk,bk,wv,bv,wo,bo).
    attn_scalars = (jnp.array([1., 0., 1., 0., 1., 0., 1., 0.], jnp.float32)
                    + 0.1 * jax.random.normal(ks[6], (8,), jnp.float32))
    attn_params = jnp.asarray(
        jnp.broadcast_to(attn_scalars[:, None], (8, _FUSE_DIM)), jnp.float32)

    # Classify-head stand-in: Linear(256 -> 2), output cols lane-padded to 128.
    w_cls = s * jax.random.normal(ks[7], (_FUSE_DIM, _NUM_CLASSES), jnp.float32)
    w_cls = jnp.pad(w_cls, ((0, 0), (0, _CLS_PAD - _NUM_CLASSES))).astype(jnp.bfloat16)
    b_cls = jnp.pad(s * jax.random.normal(ks[8], (1, _NUM_CLASSES), jnp.float32),
                    ((0, 0), (0, _CLS_PAD - _NUM_CLASSES)))

    return {
        "w_renc": w_renc, "w_venc": w_venc,
        "w_fc_radio": w_fcr, "b_fc_radio": b_fcr,
        "w_fc_vis": w_fcv, "b_fc_vis": b_fcv,
        "attn_params": attn_params,
        "w_cls": w_cls, "b_cls": b_cls,
    }


if __name__ == "__main__":
    key = jax.random.PRNGKey(0)
    k_radio, k_img, k_params = jax.random.split(key, 3)

    # Small shapes consistent with the module's forward signature:
    #   radio: [B, 1781]   img: [B, 1, D, H, W] (reduced spatial size; vision encoder is a stand-in)
    B = 2
    radio = jax.random.normal(k_radio, (B, _RADIO_DIM), jnp.float32)
    img = jax.random.normal(k_img, (B, 1, 4, 16, 16), jnp.float32)

    img_flat_dim = 1 * 4 * 16 * 16
    params = init_params(k_params, img_flat_dim)

    out = two_model_forward(params, radio, img)
    jax.block_until_ready(out)

    assert out.shape == (B, _NUM_CLASSES)
    assert bool(jnp.all(jnp.isfinite(out)))
    print("KERNEL_OK")
</pallas_src>

<mosaic_0001>
module attributes {stable_mosaic.version = 11 : i64} {
  func.func @_fused_forward_kernel(%arg0: memref<2x1792xf32, #tpu.memory_space<vmem>>, %arg1: memref<2x1024xf32, #tpu.memory_space<vmem>>, %arg2: memref<1792x512xbf16, #tpu.memory_space<vmem>>, %arg3: memref<1024x512xbf16, #tpu.memory_space<vmem>>, %arg4: memref<512x256xbf16, #tpu.memory_space<vmem>>, %arg5: memref<1x256xf32, #tpu.memory_space<vmem>>, %arg6: memref<512x256xbf16, #tpu.memory_space<vmem>>, %arg7: memref<1x256xf32, #tpu.memory_space<vmem>>, %arg8: memref<8x256xf32, #tpu.memory_space<vmem>>, %arg9: memref<256x128xbf16, #tpu.memory_space<vmem>>, %arg10: memref<1x128xf32, #tpu.memory_space<vmem>>, %arg11: memref<2x128xf32, #tpu.memory_space<vmem>>) attributes {dimension_semantics = [], scalar_prefetch = 0 : i64, scratch_operands = 0 : i64, tpu.core_type = #tpu.core_type<tc>} {
    %c0 = arith.constant 0 : index
    %c0_0 = arith.constant 0 : index
    %0 = vector.load %arg0[%c0, %c0_0] : memref<2x1792xf32, #tpu.memory_space<vmem>>, vector<2x1792xf32>
    %1 = arith.truncf %0 : vector<2x1792xf32> to vector<2x1792xbf16>
    %c0_1 = arith.constant 0 : index
    %c0_2 = arith.constant 0 : index
    %2 = vector.load %arg2[%c0_1, %c0_2] : memref<1792x512xbf16, #tpu.memory_space<vmem>>, vector<1792x512xbf16>
    %cst = arith.constant dense<0.000000e+00> : vector<2x512xf32>
    %3 = tpu.matmul %1, %2, %cst {dimension_numbers = #tpu.dot_dimension_numbers<[1], [0], [0], [1], [0, 0, 1, 1], [], []>} : vector<2x1792xbf16>, vector<1792x512xbf16>, vector<2x512xf32> -> vector<2x512xf32>
    %cst_3 = arith.constant 0.000000e+00 : f32
    %4 = vector.broadcast %cst_3 : f32 to vector<2x512xf32>
    %5 = arith.maximumf %3, %4 : vector<2x512xf32>
    %c0_4 = arith.constant 0 : index
    %c0_5 = arith.constant 0 : index
    %6 = vector.load %arg1[%c0_4, %c0_5] : memref<2x1024xf32, #tpu.memory_space<vmem>>, vector<2x1024xf32>
    %7 = arith.truncf %6 : vector<2x1024xf32> to vector<2x1024xbf16>
    %c0_6 = arith.constant 0 : index
    %c0_7 = arith.constant 0 : index
    %8 = vector.load %arg3[%c0_6, %c0_7] : memref<1024x512xbf16, #tpu.memory_space<vmem>>, vector<1024x512xbf16>
    %cst_8 = arith.constant dense<0.000000e+00> : vector<2x512xf32>
    %9 = tpu.matmul %7, %8, %cst_8 {dimension_numbers = #tpu.dot_dimension_numbers<[1], [0], [0], [1], [0, 0, 1, 1], [], []>} : vector<2x1024xbf16>, vector<1024x512xbf16>, vector<2x512xf32> -> vector<2x512xf32>
    %cst_9 = arith.constant 0.000000e+00 : f32
    %10 = vector.broadcast %cst_9 : f32 to vector<2x512xf32>
    %11 = arith.maximumf %9, %10 : vector<2x512xf32>
    %12 = arith.truncf %5 : vector<2x512xf32> to vector<2x512xbf16>
    %c0_10 = arith.constant 0 : index
    %c0_11 = arith.constant 0 : index
    %13 = vector.load %arg4[%c0_10, %c0_11] : memref<512x256xbf16, #tpu.memory_space<vmem>>, vector<512x256xbf16>
    %cst_12 = arith.constant dense<0.000000e+00> : vector<2x256xf32>
    %14 = tpu.matmul %12, %13, %cst_12 {dimension_numbers = #tpu.dot_dimension_numbers<[1], [0], [0], [1], [0, 0, 1, 1], [], []>} : vector<2x512xbf16>, vector<512x256xbf16>, vector<2x256xf32> -> vector<2x256xf32>
    %c0_13 = arith.constant 0 : index
    %c0_14 = arith.constant 0 : index
    %15 = vector.load %arg5[%c0_13, %c0_14] : memref<1x256xf32, #tpu.memory_space<vmem>>, vector<1x256xf32>
    %16 = vector.broadcast %15 : vector<1x256xf32> to vector<2x256xf32>
    %17 = arith.addf %14, %16 : vector<2x256xf32>
    %18 = arith.truncf %11 : vector<2x512xf32> to vector<2x512xbf16>
    %c0_15 = arith.constant 0 : index
    %c0_16 = arith.constant 0 : index
    %19 = vector.load %arg6[%c0_15, %c0_16] : memref<512x256xbf16, #tpu.memory_space<vmem>>, vector<512x256xbf16>
    %cst_17 = arith.constant dense<0.000000e+00> : vector<2x256xf32>
    %20 = tpu.matmul %18, %19, %cst_17 {dimension_numbers = #tpu.dot_dimension_numbers<[1], [0], [0], [1], [0, 0, 1, 1], [], []>} : vector<2x512xbf16>, vector<512x256xbf16>, vector<2x256xf32> -> vector<2x256xf32>
    %c0_18 = arith.constant 0 : index
    %c0_19 = arith.constant 0 : index
    %21 = vector.load %arg7[%c0_18, %c0_19] : memref<1x256xf32, #tpu.memory_space<vmem>>, vector<1x256xf32>
    %22 = vector.broadcast %21 : vector<1x256xf32> to vector<2x256xf32>
    %23 = arith.addf %20, %22 : vector<2x256xf32>
    %c0_20 = arith.constant 0 : index
    %c0_21 = arith.constant 0 : index
    %24 = vector.load %arg8[%c0_20, %c0_21] : memref<8x256xf32, #tpu.memory_space<vmem>>, vector<8x256xf32>
    %25 = vector.extract_strided_slice %24 {offsets = [0, 0], sizes = [1, 256], strides = [1, 1]} : vector<8x256xf32> to vector<1x256xf32>
    %26 = vector.broadcast %25 : vector<1x256xf32> to vector<2x256xf32>
    %27 = arith.mulf %17, %26 : vector<2x256xf32>
    %28 = vector.extract_strided_slice %24 {offsets = [1, 0], sizes = [1, 256], strides = [1, 1]} : vector<8x256xf32> to vector<1x256xf32>
    %29 = vector.broadcast %28 : vector<1x256xf32> to vector<2x256xf32>
    %30 = arith.addf %27, %29 : vector<2x256xf32>
    %31 = vector.extract_strided_slice %24 {offsets = [2, 0], sizes = [1, 256], strides = [1, 1]} : vector<8x256xf32> to vector<1x256xf32>
    %32 = vector.broadcast %31 : vector<1x256xf32> to vector<2x256xf32>
    %33 = arith.mulf %23, %32 : vector<2x256xf32>
    %34 = vector.extract_strided_slice %24 {offsets = [3, 0], sizes = [1, 256], strides = [1, 1]} : vector<8x256xf32> to vector<1x256xf32>
    %35 = vector.broadcast %34 : vector<1x256xf32> to vector<2x256xf32>
    %36 = arith.addf %33, %35 : vector<2x256xf32>
    %37 = vector.extract_strided_slice %24 {offsets = [4, 0], sizes = [1, 256], strides = [1, 1]} : vector<8x256xf32> to vector<1x256xf32>
    %38 = vector.broadcast %37 : vector<1x256xf32> to vector<2x256xf32>
    %39 = arith.mulf %23, %38 : vector<2x256xf32>
    %40 = vector.extract_strided_slice %24 {offsets = [5, 0], sizes = [1, 256], strides = [1, 1]} : vector<8x256xf32> to vector<1x256xf32>
    %41 = vector.broadcast %40 : vector<1x256xf32> to vector<2x256xf32>
    %42 = arith.addf %39, %41 : vector<2x256xf32>
    %43 = tpu.transpose %30, [1, 0] : vector<2x256xf32> -> vector<256x2xf32>
    %44 = vector.extract_strided_slice %43 {offsets = [0, 0], sizes = [256, 1], strides = [1, 1]} : vector<256x2xf32> to vector<256x1xf32>
    %45 = vector.extract_strided_slice %36 {offsets = [0, 0], sizes = [1, 256], strides = [1, 1]} : vector<2x256xf32> to vector<1x256xf32>
    %46 = vector.extract_strided_slice %42 {offsets = [0, 0], sizes = [1, 256], strides = [1, 1]} : vector<2x256xf32> to vector<1x256xf32>
    %47 = vector.broadcast %44 : vector<256x1xf32> to vector<256x256xf32>
    %48 = vector.broadcast %45 : vector<1x256xf32> to vector<256x256xf32>
    %49 = arith.mulf %47, %48 : vector<256x256xf32>
    %cst_22 = arith.constant dense<0xFF800000> : vector<256xf32>
    %50 = vector.multi_reduction <maximumf>, %49, %cst_22 [1] : vector<256x256xf32> to vector<256xf32>
    %51 = vector.shape_cast %50 : vector<256xf32> to vector<256x1xf32>
    %52 = vector.broadcast %51 : vector<256x1xf32> to vector<256x256xf32>
    %53 = arith.subf %49, %52 : vector<256x256xf32>
    %54 = math.exp %53 : vector<256x256xf32>
    %cst_23 = arith.constant dense<0.000000e+00> : vector<256xf32>
    %55 = vector.multi_reduction <add>, %54, %cst_23 [1] : vector<256x256xf32> to vector<256xf32>
    %56 = vector.shape_cast %55 : vector<256xf32> to vector<256x1xf32>
    %57 = vector.broadcast %56 : vector<256x1xf32> to vector<256x256xf32>
    %58 = arith.divf %54, %57 : vector<256x256xf32>
    %59 = vector.broadcast %46 : vector<1x256xf32> to vector<256x256xf32>
    %60 = arith.mulf %58, %59 : vector<256x256xf32>
    %cst_24 = arith.constant dense<0.000000e+00> : vector<256xf32>
    %61 = vector.multi_reduction <add>, %60, %cst_24 [1] : vector<256x256xf32> to vector<256xf32>
    %62 = vector.shape_cast %61 : vector<256xf32> to vector<256x1xf32>
    %63 = vector.extract_strided_slice %43 {offsets = [0, 1], sizes = [256, 1], strides = [1, 1]} : vector<256x2xf32> to vector<256x1xf32>
    %64 = vector.extract_strided_slice %36 {offsets = [1, 0], sizes = [1, 256], strides = [1, 1]} : vector<2x256xf32> to vector<1x256xf32>
    %65 = vector.extract_strided_slice %42 {offsets = [1, 0], sizes = [1, 256], strides = [1, 1]} : vector<2x256xf32> to vector<1x256xf32>
    %66 = vector.broadcast %63 : vector<256x1xf32> to vector<256x256xf32>
    %67 = vector.broadcast %64 : vector<1x256xf32> to vector<256x256xf32>
    %68 = arith.mulf %66, %67 : vector<256x256xf32>
    %cst_25 = arith.constant dense<0xFF800000> : vector<256xf32>
    %69 = vector.multi_reduction <maximumf>, %68, %cst_25 [1] : vector<256x256xf32> to vector<256xf32>
    %70 = vector.shape_cast %69 : vector<256xf32> to vector<256x1xf32>
    %71 = vector.broadcast %70 : vector<256x1xf32> to vector<256x256xf32>
    %72 = arith.subf %68, %71 : vector<256x256xf32>
    %73 = math.exp %72 : vector<256x256xf32>
    %cst_26 = arith.constant dense<0.000000e+00> : vector<256xf32>
    %74 = vector.multi_reduction <add>, %73, %cst_26 [1] : vector<256x256xf32> to vector<256xf32>
    %75 = vector.shape_cast %74 : vector<256xf32> to vector<256x1xf32>
    %76 = vector.broadcast %75 : vector<256x1xf32> to vector<256x256xf32>
    %77 = arith.divf %73, %76 : vector<256x256xf32>
    %78 = vector.broadcast %65 : vector<1x256xf32> to vector<256x256xf32>
    %79 = arith.mulf %77, %78 : vector<256x256xf32>
    %cst_27 = arith.constant dense<0.000000e+00> : vector<256xf32>
    %80 = vector.multi_reduction <add>, %79, %cst_27 [1] : vector<256x256xf32> to vector<256xf32>
    %81 = vector.shape_cast %80 : vector<256xf32> to vector<256x1xf32>
    %82 = tpu.concatenate %62, %81 in 1 : vector<256x1xf32>, vector<256x1xf32> -> vector<256x2xf32>
    %83 = tpu.transpose %82, [1, 0] : vector<256x2xf32> -> vector<2x256xf32>
    %84 = vector.extract_strided_slice %24 {offsets = [6, 0], sizes = [1, 256], strides = [1, 1]} : vector<8x256xf32> to vector<1x256xf32>
    %85 = vector.broadcast %84 : vector<1x256xf32> to vector<2x256xf32>
    %86 = arith.mulf %83, %85 : vector<2x256xf32>
    %87 = vector.extract_strided_slice %24 {offsets = [7, 0], sizes = [1, 256], strides = [1, 1]} : vector<8x256xf32> to vector<1x256xf32>
    %88 = vector.broadcast %87 : vector<1x256xf32> to vector<2x256xf32>
    %89 = arith.addf %86, %88 : vector<2x256xf32>
    %90 = arith.truncf %89 : vector<2x256xf32> to vector<2x256xbf16>
    %c0_28 = arith.constant 0 : index
    %c0_29 = arith.constant 0 : index
    %91 = vector.load %arg9[%c0_28, %c0_29] : memref<256x128xbf16, #tpu.memory_space<vmem>>, vector<256x128xbf16>
    %cst_30 = arith.constant dense<0.000000e+00> : vector<2x128xf32>
    %92 = tpu.matmul %90, %91, %cst_30 {dimension_numbers = #tpu.dot_dimension_numbers<[1], [0], [0], [1], [0, 0, 1, 1], [], []>} : vector<2x256xbf16>, vector<256x128xbf16>, vector<2x128xf32> -> vector<2x128xf32>
    %c0_31 = arith.constant 0 : index
    %c0_32 = arith.constant 0 : index
    %93 = vector.load %arg10[%c0_31, %c0_32] : memref<1x128xf32, #tpu.memory_space<vmem>>, vector<1x128xf32>
    %94 = vector.broadcast %93 : vector<1x128xf32> to vector<2x128xf32>
    %95 = arith.addf %92, %94 : vector<2x128xf32>
    %c0_33 = arith.constant 0 : index
    %c0_34 = arith.constant 0 : index
    %96 = vector.load %arg11[%c0_33, %c0_34] : memref<2x128xf32, #tpu.memory_space<vmem>>, vector<2x128xf32>
    tpu.vector_store %arg11[%c0_33, %c0_34], %95 {strides = array<i32>} : memref<2x128xf32, #tpu.memory_space<vmem>>, vector<2x128xf32>,
    return
  }
}

</mosaic_0001>

<bundles_post_ra>
// kernel: _forward_impl.1
= control target key start
LH: loop header
LB: loop body
LE: loop exit
PB: predicated region body
PF: predicated region fallthrough
CT: control target
= control target key end

     0   :  { %16 = vsyncpa [#allocation3], 0  ;;  %s13515_s0 = inlined_call_operand.vmem [shape: f32[2,1792], index: 0, kind: input, shape index: {}]   ;;  %s13516_s1 = inlined_call_operand.vmem [shape: f32[2,1024], index: 1, kind: input, shape index: {}]   ;;  %s13517_s2 = inlined_call_operand.hbm [shape: bf16[1792,512], index: 2, kind: input, shape index: {}]   ;;  %s13518_s3 = inlined_call_operand.hbm [shape: bf16[1024,512], index: 3, kind: input, shape index: {}]   ;;  %s13519_s4 = inlined_call_operand.hbm [shape: bf16[512,256], index: 4, kind: input, shape index: {}]   ;;  %s13520_s5 = inlined_call_operand.hbm [shape: f32[1,256], index: 5, kind: input, shape index: {}]   ;;  %s13521_s6 = inlined_call_operand.hbm [shape: bf16[512,256], index: 6, kind: input, shape index: {}]   ;;  %s13522_s7 = inlined_call_operand.hbm [shape: f32[1,256], index: 7, kind: input, shape index: {}]   ;;  %s13523_s8 = inlined_call_operand.hbm [shape: f32[8,256], index: 8, kind: input, shape index: {}]   ;;  %s13524_s9 = inlined_call_operand.hbm [shape: bf16[256,128], index: 9, kind: input, shape index: {}]   ;;  %s13525_s10 = inlined_call_operand.hbm [shape: f32[1,128], index: 10, kind: input, shape index: {}]   ;;  %s13526_s11 = inlined_call_operand.hbm [shape: f32[2,128], index: 11, kind: output, shape index: {}]  }
   0x1   :  { %17 = vsyncpa [#allocation6], 0 }
   0x2   :  { %18 = vsyncpa [#allocation9], 0 }
   0x3   :  { %19 = vsyncpa [#allocation12], 0 }
   0x4   :  { %20 = vsyncpa [#allocation15], 0 }
   0x5   :  { %21 = vsyncpa [#allocation4], 0  ;;  %s11476_s17 = smov [#allocation5]   ;;  %s11477_s19 = smov [#allocation8]  }
   0x6   :  { %s43_s18 = sshll.u32 %s11476_s17, 4  ;;  %s68_s20 = sshll.u32 %s11477_s19, 4  ;;  %s44_s18 = int_to_ptr.vmem [resolvable:$true] %s43_s18  ;;  %s69_s20 = int_to_ptr.vmem [resolvable:$true] %s68_s20 }
   0x7   :  { %s11244_s23 = scalar_lea.hbm %s13518_s3, 32768 }
   0x8   :  { %p11245_p0 = scmp.ne.s32.totalorder %s13518_s3, %s11244_s23  ;;  %p11248_p1 = scmp.lt.u32.totalorder %s11244_s23, %s13518_s3 }
   0xa   :  { %p11250_p2 = pnand %p11248_p1, %p11245_p0 }
   0xc   :  { %11253 = shalt.err (!%p11250_p2)
}
   0xd   :  { %s11254_s28 = scalar_lea.vmem %s44_s18, 32768  ;;  %p11259_p4 = scmp.lt.s32.totalorder %s44_s18, %s44_s18 }
   0xe   :  { %p11255_p3 = scmp.ne.s32.totalorder %s44_s18, %s11254_s28  ;;  %p11260_p5 = scmp.lt.s32.totalorder %s11254_s28, %s11254_s28 }
  0x10   :  { %p11261_p6 = por %p11260_p5, %p11259_p4 }
  0x12   :  { %p11262_p7 = pnand %p11261_p6, %p11255_p3 }
  0x14   :  { %11265 = shalt.err (!%p11262_p7)
}
  0x15   :  { %s11478_s29 = smov 256   ;;  %s11479_s30 = smov 16  }
  0x16   :  { %49 = dma.hbm_to_vmem [thread:$0]  %s13518_s3, 32768, %s44_s18, [#allocation6], %s11478_s29, %s11478_s29, %s11479_s30  }
  0x17   :  { %s11266_s16 = scalar_lea.hbm %s13520_s5, 32 }
  0x18   :  { %p11267_p8 = scmp.ne.s32.totalorder %s13520_s5, %s11266_s16  ;;  %p11270_p9 = scmp.lt.u32.totalorder %s11266_s16, %s13520_s5 }
  0x1a   :  { %p11272_p10 = pnand %p11270_p9, %p11267_p8 }
  0x1c   :  { %11275 = shalt.err (!%p11272_p10)
}
  0x1d   :  { %s11276_s23 = scalar_lea.vmem %s69_s20, 32  ;;  %p11281_p12 = scmp.lt.s32.totalorder %s69_s20, %s69_s20 }
  0x1e   :  { %p11277_p11 = scmp.ne.s32.totalorder %s69_s20, %s11276_s23  ;;  %p11282_p13 = scmp.lt.s32.totalorder %s11276_s23, %s11276_s23 }
  0x20   :  { %p11283_p0 = por %p11282_p13, %p11281_p12 }
  0x22   :  { %p11284_p1 = pnand %p11283_p0, %p11277_p11 }
  0x24   :  { %11287 = shalt.err (!%p11284_p1)
}
  0x25   :  { %71 = dma.hbm_to_vmem [thread:$0]  %s13520_s5, 32, %s69_s20, [#allocation9]  }
  0x26   :  { %s11480_s24 = smov [#allocation11]   ;;  %s11481_s26 = smov [#allocation14]  }
  0x27   :  { %s90_s25 = sshll.u32 %s11480_s24, 4  ;;  %s109_s27 = sshll.u32 %s11481_s26, 4  ;;  %s91_s25 = int_to_ptr.vmem [resolvable:$true] %s90_s25  ;;  %s11582_s27 = int_to_ptr.vmem [resolvable:$true] %s109_s27 }
  0x28   :  { %s11288_s13 = scalar_lea.hbm %s13522_s7, 32 }
  0x29   :  { %p11289_p2 = scmp.ne.s32.totalorder %s13522_s7, %s11288_s13  ;;  %p11292_p3 = scmp.lt.u32.totalorder %s11288_s13, %s13522_s7 }
  0x2b   :  { %p11294_p4 = pnand %p11292_p3, %p11289_p2 }
  0x2d   :  { %11297 = shalt.err (!%p11294_p4)
}
  0x2e   :  { %s11298_s5 = scalar_lea.vmem %s91_s25, 32  ;;  %p11303_p6 = scmp.lt.s32.totalorder %s91_s25, %s91_s25 }
  0x2f   :  { %p11299_p5 = scmp.ne.s32.totalorder %s91_s25, %s11298_s5  ;;  %p11304_p7 = scmp.lt.s32.totalorder %s11298_s5, %s11298_s5 }
  0x31   :  { %p11305_p8 = por %p11304_p7, %p11303_p6 }
  0x33   :  { %p11306_p9 = pnand %p11305_p8, %p11299_p5 }
  0x35   :  { %11309 = shalt.err (!%p11306_p9)
}
  0x36   :  { %93 = dma.hbm_to_vmem [thread:$0]  %s13522_s7, 32, %s91_s25, [#allocation12]  }
  0x37   :  { %s11310_s23 = scalar_lea.hbm %s13524_s9, 2048 }
  0x38   :  { %p11311_p10 = scmp.ne.s32.totalorder %s13524_s9, %s11310_s23  ;;  %p11314_p11 = scmp.lt.u32.totalorder %s11310_s23, %s13524_s9 }
  0x3a   :  { %p11316_p12 = pnand %p11314_p11, %p11311_p10 }
  0x3c   :  { %11319 = shalt.err (!%p11316_p12)
}
  0x3d   :  { %s11320_s28 = scalar_lea.vmem %s11582_s27, 2048  ;;  %p11325_p0 = scmp.lt.s32.totalorder %s11582_s27, %s11582_s27 }
  0x3e   :  { %p11321_p13 = scmp.ne.s32.totalorder %s11582_s27, %s11320_s28  ;;  %p11326_p1 = scmp.lt.s32.totalorder %s11320_s28, %s11320_s28 }
  0x40   :  { %p11327_p2 = por %p11326_p1, %p11325_p0 }
  0x42   :  { %p11328_p3 = pnand %p11327_p2, %p11321_p13 }
  0x44   :  { %11331 = shalt.err (!%p11328_p3)
}
  0x45   :  { %s11482_s7 = smov 64   ;;  %s11483_s25 = smov 4  }
  0x46   :  { %115 = dma.hbm_to_vmem [thread:$0]  %s13524_s9, 2048, %s11582_s27, [#allocation15], %s11482_s7, %s11482_s7, %s11483_s25  }
  0x47   :  { %s11484_s14 = smov [#allocation2]   ;;  %s11485_s16 = smov [#allocation7]  }
  0x48   :  { %s31_s15 = sshll.u32 %s11484_s14, 4  ;;  %s55_s17 = sshll.u32 %s11485_s16, 4  ;;  %s32_s15 = int_to_ptr.vmem [resolvable:$true] %s31_s15  ;;  %s11613_s17 = int_to_ptr.vmem [resolvable:$true] %s55_s17 }
  0x49   :  { %s11332_s19 = scalar_lea.hbm %s13517_s2, 57344 }
  0x4a   :  { %p11333_p4 = scmp.ne.s32.totalorder %s13517_s2, %s11332_s19  ;;  %p11336_p5 = scmp.lt.u32.totalorder %s11332_s19, %s13517_s2 }
  0x4c   :  { %p11338_p6 = pnand %p11336_p5, %p11333_p4 }
  0x4e   :  { %11341 = shalt.err (!%p11338_p6)
}
  0x4f   :  { %s11342_s9 = scalar_lea.vmem %s32_s15, 57344  ;;  %p11347_p8 = scmp.lt.s32.totalorder %s32_s15, %s32_s15 }
  0x50   :  { %p11343_p7 = scmp.ne.s32.totalorder %s32_s15, %s11342_s9  ;;  %p11348_p9 = scmp.lt.s32.totalorder %s11342_s9, %s11342_s9 }
  0x52   :  { %p11349_p10 = por %p11348_p9, %p11347_p8 }
  0x54   :  { %p11350_p11 = pnand %p11349_p10, %p11343_p7 }
  0x56   :  { %11353 = shalt.err (!%p11350_p11)
}
  0x57   :  { %37 = dma.hbm_to_vmem [thread:$0]  %s13517_s2, 57344, %s32_s15, [#allocation3], %s11478_s29, %s11478_s29, %s11479_s30  }
  0x58   :  { %s11354_s28 = scalar_lea.hbm %s13519_s4, 8192 }
  0x59   :  { %p11355_p12 = scmp.ne.s32.totalorder %s13519_s4, %s11354_s28  ;;  %p11358_p13 = scmp.lt.u32.totalorder %s11354_s28, %s13519_s4 }
  0x5b   :  { %p11360_p0 = pnand %p11358_p13, %p11355_p12 }
  0x5d   :  { %11363 = shalt.err (!%p11360_p0)
}
  0x5e   :  { %s11364_s14 = scalar_lea.vmem %s11613_s17, 8192  ;;  %p11369_p2 = scmp.lt.s32.totalorder %s11613_s17, %s11613_s17 }
  0x5f   :  { %p11365_p1 = scmp.ne.s32.totalorder %s11613_s17, %s11364_s14  ;;  %p11370_p3 = scmp.lt.s32.totalorder %s11364_s14, %s11364_s14 }
  0x61   :  { %p11371_p4 = por %p11370_p3, %p11369_p2 }
  0x63   :  { %p11372_p5 = pnand %p11371_p4, %p11365_p1 }
  0x65   :  { %11375 = shalt.err (!%p11372_p5)
}
  0x66   :  { %s11486_s2 = smov 128   ;;  %s11487_s29 = smov 8  }
  0x67   :  { %61 = dma.hbm_to_vmem [thread:$0]  %s13519_s4, 8192, %s11613_s17, [#allocation6], %s11486_s2, %s11486_s2, %s11487_s29  }
  0x68   :  { %s11488_s16 = smov [#allocation10]   ;;  %s11489_s20 = smov [#allocation13]  }
  0x69   :  { %s77_s5 = sshll.u32 %s11488_s16, 4  ;;  %s100_s19 = sshll.u32 %s11489_s20, 4  ;;  %s78_s5 = int_to_ptr.vmem [resolvable:$true] %s77_s5  ;;  %s101_s19 = int_to_ptr.vmem [resolvable:$true] %s100_s19 }
  0x6a   :  { %s11376_s23 = scalar_lea.hbm %s13521_s6, 8192 }
  0x6b   :  { %p11377_p6 = scmp.ne.s32.totalorder %s13521_s6, %s11376_s23  ;;  %p11380_p7 = scmp.lt.u32.totalorder %s11376_s23, %s13521_s6 }
  0x6d   :  { %p11382_p8 = pnand %p11380_p7, %p11377_p6 }
  0x6f   :  { %11385 = shalt.err (!%p11382_p8)
}
  0x70   :  { %s11386_s4 = scalar_lea.vmem %s78_s5, 8192  ;;  %p11391_p10 = scmp.lt.s32.totalorder %s78_s5, %s78_s5 }
  0x71   :  { %p11387_p9 = scmp.ne.s32.totalorder %s78_s5, %s11386_s4  ;;  %p11392_p11 = scmp.lt.s32.totalorder %s11386_s4, %s11386_s4 }
  0x73   :  { %p11393_p12 = por %p11392_p11, %p11391_p10 }
  0x75   :  { %p11394_p13 = pnand %p11393_p12, %p11387_p9 }
  0x77   :  { %11397 = shalt.err (!%p11394_p13)
}
  0x78   :  { %83 = dma.hbm_to_vmem [thread:$0]  %s13521_s6, 8192, %s78_s5, [#allocation9], %s11486_s2, %s11486_s2, %s11487_s29  }
  0x79   :  { %s11398_s7 = scalar_lea.hbm %s13523_s8, 256 }
  0x7a   :  { %p11399_p0 = scmp.ne.s32.totalorder %s13523_s8, %s11398_s7  ;;  %p11402_p1 = scmp.lt.u32.totalorder %s11398_s7, %s13523_s8 }
  0x7c   :  { %p11404_p2 = pnand %p11402_p1, %p11399_p0 }
  0x7e   :  { %11407 = shalt.err (!%p11404_p2)
}
  0x7f   :  { %s11408_s30 = scalar_lea.vmem %s101_s19, 256  ;;  %p11413_p4 = scmp.lt.s32.totalorder %s101_s19, %s101_s19 }
  0x80   :  { %p11409_p3 = scmp.ne.s32.totalorder %s101_s19, %s11408_s30  ;;  %p11414_p5 = scmp.lt.s32.totalorder %s11408_s30, %s11408_s30 }
  0x82   :  { %p11415_p6 = por %p11414_p5, %p11413_p4 }
  0x84   :  { %p11416_p7 = pnand %p11415_p6, %p11409_p3 }
  0x86   :  { %11419 = shalt.err (!%p11416_p7)
}
  0x87   :  { %103 = dma.hbm_to_vmem [thread:$0]  %s13523_s8, 256, %s101_s19, [#allocation12]  }
  0x88   :  { %s11490_s29 = smov [#allocation16]   ;;  %s11420_s20 = scalar_lea.hbm %s13525_s10, 16 }
  0x89   :  { %s122_s15 = sshll.u32 %s11490_s29, 4  ;;  %p11421_p8 = scmp.ne.s32.totalorder %s13525_s10, %s11420_s20  ;;  %s123_s15 = int_to_ptr.vmem [resolvable:$true] %s122_s15 }
  0x8a   :  { %p11424_p9 = scmp.lt.u32.totalorder %s11420_s20, %s13525_s10 }
  0x8c   :  { %p11426_p10 = pnand %p11424_p9, %p11421_p8 }
  0x8e   :  { %11429 = shalt.err (!%p11426_p10)
}
  0x8f   :  { %s11430_s9 = scalar_lea.vmem %s123_s15, 16  ;;  %s11434_s8 = scalar_lea.vmem %s123_s15, 32 }
  0x90   :  { %p11431_p11 = scmp.ne.s32.totalorder %s123_s15, %s11430_s9  ;;  %p11435_p12 = scmp.lt.s32.totalorder %s123_s15, %s123_s15 }
  0x91   :  { %p11436_p13 = scmp.lt.s32.totalorder %s11434_s8, %s11430_s9 }
  0x93   :  { %p11437_p0 = por %p11436_p13, %p11435_p12 }
  0x95   :  { %p11438_p1 = pnand %p11437_p0, %p11431_p11 }
  0x97   :  { %11441 = shalt.err (!%p11438_p1)
}
  0x98   :  { %125 = dma.hbm_to_vmem [thread:$0]  %s13525_s10, 16, %s123_s15, [#allocation15]  }
  0x99   :  { %11464 = dma.done.wait [#allocation3], 57344  }
  0x9a   :  { %11465 = vsyncadd [#allocation3], 4294909952 }
  0x9b   :  { %11466 = dma.done.wait [#allocation6], 40960  }
  0x9c   :  { %11467 = vsyncadd [#allocation6], 4294926336 }
  0x9d   :  { %11468 = dma.done.wait [#allocation9], 8224  }
  0x9e   :  { %11469 = vsyncadd [#allocation9], 4294959072 }
  0x9f   :  { %11470 = dma.done.wait [#allocation12], 288  }
  0xa0   :  { %11471 = vsyncadd [#allocation12], 4294967008 }
  0xa1   :  { %11472 = dma.done.wait [#allocation15], 2064  }
  0xa2   :  { %11473 = vsyncadd [#allocation15], 4294965232  ;;  %v9587_v0 = vld [vmem:[#allocation2 + $0x4] ss:$16 sps:$4 sm:$0xff]   ;;  %v9589_v1 = vld [vmem:[#allocation2 + $0xc] ss:$16 sps:$4 sm:$0xff]   ;;  %v166_v38 = vlaneseq }
  0xa3   :  { %2937 = vmatprep.subr.bf16.mxu0 %v9587_v0  ;;  %v9591_v2 = vld [vmem:[#allocation2] ss:$16 sps:$4 sm:$0xff]   ;;  %v9592_v3 = vld [vmem:[#allocation2 + $0x8] ss:$16 sps:$4 sm:$0xff]   ;;  %3224 = vmatprep.subr.bf16.mxu1 %v9589_v1  ;;  %v9593_v4 = vld [vmem:[#allocation2 + $0x24] ss:$16 sps:$4 sm:$0xff]  }
  0xa4   :  { %2938 = vmatpush1.bf16.msra.mxu0 %v9591_v2  ;;  %3225 = vmatpush1.bf16.msra.mxu1 %v9592_v3  ;;  %v9595_v5 = vld [vmem:[#allocation2 + $0x2c] ss:$16 sps:$4 sm:$0xff]   ;;  %v9597_v6 = vld [vmem:[#allocation2 + $0x20] ss:$16 sps:$4 sm:$0xff]   ;;  %v9598_v7 = vld [vmem:[#allocation2 + $0x28] ss:$16 sps:$4 sm:$0xff]  }
  0xa5   :  { %2939 = vmatprep.subr.bf16.mxu0 %v9593_v4  ;;  %3226 = vmatprep.subr.bf16.mxu1 %v9595_v5  ;;  %v9599_v8 = vld [vmem:[#allocation2 + $0x44] ss:$16 sps:$4 sm:$0xff]   ;;  %v9601_v9 = vld [vmem:[#allocation2 + $0x4c] ss:$16 sps:$4 sm:$0xff]   ;;  %v9603_v10 = vld [vmem:[#allocation2 + $0x40] ss:$16 sps:$4 sm:$0xff]  }
  0xa6   :  { %v9604_v11 = vld [vmem:[#allocation2 + $0x48] ss:$16 sps:$4 sm:$0xff]   ;;  %v9605_v12 = vld [vmem:[#allocation2 + $0x64] ss:$16 sps:$4 sm:$0xff]   ;;  %v9607_v13 = vld [vmem:[#allocation2 + $0x6c] ss:$16 sps:$4 sm:$0xff]  }
  0xa7   :  { %v9609_v14 = vld [vmem:[#allocation2 + $0x60] ss:$16 sps:$4 sm:$0xff]   ;;  %v9610_v15 = vld [vmem:[#allocation2 + $0x68] ss:$16 sps:$4 sm:$0xff]   ;;  %v9611_v16 = vld [vmem:[#allocation2 + $0x84] ss:$16 sps:$4 sm:$0xff]  }
  0xa8   :  { %2940 = vmatpush1.bf16.msra.mxu0 %v9597_v6  ;;  %3227 = vmatpush1.bf16.msra.mxu1 %v9598_v7  ;;  %v9613_v17 = vld [vmem:[#allocation2 + $0x8c] ss:$16 sps:$4 sm:$0xff]   ;;  %v9615_v18 = vld [vmem:[#allocation2 + $0x80] ss:$16 sps:$4 sm:$0xff]   ;;  %v9616_v19 = vld [vmem:[#allocation2 + $0x88] ss:$16 sps:$4 sm:$0xff]  }
  0xa9   :  { %2941 = vmatprep.subr.bf16.mxu0 %v9599_v8  ;;  %3228 = vmatprep.subr.bf16.mxu1 %v9601_v9  ;;  %v9617_v20 = vld [vmem:[#allocation2 + $0xa4] ss:$16 sps:$4 sm:$0xff]   ;;  %v9619_v21 = vld [vmem:[#allocation2 + $0xac] ss:$16 sps:$4 sm:$0xff]   ;;  %v9621_v22 = vld [vmem:[#allocation2 + $0xa0] ss:$16 sps:$4 sm:$0xff]  }
  0xaa   :  { %v9622_v23 = vld [vmem:[#allocation2 + $0xa8] ss:$16 sps:$4 sm:$0xff]   ;;  %v9623_v24 = vld [vmem:[#allocation2 + $0xc4] ss:$16 sps:$4 sm:$0xff]   ;;  %v9625_v25 = vld [vmem:[#allocation2 + $0xcc] ss:$16 sps:$4 sm:$0xff]  }
  0xab   :  { %v9627_v26 = vld [vmem:[#allocation2 + $0xc0] ss:$16 sps:$4 sm:$0xff]   ;;  %v9628_v27 = vld [vmem:[#allocation2 + $0xc8] ss:$16 sps:$4 sm:$0xff]   ;;  %v9629_v28 = vld [vmem:[#allocation2 + $0xe4] ss:$16 sps:$4 sm:$0xff]  }
  0xac   :  { %2942 = vmatpush1.bf16.msra.mxu0 %v9603_v10  ;;  %3229 = vmatpush1.bf16.msra.mxu1 %v9604_v11  ;;  %v9631_v29 = vld [vmem:[#allocation2 + $0xec] ss:$16 sps:$4 sm:$0xff]   ;;  %v9633_v30 = vld [vmem:[#allocation2 + $0xe0] ss:$16 sps:$4 sm:$0xff]   ;;  %v9634_v31 = vld [vmem:[#allocation2 + $0xe8] ss:$16 sps:$4 sm:$0xff]  }
  0xad   :  { %2943 = vmatprep.subr.bf16.mxu0 %v9605_v12  ;;  %3230 = vmatprep.subr.bf16.mxu1 %v9607_v13  ;;  %v9635_v32 = vld [vmem:[#allocation2 + $0x104] ss:$16 sps:$4 sm:$0xff]   ;;  %v9637_v33 = vld [vmem:[#allocation2 + $0x10c] ss:$16 sps:$4 sm:$0xff]   ;;  %v9639_v34 = vld [vmem:[#allocation2 + $0x100] ss:$16 sps:$4 sm:$0xff]  }
  0xae   :  { %v9640_v35 = vld [vmem:[#allocation2 + $0x108] ss:$16 sps:$4 sm:$0xff]   ;;  %v11491_v36 = vmov 1983009808   ;;  %v9641_v39 = vld [vmem:[#allocation2 + $0x124] ss:$16 sps:$4 sm:$0xff]  }
  0xaf   :  { %v164_v37 = vunpack.c.l.s4 %v11491_v36  ;;  %v9643_v40 = vld [vmem:[#allocation2 + $0x12c] ss:$16 sps:$4 sm:$0xff]   ;;  %v9645_v41 = vld [vmem:[#allocation2 + $0x120] ss:$16 sps:$4 sm:$0xff]   ;;  %v11683_v43 = vshrl.u32 %v166_v38, 7  ;;  %vm8255_vm0 = vcmask 7168  }
  0xb0   :  { %2944 = vmatpush1.bf16.msra.mxu0 %v9609_v14  ;;  %3231 = vmatpush1.bf16.msra.mxu1 %v9610_v15  ;;  %v9646_v44 = vld [vmem:[#allocation2 + $0x128] ss:$16 sps:$4 sm:$0xff]   ;;  %v9647_v45 = vld [vmem:[#allocation2 + $0x144] ss:$16 sps:$4 sm:$0xff]   ;;  %v9649_v46 = vld [vmem:[#allocation2 + $0x14c] ss:$16 sps:$4 sm:$0xff]  }
  0xb1   :  { %2945 = vmatprep.subr.bf16.mxu0 %v9611_v16  ;;  %3232 = vmatprep.subr.bf16.mxu1 %v9613_v17  ;;  %v165_v42 = vunpack.c.0.s8 %v164_v37  ;;  %13697 = vst [vmem:[#allocation24_spill] sm:$0xff] %v11683_v43  ;;  %v9651_v47 = vld [vmem:[#allocation2 + $0x140] ss:$16 sps:$4 sm:$0xff]   ;;  %v9652_v48 = vld [vmem:[#allocation2 + $0x148] ss:$16 sps:$4 sm:$0xff]  }
  0xb2   :  { %v9653_v50 = vld [vmem:[#allocation2 + $0x164] ss:$16 sps:$4 sm:$0xff]   ;;  %v9655_v51 = vld [vmem:[#allocation2 + $0x16c] ss:$16 sps:$4 sm:$0xff]   ;;  %v9657_v53 = vld [vmem:[#allocation2 + $0x160] ss:$16 sps:$4 sm:$0xff]  }
  0xb3   :  { %v11686_v49 = vsub.s32 %v165_v42, %v11683_v43  ;;  %v154_v52 = vld [vmem:[%s13515_s0] sm:$0xff]  ;;  %v9658_v55 = vld [vmem:[#allocation2 + $0x168] ss:$16 sps:$4 sm:$0xff]   ;;  %v9661_v57 = vld [vmem:[#allocation2 + $0x18c] ss:$16 sps:$4 sm:$0xff]  }
  0xb4   :  { %2946 = vmatpush1.bf16.msra.mxu0 %v9615_v18  ;;  %3233 = vmatpush1.bf16.msra.mxu1 %v9616_v19  ;;  %v9659_v56 = vld [vmem:[#allocation2 + $0x184] ss:$16 sps:$4 sm:$0xff]   ;;  %v9663_v59 = vld [vmem:[#allocation2 + $0x180] ss:$16 sps:$4 sm:$0xff]   ;;  %v9664_v61 = vld [vmem:[#allocation2 + $0x188] ss:$16 sps:$4 sm:$0xff]   ;;  %v162_v4 = vcombine.high %v154_v52, %v154_v52 }
  0xb5   :  { %2947 = vmatprep.subr.bf16.mxu0 %v9617_v20  ;;  %3234 = vmatprep.subr.bf16.mxu1 %v9619_v21  ;;  %v169_v54 = vrot.slane %v154_v52, %v11686_v49  ;;  %v9665_v62 = vld [vmem:[#allocation2 + $0x1a4] ss:$16 sps:$4 sm:$0xff]   ;;  %v9667_v63 = vld [vmem:[#allocation2 + $0x1ac] ss:$16 sps:$4 sm:$0xff]   ;;  %v9669_v0 = vld [vmem:[#allocation2 + $0x1a0] ss:$16 sps:$4 sm:$0xff]  }
  0xb6   :  { %v9670_v1 = vld [vmem:[#allocation2 + $0x1a8] ss:$16 sps:$4 sm:$0xff]   ;;  %v9671_v2 = vld [vmem:[#allocation2 + $0x1c4] ss:$16 sps:$4 sm:$0xff]   ;;  %v9673_v3 = vld [vmem:[#allocation2 + $0x1cc] ss:$16 sps:$4 sm:$0xff]   ;;  %v11693_v9 = vrot.slane %v162_v4, %v11686_v49 }
  0xb7   :  { %v177_v58 = vcombine.high %v169_v54, %v169_v54  ;;  %v9675_v5 = vld [vmem:[#allocation2 + $0x1c0] ss:$16 sps:$4 sm:$0xff]   ;;  %v9676_v6 = vld [vmem:[#allocation2 + $0x1c8] ss:$16 sps:$4 sm:$0xff]   ;;  %v9677_v7 = vld [vmem:[#allocation2 + $0x1e4] ss:$16 sps:$4 sm:$0xff]   ;;  %v235_v16 = vpack.c.bf16 %v169_v54, %v169_v54 }
  0xb8   :  { %2948 = vmatpush1.bf16.msra.mxu0 %v9621_v22  ;;  %3235 = vmatpush1.bf16.msra.mxu1 %v9622_v23  ;;  %v9679_v8 = vld [vmem:[#allocation2 + $0x1ec] ss:$16 sps:$4 sm:$0xff]   ;;  %v9681_v10 = vld [vmem:[#allocation2 + $0x1e0] ss:$16 sps:$4 sm:$0xff]   ;;  %v9682_v11 = vld [vmem:[#allocation2 + $0x1e8] ss:$16 sps:$4 sm:$0xff]   ;;  %v178_v14 = vcombine.high %v11693_v9, %v11693_v9 }
  0xb9   :  { %2949 = vmatprep.subr.bf16.mxu0 %v9623_v24  ;;  %3236 = vmatprep.subr.bf16.mxu1 %v9625_v25  ;;  %v236_v60 = vpack.c.bf16 %v177_v58, %v177_v58  ;;  %v9686_v12 = vld [vmem:[#allocation2 + $0x204] ss:$16 sps:$4 sm:$0xff]   ;;  %v9689_v13 = vld [vmem:[#allocation2 + $0x20c] ss:$16 sps:$4 sm:$0xff]   ;;  %v9684_v15 = vld [vmem:[#allocation2 + $0x200] ss:$16 sps:$4 sm:$0xff]  }
  0xba   :  { %v9687_v17 = vld [vmem:[#allocation2 + $0x208] ss:$16 sps:$4 sm:$0xff]   ;;  %v9692_v18 = vld [vmem:[#allocation2 + $0x224] ss:$16 sps:$4 sm:$0xff]   ;;  %v9695_v19 = vld [vmem:[#allocation2 + $0x22c] ss:$16 sps:$4 sm:$0xff]   ;;  %v238_v20 = vpack.c.bf16 %v178_v14, %v178_v14 }
  0xbb   :  { %2969 = vmatprep.mubr.bf16.mxu0 %v236_v60  ;;  %3256 = vmatprep.mubr.bf16.mxu1 %v236_v60  ;;  %v9690_v21 = vld [vmem:[#allocation2 + $0x220] ss:$16 sps:$4 sm:$0xff]   ;;  %v9693_v22 = vld [vmem:[#allocation2 + $0x228] ss:$16 sps:$4 sm:$0xff]   ;;  %v9698_v23 = vld [vmem:[#allocation2 + $0x244] ss:$16 sps:$4 sm:$0xff]  }
  0xbc   :  { %2950 = vmatpush1.bf16.msra.mxu0 %v9627_v26  ;;  %3237 = vmatpush1.bf16.msra.mxu1 %v9628_v27  ;;  %v9701_v24 = vld [vmem:[#allocation2 + $0x24c] ss:$16 sps:$4 sm:$0xff]   ;;  %v9696_v25 = vld [vmem:[#allocation2 + $0x240] ss:$16 sps:$4 sm:$0xff]   ;;  %v9699_v26 = vld [vmem:[#allocation2 + $0x248] ss:$16 sps:$4 sm:$0xff]  }
  0xbd   :  { %2951 = vmatprep.subr.bf16.mxu0 %v9629_v28  ;;  %3238 = vmatprep.subr.bf16.mxu1 %v9631_v29  ;;  %v9704_v27 = vld [vmem:[#allocation2 + $0x264] ss:$16 sps:$4 sm:$0xff]   ;;  %v9707_v28 = vld [vmem:[#allocation2 + $0x26c] ss:$16 sps:$4 sm:$0xff]   ;;  %v9702_v29 = vld [vmem:[#allocation2 + $0x260] ss:$16 sps:$4 sm:$0xff]  }
  0xbe   :  { %v9719_v36 = vld [vmem:[#allocation2 + $0x2ac] ss:$16 sps:$4 sm:$0xff]   ;;  %v9714_v37 = vld [vmem:[#allocation2 + $0x2a0] ss:$16 sps:$4 sm:$0xff]   ;;  %v9717_v38 = vld [vmem:[#allocation2 + $0x2a8] ss:$16 sps:$4 sm:$0xff]  }
  0xbf   :  { %v9723_v42 = vld [vmem:[#allocation2 + $0x2c8] ss:$16 sps:$4 sm:$0xff]   ;;  %v9743_v54 = vld [vmem:[#allocation2 + $0x32c] ss:$16 sps:$4 sm:$0xff]   ;;  %v9776_v14 = vld [vmem:[#allocation2 + $0x3e4] ss:$16 sps:$4 sm:$0xff]  }
  0xc0   :  { %2952 = vmatpush1.bf16.msra.mxu0 %v9633_v30  ;;  %3239 = vmatpush1.bf16.msra.mxu1 %v9634_v31  ;;  %v9705_v30 = vld [vmem:[#allocation2 + $0x268] ss:$16 sps:$4 sm:$0xff]   ;;  %v9710_v31 = vld [vmem:[#allocation2 + $0x284] ss:$16 sps:$4 sm:$0xff]   ;;  %v9749_v58 = vld [vmem:[#allocation2 + $0x34c] ss:$16 sps:$4 sm:$0xff]  }
  0xc1   :  { %2953 = vmatprep.subr.bf16.mxu0 %v9635_v32  ;;  %3240 = vmatprep.subr.bf16.mxu1 %v9637_v33  ;;  %v9713_v32 = vld [vmem:[#allocation2 + $0x28c] ss:$16 sps:$4 sm:$0xff]   ;;  %v9708_v33 = vld [vmem:[#allocation2 + $0x280] ss:$16 sps:$4 sm:$0xff]   ;;  %v9735_v52 = vld [vmem:[#allocation2 + $0x308] ss:$16 sps:$4 sm:$0xff]  }
  0xc2   :  { %v9747_v60 = vld [vmem:[#allocation2 + $0x348] ss:$16 sps:$4 sm:$0xff]  }
  0xc3   :  { %v9759_v4 = vld [vmem:[#allocation2 + $0x388] ss:$16 sps:$4 sm:$0xff]  }
  0xc4   :  { %2954 = vmatpush1.bf16.msra.mxu0 %v9639_v34  ;;  %3241 = vmatpush1.bf16.msra.mxu1 %v9640_v35  ;;  %v9711_v34 = vld [vmem:[#allocation2 + $0x288] ss:$16 sps:$4 sm:$0xff]   ;;  %v9716_v35 = vld [vmem:[#allocation2 + $0x2a4] ss:$16 sps:$4 sm:$0xff]  }
  0xc5   :  { %2955 = vmatprep.subr.bf16.mxu0 %v9641_v39  ;;  %3242 = vmatprep.subr.bf16.mxu1 %v9643_v40  ;;  %v9722_v39 = vld [vmem:[#allocation2 + $0x2c4] ss:$16 sps:$4 sm:$0xff]   ;;  %v9725_v40 = vld [vmem:[#allocation2 + $0x2cc] ss:$16 sps:$4 sm:$0xff]  }
  0xc8   :  { %2956 = vmatpush1.bf16.msra.mxu0 %v9645_v41  ;;  %3243 = vmatpush1.bf16.msra.mxu1 %v9646_v44  ;;  %v9720_v41 = vld [vmem:[#allocation2 + $0x2c0] ss:$16 sps:$4 sm:$0xff]   ;;  %v9728_v44 = vld [vmem:[#allocation2 + $0x2e4] ss:$16 sps:$4 sm:$0xff]  }
  0xc9   :  { %2957 = vmatprep.subr.bf16.mxu0 %v9647_v45  ;;  %3244 = vmatprep.subr.bf16.mxu1 %v9649_v46  ;;  %v9731_v45 = vld [vmem:[#allocation2 + $0x2ec] ss:$16 sps:$4 sm:$0xff]   ;;  %v9726_v46 = vld [vmem:[#allocation2 + $0x2e0] ss:$16 sps:$4 sm:$0xff]  }
  0xcc   :  { %2958 = vmatpush1.bf16.msra.mxu0 %v9651_v47  ;;  %3245 = vmatpush1.bf16.msra.mxu1 %v9652_v48  ;;  %v9729_v47 = vld [vmem:[#allocation2 + $0x2e8] ss:$16 sps:$4 sm:$0xff]   ;;  %v9734_v48 = vld [vmem:[#allocation2 + $0x304] ss:$16 sps:$4 sm:$0xff]  }
  0xcd   :  { %2959 = vmatprep.subr.bf16.mxu0 %v9653_v50  ;;  %3246 = vmatprep.subr.bf16.mxu1 %v9655_v51  ;;  %v9737_v50 = vld [vmem:[#allocation2 + $0x30c] ss:$16 sps:$4 sm:$0xff]   ;;  %v9732_v51 = vld [vmem:[#allocation2 + $0x300] ss:$16 sps:$4 sm:$0xff]  }
  0xd0   :  { %2960 = vmatpush1.bf16.msra.mxu0 %v9657_v53  ;;  %3247 = vmatpush1.bf16.msra.mxu1 %v9658_v55  ;;  %v9740_v53 = vld [vmem:[#allocation2 + $0x324] ss:$16 sps:$4 sm:$0xff]   ;;  %v9738_v55 = vld [vmem:[#allocation2 + $0x320] ss:$16 sps:$4 sm:$0xff]  }
  0xd1   :  { %2961 = vmatprep.subr.bf16.mxu0 %v9659_v56  ;;  %3248 = vmatprep.subr.bf16.mxu1 %v9661_v57  ;;  %v9741_v56 = vld [vmem:[#allocation2 + $0x328] ss:$16 sps:$4 sm:$0xff]   ;;  %v9746_v57 = vld [vmem:[#allocation2 + $0x344] ss:$16 sps:$4 sm:$0xff]  }
  0xd4   :  { %2962 = vmatpush1.bf16.msra.mxu0 %v9663_v59  ;;  %3249 = vmatpush1.bf16.msra.mxu1 %v9664_v61  ;;  %v9744_v59 = vld [vmem:[#allocation2 + $0x340] ss:$16 sps:$4 sm:$0xff]   ;;  %v9752_v61 = vld [vmem:[#allocation2 + $0x364] ss:$16 sps:$4 sm:$0xff]  }
  0xd5   :  { %2963 = vmatprep.subr.bf16.mxu0 %v9665_v62  ;;  %3250 = vmatprep.subr.bf16.mxu1 %v9667_v63  ;;  %v9755_v62 = vld [vmem:[#allocation2 + $0x36c] ss:$16 sps:$4 sm:$0xff]   ;;  %v9750_v63 = vld [vmem:[#allocation2 + $0x360] ss:$16 sps:$4 sm:$0xff]  }
  0xd8   :  { %2964 = vmatpush1.bf16.msra.mxu0 %v9669_v0  ;;  %3251 = vmatpush1.bf16.msra.mxu1 %v9670_v1  ;;  %v9753_v0 = vld [vmem:[#allocation2 + $0x368] ss:$16 sps:$4 sm:$0xff]   ;;  %v9758_v1 = vld [vmem:[#allocation2 + $0x384] ss:$16 sps:$4 sm:$0xff]  }
  0xd9   :  { %2965 = vmatprep.subr.bf16.mxu0 %v9671_v2  ;;  %3252 = vmatprep.subr.bf16.mxu1 %v9673_v3  ;;  %v9761_v2 = vld [vmem:[#allocation2 + $0x38c] ss:$16 sps:$4 sm:$0xff]   ;;  %v9756_v3 = vld [vmem:[#allocation2 + $0x380] ss:$16 sps:$4 sm:$0xff]  }
  0xdc   :  { %2966 = vmatpush1.bf16.msra.mxu0 %v9675_v5  ;;  %3253 = vmatpush1.bf16.msra.mxu1 %v9676_v6  ;;  %v9764_v5 = vld [vmem:[#allocation2 + $0x3a4] ss:$16 sps:$4 sm:$0xff]   ;;  %v9767_v6 = vld [vmem:[#allocation2 + $0x3ac] ss:$16 sps:$4 sm:$0xff]  }
  0xdd   :  { %2967 = vmatprep.subr.bf16.mxu0 %v9677_v7  ;;  %3254 = vmatprep.subr.bf16.mxu1 %v9679_v8  ;;  %v9762_v7 = vld [vmem:[#allocation2 + $0x3a0] ss:$16 sps:$4 sm:$0xff]   ;;  %v9765_v8 = vld [vmem:[#allocation2 + $0x3a8] ss:$16 sps:$4 sm:$0xff]  }
  0xe0   :  { %2968 = vmatpush1.bf16.msra.mxu0 %v9681_v10  ;;  %3255 = vmatpush1.bf16.msra.mxu1 %v9682_v11  ;;  %v9770_v10 = vld [vmem:[#allocation2 + $0x3c4] ss:$16 sps:$4 sm:$0xff]   ;;  %v9773_v11 = vld [vmem:[#allocation2 + $0x3cc] ss:$16 sps:$4 sm:$0xff]  }
  0xe1   :  { %2978 = vmatprep.subr.bf16.mxu0 %v9686_v12  ;;  %3265 = vmatprep.subr.bf16.mxu1 %v9689_v13  ;;  %v9768_v12 = vld [vmem:[#allocation2 + $0x3c0] ss:$16 sps:$4 sm:$0xff]   ;;  %v9771_v13 = vld [vmem:[#allocation2 + $0x3c8] ss:$16 sps:$4 sm:$0xff]  }
  0xe3   :  { %2970 = vmatmul.mubr.bf16.vlgmr.msra.gmra.mrb[0].mxu0 %v235_v16  ;;  %3257 = vmatmul.mubr.bf16.vlgmr.msra.gmra.mrb[0].mxu1 %v235_v16  ;;  %v9774_v16 = vld [vmem:[#allocation2 + $0x3e0] ss:$16 sps:$4 sm:$0xff]  }
  0xe4   :  { %2979 = vmatpush1.bf16.msra.mxu0 %v9684_v15  ;;  %3266 = vmatpush1.bf16.msra.mxu1 %v9687_v17  ;;  %v9779_v15 = vld [vmem:[#allocation2 + $0x3ec] ss:$16 sps:$4 sm:$0xff]   ;;  %v9777_v17 = vld [vmem:[#allocation2 + $0x3e8] ss:$16 sps:$4 sm:$0xff]  }
  0xe5   :  { %2980 = vmatprep.subr.bf16.mxu0 %v9692_v18  ;;  %3267 = vmatprep.subr.bf16.mxu1 %v9695_v19  ;;  %v9782_v18 = vld [vmem:[#allocation2 + $0x404] ss:$16 sps:$4 sm:$0xff]   ;;  %v9785_v19 = vld [vmem:[#allocation2 + $0x40c] ss:$16 sps:$4 sm:$0xff]  }
  0xe6   :  { %3010 = vmatprep.mubr.bf16.mxu0 %v238_v20  ;;  %3297 = vmatprep.mubr.bf16.mxu1 %v238_v20  ;;  %v9780_v20 = vld [vmem:[#allocation2 + $0x400] ss:$16 sps:$4 sm:$0xff]  }
  0xe8   :  { %2981 = vmatpush1.bf16.msra.mxu0 %v9690_v21  ;;  %3268 = vmatpush1.bf16.msra.mxu1 %v9693_v22  ;;  %v237_v21 = vpack.c.bf16 %v11693_v9, %v11693_v9  ;;  %v9783_v22 = vld [vmem:[#allocation2 + $0x408] ss:$16 sps:$4 sm:$0xff]  }
  0xe9   :  { %2982 = vmatprep.subr.bf16.mxu0 %v9698_v23  ;;  %3269 = vmatprep.subr.bf16.mxu1 %v9701_v24  ;;  %v11702_v23 = vld [vmem:[%s13515_s0 + $0x8] sm:$0xff]  ;;  %v9788_v24 = vld [vmem:[#allocation2 + $0x424] ss:$16 sps:$4 sm:$0xff]  }
  0xec   :  { %2983 = vmatpush1.bf16.msra.mxu0 %v9696_v25  ;;  %3270 = vmatpush1.bf16.msra.mxu1 %v9699_v26  ;;  %v9791_v25 = vld [vmem:[#allocation2 + $0x42c] ss:$16 sps:$4 sm:$0xff]   ;;  %v11706_v26 = vrot.slane %v11702_v23, %v11686_v49 }
  0xed   :  { %2984 = vmatprep.subr.bf16.mxu0 %v9704_v27  ;;  %3271 = vmatprep.subr.bf16.mxu1 %v9707_v28  ;;  %v9786_v27 = vld [vmem:[#allocation2 + $0x420] ss:$16 sps:$4 sm:$0xff]   ;;  %v9789_v28 = vld [vmem:[#allocation2 + $0x428] ss:$16 sps:$4 sm:$0xff]  }
  0xee   :  { %v194_v9 = vcombine.high %v11706_v26, %v11706_v26 }
  0xf0   :  { %2985 = vmatpush1.bf16.msra.mxu0 %v9702_v29  ;;  %3272 = vmatpush1.bf16.msra.mxu1 %v9705_v30  ;;  %v9794_v29 = vld [vmem:[#allocation2 + $0x444] ss:$16 sps:$4 sm:$0xff]   ;;  %v9797_v30 = vld [vmem:[#allocation2 + $0x44c] ss:$16 sps:$4 sm:$0xff]  }
  0xf1   :  { %2986 = vmatprep.subr.bf16.mxu0 %v9710_v31  ;;  %3273 = vmatprep.subr.bf16.mxu1 %v9713_v32  ;;  %v240_v31 = vpack.c.bf16 %v194_v9, %v194_v9  ;;  %v9792_v32 = vld [vmem:[#allocation2 + $0x440] ss:$16 sps:$4 sm:$0xff]  }
  0xf2   :  { %v9870_v9 = vld [vmem:[#allocation2 + $0x5e0] ss:$16 sps:$4 sm:$0xff]  }
  0xf4   :  { %2987 = vmatpush1.bf16.msra.mxu0 %v9708_v33  ;;  %3274 = vmatpush1.bf16.msra.mxu1 %v9711_v34  ;;  %v9795_v33 = vld [vmem:[#allocation2 + $0x448] ss:$16 sps:$4 sm:$0xff]   ;;  %v9800_v34 = vld [vmem:[#allocation2 + $0x464] ss:$16 sps:$4 sm:$0xff]  }
  0xf5   :  { %2988 = vmatprep.subr.bf16.mxu0 %v9716_v35  ;;  %3275 = vmatprep.subr.bf16.mxu1 %v9719_v36  ;;  %v9803_v35 = vld [vmem:[#allocation2 + $0x46c] ss:$16 sps:$4 sm:$0xff]   ;;  %v9798_v36 = vld [vmem:[#allocation2 + $0x460] ss:$16 sps:$4 sm:$0xff]  }
  0xf8   :  { %2989 = vmatpush1.bf16.msra.mxu0 %v9714_v37  ;;  %3276 = vmatpush1.bf16.msra.mxu1 %v9717_v38  ;;  %v9801_v37 = vld [vmem:[#allocation2 + $0x468] ss:$16 sps:$4 sm:$0xff]   ;;  %v9806_v38 = vld [vmem:[#allocation2 + $0x484] ss:$16 sps:$4 sm:$0xff]  }
  0xf9   :  { %2990 = vmatprep.subr.bf16.mxu0 %v9722_v39  ;;  %3277 = vmatprep.subr.bf16.mxu1 %v9725_v40  ;;  %v9809_v39 = vld [vmem:[#allocation2 + $0x48c] ss:$16 sps:$4 sm:$0xff]   ;;  %v9804_v40 = vld [vmem:[#allocation2 + $0x480] ss:$16 sps:$4 sm:$0xff]  }
  0xfc   :  { %2991 = vmatpush1.bf16.msra.mxu0 %v9720_v41  ;;  %3278 = vmatpush1.bf16.msra.mxu1 %v9723_v42  ;;  %v9807_v41 = vld [vmem:[#allocation2 + $0x488] ss:$16 sps:$4 sm:$0xff]   ;;  %v9812_v42 = vld [vmem:[#allocation2 + $0x4a4] ss:$16 sps:$4 sm:$0xff]  }
  0xfd   :  { %2992 = vmatprep.subr.bf16.mxu0 %v9728_v44  ;;  %3279 = vmatprep.subr.bf16.mxu1 %v9731_v45  ;;  %v9815_v44 = vld [vmem:[#allocation2 + $0x4ac] ss:$16 sps:$4 sm:$0xff]   ;;  %v9810_v45 = vld [vmem:[#allocation2 + $0x4a0] ss:$16 sps:$4 sm:$0xff]  }
 0x100   :  { %2993 = vmatpush1.bf16.msra.mxu0 %v9726_v46  ;;  %3280 = vmatpush1.bf16.msra.mxu1 %v9729_v47  ;;  %v9813_v46 = vld [vmem:[#allocation2 + $0x4a8] ss:$16 sps:$4 sm:$0xff]   ;;  %v9818_v47 = vld [vmem:[#allocation2 + $0x4c4] ss:$16 sps:$4 sm:$0xff]  }
 0x101   :  { %2994 = vmatprep.subr.bf16.mxu0 %v9734_v48  ;;  %3281 = vmatprep.subr.bf16.mxu1 %v9737_v50  ;;  %v9821_v48 = vld [vmem:[#allocation2 + $0x4cc] ss:$16 sps:$4 sm:$0xff]   ;;  %v9816_v50 = vld [vmem:[#allocation2 + $0x4c0] ss:$16 sps:$4 sm:$0xff]  }
 0x104   :  { %2995 = vmatpush1.bf16.msra.mxu0 %v9732_v51  ;;  %3282 = vmatpush1.bf16.msra.mxu1 %v9735_v52  ;;  %v9819_v51 = vld [vmem:[#allocation2 + $0x4c8] ss:$16 sps:$4 sm:$0xff]   ;;  %v9824_v52 = vld [vmem:[#allocation2 + $0x4e4] ss:$16 sps:$4 sm:$0xff]  }
 0x105   :  { %2996 = vmatprep.subr.bf16.mxu0 %v9740_v53  ;;  %3283 = vmatprep.subr.bf16.mxu1 %v9743_v54  ;;  %v9827_v53 = vld [vmem:[#allocation2 + $0x4ec] ss:$16 sps:$4 sm:$0xff]   ;;  %v9822_v54 = vld [vmem:[#allocation2 + $0x4e0] ss:$16 sps:$4 sm:$0xff]  }
 0x108   :  { %2997 = vmatpush1.bf16.msra.mxu0 %v9738_v55  ;;  %3284 = vmatpush1.bf16.msra.mxu1 %v9741_v56  ;;  %v9825_v55 = vld [vmem:[#allocation2 + $0x4e8] ss:$16 sps:$4 sm:$0xff]   ;;  %v9830_v56 = vld [vmem:[#allocation2 + $0x504] ss:$16 sps:$4 sm:$0xff]  }
 0x109   :  { %2998 = vmatprep.subr.bf16.mxu0 %v9746_v57  ;;  %3285 = vmatprep.subr.bf16.mxu1 %v9749_v58  ;;  %v9833_v57 = vld [vmem:[#allocation2 + $0x50c] ss:$16 sps:$4 sm:$0xff]   ;;  %v9828_v58 = vld [vmem:[#allocation2 + $0x500] ss:$16 sps:$4 sm:$0xff]  }
 0x10c   :  { %2999 = vmatpush1.bf16.msra.mxu0 %v9744_v59  ;;  %3286 = vmatpush1.bf16.msra.mxu1 %v9747_v60  ;;  %v9831_v59 = vld [vmem:[#allocation2 + $0x508] ss:$16 sps:$4 sm:$0xff]   ;;  %v9836_v60 = vld [vmem:[#allocation2 + $0x524] ss:$16 sps:$4 sm:$0xff]  }
 0x10d   :  { %3000 = vmatprep.subr.bf16.mxu0 %v9752_v61  ;;  %3287 = vmatprep.subr.bf16.mxu1 %v9755_v62  ;;  %v9839_v61 = vld [vmem:[#allocation2 + $0x52c] ss:$16 sps:$4 sm:$0xff]   ;;  %v9834_v62 = vld [vmem:[#allocation2 + $0x520] ss:$16 sps:$4 sm:$0xff]  }
 0x110   :  { %3001 = vmatpush1.bf16.msra.mxu0 %v9750_v63  ;;  %3288 = vmatpush1.bf16.msra.mxu1 %v9753_v0  ;;  %v9837_v63 = vld [vmem:[#allocation2 + $0x528] ss:$16 sps:$4 sm:$0xff]   ;;  %v9842_v0 = vld [vmem:[#allocation2 + $0x544] ss:$16 sps:$4 sm:$0xff]  }
 0x111   :  { %3002 = vmatprep.subr.bf16.mxu0 %v9758_v1  ;;  %3289 = vmatprep.subr.bf16.mxu1 %v9761_v2  ;;  %v9845_v1 = vld [vmem:[#allocation2 + $0x54c] ss:$16 sps:$4 sm:$0xff]   ;;  %v9840_v2 = vld [vmem:[#allocation2 + $0x540] ss:$16 sps:$4 sm:$0xff]  }
 0x114   :  { %3003 = vmatpush1.bf16.msra.mxu0 %v9756_v3  ;;  %3290 = vmatpush1.bf16.msra.mxu1 %v9759_v4  ;;  %v9843_v3 = vld [vmem:[#allocation2 + $0x548] ss:$16 sps:$4 sm:$0xff]   ;;  %v9848_v4 = vld [vmem:[#allocation2 + $0x564] ss:$16 sps:$4 sm:$0xff]  }
 0x115   :  { %3004 = vmatprep.subr.bf16.mxu0 %v9764_v5  ;;  %3291 = vmatprep.subr.bf16.mxu1 %v9767_v6  ;;  %v9851_v5 = vld [vmem:[#allocation2 + $0x56c] ss:$16 sps:$4 sm:$0xff]   ;;  %v9846_v6 = vld [vmem:[#allocation2 + $0x560] ss:$16 sps:$4 sm:$0xff]  }
 0x118   :  { %3005 = vmatpush1.bf16.msra.mxu0 %v9762_v7  ;;  %3292 = vmatpush1.bf16.msra.mxu1 %v9765_v8  ;;  %v9849_v7 = vld [vmem:[#allocation2 + $0x568] ss:$16 sps:$4 sm:$0xff]   ;;  %v9854_v8 = vld [vmem:[#allocation2 + $0x584] ss:$16 sps:$4 sm:$0xff]  }
 0x119   :  { %3006 = vmatprep.subr.bf16.mxu0 %v9770_v10  ;;  %3293 = vmatprep.subr.bf16.mxu1 %v9773_v11  ;;  %v9857_v10 = vld [vmem:[#allocation2 + $0x58c] ss:$16 sps:$4 sm:$0xff]   ;;  %v9852_v11 = vld [vmem:[#allocation2 + $0x580] ss:$16 sps:$4 sm:$0xff]  }
 0x11c   :  { %3007 = vmatpush1.bf16.msra.mxu0 %v9768_v12  ;;  %3294 = vmatpush1.bf16.msra.mxu1 %v9771_v13  ;;  %v9855_v12 = vld [vmem:[#allocation2 + $0x588] ss:$16 sps:$4 sm:$0xff]   ;;  %v9860_v13 = vld [vmem:[#allocation2 + $0x5a4] ss:$16 sps:$4 sm:$0xff]  }
 0x11d   :  { %3008 = vmatprep.subr.bf16.mxu0 %v9776_v14  ;;  %3295 = vmatprep.subr.bf16.mxu1 %v9779_v15  ;;  %v9863_v14 = vld [vmem:[#allocation2 + $0x5ac] ss:$16 sps:$4 sm:$0xff]   ;;  %v9858_v15 = vld [vmem:[#allocation2 + $0x5a0] ss:$16 sps:$4 sm:$0xff]  }
 0x120   :  { %3009 = vmatpush1.bf16.msra.mxu0 %v9774_v16  ;;  %3296 = vmatpush1.bf16.msra.mxu1 %v9777_v17  ;;  %v9861_v16 = vld [vmem:[#allocation2 + $0x5a8] ss:$16 sps:$4 sm:$0xff]   ;;  %v9866_v17 = vld [vmem:[#allocation2 + $0x5c4] ss:$16 sps:$4 sm:$0xff]  }
 0x121   :  { %3019 = vmatprep.subr.bf16.mxu0 %v9782_v18  ;;  %3306 = vmatprep.subr.bf16.mxu1 %v9785_v19  ;;  %v9869_v18 = vld [vmem:[#allocation2 + $0x5cc] ss:$16 sps:$4 sm:$0xff]   ;;  %v179_v19 = vcombine.high %v11702_v23, %v11702_v23 }
 0x123   :  { %3011 = vmatmul.mubr.bf16.vlgmr.msra.gmra.mrb[0].mxu0 %v237_v21  ;;  %3298 = vmatmul.mubr.bf16.vlgmr.msra.gmra.mrb[0].mxu1 %v237_v21  ;;  %v9867_v21 = vld [vmem:[#allocation2 + $0x5c8] ss:$16 sps:$4 sm:$0xff]  }
 0x124   :  { %3020 = vmatpush1.bf16.msra.mxu0 %v9780_v20  ;;  %3307 = vmatpush1.bf16.msra.mxu1 %v9783_v22  ;;  %v9864_v20 = vld [vmem:[#allocation2 + $0x5c0] ss:$16 sps:$4 sm:$0xff]   ;;  %v9872_v22 = vld [vmem:[#allocation2 + $0x5e4] ss:$16 sps:$4 sm:$0xff]  }
 0x125   :  { %3021 = vmatprep.subr.bf16.mxu0 %v9788_v24  ;;  %3308 = vmatprep.subr.bf16.mxu1 %v9791_v25  ;;  %v9875_v24 = vld [vmem:[#allocation2 + $0x5ec] ss:$16 sps:$4 sm:$0xff]   ;;  %v11713_v25 = vrot.slane %v179_v19, %v11686_v49  ;;  %v9951_v19 = vld [vmem:[#allocation2 + $0x788] ss:$16 sps:$4 sm:$0xff]  }
 0x126   :  { %3051 = vmatprep.mubr.bf16.mxu0 %v240_v31  ;;  %3338 = vmatprep.mubr.bf16.mxu1 %v240_v31  ;;  %v9876_v31 = vld [vmem:[#allocation2 + $0x600] ss:$16 sps:$4 sm:$0xff]  }
 0x127   :  { %v195_v23 = vcombine.high %v11713_v25, %v11713_v25 }
 0x128   :  { %3022 = vmatpush1.bf16.msra.mxu0 %v9786_v27  ;;  %3309 = vmatpush1.bf16.msra.mxu1 %v9789_v28  ;;  %v9873_v27 = vld [vmem:[#allocation2 + $0x5e8] ss:$16 sps:$4 sm:$0xff]   ;;  %v9878_v28 = vld [vmem:[#allocation2 + $0x604] ss:$16 sps:$4 sm:$0xff]  }
 0x129   :  { %3023 = vmatprep.subr.bf16.mxu0 %v9794_v29  ;;  %3310 = vmatprep.subr.bf16.mxu1 %v9797_v30  ;;  %v9881_v29 = vld [vmem:[#allocation2 + $0x60c] ss:$16 sps:$4 sm:$0xff]   ;;  %v239_v30 = vpack.c.bf16 %v11706_v26, %v11706_v26  ;;  %v9888_v26 = vld [vmem:[#allocation2 + $0x640] ss:$16 sps:$4 sm:$0xff]  }
 0x12c   :  { %3024 = vmatpush1.bf16.msra.mxu0 %v9792_v32  ;;  %3311 = vmatpush1.bf16.msra.mxu1 %v9795_v33  ;;  %v9879_v32 = vld [vmem:[#allocation2 + $0x608] ss:$16 sps:$4 sm:$0xff]   ;;  %v9884_v33 = vld [vmem:[#allocation2 + $0x624] ss:$16 sps:$4 sm:$0xff]  }
 0x12d   :  { %3025 = vmatprep.subr.bf16.mxu0 %v9800_v34  ;;  %3312 = vmatprep.subr.bf16.mxu1 %v9803_v35  ;;  %v9887_v34 = vld [vmem:[#allocation2 + $0x62c] ss:$16 sps:$4 sm:$0xff]   ;;  %v242_v35 = vpack.c.bf16 %v195_v23, %v195_v23  ;;  %v9963_v23 = vld [vmem:[#allocation2 + $0x7c8] ss:$16 sps:$4 sm:$0xff]  }
 0x130   :  { %3026 = vmatpush1.bf16.msra.mxu0 %v9798_v36  ;;  %3313 = vmatpush1.bf16.msra.mxu1 %v9801_v37  ;;  %v9882_v36 = vld [vmem:[#allocation2 + $0x620] ss:$16 sps:$4 sm:$0xff]   ;;  %v9885_v37 = vld [vmem:[#allocation2 + $0x628] ss:$16 sps:$4 sm:$0xff]  }
 0x131   :  { %3027 = vmatprep.subr.bf16.mxu0 %v9806_v38  ;;  %3314 = vmatprep.subr.bf16.mxu1 %v9809_v39  ;;  %v9890_v38 = vld [vmem:[#allocation2 + $0x644] ss:$16 sps:$4 sm:$0xff]   ;;  %v9893_v39 = vld [vmem:[#allocation2 + $0x64c] ss:$16 sps:$4 sm:$0xff]  }
 0x134   :  { %3028 = vmatpush1.bf16.msra.mxu0 %v9804_v40  ;;  %3315 = vmatpush1.bf16.msra.mxu1 %v9807_v41  ;;  %v9891_v40 = vld [vmem:[#allocation2 + $0x648] ss:$16 sps:$4 sm:$0xff]   ;;  %v9896_v41 = vld [vmem:[#allocation2 + $0x664] ss:$16 sps:$4 sm:$0xff]  }
 0x135   :  { %3029 = vmatprep.subr.bf16.mxu0 %v9812_v42  ;;  %3316 = vmatprep.subr.bf16.mxu1 %v9815_v44  ;;  %v9899_v42 = vld [vmem:[#allocation2 + $0x66c] ss:$16 sps:$4 sm:$0xff]   ;;  %v9894_v44 = vld [vmem:[#allocation2 + $0x660] ss:$16 sps:$4 sm:$0xff]  }
 0x138   :  { %3030 = vmatpush1.bf16.msra.mxu0 %v9810_v45  ;;  %3317 = vmatpush1.bf16.msra.mxu1 %v9813_v46  ;;  %v9897_v45 = vld [vmem:[#allocation2 + $0x668] ss:$16 sps:$4 sm:$0xff]   ;;  %v9902_v46 = vld [vmem:[#allocation2 + $0x684] ss:$16 sps:$4 sm:$0xff]  }
 0x139   :  { %3031 = vmatprep.subr.bf16.mxu0 %v9818_v47  ;;  %3318 = vmatprep.subr.bf16.mxu1 %v9821_v48  ;;  %v9905_v47 = vld [vmem:[#allocation2 + $0x68c] ss:$16 sps:$4 sm:$0xff]   ;;  %v9900_v48 = vld [vmem:[#allocation2 + $0x680] ss:$16 sps:$4 sm:$0xff]  }
 0x13c   :  { %3032 = vmatpush1.bf16.msra.mxu0 %v9816_v50  ;;  %3319 = vmatpush1.bf16.msra.mxu1 %v9819_v51  ;;  %v9903_v50 = vld [vmem:[#allocation2 + $0x688] ss:$16 sps:$4 sm:$0xff]   ;;  %v9908_v51 = vld [vmem:[#allocation2 + $0x6a4] ss:$16 sps:$4 sm:$0xff]  }
 0x13d   :  { %3033 = vmatprep.subr.bf16.mxu0 %v9824_v52  ;;  %3320 = vmatprep.subr.bf16.mxu1 %v9827_v53  ;;  %v9911_v52 = vld [vmem:[#allocation2 + $0x6ac] ss:$16 sps:$4 sm:$0xff]   ;;  %v9906_v53 = vld [vmem:[#allocation2 + $0x6a0] ss:$16 sps:$4 sm:$0xff]  }
 0x140   :  { %3034 = vmatpush1.bf16.msra.mxu0 %v9822_v54  ;;  %3321 = vmatpush1.bf16.msra.mxu1 %v9825_v55  ;;  %v9909_v54 = vld [vmem:[#allocation2 + $0x6a8] ss:$16 sps:$4 sm:$0xff]   ;;  %v9914_v55 = vld [vmem:[#allocation2 + $0x6c4] ss:$16 sps:$4 sm:$0xff]  }
 0x141   :  { %3035 = vmatprep.subr.bf16.mxu0 %v9830_v56  ;;  %3322 = vmatprep.subr.bf16.mxu1 %v9833_v57  ;;  %v9917_v56 = vld [vmem:[#allocation2 + $0x6cc] ss:$16 sps:$4 sm:$0xff]   ;;  %v9912_v57 = vld [vmem:[#allocation2 + $0x6c0] ss:$16 sps:$4 sm:$0xff]  }
 0x144   :  { %3036 = vmatpush1.bf16.msra.mxu0 %v9828_v58  ;;  %3323 = vmatpush1.bf16.msra.mxu1 %v9831_v59  ;;  %v9915_v58 = vld [vmem:[#allocation2 + $0x6c8] ss:$16 sps:$4 sm:$0xff]   ;;  %v9920_v59 = vld [vmem:[#allocation2 + $0x6e4] ss:$16 sps:$4 sm:$0xff]  }
 0x145   :  { %3037 = vmatprep.subr.bf16.mxu0 %v9836_v60  ;;  %3324 = vmatprep.subr.bf16.mxu1 %v9839_v61  ;;  %v9923_v60 = vld [vmem:[#allocation2 + $0x6ec] ss:$16 sps:$4 sm:$0xff]   ;;  %v9918_v61 = vld [vmem:[#allocation2 + $0x6e0] ss:$16 sps:$4 sm:$0xff]  }
 0x148   :  { %3038 = vmatpush1.bf16.msra.mxu0 %v9834_v62  ;;  %3325 = vmatpush1.bf16.msra.mxu1 %v9837_v63  ;;  %v9921_v62 = vld [vmem:[#allocation2 + $0x6e8] ss:$16 sps:$4 sm:$0xff]   ;;  %v9926_v63 = vld [vmem:[#allocation2 + $0x704] ss:$16 sps:$4 sm:$0xff]  }
 0x149   :  { %3039 = vmatprep.subr.bf16.mxu0 %v9842_v0  ;;  %3326 = vmatprep.subr.bf16.mxu1 %v9845_v1  ;;  %v9929_v0 = vld [vmem:[#allocation2 + $0x70c] ss:$16 sps:$4 sm:$0xff]   ;;  %v9924_v1 = vld [vmem:[#allocation2 + $0x700] ss:$16 sps:$4 sm:$0xff]  }
 0x14c   :  { %3040 = vmatpush1.bf16.msra.mxu0 %v9840_v2  ;;  %3327 = vmatpush1.bf16.msra.mxu1 %v9843_v3  ;;  %v9927_v2 = vld [vmem:[#allocation2 + $0x708] ss:$16 sps:$4 sm:$0xff]   ;;  %v9932_v3 = vld [vmem:[#allocation2 + $0x724] ss:$16 sps:$4 sm:$0xff]  }
 0x14d   :  { %3041 = vmatprep.subr.bf16.mxu0 %v9848_v4  ;;  %3328 = vmatprep.subr.bf16.mxu1 %v9851_v5  ;;  %v9935_v4 = vld [vmem:[#allocation2 + $0x72c] ss:$16 sps:$4 sm:$0xff]   ;;  %v9930_v5 = vld [vmem:[#allocation2 + $0x720] ss:$16 sps:$4 sm:$0xff]  }
 0x150   :  { %3042 = vmatpush1.bf16.msra.mxu0 %v9846_v6  ;;  %3329 = vmatpush1.bf16.msra.mxu1 %v9849_v7  ;;  %v9933_v6 = vld [vmem:[#allocation2 + $0x728] ss:$16 sps:$4 sm:$0xff]   ;;  %v9938_v7 = vld [vmem:[#allocation2 + $0x744] ss:$16 sps:$4 sm:$0xff]  }
 0x151   :  { %3043 = vmatprep.subr.bf16.mxu0 %v9854_v8  ;;  %3330 = vmatprep.subr.bf16.mxu1 %v9857_v10  ;;  %v9941_v8 = vld [vmem:[#allocation2 + $0x74c] ss:$16 sps:$4 sm:$0xff]   ;;  %v9936_v10 = vld [vmem:[#allocation2 + $0x740] ss:$16 sps:$4 sm:$0xff]  }
 0x154   :  { %3044 = vmatpush1.bf16.msra.mxu0 %v9852_v11  ;;  %3331 = vmatpush1.bf16.msra.mxu1 %v9855_v12  ;;  %v9939_v11 = vld [vmem:[#allocation2 + $0x748] ss:$16 sps:$4 sm:$0xff]   ;;  %v9944_v12 = vld [vmem:[#allocation2 + $0x764] ss:$16 sps:$4 sm:$0xff]  }
 0x155   :  { %3045 = vmatprep.subr.bf16.mxu0 %v9860_v13  ;;  %3332 = vmatprep.subr.bf16.mxu1 %v9863_v14  ;;  %v9947_v13 = vld [vmem:[#allocation2 + $0x76c] ss:$16 sps:$4 sm:$0xff]   ;;  %v9942_v14 = vld [vmem:[#allocation2 + $0x760] ss:$16 sps:$4 sm:$0xff]  }
 0x158   :  { %3046 = vmatpush1.bf16.msra.mxu0 %v9858_v15  ;;  %3333 = vmatpush1.bf16.msra.mxu1 %v9861_v16  ;;  %v9945_v15 = vld [vmem:[#allocation2 + $0x768] ss:$16 sps:$4 sm:$0xff]   ;;  %v9950_v16 = vld [vmem:[#allocation2 + $0x784] ss:$16 sps:$4 sm:$0xff]  }
 0x159   :  { %3047 = vmatprep.subr.bf16.mxu0 %v9866_v17  ;;  %3334 = vmatprep.subr.bf16.mxu1 %v9869_v18  ;;  %v9953_v17 = vld [vmem:[#allocation2 + $0x78c] ss:$16 sps:$4 sm:$0xff]   ;;  %v9948_v18 = vld [vmem:[#allocation2 + $0x780] ss:$16 sps:$4 sm:$0xff]  }
 0x15c   :  { %3048 = vmatpush1.bf16.msra.mxu0 %v9864_v20  ;;  %3335 = vmatpush1.bf16.msra.mxu1 %v9867_v21  ;;  %v9956_v20 = vld [vmem:[#allocation2 + $0x7a4] ss:$16 sps:$4 sm:$0xff]   ;;  %v9959_v21 = vld [vmem:[#allocation2 + $0x7ac] ss:$16 sps:$4 sm:$0xff]  }
 0x15d   :  { %3049 = vmatprep.subr.bf16.mxu0 %v9872_v22  ;;  %3336 = vmatprep.subr.bf16.mxu1 %v9875_v24  ;;  %v9954_v22 = vld [vmem:[#allocation2 + $0x7a0] ss:$16 sps:$4 sm:$0xff]   ;;  %v9957_v24 = vld [vmem:[#allocation2 + $0x7a8] ss:$16 sps:$4 sm:$0xff]  }
 0x160   :  { %3050 = vmatpush1.bf16.msra.mxu0 %v9870_v9  ;;  %3337 = vmatpush1.bf16.msra.mxu1 %v9873_v27  ;;  %v9962_v9 = vld [vmem:[#allocation2 + $0x7c4] ss:$16 sps:$4 sm:$0xff]   ;;  %v9965_v27 = vld [vmem:[#allocation2 + $0x7cc] ss:$16 sps:$4 sm:$0xff]  }
 0x161   :  { %3060 = vmatprep.subr.bf16.mxu0 %v9878_v28  ;;  %3347 = vmatprep.subr.bf16.mxu1 %v9881_v29  ;;  %v9960_v28 = vld [vmem:[#allocation2 + $0x7c0] ss:$16 sps:$4 sm:$0xff]  }
 0x162   :  { %v11722_v29 = vld [vmem:[%s13515_s0 + $0x10] sm:$0xff] }
 0x163   :  { %3052 = vmatmul.mubr.bf16.vlgmr.msra.gmra.mrb[0].mxu0 %v239_v30  ;;  %3339 = vmatmul.mubr.bf16.vlgmr.msra.gmra.mrb[0].mxu1 %v239_v30  ;;  %v9968_v30 = vld [vmem:[#allocation2 + $0x7e4] ss:$16 sps:$4 sm:$0xff]  }
 0x164   :  { %3061 = vmatpush1.bf16.msra.mxu0 %v9876_v31  ;;  %3348 = vmatpush1.bf16.msra.mxu1 %v9879_v32  ;;  %v9971_v31 = vld [vmem:[#allocation2 + $0x7ec] ss:$16 sps:$4 sm:$0xff]   ;;  %v11726_v32 = vrot.slane %v11722_v29, %v11686_v49 }
 0x165   :  { %3062 = vmatprep.subr.bf16.mxu0 %v9884_v33  ;;  %3349 = vmatprep.subr.bf16.mxu1 %v9887_v34  ;;  %v9966_v33 = vld [vmem:[#allocation2 + $0x7e0] ss:$16 sps:$4 sm:$0xff]   ;;  %v9969_v34 = vld [vmem:[#allocation2 + $0x7e8] ss:$16 sps:$4 sm:$0xff]  }
 0x166   :  { %3092 = vmatprep.mubr.bf16.mxu0 %v242_v35  ;;  %3379 = vmatprep.mubr.bf16.mxu1 %v242_v35  ;;  %v9975_v35 = vld [vmem:[#allocation2 + $0x804] ss:$16 sps:$4 sm:$0xff]  }
 0x168   :  { %3063 = vmatpush1.bf16.msra.mxu0 %v9882_v36  ;;  %3350 = vmatpush1.bf16.msra.mxu1 %v9885_v37  ;;  %v9978_v36 = vld [vmem:[#allocation2 + $0x80c] ss:$16 sps:$4 sm:$0xff]   ;;  %v211_v37 = vcombine.high %v11726_v32, %v11726_v32 }
 0x169   :  { %3064 = vmatprep.subr.bf16.mxu0 %v9890_v38  ;;  %3351 = vmatprep.subr.bf16.mxu1 %v9893_v39  ;;  %v9973_v38 = vld [vmem:[#allocation2 + $0x800] ss:$16 sps:$4 sm:$0xff]   ;;  %v241_v39 = vpack.c.bf16 %v11713_v25, %v11713_v25 }
 0x16a   :  { %v9985_v25 = vld [vmem:[#allocation2 + $0x840] ss:$16 sps:$4 sm:$0xff]  }
 0x16c   :  { %3065 = vmatpush1.bf16.msra.mxu0 %v9888_v26  ;;  %3352 = vmatpush1.bf16.msra.mxu1 %v9891_v40  ;;  %v9976_v26 = vld [vmem:[#allocation2 + $0x808] ss:$16 sps:$4 sm:$0xff]   ;;  %v9981_v40 = vld [vmem:[#allocation2 + $0x824] ss:$16 sps:$4 sm:$0xff]  }
 0x16d   :  { %3066 = vmatprep.subr.bf16.mxu0 %v9896_v41  ;;  %3353 = vmatprep.subr.bf16.mxu1 %v9899_v42  ;;  %v9984_v41 = vld [vmem:[#allocation2 + $0x82c] ss:$16 sps:$4 sm:$0xff]   ;;  %v244_v42 = vpack.c.bf16 %v211_v37, %v211_v37  ;;  %v10057_v37 = vld [vmem:[#allocation2 + $0x9c0] ss:$16 sps:$4 sm:$0xff]  }
 0x170   :  { %3067 = vmatpush1.bf16.msra.mxu0 %v9894_v44  ;;  %3354 = vmatpush1.bf16.msra.mxu1 %v9897_v45  ;;  %v9979_v44 = vld [vmem:[#allocation2 + $0x820] ss:$16 sps:$4 sm:$0xff]   ;;  %v9982_v45 = vld [vmem:[#allocation2 + $0x828] ss:$16 sps:$4 sm:$0xff]  }
 0x171   :  { %3068 = vmatprep.subr.bf16.mxu0 %v9902_v46  ;;  %3355 = vmatprep.subr.bf16.mxu1 %v9905_v47  ;;  %v9987_v46 = vld [vmem:[#allocation2 + $0x844] ss:$16 sps:$4 sm:$0xff]   ;;  %v9990_v47 = vld [vmem:[#allocation2 + $0x84c] ss:$16 sps:$4 sm:$0xff]  }
 0x174   :  { %3069 = vmatpush1.bf16.msra.mxu0 %v9900_v48  ;;  %3356 = vmatpush1.bf16.msra.mxu1 %v9903_v50  ;;  %v9988_v48 = vld [vmem:[#allocation2 + $0x848] ss:$16 sps:$4 sm:$0xff]   ;;  %v9993_v50 = vld [vmem:[#allocation2 + $0x864] ss:$16 sps:$4 sm:$0xff]  }
 0x175   :  { %3070 = vmatprep.subr.bf16.mxu0 %v9908_v51  ;;  %3357 = vmatprep.subr.bf16.mxu1 %v9911_v52  ;;  %v9996_v51 = vld [vmem:[#allocation2 + $0x86c] ss:$16 sps:$4 sm:$0xff]   ;;  %v9991_v52 = vld [vmem:[#allocation2 + $0x860] ss:$16 sps:$4 sm:$0xff]  }
 0x178   :  { %3071 = vmatpush1.bf16.msra.mxu0 %v9906_v53  ;;  %3358 = vmatpush1.bf16.msra.mxu1 %v9909_v54  ;;  %v9994_v53 = vld [vmem:[#allocation2 + $0x868] ss:$16 sps:$4 sm:$0xff]   ;;  %v9999_v54 = vld [vmem:[#allocation2 + $0x884] ss:$16 sps:$4 sm:$0xff]  }
 0x179   :  { %3072 = vmatprep.subr.bf16.mxu0 %v9914_v55  ;;  %3359 = vmatprep.subr.bf16.mxu1 %v9917_v56  ;;  %v10002_v55 = vld [vmem:[#allocation2 + $0x88c] ss:$16 sps:$4 sm:$0xff]   ;;  %v9997_v56 = vld [vmem:[#allocation2 + $0x880] ss:$16 sps:$4 sm:$0xff]  }
 0x17c   :  { %3073 = vmatpush1.bf16.msra.mxu0 %v9912_v57  ;;  %3360 = vmatpush1.bf16.msra.mxu1 %v9915_v58  ;;  %v10000_v57 = vld [vmem:[#allocation2 + $0x888] ss:$16 sps:$4 sm:$0xff]   ;;  %v10005_v58 = vld [vmem:[#allocation2 + $0x8a4] ss:$16 sps:$4 sm:$0xff]  }
 0x17d   :  { %3074 = vmatprep.subr.bf16.mxu0 %v9920_v59  ;;  %3361 = vmatprep.subr.bf16.mxu1 %v9923_v60  ;;  %v10008_v59 = vld [vmem:[#allocation2 + $0x8ac] ss:$16 sps:$4 sm:$0xff]   ;;  %v10003_v60 = vld [vmem:[#allocation2 + $0x8a0] ss:$16 sps:$4 sm:$0xff]  }
 0x180   :  { %3075 = vmatpush1.bf16.msra.mxu0 %v9918_v61  ;;  %3362 = vmatpush1.bf16.msra.mxu1 %v9921_v62  ;;  %v10006_v61 = vld [vmem:[#allocation2 + $0x8a8] ss:$16 sps:$4 sm:$0xff]   ;;  %v10011_v62 = vld [vmem:[#allocation2 + $0x8c4] ss:$16 sps:$4 sm:$0xff]  }
 0x181   :  { %3076 = vmatprep.subr.bf16.mxu0 %v9926_v63  ;;  %3363 = vmatprep.subr.bf16.mxu1 %v9929_v0  ;;  %v10014_v63 = vld [vmem:[#allocation2 + $0x8cc] ss:$16 sps:$4 sm:$0xff]   ;;  %v10009_v0 = vld [vmem:[#allocation2 + $0x8c0] ss:$16 sps:$4 sm:$0xff]  }
 0x184   :  { %3077 = vmatpush1.bf16.msra.mxu0 %v9924_v1  ;;  %3364 = vmatpush1.bf16.msra.mxu1 %v9927_v2  ;;  %v10012_v1 = vld [vmem:[#allocation2 + $0x8c8] ss:$16 sps:$4 sm:$0xff]   ;;  %v10017_v2 = vld [vmem:[#allocation2 + $0x8e4] ss:$16 sps:$4 sm:$0xff]  }
 0x185   :  { %3078 = vmatprep.subr.bf16.mxu0 %v9932_v3  ;;  %3365 = vmatprep.subr.bf16.mxu1 %v9935_v4  ;;  %v10020_v3 = vld [vmem:[#allocation2 + $0x8ec] ss:$16 sps:$4 sm:$0xff]   ;;  %v10015_v4 = vld [vmem:[#allocation2 + $0x8e0] ss:$16 sps:$4 sm:$0xff]  }
 0x188   :  { %3079 = vmatpush1.bf16.msra.mxu0 %v9930_v5  ;;  %3366 = vmatpush1.bf16.msra.mxu1 %v9933_v6  ;;  %v10018_v5 = vld [vmem:[#allocation2 + $0x8e8] ss:$16 sps:$4 sm:$0xff]   ;;  %v10023_v6 = vld [vmem:[#allocation2 + $0x904] ss:$16 sps:$4 sm:$0xff]  }
 0x189   :  { %3080 = vmatprep.subr.bf16.mxu0 %v9938_v7  ;;  %3367 = vmatprep.subr.bf16.mxu1 %v9941_v8  ;;  %v10026_v7 = vld [vmem:[#allocation2 + $0x90c] ss:$16 sps:$4 sm:$0xff]   ;;  %v10021_v8 = vld [vmem:[#allocation2 + $0x900] ss:$16 sps:$4 sm:$0xff]  }
 0x18c   :  { %3081 = vmatpush1.bf16.msra.mxu0 %v9936_v10  ;;  %3368 = vmatpush1.bf16.msra.mxu1 %v9939_v11  ;;  %v10024_v10 = vld [vmem:[#allocation2 + $0x908] ss:$16 sps:$4 sm:$0xff]   ;;  %v10029_v11 = vld [vmem:[#allocation2 + $0x924] ss:$16 sps:$4 sm:$0xff]  }
 0x18d   :  { %3082 = vmatprep.subr.bf16.mxu0 %v9944_v12  ;;  %3369 = vmatprep.subr.bf16.mxu1 %v9947_v13  ;;  %v10032_v12 = vld [vmem:[#allocation2 + $0x92c] ss:$16 sps:$4 sm:$0xff]   ;;  %v10027_v13 = vld [vmem:[#allocation2 + $0x920] ss:$16 sps:$4 sm:$0xff]  }
 0x190   :  { %3083 = vmatpush1.bf16.msra.mxu0 %v9942_v14  ;;  %3370 = vmatpush1.bf16.msra.mxu1 %v9945_v15  ;;  %v10030_v14 = vld [vmem:[#allocation2 + $0x928] ss:$16 sps:$4 sm:$0xff]   ;;  %v10035_v15 = vld [vmem:[#allocation2 + $0x944] ss:$16 sps:$4 sm:$0xff]  }
 0x191   :  { %3084 = vmatprep.subr.bf16.mxu0 %v9950_v16  ;;  %3371 = vmatprep.subr.bf16.mxu1 %v9953_v17  ;;  %v10038_v16 = vld [vmem:[#allocation2 + $0x94c] ss:$16 sps:$4 sm:$0xff]   ;;  %v10033_v17 = vld [vmem:[#allocation2 + $0x940] ss:$16 sps:$4 sm:$0xff]  }
 0x194   :  { %3085 = vmatpush1.bf16.msra.mxu0 %v9948_v18  ;;  %3372 = vmatpush1.bf16.msra.mxu1 %v9951_v19  ;;  %v10036_v18 = vld [vmem:[#allocation2 + $0x948] ss:$16 sps:$4 sm:$0xff]   ;;  %v10041_v19 = vld [vmem:[#allocation2 + $0x964] ss:$16 sps:$4 sm:$0xff]  }
 0x195   :  { %3086 = vmatprep.subr.bf16.mxu0 %v9956_v20  ;;  %3373 = vmatprep.subr.bf16.mxu1 %v9959_v21  ;;  %v10044_v20 = vld [vmem:[#allocation2 + $0x96c] ss:$16 sps:$4 sm:$0xff]   ;;  %v10039_v21 = vld [vmem:[#allocation2 + $0x960] ss:$16 sps:$4 sm:$0xff]  }
 0x198   :  { %3087 = vmatpush1.bf16.msra.mxu0 %v9954_v22  ;;  %3374 = vmatpush1.bf16.msra.mxu1 %v9957_v24  ;;  %v10042_v22 = vld [vmem:[#allocation2 + $0x968] ss:$16 sps:$4 sm:$0xff]   ;;  %v10047_v24 = vld [vmem:[#allocation2 + $0x984] ss:$16 sps:$4 sm:$0xff]  }
 0x199   :  { %3088 = vmatprep.subr.bf16.mxu0 %v9962_v9  ;;  %3375 = vmatprep.subr.bf16.mxu1 %v9965_v27  ;;  %v10050_v9 = vld [vmem:[#allocation2 + $0x98c] ss:$16 sps:$4 sm:$0xff]   ;;  %v10045_v27 = vld [vmem:[#allocation2 + $0x980] ss:$16 sps:$4 sm:$0xff]  }
 0x19c   :  { %3089 = vmatpush1.bf16.msra.mxu0 %v9960_v28  ;;  %3376 = vmatpush1.bf16.msra.mxu1 %v9963_v23  ;;  %v10048_v28 = vld [vmem:[#allocation2 + $0x988] ss:$16 sps:$4 sm:$0xff]   ;;  %v10053_v23 = vld [vmem:[#allocation2 + $0x9a4] ss:$16 sps:$4 sm:$0xff]  }
 0x19d   :  { %3090 = vmatprep.subr.bf16.mxu0 %v9968_v30  ;;  %3377 = vmatprep.subr.bf16.mxu1 %v9971_v31  ;;  %v10056_v30 = vld [vmem:[#allocation2 + $0x9ac] ss:$16 sps:$4 sm:$0xff]   ;;  %v10051_v31 = vld [vmem:[#allocation2 + $0x9a0] ss:$16 sps:$4 sm:$0xff]  }
 0x1a0   :  { %3091 = vmatpush1.bf16.msra.mxu0 %v9966_v33  ;;  %3378 = vmatpush1.bf16.msra.mxu1 %v9969_v34  ;;  %v10054_v33 = vld [vmem:[#allocation2 + $0x9a8] ss:$16 sps:$4 sm:$0xff]   ;;  %v10059_v34 = vld [vmem:[#allocation2 + $0x9c4] ss:$16 sps:$4 sm:$0xff]  }
 0x1a1   :  { %3101 = vmatprep.subr.bf16.mxu0 %v9975_v35  ;;  %3388 = vmatprep.subr.bf16.mxu1 %v9978_v36  ;;  %v10062_v35 = vld [vmem:[#allocation2 + $0x9cc] ss:$16 sps:$4 sm:$0xff]   ;;  %v196_v36 = vcombine.high %v11722_v29, %v11722_v29  ;;  %v10069_v29 = vld [vmem:[#allocation2 + $0xa00] ss:$16 sps:$4 sm:$0xff]  }
 0x1a3   :  { %3093 = vmatmul.mubr.bf16.vlgmr.msra.gmra.mrb[0].mxu0 %v241_v39  ;;  %3380 = vmatmul.mubr.bf16.vlgmr.msra.gmra.mrb[0].mxu1 %v241_v39  ;;  %v10065_v39 = vld [vmem:[#allocation2 + $0x9e4] ss:$16 sps:$4 sm:$0xff]  }
 0x1a4   :  { %3102 = vmatpush1.bf16.msra.mxu0 %v9973_v38  ;;  %3389 = vmatpush1.bf16.msra.mxu1 %v9976_v26  ;;  %v10060_v38 = vld [vmem:[#allocation2 + $0x9c8] ss:$16 sps:$4 sm:$0xff]   ;;  %v10068_v26 = vld [vmem:[#allocation2 + $0x9ec] ss:$16 sps:$4 sm:$0xff]  }
 0x1a5   :  { %3103 = vmatprep.subr.bf16.mxu0 %v9981_v40  ;;  %3390 = vmatprep.subr.bf16.mxu1 %v9984_v41  ;;  %v11735_v40 = vrot.slane %v196_v36, %v11686_v49  ;;  %v10063_v41 = vld [vmem:[#allocation2 + $0x9e0] ss:$16 sps:$4 sm:$0xff]   ;;  %v10144_v36 = vld [vmem:[#allocation2 + $0xb88] ss:$16 sps:$4 sm:$0xff]  }
 0x1a6   :  { %3133 = vmatprep.mubr.bf16.mxu0 %v244_v42  ;;  %3420 = vmatprep.mubr.bf16.mxu1 %v244_v42  ;;  %v10066_v42 = vld [vmem:[#allocation2 + $0x9e8] ss:$16 sps:$4 sm:$0xff]  }
 0x1a8   :  { %3104 = vmatpush1.bf16.msra.mxu0 %v9979_v44  ;;  %3391 = vmatpush1.bf16.msra.mxu1 %v9982_v45  ;;  %v10071_v44 = vld [vmem:[#allocation2 + $0xa04] ss:$16 sps:$4 sm:$0xff]   ;;  %v10074_v45 = vld [vmem:[#allocation2 + $0xa0c] ss:$16 sps:$4 sm:$0xff]  }
 0x1a9   :  { %3105 = vmatprep.subr.bf16.mxu0 %v9987_v46  ;;  %3392 = vmatprep.subr.bf16.mxu1 %v9990_v47  ;;  %v10072_v46 = vld [vmem:[#allocation2 + $0xa08] ss:$16 sps:$4 sm:$0xff]   ;;  %v212_v47 = vcombine.high %v11735_v40, %v11735_v40 }
 0x1ac   :  { %3106 = vmatpush1.bf16.msra.mxu0 %v9985_v25  ;;  %3393 = vmatpush1.bf16.msra.mxu1 %v9988_v48  ;;  %v243_v25 = vpack.c.bf16 %v11726_v32, %v11726_v32  ;;  %v10077_v48 = vld [vmem:[#allocation2 + $0xa24] ss:$16 sps:$4 sm:$0xff]  }
 0x1ad   :  { %3107 = vmatprep.subr.bf16.mxu0 %v9993_v50  ;;  %3394 = vmatprep.subr.bf16.mxu1 %v9996_v51  ;;  %v10080_v50 = vld [vmem:[#allocation2 + $0xa2c] ss:$16 sps:$4 sm:$0xff]   ;;  %v10075_v51 = vld [vmem:[#allocation2 + $0xa20] ss:$16 sps:$4 sm:$0xff]   ;;  %v10089_v32 = vld [vmem:[#allocation2 + $0xa64] ss:$16 sps:$4 sm:$0xff]  }
 0x1b0   :  { %3108 = vmatpush1.bf16.msra.mxu0 %v9991_v52  ;;  %3395 = vmatpush1.bf16.msra.mxu1 %v9994_v53  ;;  %v10078_v52 = vld [vmem:[#allocation2 + $0xa28] ss:$16 sps:$4 sm:$0xff]   ;;  %v246_v53 = vpack.c.bf16 %v212_v47, %v212_v47 }
 0x1b1   :  { %3109 = vmatprep.subr.bf16.mxu0 %v9999_v54  ;;  %3396 = vmatprep.subr.bf16.mxu1 %v10002_v55  ;;  %v10083_v54 = vld [vmem:[#allocation2 + $0xa44] ss:$16 sps:$4 sm:$0xff]   ;;  %v10086_v55 = vld [vmem:[#allocation2 + $0xa4c] ss:$16 sps:$4 sm:$0xff]  }
 0x1b2   :  { %v11744_v47 = vld.sshfl [vmem:[%s13515_s0 + $0x18] sm:$0x33 pattern:$0x76325410] }
 0x1b4   :  { %3110 = vmatpush1.bf16.msra.mxu0 %v9997_v56  ;;  %3397 = vmatpush1.bf16.msra.mxu1 %v10000_v57  ;;  %v10081_v56 = vld [vmem:[#allocation2 + $0xa40] ss:$16 sps:$4 sm:$0xff]   ;;  %v10084_v57 = vld [vmem:[#allocation2 + $0xa48] ss:$16 sps:$4 sm:$0xff]  }
 0x1b5   :  { %3111 = vmatprep.subr.bf16.mxu0 %v10005_v58  ;;  %3398 = vmatprep.subr.bf16.mxu1 %v10008_v59  ;;  %v10092_v58 = vld [vmem:[#allocation2 + $0xa6c] ss:$16 sps:$4 sm:$0xff]   ;;  %v10087_v59 = vld [vmem:[#allocation2 + $0xa60] ss:$16 sps:$4 sm:$0xff]  }
 0x1b8   :  { %3112 = vmatpush1.bf16.msra.mxu0 %v10003_v60  ;;  %3399 = vmatpush1.bf16.msra.mxu1 %v10006_v61  ;;  %v10090_v60 = vld [vmem:[#allocation2 + $0xa68] ss:$16 sps:$4 sm:$0xff]   ;;  %v10095_v61 = vld [vmem:[#allocation2 + $0xa84] ss:$16 sps:$4 sm:$0xff]  }
 0x1b9   :  { %3113 = vmatprep.subr.bf16.mxu0 %v10011_v62  ;;  %3400 = vmatprep.subr.bf16.mxu1 %v10014_v63  ;;  %v10098_v62 = vld [vmem:[#allocation2 + $0xa8c] ss:$16 sps:$4 sm:$0xff]   ;;  %v10093_v63 = vld [vmem:[#allocation2 + $0xa80] ss:$16 sps:$4 sm:$0xff]  }
 0x1bc   :  { %3114 = vmatpush1.bf16.msra.mxu0 %v10009_v0  ;;  %3401 = vmatpush1.bf16.msra.mxu1 %v10012_v1  ;;  %v10096_v0 = vld [vmem:[#allocation2 + $0xa88] ss:$16 sps:$4 sm:$0xff]   ;;  %v10101_v1 = vld [vmem:[#allocation2 + $0xaa4] ss:$16 sps:$4 sm:$0xff]  }
 0x1bd   :  { %3115 = vmatprep.subr.bf16.mxu0 %v10017_v2  ;;  %3402 = vmatprep.subr.bf16.mxu1 %v10020_v3  ;;  %v10104_v2 = vld [vmem:[#allocation2 + $0xaac] ss:$16 sps:$4 sm:$0xff]   ;;  %v10099_v3 = vld [vmem:[#allocation2 + $0xaa0] ss:$16 sps:$4 sm:$0xff]  }
 0x1c0   :  { %3116 = vmatpush1.bf16.msra.mxu0 %v10015_v4  ;;  %3403 = vmatpush1.bf16.msra.mxu1 %v10018_v5  ;;  %v10102_v4 = vld [vmem:[#allocation2 + $0xaa8] ss:$16 sps:$4 sm:$0xff]   ;;  %v10107_v5 = vld [vmem:[#allocation2 + $0xac4] ss:$16 sps:$4 sm:$0xff]  }
 0x1c1   :  { %3117 = vmatprep.subr.bf16.mxu0 %v10023_v6  ;;  %3404 = vmatprep.subr.bf16.mxu1 %v10026_v7  ;;  %v10110_v6 = vld [vmem:[#allocation2 + $0xacc] ss:$16 sps:$4 sm:$0xff]   ;;  %v10105_v7 = vld [vmem:[#allocation2 + $0xac0] ss:$16 sps:$4 sm:$0xff]  }
 0x1c4   :  { %3118 = vmatpush1.bf16.msra.mxu0 %v10021_v8  ;;  %3405 = vmatpush1.bf16.msra.mxu1 %v10024_v10  ;;  %v10108_v8 = vld [vmem:[#allocation2 + $0xac8] ss:$16 sps:$4 sm:$0xff]   ;;  %v10113_v10 = vld [vmem:[#allocation2 + $0xae4] ss:$16 sps:$4 sm:$0xff]  }
 0x1c5   :  { %3119 = vmatprep.subr.bf16.mxu0 %v10029_v11  ;;  %3406 = vmatprep.subr.bf16.mxu1 %v10032_v12  ;;  %v10116_v11 = vld [vmem:[#allocation2 + $0xaec] ss:$16 sps:$4 sm:$0xff]   ;;  %v10111_v12 = vld [vmem:[#allocation2 + $0xae0] ss:$16 sps:$4 sm:$0xff]  }
 0x1c8   :  { %3120 = vmatpush1.bf16.msra.mxu0 %v10027_v13  ;;  %3407 = vmatpush1.bf16.msra.mxu1 %v10030_v14  ;;  %v10114_v13 = vld [vmem:[#allocation2 + $0xae8] ss:$16 sps:$4 sm:$0xff]   ;;  %v10119_v14 = vld [vmem:[#allocation2 + $0xb04] ss:$16 sps:$4 sm:$0xff]  }
 0x1c9   :  { %3121 = vmatprep.subr.bf16.mxu0 %v10035_v15  ;;  %3408 = vmatprep.subr.bf16.mxu1 %v10038_v16  ;;  %v10122_v15 = vld [vmem:[#allocation2 + $0xb0c] ss:$16 sps:$4 sm:$0xff]   ;;  %v10117_v16 = vld [vmem:[#allocation2 + $0xb00] ss:$16 sps:$4 sm:$0xff]  }
 0x1cc   :  { %3122 = vmatpush1.bf16.msra.mxu0 %v10033_v17  ;;  %3409 = vmatpush1.bf16.msra.mxu1 %v10036_v18  ;;  %v10120_v17 = vld [vmem:[#allocation2 + $0xb08] ss:$16 sps:$4 sm:$0xff]   ;;  %v10125_v18 = vld [vmem:[#allocation2 + $0xb24] ss:$16 sps:$4 sm:$0xff]  }
 0x1cd   :  { %3123 = vmatprep.subr.bf16.mxu0 %v10041_v19  ;;  %3410 = vmatprep.subr.bf16.mxu1 %v10044_v20  ;;  %v10128_v19 = vld [vmem:[#allocation2 + $0xb2c] ss:$16 sps:$4 sm:$0xff]   ;;  %v10123_v20 = vld [vmem:[#allocation2 + $0xb20] ss:$16 sps:$4 sm:$0xff]  }
 0x1d0   :  { %3124 = vmatpush1.bf16.msra.mxu0 %v10039_v21  ;;  %3411 = vmatpush1.bf16.msra.mxu1 %v10042_v22  ;;  %v10126_v21 = vld [vmem:[#allocation2 + $0xb28] ss:$16 sps:$4 sm:$0xff]   ;;  %v10131_v22 = vld [vmem:[#allocation2 + $0xb44] ss:$16 sps:$4 sm:$0xff]  }
 0x1d1   :  { %3125 = vmatprep.subr.bf16.mxu0 %v10047_v24  ;;  %3412 = vmatprep.subr.bf16.mxu1 %v10050_v9  ;;  %v10134_v24 = vld [vmem:[#allocation2 + $0xb4c] ss:$16 sps:$4 sm:$0xff]   ;;  %v10129_v9 = vld [vmem:[#allocation2 + $0xb40] ss:$16 sps:$4 sm:$0xff]  }
 0x1d4   :  { %3126 = vmatpush1.bf16.msra.mxu0 %v10045_v27  ;;  %3413 = vmatpush1.bf16.msra.mxu1 %v10048_v28  ;;  %v10132_v27 = vld [vmem:[#allocation2 + $0xb48] ss:$16 sps:$4 sm:$0xff]   ;;  %v10137_v28 = vld [vmem:[#allocation2 + $0xb64] ss:$16 sps:$4 sm:$0xff]  }
 0x1d5   :  { %3127 = vmatprep.subr.bf16.mxu0 %v10053_v23  ;;  %3414 = vmatprep.subr.bf16.mxu1 %v10056_v30  ;;  %v10140_v23 = vld [vmem:[#allocation2 + $0xb6c] ss:$16 sps:$4 sm:$0xff]   ;;  %v10135_v30 = vld [vmem:[#allocation2 + $0xb60] ss:$16 sps:$4 sm:$0xff]  }
 0x1d8   :  { %3128 = vmatpush1.bf16.msra.mxu0 %v10051_v31  ;;  %3415 = vmatpush1.bf16.msra.mxu1 %v10054_v33  ;;  %v10138_v31 = vld [vmem:[#allocation2 + $0xb68] ss:$16 sps:$4 sm:$0xff]   ;;  %v10143_v33 = vld [vmem:[#allocation2 + $0xb84] ss:$16 sps:$4 sm:$0xff]  }
 0x1d9   :  { %3129 = vmatprep.subr.bf16.mxu0 %v10059_v34  ;;  %3416 = vmatprep.subr.bf16.mxu1 %v10062_v35  ;;  %v10146_v34 = vld [vmem:[#allocation2 + $0xb8c] ss:$16 sps:$4 sm:$0xff]   ;;  %v10141_v35 = vld [vmem:[#allocation2 + $0xb80] ss:$16 sps:$4 sm:$0xff]  }
 0x1dc   :  { %3130 = vmatpush1.bf16.msra.mxu0 %v10057_v37  ;;  %3417 = vmatpush1.bf16.msra.mxu1 %v10060_v38  ;;  %v10149_v37 = vld [vmem:[#allocation2 + $0xba4] ss:$16 sps:$4 sm:$0xff]   ;;  %v10152_v38 = vld [vmem:[#allocation2 + $0xbac] ss:$16 sps:$4 sm:$0xff]  }
 0x1dd   :  { %3131 = vmatprep.subr.bf16.mxu0 %v10065_v39  ;;  %3418 = vmatprep.subr.bf16.mxu1 %v10068_v26  ;;  %v10147_v39 = vld [vmem:[#allocation2 + $0xba0] ss:$16 sps:$4 sm:$0xff]   ;;  %v10150_v26 = vld [vmem:[#allocation2 + $0xba8] ss:$16 sps:$4 sm:$0xff]  }
 0x1e0   :  { %3132 = vmatpush1.bf16.msra.mxu0 %v10063_v41  ;;  %3419 = vmatpush1.bf16.msra.mxu1 %v10066_v42  ;;  %v10155_v41 = vld [vmem:[#allocation2 + $0xbc4] ss:$16 sps:$4 sm:$0xff]   ;;  %v10158_v42 = vld [vmem:[#allocation2 + $0xbcc] ss:$16 sps:$4 sm:$0xff]  }
 0x1e1   :  { %3142 = vmatprep.subr.bf16.mxu0 %v10071_v44  ;;  %3429 = vmatprep.subr.bf16.mxu1 %v10074_v45  ;;  %v10153_v44 = vld [vmem:[#allocation2 + $0xbc0] ss:$16 sps:$4 sm:$0xff]   ;;  %v10156_v45 = vld [vmem:[#allocation2 + $0xbc8] ss:$16 sps:$4 sm:$0xff]  }
 0x1e3   :  { %3134 = vmatmul.mubr.bf16.vlgmr.msra.gmra.mrb[0].mxu0 %v243_v25  ;;  %3421 = vmatmul.mubr.bf16.vlgmr.msra.gmra.mrb[0].mxu1 %v243_v25  ;;  %v10159_v25 = vld [vmem:[#allocation2 + $0xbe0] ss:$16 sps:$4 sm:$0xff]  }
 0x1e4   :  { %3143 = vmatpush1.bf16.msra.mxu0 %v10069_v29  ;;  %3430 = vmatpush1.bf16.msra.mxu1 %v10072_v46  ;;  %v10161_v29 = vld [vmem:[#allocation2 + $0xbe4] ss:$16 sps:$4 sm:$0xff]   ;;  %v10164_v46 = vld [vmem:[#allocation2 + $0xbec] ss:$16 sps:$4 sm:$0xff]  }
 0x1e5   :  { %3144 = vmatprep.subr.bf16.mxu0 %v10077_v48  ;;  %3431 = vmatprep.subr.bf16.mxu1 %v10080_v50  ;;  %v10162_v48 = vld [vmem:[#allocation2 + $0xbe8] ss:$16 sps:$4 sm:$0xff]   ;;  %v10168_v50 = vld [vmem:[#allocation2 + $0xc04] ss:$16 sps:$4 sm:$0xff]  }
 0x1e6   :  { %3174 = vmatprep.mubr.bf16.mxu0 %v246_v53  ;;  %3461 = vmatprep.mubr.bf16.mxu1 %v246_v53  ;;  %v245_v53 = vpack.c.bf16 %v11735_v40, %v11735_v40  ;;  %v10178_v40 = vld [vmem:[#allocation2 + $0xc40] ss:$16 sps:$4 sm:$0xff]  }
 0x1e8   :  { %3145 = vmatpush1.bf16.msra.mxu0 %v10075_v51  ;;  %3432 = vmatpush1.bf16.msra.mxu1 %v10078_v52  ;;  %v10171_v51 = vld [vmem:[#allocation2 + $0xc0c] ss:$16 sps:$4 sm:$0xff]   ;;  %v220_v52 = vcombine.high %v11744_v47, %v11744_v47 }
 0x1e9   :  { %3146 = vmatprep.subr.bf16.mxu0 %v10083_v54  ;;  %3433 = vmatprep.subr.bf16.mxu1 %v10086_v55  ;;  %v10166_v54 = vld [vmem:[#allocation2 + $0xc00] ss:$16 sps:$4 sm:$0xff]   ;;  %v10169_v55 = vld [vmem:[#allocation2 + $0xc08] ss:$16 sps:$4 sm:$0xff]  }
 0x1ec   :  { %3147 = vmatpush1.bf16.msra.mxu0 %v10081_v56  ;;  %3434 = vmatpush1.bf16.msra.mxu1 %v10084_v57  ;;  %v10174_v56 = vld [vmem:[#allocation2 + $0xc24] ss:$16 sps:$4 sm:$0xff]   ;;  %v10177_v57 = vld [vmem:[#allocation2 + $0xc2c] ss:$16 sps:$4 sm:$0xff]  }
 0x1ed   :  { %3148 = vmatprep.subr.bf16.mxu0 %v10089_v32  ;;  %3435 = vmatprep.subr.bf16.mxu1 %v10092_v58  ;;  %v248_v32 = vpack.c.bf16 %v220_v52, %v220_v52  ;;  %v10172_v58 = vld [vmem:[#allocation2 + $0xc20] ss:$16 sps:$4 sm:$0xff]   ;;  %v10253_v52 = vld [vmem:[#allocation2 + $0xdc8] ss:$16 sps:$4 sm:$0xff]  }
 0x1f0   :  { %3149 = vmatpush1.bf16.msra.mxu0 %v10087_v59  ;;  %3436 = vmatpush1.bf16.msra.mxu1 %v10090_v60  ;;  %v10175_v59 = vld [vmem:[#allocation2 + $0xc28] ss:$16 sps:$4 sm:$0xff]   ;;  %v10180_v60 = vld [vmem:[#allocation2 + $0xc44] ss:$16 sps:$4 sm:$0xff]  }
 0x1f1   :  { %3150 = vmatprep.subr.bf16.mxu0 %v10095_v61  ;;  %3437 = vmatprep.subr.bf16.mxu1 %v10098_v62  ;;  %v10183_v61 = vld [vmem:[#allocation2 + $0xc4c] ss:$16 sps:$4 sm:$0xff]   ;;  %v10181_v62 = vld [vmem:[#allocation2 + $0xc48] ss:$16 sps:$4 sm:$0xff]  }
 0x1f4   :  { %3151 = vmatpush1.bf16.msra.mxu0 %v10093_v63  ;;  %3438 = vmatpush1.bf16.msra.mxu1 %v10096_v0  ;;  %v10186_v63 = vld [vmem:[#allocation2 + $0xc64] ss:$16 sps:$4 sm:$0xff]   ;;  %v10189_v0 = vld [vmem:[#allocation2 + $0xc6c] ss:$16 sps:$4 sm:$0xff]  }
 0x1f5   :  { %3152 = vmatprep.subr.bf16.mxu0 %v10101_v1  ;;  %3439 = vmatprep.subr.bf16.mxu1 %v10104_v2  ;;  %v10184_v1 = vld [vmem:[#allocation2 + $0xc60] ss:$16 sps:$4 sm:$0xff]   ;;  %v10187_v2 = vld [vmem:[#allocation2 + $0xc68] ss:$16 sps:$4 sm:$0xff]  }
 0x1f8   :  { %3153 = vmatpush1.bf16.msra.mxu0 %v10099_v3  ;;  %3440 = vmatpush1.bf16.msra.mxu1 %v10102_v4  ;;  %v10192_v3 = vld [vmem:[#allocation2 + $0xc84] ss:$16 sps:$4 sm:$0xff]   ;;  %v10195_v4 = vld [vmem:[#allocation2 + $0xc8c] ss:$16 sps:$4 sm:$0xff]  }
 0x1f9   :  { %3154 = vmatprep.subr.bf16.mxu0 %v10107_v5  ;;  %3441 = vmatprep.subr.bf16.mxu1 %v10110_v6  ;;  %v10190_v5 = vld [vmem:[#allocation2 + $0xc80] ss:$16 sps:$4 sm:$0xff]   ;;  %v10193_v6 = vld [vmem:[#allocation2 + $0xc88] ss:$16 sps:$4 sm:$0xff]  }
 0x1fc   :  { %3155 = vmatpush1.bf16.msra.mxu0 %v10105_v7  ;;  %3442 = vmatpush1.bf16.msra.mxu1 %v10108_v8  ;;  %v10198_v7 = vld [vmem:[#allocation2 + $0xca4] ss:$16 sps:$4 sm:$0xff]   ;;  %v10201_v8 = vld [vmem:[#allocation2 + $0xcac] ss:$16 sps:$4 sm:$0xff]  }
 0x1fd   :  { %3156 = vmatprep.subr.bf16.mxu0 %v10113_v10  ;;  %3443 = vmatprep.subr.bf16.mxu1 %v10116_v11  ;;  %v10196_v10 = vld [vmem:[#allocation2 + $0xca0] ss:$16 sps:$4 sm:$0xff]   ;;  %v10199_v11 = vld [vmem:[#allocation2 + $0xca8] ss:$16 sps:$4 sm:$0xff]  }
 0x200   :  { %3157 = vmatpush1.bf16.msra.mxu0 %v10111_v12  ;;  %3444 = vmatpush1.bf16.msra.mxu1 %v10114_v13  ;;  %v10204_v12 = vld [vmem:[#allocation2 + $0xcc4] ss:$16 sps:$4 sm:$0xff]   ;;  %v10207_v13 = vld [vmem:[#allocation2 + $0xccc] ss:$16 sps:$4 sm:$0xff]  }
 0x201   :  { %3158 = vmatprep.subr.bf16.mxu0 %v10119_v14  ;;  %3445 = vmatprep.subr.bf16.mxu1 %v10122_v15  ;;  %v10202_v14 = vld [vmem:[#allocation2 + $0xcc0] ss:$16 sps:$4 sm:$0xff]   ;;  %v10205_v15 = vld [vmem:[#allocation2 + $0xcc8] ss:$16 sps:$4 sm:$0xff]  }
 0x204   :  { %3159 = vmatpush1.bf16.msra.mxu0 %v10117_v16  ;;  %3446 = vmatpush1.bf16.msra.mxu1 %v10120_v17  ;;  %v10210_v16 = vld [vmem:[#allocation2 + $0xce4] ss:$16 sps:$4 sm:$0xff]   ;;  %v10213_v17 = vld [vmem:[#allocation2 + $0xcec] ss:$16 sps:$4 sm:$0xff]  }
 0x205   :  { %3160 = vmatprep.subr.bf16.mxu0 %v10125_v18  ;;  %3447 = vmatprep.subr.bf16.mxu1 %v10128_v19  ;;  %v10208_v18 = vld [vmem:[#allocation2 + $0xce0] ss:$16 sps:$4 sm:$0xff]   ;;  %v10211_v19 = vld [vmem:[#allocation2 + $0xce8] ss:$16 sps:$4 sm:$0xff]  }
 0x208   :  { %3161 = vmatpush1.bf16.msra.mxu0 %v10123_v20  ;;  %3448 = vmatpush1.bf16.msra.mxu1 %v10126_v21  ;;  %v10216_v20 = vld [vmem:[#allocation2 + $0xd04] ss:$16 sps:$4 sm:$0xff]   ;;  %v10219_v21 = vld [vmem:[#allocation2 + $0xd0c] ss:$16 sps:$4 sm:$0xff]  }
 0x209   :  { %3162 = vmatprep.subr.bf16.mxu0 %v10131_v22  ;;  %3449 = vmatprep.subr.bf16.mxu1 %v10134_v24  ;;  %v10214_v22 = vld [vmem:[#allocation2 + $0xd00] ss:$16 sps:$4 sm:$0xff]   ;;  %v10217_v24 = vld [vmem:[#allocation2 + $0xd08] ss:$16 sps:$4 sm:$0xff]  }
 0x20c   :  { %3163 = vmatpush1.bf16.msra.mxu0 %v10129_v9  ;;  %3450 = vmatpush1.bf16.msra.mxu1 %v10132_v27  ;;  %v10222_v9 = vld [vmem:[#allocation2 + $0xd24] ss:$16 sps:$4 sm:$0xff]   ;;  %v10225_v27 = vld [vmem:[#allocation2 + $0xd2c] ss:$16 sps:$4 sm:$0xff]  }
 0x20d   :  { %3164 = vmatprep.subr.bf16.mxu0 %v10137_v28  ;;  %3451 = vmatprep.subr.bf16.mxu1 %v10140_v23  ;;  %v10220_v28 = vld [vmem:[#allocation2 + $0xd20] ss:$16 sps:$4 sm:$0xff]   ;;  %v10223_v23 = vld [vmem:[#allocation2 + $0xd28] ss:$16 sps:$4 sm:$0xff]  }
 0x210   :  { %3165 = vmatpush1.bf16.msra.mxu0 %v10135_v30  ;;  %3452 = vmatpush1.bf16.msra.mxu1 %v10138_v31  ;;  %v10228_v30 = vld [vmem:[#allocation2 + $0xd44] ss:$16 sps:$4 sm:$0xff]   ;;  %v10231_v31 = vld [vmem:[#allocation2 + $0xd4c] ss:$16 sps:$4 sm:$0xff]  }
 0x211   :  { %3166 = vmatprep.subr.bf16.mxu0 %v10143_v33  ;;  %3453 = vmatprep.subr.bf16.mxu1 %v10146_v34  ;;  %v10226_v33 = vld [vmem:[#allocation2 + $0xd40] ss:$16 sps:$4 sm:$0xff]   ;;  %v10229_v34 = vld [vmem:[#allocation2 + $0xd48] ss:$16 sps:$4 sm:$0xff]  }
 0x214   :  { %3167 = vmatpush1.bf16.msra.mxu0 %v10141_v35  ;;  %3454 = vmatpush1.bf16.msra.mxu1 %v10144_v36  ;;  %v10234_v35 = vld [vmem:[#allocation2 + $0xd64] ss:$16 sps:$4 sm:$0xff]   ;;  %v10237_v36 = vld [vmem:[#allocation2 + $0xd6c] ss:$16 sps:$4 sm:$0xff]  }
 0x215   :  { %3168 = vmatprep.subr.bf16.mxu0 %v10149_v37  ;;  %3455 = vmatprep.subr.bf16.mxu1 %v10152_v38  ;;  %v10232_v37 = vld [vmem:[#allocation2 + $0xd60] ss:$16 sps:$4 sm:$0xff]   ;;  %v10235_v38 = vld [vmem:[#allocation2 + $0xd68] ss:$16 sps:$4 sm:$0xff]  }
 0x218   :  { %3169 = vmatpush1.bf16.msra.mxu0 %v10147_v39  ;;  %3456 = vmatpush1.bf16.msra.mxu1 %v10150_v26  ;;  %v10240_v39 = vld [vmem:[#allocation2 + $0xd84] ss:$16 sps:$4 sm:$0xff]   ;;  %v10243_v26 = vld [vmem:[#allocation2 + $0xd8c] ss:$16 sps:$4 sm:$0xff]  }
 0x219   :  { %3170 = vmatprep.subr.bf16.mxu0 %v10155_v41  ;;  %3457 = vmatprep.subr.bf16.mxu1 %v10158_v42  ;;  %v10238_v41 = vld [vmem:[#allocation2 + $0xd80] ss:$16 sps:$4 sm:$0xff]   ;;  %v10241_v42 = vld [vmem:[#allocation2 + $0xd88] ss:$16 sps:$4 sm:$0xff]  }
 0x21c   :  { %3171 = vmatpush1.bf16.msra.mxu0 %v10153_v44  ;;  %3458 = vmatpush1.bf16.msra.mxu1 %v10156_v45  ;;  %v10246_v44 = vld [vmem:[#allocation2 + $0xda4] ss:$16 sps:$4 sm:$0xff]   ;;  %v10249_v45 = vld [vmem:[#allocation2 + $0xdac] ss:$16 sps:$4 sm:$0xff]  }
 0x21d   :  { %3172 = vmatprep.subr.bf16.mxu0 %v10161_v29  ;;  %3459 = vmatprep.subr.bf16.mxu1 %v10164_v46  ;;  %v10244_v29 = vld [vmem:[#allocation2 + $0xda0] ss:$16 sps:$4 sm:$0xff]   ;;  %v10247_v46 = vld [vmem:[#allocation2 + $0xda8] ss:$16 sps:$4 sm:$0xff]  }
 0x220   :  { %3173 = vmatpush1.bf16.msra.mxu0 %v10159_v25  ;;  %3460 = vmatpush1.bf16.msra.mxu1 %v10162_v48  ;;  %v10252_v25 = vld [vmem:[#allocation2 + $0xdc4] ss:$16 sps:$4 sm:$0xff]   ;;  %v10255_v48 = vld [vmem:[#allocation2 + $0xdcc] ss:$16 sps:$4 sm:$0xff]  }
 0x221   :  { %3183 = vmatprep.subr.bf16.mxu0 %v10168_v50  ;;  %3470 = vmatprep.subr.bf16.mxu1 %v10171_v51  ;;  %v11753_v50 = vld [vmem:[%s13516_s1] sm:$0xff] }
 0x222   :  { %v10250_v51 = vld [vmem:[#allocation2 + $0xdc0] ss:$16 sps:$4 sm:$0xff]  }
 0x223   :  { %3175 = vmatmul.mubr.bf16.vlgmr.msra.gmra.mrb[0].mxu0 %v245_v53  ;;  %3462 = vmatmul.mubr.bf16.vlgmr.msra.gmra.mrb[0].mxu1 %v245_v53  ;;  %v10258_v53 = vld [vmem:[#allocation2 + $0xde4] ss:$16 sps:$4 sm:$0xff]  }
 0x224   :  { %3184 = vmatpush1.bf16.msra.mxu0 %v10166_v54  ;;  %3471 = vmatpush1.bf16.msra.mxu1 %v10169_v55  ;;  %v11757_v54 = vrot.slane %v11753_v50, %v11686_v49  ;;  %v10261_v55 = vld [vmem:[#allocation2 + $0xdec] ss:$16 sps:$4 sm:$0xff]  }
 0x225   :  { %3185 = vmatprep.subr.bf16.mxu0 %v10174_v56  ;;  %3472 = vmatprep.subr.bf16.mxu1 %v10177_v57  ;;  %v10256_v56 = vld [vmem:[#allocation2 + $0xde0] ss:$16 sps:$4 sm:$0xff]   ;;  %v10259_v57 = vld [vmem:[#allocation2 + $0xde8] ss:$16 sps:$4 sm:$0xff]  }
 0x226   :  { %3215 = vmatprep.mubr.bf16.mxu0 %v248_v32  ;;  %3502 = vmatprep.mubr.bf16.mxu1 %v248_v32  ;;  %v10264_v32 = vld [vmem:[#allocation5 + $0x4] ss:$16 sps:$4 sm:$0xff]  }
 0x228   :  { %3186 = vmatpush1.bf16.msra.mxu0 %v10172_v58  ;;  %3473 = vmatpush1.bf16.msra.mxu1 %v10175_v59  ;;  %v3534_v58 = vcombine.high %v11757_v54, %v11757_v54  ;;  %v10312_v59 = vld [vmem:[#allocation5 + $0xc] ss:$16 sps:$4 sm:$0xff]  }
 0x229   :  { %3187 = vmatprep.subr.bf16.mxu0 %v10180_v60  ;;  %3474 = vmatprep.subr.bf16.mxu1 %v10183_v61  ;;  %v247_v60 = vpack.c.bf16 %v11744_v47, %v11744_v47  ;;  %v10262_v61 = vld [vmem:[#allocation5] ss:$16 sps:$4 sm:$0xff]  }
 0x22a   :  { %v10268_v47 = vld [vmem:[#allocation5 + $0x40] ss:$16 sps:$4 sm:$0xff]  }
 0x22c   :  { %3188 = vmatpush1.bf16.msra.mxu0 %v10178_v40  ;;  %3475 = vmatpush1.bf16.msra.mxu1 %v10181_v62  ;;  %v10267_v40 = vld [vmem:[#allocation5 + $0x24] ss:$16 sps:$4 sm:$0xff]   ;;  %v10310_v62 = vld [vmem:[#allocation5 + $0x8] ss:$16 sps:$4 sm:$0xff]  }
 0x22d   :  { %3189 = vmatprep.subr.bf16.mxu0 %v10186_v63  ;;  %3476 = vmatprep.subr.bf16.mxu1 %v10189_v0  ;;  %v3562_v63 = vpack.c.bf16 %v3534_v58, %v3534_v58  ;;  %v10318_v0 = vld [vmem:[#allocation5 + $0x2c] ss:$16 sps:$4 sm:$0xff]  }
 0x22e   :  { %v10396_v58 = vld [vmem:[#allocation5 + $0x1cc] ss:$16 sps:$4 sm:$0xff]  }
 0x230   :  { %3190 = vmatpush1.bf16.msra.mxu0 %v10184_v1  ;;  %3477 = vmatpush1.bf16.msra.mxu1 %v10187_v2  ;;  %v10265_v1 = vld [vmem:[#allocation5 + $0x20] ss:$16 sps:$4 sm:$0xff]   ;;  %v10270_v2 = vld [vmem:[#allocation5 + $0x44] ss:$16 sps:$4 sm:$0xff]  }
 0x231   :  { %3191 = vmatprep.subr.bf16.mxu0 %v10192_v3  ;;  %3478 = vmatprep.subr.bf16.mxu1 %v10195_v4  ;;  %v10316_v3 = vld [vmem:[#allocation5 + $0x28] ss:$16 sps:$4 sm:$0xff]   ;;  %v10324_v4 = vld [vmem:[#allocation5 + $0x4c] ss:$16 sps:$4 sm:$0xff]  }
 0x234   :  { %3192 = vmatpush1.bf16.msra.mxu0 %v10190_v5  ;;  %3479 = vmatpush1.bf16.msra.mxu1 %v10193_v6  ;;  %v10273_v5 = vld [vmem:[#allocation5 + $0x64] ss:$16 sps:$4 sm:$0xff]   ;;  %v10322_v6 = vld [vmem:[#allocation5 + $0x48] ss:$16 sps:$4 sm:$0xff]  }
 0x235   :  { %3193 = vmatprep.subr.bf16.mxu0 %v10198_v7  ;;  %3480 = vmatprep.subr.bf16.mxu1 %v10201_v8  ;;  %v10330_v7 = vld [vmem:[#allocation5 + $0x6c] ss:$16 sps:$4 sm:$0xff]   ;;  %v10271_v8 = vld [vmem:[#allocation5 + $0x60] ss:$16 sps:$4 sm:$0xff]  }
 0x238   :  { %3194 = vmatpush1.bf16.msra.mxu0 %v10196_v10  ;;  %3481 = vmatpush1.bf16.msra.mxu1 %v10199_v11  ;;  %v10276_v10 = vld [vmem:[#allocation5 + $0x84] ss:$16 sps:$4 sm:$0xff]   ;;  %v10328_v11 = vld [vmem:[#allocation5 + $0x68] ss:$16 sps:$4 sm:$0xff]  }
 0x239   :  { %3195 = vmatprep.subr.bf16.mxu0 %v10204_v12  ;;  %3482 = vmatprep.subr.bf16.mxu1 %v10207_v13  ;;  %v10336_v12 = vld [vmem:[#allocation5 + $0x8c] ss:$16 sps:$4 sm:$0xff]   ;;  %v10274_v13 = vld [vmem:[#allocation5 + $0x80] ss:$16 sps:$4 sm:$0xff]  }
 0x23c   :  { %3196 = vmatpush1.bf16.msra.mxu0 %v10202_v14  ;;  %3483 = vmatpush1.bf16.msra.mxu1 %v10205_v15  ;;  %v10279_v14 = vld [vmem:[#allocation5 + $0xa4] ss:$16 sps:$4 sm:$0xff]   ;;  %v10334_v15 = vld [vmem:[#allocation5 + $0x88] ss:$16 sps:$4 sm:$0xff]  }
 0x23d   :  { %3197 = vmatprep.subr.bf16.mxu0 %v10210_v16  ;;  %3484 = vmatprep.subr.bf16.mxu1 %v10213_v17  ;;  %v10342_v16 = vld [vmem:[#allocation5 + $0xac] ss:$16 sps:$4 sm:$0xff]   ;;  %v10277_v17 = vld [vmem:[#allocation5 + $0xa0] ss:$16 sps:$4 sm:$0xff]  }
 0x240   :  { %3198 = vmatpush1.bf16.msra.mxu0 %v10208_v18  ;;  %3485 = vmatpush1.bf16.msra.mxu1 %v10211_v19  ;;  %v10282_v18 = vld [vmem:[#allocation5 + $0xc4] ss:$16 sps:$4 sm:$0xff]   ;;  %v10340_v19 = vld [vmem:[#allocation5 + $0xa8] ss:$16 sps:$4 sm:$0xff]  }
 0x241   :  { %3199 = vmatprep.subr.bf16.mxu0 %v10216_v20  ;;  %3486 = vmatprep.subr.bf16.mxu1 %v10219_v21  ;;  %v10348_v20 = vld [vmem:[#allocation5 + $0xcc] ss:$16 sps:$4 sm:$0xff]   ;;  %v10280_v21 = vld [vmem:[#allocation5 + $0xc0] ss:$16 sps:$4 sm:$0xff]  }
 0x244   :  { %3200 = vmatpush1.bf16.msra.mxu0 %v10214_v22  ;;  %3487 = vmatpush1.bf16.msra.mxu1 %v10217_v24  ;;  %v10285_v22 = vld [vmem:[#allocation5 + $0xe4] ss:$16 sps:$4 sm:$0xff]   ;;  %v10346_v24 = vld [vmem:[#allocation5 + $0xc8] ss:$16 sps:$4 sm:$0xff]  }
 0x245   :  { %3201 = vmatprep.subr.bf16.mxu0 %v10222_v9  ;;  %3488 = vmatprep.subr.bf16.mxu1 %v10225_v27  ;;  %v10354_v9 = vld [vmem:[#allocation5 + $0xec] ss:$16 sps:$4 sm:$0xff]   ;;  %v10283_v27 = vld [vmem:[#allocation5 + $0xe0] ss:$16 sps:$4 sm:$0xff]  }
 0x248   :  { %3202 = vmatpush1.bf16.msra.mxu0 %v10220_v28  ;;  %3489 = vmatpush1.bf16.msra.mxu1 %v10223_v23  ;;  %v10288_v28 = vld [vmem:[#allocation5 + $0x104] ss:$16 sps:$4 sm:$0xff]   ;;  %v10352_v23 = vld [vmem:[#allocation5 + $0xe8] ss:$16 sps:$4 sm:$0xff]  }
 0x249   :  { %3203 = vmatprep.subr.bf16.mxu0 %v10228_v30  ;;  %3490 = vmatprep.subr.bf16.mxu1 %v10231_v31  ;;  %v10360_v30 = vld [vmem:[#allocation5 + $0x10c] ss:$16 sps:$4 sm:$0xff]   ;;  %v10286_v31 = vld [vmem:[#allocation5 + $0x100] ss:$16 sps:$4 sm:$0xff]  }
 0x24c   :  { %3204 = vmatpush1.bf16.msra.mxu0 %v10226_v33  ;;  %3491 = vmatpush1.bf16.msra.mxu1 %v10229_v34  ;;  %v10291_v33 = vld [vmem:[#allocation5 + $0x124] ss:$16 sps:$4 sm:$0xff]   ;;  %v10358_v34 = vld [vmem:[#allocation5 + $0x108] ss:$16 sps:$4 sm:$0xff]  }
 0x24d   :  { %3205 = vmatprep.subr.bf16.mxu0 %v10234_v35  ;;  %3492 = vmatprep.subr.bf16.mxu1 %v10237_v36  ;;  %v10366_v35 = vld [vmem:[#allocation5 + $0x12c] ss:$16 sps:$4 sm:$0xff]   ;;  %v10289_v36 = vld [vmem:[#allocation5 + $0x120] ss:$16 sps:$4 sm:$0xff]  }
 0x250   :  { %3206 = vmatpush1.bf16.msra.mxu0 %v10232_v37  ;;  %3493 = vmatpush1.bf16.msra.mxu1 %v10235_v38  ;;  %v10294_v37 = vld [vmem:[#allocation5 + $0x144] ss:$16 sps:$4 sm:$0xff]   ;;  %v10364_v38 = vld [vmem:[#allocation5 + $0x128] ss:$16 sps:$4 sm:$0xff]  }
 0x251   :  { %3207 = vmatprep.subr.bf16.mxu0 %v10240_v39  ;;  %3494 = vmatprep.subr.bf16.mxu1 %v10243_v26  ;;  %v10372_v39 = vld [vmem:[#allocation5 + $0x14c] ss:$16 sps:$4 sm:$0xff]   ;;  %v10292_v26 = vld [vmem:[#allocation5 + $0x140] ss:$16 sps:$4 sm:$0xff]  }
 0x254   :  { %3208 = vmatpush1.bf16.msra.mxu0 %v10238_v41  ;;  %3495 = vmatpush1.bf16.msra.mxu1 %v10241_v42  ;;  %v10297_v41 = vld [vmem:[#allocation5 + $0x164] ss:$16 sps:$4 sm:$0xff]   ;;  %v10370_v42 = vld [vmem:[#allocation5 + $0x148] ss:$16 sps:$4 sm:$0xff]  }
 0x255   :  { %3209 = vmatprep.subr.bf16.mxu0 %v10246_v44  ;;  %3496 = vmatprep.subr.bf16.mxu1 %v10249_v45  ;;  %v10378_v44 = vld [vmem:[#allocation5 + $0x16c] ss:$16 sps:$4 sm:$0xff]   ;;  %v10295_v45 = vld [vmem:[#allocation5 + $0x160] ss:$16 sps:$4 sm:$0xff]  }
 0x258   :  { %3210 = vmatpush1.bf16.msra.mxu0 %v10244_v29  ;;  %3497 = vmatpush1.bf16.msra.mxu1 %v10247_v46  ;;  %v10300_v29 = vld [vmem:[#allocation5 + $0x184] ss:$16 sps:$4 sm:$0xff]   ;;  %v10376_v46 = vld [vmem:[#allocation5 + $0x168] ss:$16 sps:$4 sm:$0xff]  }
 0x259   :  { %3211 = vmatprep.subr.bf16.mxu0 %v10252_v25  ;;  %3498 = vmatprep.subr.bf16.mxu1 %v10255_v48  ;;  %v10384_v25 = vld [vmem:[#allocation5 + $0x18c] ss:$16 sps:$4 sm:$0xff]   ;;  %v10298_v48 = vld [vmem:[#allocation5 + $0x180] ss:$16 sps:$4 sm:$0xff]  }
 0x25c   :  { %3212 = vmatpush1.bf16.msra.mxu0 %v10250_v51  ;;  %3499 = vmatpush1.bf16.msra.mxu1 %v10253_v52  ;;  %v10303_v51 = vld [vmem:[#allocation5 + $0x1a4] ss:$16 sps:$4 sm:$0xff]   ;;  %v10382_v52 = vld [vmem:[#allocation5 + $0x188] ss:$16 sps:$4 sm:$0xff]  }
 0x25d   :  { %3213 = vmatprep.subr.bf16.mxu0 %v10258_v53  ;;  %3500 = vmatprep.subr.bf16.mxu1 %v10261_v55  ;;  %v10390_v53 = vld [vmem:[#allocation5 + $0x1ac] ss:$16 sps:$4 sm:$0xff]   ;;  %v10301_v55 = vld [vmem:[#allocation5 + $0x1a0] ss:$16 sps:$4 sm:$0xff]  }
 0x260   :  { %3214 = vmatpush1.bf16.msra.mxu0 %v10256_v56  ;;  %3501 = vmatpush1.bf16.msra.mxu1 %v10259_v57  ;;  %v3519_v56 = vcombine.high %v11753_v50, %v11753_v50  ;;  %v10306_v57 = vld [vmem:[#allocation5 + $0x1c4] ss:$16 sps:$4 sm:$0xff]  }
 0x261   :  { %5105 = vmatprep.subr.bf16.mxu0 %v10264_v32  ;;  %5269 = vmatprep.subr.bf16.mxu1 %v10312_v59  ;;  %v10388_v32 = vld [vmem:[#allocation5 + $0x1a8] ss:$16 sps:$4 sm:$0xff]   ;;  %v10304_v59 = vld [vmem:[#allocation5 + $0x1c0] ss:$16 sps:$4 sm:$0xff]  }
 0x263   :  { %3216 = vmatmul.mubr.bf16.vlgmr.msra.gmra.mrb[0].mxu0 %v247_v60  ;;  %3503 = vmatmul.mubr.bf16.vlgmr.msra.gmra.mrb[0].mxu1 %v247_v60  ;;  %v11766_v60 = vrot.slane %v3519_v56, %v11686_v49  ;;  %v10473_v56 = vld [vmem:[#allocation5 + $0x368] ss:$16 sps:$4 sm:$0xff]  }
 0x264   :  { %5106 = vmatpush1.bf16.msra.mxu0 %v10262_v61  ;;  %5137 = vmatprep.mubr.bf16.mxu0 %v3562_v63  ;;  %v10309_v61 = vld [vmem:[#allocation5 + $0x1e4] ss:$16 sps:$4 sm:$0xff]  }
 0x265   :  { %5107 = vmatprep.subr.bf16.mxu0 %v10267_v40  ;;  %5270 = vmatpush1.bf16.msra.mxu1 %v10310_v62  ;;  %v10394_v40 = vld [vmem:[#allocation5 + $0x1c8] ss:$16 sps:$4 sm:$0xff]   ;;  %v10402_v62 = vld [vmem:[#allocation5 + $0x1ec] ss:$16 sps:$4 sm:$0xff]   ;;  %v3535_v50 = vcombine.high %v11766_v60, %v11766_v60 }
 0x266   :  { %5271 = vmatprep.subr.bf16.mxu1 %v10318_v0  ;;  %5301 = vmatprep.mubr.bf16.mxu1 %v3562_v63  ;;  %v10307_v63 = vld [vmem:[#allocation5 + $0x1e0] ss:$16 sps:$4 sm:$0xff]   ;;  %v10315_v0 = vld [vmem:[#allocation5 + $0x204] ss:$16 sps:$4 sm:$0xff]  }
 0x268   :  { %5108 = vmatpush1.bf16.msra.mxu0 %v10265_v1  ;;  %v10400_v1 = vld [vmem:[#allocation5 + $0x1e8] ss:$16 sps:$4 sm:$0xff]  }
 0x269   :  { %5109 = vmatprep.subr.bf16.mxu0 %v10270_v2  ;;  %5272 = vmatpush1.bf16.msra.mxu1 %v10316_v3  ;;  %v10408_v2 = vld [vmem:[#allocation5 + $0x20c] ss:$16 sps:$4 sm:$0xff]   ;;  %v3561_v3 = vpack.c.bf16 %v11757_v54, %v11757_v54 }
 0x26a   :  { %5273 = vmatprep.subr.bf16.mxu1 %v10324_v4  ;;  %v10313_v4 = vld [vmem:[#allocation5 + $0x200] ss:$16 sps:$4 sm:$0xff]   ;;  %v10421_v54 = vld [vmem:[#allocation5 + $0x24c] ss:$16 sps:$4 sm:$0xff]  }
 0x26c   :  { %5110 = vmatpush1.bf16.msra.mxu0 %v10268_v47  ;;  %v3564_v47 = vpack.c.bf16 %v3535_v50, %v3535_v50  ;;  %v10485_v50 = vld [vmem:[#allocation5 + $0x3a8] ss:$16 sps:$4 sm:$0xff]  }
 0x26d   :  { %5111 = vmatprep.subr.bf16.mxu0 %v10273_v5  ;;  %5274 = vmatpush1.bf16.msra.mxu1 %v10322_v6  ;;  %v10321_v5 = vld [vmem:[#allocation5 + $0x224] ss:$16 sps:$4 sm:$0xff]   ;;  %v10406_v6 = vld [vmem:[#allocation5 + $0x208] ss:$16 sps:$4 sm:$0xff]  }
 0x26e   :  { %5275 = vmatprep.subr.bf16.mxu1 %v10330_v7  ;;  %v10415_v7 = vld [vmem:[#allocation5 + $0x22c] ss:$16 sps:$4 sm:$0xff]  }
 0x270   :  { %5112 = vmatpush1.bf16.msra.mxu0 %v10271_v8  ;;  %v10319_v8 = vld [vmem:[#allocation5 + $0x220] ss:$16 sps:$4 sm:$0xff]  }
 0x271   :  { %5113 = vmatprep.subr.bf16.mxu0 %v10276_v10  ;;  %5276 = vmatpush1.bf16.msra.mxu1 %v10328_v11  ;;  %v10327_v10 = vld [vmem:[#allocation5 + $0x244] ss:$16 sps:$4 sm:$0xff]   ;;  %v10413_v11 = vld [vmem:[#allocation5 + $0x228] ss:$16 sps:$4 sm:$0xff]  }
 0x272   :  { %5277 = vmatprep.subr.bf16.mxu1 %v10336_v12  ;;  %v10325_v12 = vld [vmem:[#allocation5 + $0x240] ss:$16 sps:$4 sm:$0xff]  }
 0x274   :  { %5114 = vmatpush1.bf16.msra.mxu0 %v10274_v13  ;;  %v10333_v13 = vld [vmem:[#allocation5 + $0x264] ss:$16 sps:$4 sm:$0xff]  }
 0x275   :  { %5115 = vmatprep.subr.bf16.mxu0 %v10279_v14  ;;  %5278 = vmatpush1.bf16.msra.mxu1 %v10334_v15  ;;  %v10419_v14 = vld [vmem:[#allocation5 + $0x248] ss:$16 sps:$4 sm:$0xff]   ;;  %v10427_v15 = vld [vmem:[#allocation5 + $0x26c] ss:$16 sps:$4 sm:$0xff]  }
 0x276   :  { %5279 = vmatprep.subr.bf16.mxu1 %v10342_v16  ;;  %v10331_v16 = vld [vmem:[#allocation5 + $0x260] ss:$16 sps:$4 sm:$0xff]  }
 0x278   :  { %5116 = vmatpush1.bf16.msra.mxu0 %v10277_v17  ;;  %v10339_v17 = vld [vmem:[#allocation5 + $0x284] ss:$16 sps:$4 sm:$0xff]  }
 0x279   :  { %5117 = vmatprep.subr.bf16.mxu0 %v10282_v18  ;;  %5280 = vmatpush1.bf16.msra.mxu1 %v10340_v19  ;;  %v10425_v18 = vld [vmem:[#allocation5 + $0x268] ss:$16 sps:$4 sm:$0xff]   ;;  %v10433_v19 = vld [vmem:[#allocation5 + $0x28c] ss:$16 sps:$4 sm:$0xff]  }
 0x27a   :  { %5281 = vmatprep.subr.bf16.mxu1 %v10348_v20  ;;  %v10337_v20 = vld [vmem:[#allocation5 + $0x280] ss:$16 sps:$4 sm:$0xff]  }
 0x27c   :  { %5118 = vmatpush1.bf16.msra.mxu0 %v10280_v21  ;;  %v10345_v21 = vld [vmem:[#allocation5 + $0x2a4] ss:$16 sps:$4 sm:$0xff]  }
 0x27d   :  { %5119 = vmatprep.subr.bf16.mxu0 %v10285_v22  ;;  %5282 = vmatpush1.bf16.msra.mxu1 %v10346_v24  ;;  %v10431_v22 = vld [vmem:[#allocation5 + $0x288] ss:$16 sps:$4 sm:$0xff]   ;;  %v10439_v24 = vld [vmem:[#allocation5 + $0x2ac] ss:$16 sps:$4 sm:$0xff]  }
 0x27e   :  { %5283 = vmatprep.subr.bf16.mxu1 %v10354_v9  ;;  %v10343_v9 = vld [vmem:[#allocation5 + $0x2a0] ss:$16 sps:$4 sm:$0xff]  }
 0x280   :  { %5120 = vmatpush1.bf16.msra.mxu0 %v10283_v27  ;;  %v10351_v27 = vld [vmem:[#allocation5 + $0x2c4] ss:$16 sps:$4 sm:$0xff]  }
 0x281   :  { %5121 = vmatprep.subr.bf16.mxu0 %v10288_v28  ;;  %5284 = vmatpush1.bf16.msra.mxu1 %v10352_v23  ;;  %v10437_v28 = vld [vmem:[#allocation5 + $0x2a8] ss:$16 sps:$4 sm:$0xff]   ;;  %v10445_v23 = vld [vmem:[#allocation5 + $0x2cc] ss:$16 sps:$4 sm:$0xff]  }
 0x282   :  { %5285 = vmatprep.subr.bf16.mxu1 %v10360_v30  ;;  %v10349_v30 = vld [vmem:[#allocation5 + $0x2c0] ss:$16 sps:$4 sm:$0xff]  }
 0x284   :  { %5122 = vmatpush1.bf16.msra.mxu0 %v10286_v31  ;;  %v10357_v31 = vld [vmem:[#allocation5 + $0x2e4] ss:$16 sps:$4 sm:$0xff]  }
 0x285   :  { %5123 = vmatprep.subr.bf16.mxu0 %v10291_v33  ;;  %5286 = vmatpush1.bf16.msra.mxu1 %v10358_v34  ;;  %v10443_v33 = vld [vmem:[#allocation5 + $0x2c8] ss:$16 sps:$4 sm:$0xff]   ;;  %v10451_v34 = vld [vmem:[#allocation5 + $0x2ec] ss:$16 sps:$4 sm:$0xff]  }
 0x286   :  { %5287 = vmatprep.subr.bf16.mxu1 %v10366_v35  ;;  %v10355_v35 = vld [vmem:[#allocation5 + $0x2e0] ss:$16 sps:$4 sm:$0xff]  }
 0x288   :  { %5124 = vmatpush1.bf16.msra.mxu0 %v10289_v36  ;;  %v10363_v36 = vld [vmem:[#allocation5 + $0x304] ss:$16 sps:$4 sm:$0xff]  }
 0x289   :  { %5125 = vmatprep.subr.bf16.mxu0 %v10294_v37  ;;  %5288 = vmatpush1.bf16.msra.mxu1 %v10364_v38  ;;  %v10449_v37 = vld [vmem:[#allocation5 + $0x2e8] ss:$16 sps:$4 sm:$0xff]   ;;  %v10457_v38 = vld [vmem:[#allocation5 + $0x30c] ss:$16 sps:$4 sm:$0xff]  }
 0x28a   :  { %5289 = vmatprep.subr.bf16.mxu1 %v10372_v39  ;;  %v10361_v39 = vld [vmem:[#allocation5 + $0x300] ss:$16 sps:$4 sm:$0xff]  }
 0x28c   :  { %5126 = vmatpush1.bf16.msra.mxu0 %v10292_v26  ;;  %v10369_v26 = vld [vmem:[#allocation5 + $0x324] ss:$16 sps:$4 sm:$0xff]  }
 0x28d   :  { %5127 = vmatprep.subr.bf16.mxu0 %v10297_v41  ;;  %5290 = vmatpush1.bf16.msra.mxu1 %v10370_v42  ;;  %v10455_v41 = vld [vmem:[#allocation5 + $0x308] ss:$16 sps:$4 sm:$0xff]   ;;  %v10463_v42 = vld [vmem:[#allocation5 + $0x32c] ss:$16 sps:$4 sm:$0xff]  }
 0x28e   :  { %5291 = vmatprep.subr.bf16.mxu1 %v10378_v44  ;;  %v10367_v44 = vld [vmem:[#allocation5 + $0x320] ss:$16 sps:$4 sm:$0xff]  }
 0x290   :  { %5128 = vmatpush1.bf16.msra.mxu0 %v10295_v45  ;;  %v10375_v45 = vld [vmem:[#allocation5 + $0x344] ss:$16 sps:$4 sm:$0xff]  }
 0x291   :  { %5129 = vmatprep.subr.bf16.mxu0 %v10300_v29  ;;  %5292 = vmatpush1.bf16.msra.mxu1 %v10376_v46  ;;  %v10461_v29 = vld [vmem:[#allocation5 + $0x328] ss:$16 sps:$4 sm:$0xff]   ;;  %v10469_v46 = vld [vmem:[#allocation5 + $0x34c] ss:$16 sps:$4 sm:$0xff]  }
 0x292   :  { %5293 = vmatprep.subr.bf16.mxu1 %v10384_v25  ;;  %v10373_v25 = vld [vmem:[#allocation5 + $0x340] ss:$16 sps:$4 sm:$0xff]  }
 0x294   :  { %5130 = vmatpush1.bf16.msra.mxu0 %v10298_v48  ;;  %v10381_v48 = vld [vmem:[#allocation5 + $0x364] ss:$16 sps:$4 sm:$0xff]  }
 0x295   :  { %5131 = vmatprep.subr.bf16.mxu0 %v10303_v51  ;;  %5294 = vmatpush1.bf16.msra.mxu1 %v10382_v52  ;;  %v10467_v51 = vld [vmem:[#allocation5 + $0x348] ss:$16 sps:$4 sm:$0xff]   ;;  %v10475_v52 = vld [vmem:[#allocation5 + $0x36c] ss:$16 sps:$4 sm:$0xff]  }
 0x296   :  { %5295 = vmatprep.subr.bf16.mxu1 %v10390_v53  ;;  %v10379_v53 = vld [vmem:[#allocation5 + $0x360] ss:$16 sps:$4 sm:$0xff]  }
 0x298   :  { %5132 = vmatpush1.bf16.msra.mxu0 %v10301_v55  ;;  %v10387_v55 = vld [vmem:[#allocation5 + $0x384] ss:$16 sps:$4 sm:$0xff]  }
 0x299   :  { %5133 = vmatprep.subr.bf16.mxu0 %v10306_v57  ;;  %5296 = vmatpush1.bf16.msra.mxu1 %v10388_v32  ;;  %v10481_v57 = vld [vmem:[#allocation5 + $0x38c] ss:$16 sps:$4 sm:$0xff]   ;;  %v10385_v32 = vld [vmem:[#allocation5 + $0x380] ss:$16 sps:$4 sm:$0xff]  }
 0x29a   :  { %5297 = vmatprep.subr.bf16.mxu1 %v10396_v58  ;;  %v10393_v58 = vld [vmem:[#allocation5 + $0x3a4] ss:$16 sps:$4 sm:$0xff]  }
 0x29c   :  { %5134 = vmatpush1.bf16.msra.mxu0 %v10304_v59  ;;  %v10479_v59 = vld [vmem:[#allocation5 + $0x388] ss:$16 sps:$4 sm:$0xff]  }
 0x29d   :  { %5135 = vmatprep.subr.bf16.mxu0 %v10309_v61  ;;  %5298 = vmatpush1.bf16.msra.mxu1 %v10394_v40  ;;  %v10487_v61 = vld [vmem:[#allocation5 + $0x3ac] ss:$16 sps:$4 sm:$0xff]   ;;  %v10391_v40 = vld [vmem:[#allocation5 + $0x3a0] ss:$16 sps:$4 sm:$0xff]  }
 0x29e   :  { %5299 = vmatprep.subr.bf16.mxu1 %v10402_v62  ;;  %v10399_v62 = vld [vmem:[#allocation5 + $0x3c4] ss:$16 sps:$4 sm:$0xff]  }
 0x2a0   :  { %5136 = vmatpush1.bf16.msra.mxu0 %v10307_v63  ;;  %v11775_v63 = vld [vmem:[%s13516_s1 + $0x8] sm:$0xff]  ;;  %s11494_s1 = smov [#allocation17]  }
 0x2a1   :  { %5146 = vmatprep.subr.bf16.mxu0 %v10315_v0  ;;  %5300 = vmatpush1.bf16.msra.mxu1 %v10400_v1  ;;  %v10493_v0 = vld [vmem:[#allocation5 + $0x3cc] ss:$16 sps:$4 sm:$0xff]   ;;  %v10397_v1 = vld [vmem:[#allocation5 + $0x3c0] ss:$16 sps:$4 sm:$0xff]   ;;  %s8556_s14 = sshll.u32 %s11494_s1, 4  ;;  %s8557_s14 = int_to_ptr.vmem [resolvable:$true] %s8556_s14 }
 0x2a2   :  { %5310 = vmatprep.subr.bf16.mxu1 %v10408_v2  ;;  %v11779_v2 = vrot.slane %v11775_v63, %v11686_v49  ;;  %s11442_s30 = scalar_lea.vmem %s8557_s14, 32  ;;  %p11447_p3 = scmp.lt.s32.totalorder %s8557_s14, %s8557_s14 }
 0x2a3   :  { %5138 = vmatmul.mubr.bf16.vlgmr.msra.gmra.mrb[4].mxu0 %v3561_v3  ;;  %p11443_p2 = scmp.ne.s32.totalorder %s8557_s14, %s11442_s30  ;;  %p11448_p4 = scmp.lt.s32.totalorder %s11442_s30, %s11442_s30 }
 0x2a4   :  { %5147 = vmatpush1.bf16.msra.mxu0 %v10313_v4  ;;  %5178 = vmatprep.mubr.bf16.mxu0 %v3564_v47  ;;  %v10491_v4 = vld [vmem:[#allocation5 + $0x3c8] ss:$16 sps:$4 sm:$0xff]  }
 0x2a5   :  { %5148 = vmatprep.subr.bf16.mxu0 %v10321_v5  ;;  %5302 = vmatmul.mubr.bf16.vlgmr.msra.gmra.mrb[4].mxu1 %v3561_v3  ;;  %v10405_v3 = vld [vmem:[#allocation5 + $0x3e4] ss:$16 sps:$4 sm:$0xff]   ;;  %v10403_v5 = vld [vmem:[#allocation5 + $0x3e0] ss:$16 sps:$4 sm:$0xff]   ;;  %p11449_p5 = por %p11448_p4, %p11447_p3 }
 0x2a6   :  { %5311 = vmatpush1.bf16.msra.mxu1 %v10406_v6  ;;  %5342 = vmatprep.mubr.bf16.mxu1 %v3564_v47  ;;  %v10499_v47 = vld [vmem:[#allocation5 + $0x3ec] ss:$16 sps:$4 sm:$0xff]   ;;  %v3551_v6 = vcombine.high %v11779_v2, %v11779_v2 }
 0x2a7   :  { %5312 = vmatprep.subr.bf16.mxu1 %v10415_v7  ;;  %v10412_v7 = vld [vmem:[#allocation5 + $0x404] ss:$16 sps:$4 sm:$0xff]   ;;  %p11450_p6 = pnand %p11449_p5, %p11443_p2 }
 0x2a8   :  { %5149 = vmatpush1.bf16.msra.mxu0 %v10319_v8  ;;  %v10497_v8 = vld [vmem:[#allocation5 + $0x3e8] ss:$16 sps:$4 sm:$0xff]  }
 0x2a9   :  { %5150 = vmatprep.subr.bf16.mxu0 %v10327_v10  ;;  %v3563_v10 = vpack.c.bf16 %v11766_v60, %v11766_v60  ;;  %v10509_v60 = vld [vmem:[#allocation5 + $0x428] ss:$16 sps:$4 sm:$0xff]  }
 0x2aa   :  { %5313 = vmatpush1.bf16.msra.mxu1 %v10413_v11  ;;  %v10505_v11 = vld [vmem:[#allocation5 + $0x40c] ss:$16 sps:$4 sm:$0xff]  }
 0x2ab   :  { %5314 = vmatprep.subr.bf16.mxu1 %v10421_v54  ;;  %v10410_v54 = vld [vmem:[#allocation5 + $0x400] ss:$16 sps:$4 sm:$0xff]  }
 0x2ac   :  { %5151 = vmatpush1.bf16.msra.mxu0 %v10325_v12  ;;  %v3566_v12 = vpack.c.bf16 %v3551_v6, %v3551_v6  ;;  %v10496_v6 = vld [vmem:[#allocation5 + $0x5c4] ss:$16 sps:$4 sm:$0xff]  }
 0x2ad   :  { %5152 = vmatprep.subr.bf16.mxu0 %v10333_v13  ;;  %v10418_v13 = vld [vmem:[#allocation5 + $0x424] ss:$16 sps:$4 sm:$0xff]  }
 0x2ae   :  { %5315 = vmatpush1.bf16.msra.mxu1 %v10419_v14  ;;  %v10503_v14 = vld [vmem:[#allocation5 + $0x408] ss:$16 sps:$4 sm:$0xff]  }
 0x2af   :  { %5316 = vmatprep.subr.bf16.mxu1 %v10427_v15  ;;  %v10511_v15 = vld [vmem:[#allocation5 + $0x42c] ss:$16 sps:$4 sm:$0xff]  }
 0x2b0   :  { %5153 = vmatpush1.bf16.msra.mxu0 %v10331_v16  ;;  %v10416_v16 = vld [vmem:[#allocation5 + $0x420] ss:$16 sps:$4 sm:$0xff]  }
 0x2b1   :  { %5154 = vmatprep.subr.bf16.mxu0 %v10339_v17  ;;  %v10424_v17 = vld [vmem:[#allocation5 + $0x444] ss:$16 sps:$4 sm:$0xff]  }
 0x2b2   :  { %5317 = vmatpush1.bf16.msra.mxu1 %v10425_v18  ;;  %v10517_v18 = vld [vmem:[#allocation5 + $0x44c] ss:$16 sps:$4 sm:$0xff]  }
 0x2b3   :  { %5318 = vmatprep.subr.bf16.mxu1 %v10433_v19  ;;  %v10422_v19 = vld [vmem:[#allocation5 + $0x440] ss:$16 sps:$4 sm:$0xff]  }
 0x2b4   :  { %5155 = vmatpush1.bf16.msra.mxu0 %v10337_v20  ;;  %v10430_v20 = vld [vmem:[#allocation5 + $0x464] ss:$16 sps:$4 sm:$0xff]  }
 0x2b5   :  { %5156 = vmatprep.subr.bf16.mxu0 %v10345_v21  ;;  %v10515_v21 = vld [vmem:[#allocation5 + $0x448] ss:$16 sps:$4 sm:$0xff]  }
 0x2b6   :  { %5319 = vmatpush1.bf16.msra.mxu1 %v10431_v22  ;;  %v10523_v22 = vld [vmem:[#allocation5 + $0x46c] ss:$16 sps:$4 sm:$0xff]  }
 0x2b7   :  { %5320 = vmatprep.subr.bf16.mxu1 %v10439_v24  ;;  %v10428_v24 = vld [vmem:[#allocation5 + $0x460] ss:$16 sps:$4 sm:$0xff]  }
 0x2b8   :  { %5157 = vmatpush1.bf16.msra.mxu0 %v10343_v9  ;;  %v10436_v9 = vld [vmem:[#allocation5 + $0x484] ss:$16 sps:$4 sm:$0xff]  }
 0x2b9   :  { %5158 = vmatprep.subr.bf16.mxu0 %v10351_v27  ;;  %v10521_v27 = vld [vmem:[#allocation5 + $0x468] ss:$16 sps:$4 sm:$0xff]  }
 0x2ba   :  { %5321 = vmatpush1.bf16.msra.mxu1 %v10437_v28  ;;  %v10529_v28 = vld [vmem:[#allocation5 + $0x48c] ss:$16 sps:$4 sm:$0xff]  }
 0x2bb   :  { %5322 = vmatprep.subr.bf16.mxu1 %v10445_v23  ;;  %v10434_v23 = vld [vmem:[#allocation5 + $0x480] ss:$16 sps:$4 sm:$0xff]  }
 0x2bc   :  { %5159 = vmatpush1.bf16.msra.mxu0 %v10349_v30  ;;  %v10442_v30 = vld [vmem:[#allocation5 + $0x4a4] ss:$16 sps:$4 sm:$0xff]  }
 0x2bd   :  { %5160 = vmatprep.subr.bf16.mxu0 %v10357_v31  ;;  %v10527_v31 = vld [vmem:[#allocation5 + $0x488] ss:$16 sps:$4 sm:$0xff]  }
 0x2be   :  { %5323 = vmatpush1.bf16.msra.mxu1 %v10443_v33  ;;  %v10535_v33 = vld [vmem:[#allocation5 + $0x4ac] ss:$16 sps:$4 sm:$0xff]  }
 0x2bf   :  { %5324 = vmatprep.subr.bf16.mxu1 %v10451_v34  ;;  %v10440_v34 = vld [vmem:[#allocation5 + $0x4a0] ss:$16 sps:$4 sm:$0xff]  }
 0x2c0   :  { %5161 = vmatpush1.bf16.msra.mxu0 %v10355_v35  ;;  %v10448_v35 = vld [vmem:[#allocation5 + $0x4c4] ss:$16 sps:$4 sm:$0xff]  }
 0x2c1   :  { %5162 = vmatprep.subr.bf16.mxu0 %v10363_v36  ;;  %v10533_v36 = vld [vmem:[#allocation5 + $0x4a8] ss:$16 sps:$4 sm:$0xff]  }
 0x2c2   :  { %5325 = vmatpush1.bf16.msra.mxu1 %v10449_v37  ;;  %v10541_v37 = vld [vmem:[#allocation5 + $0x4cc] ss:$16 sps:$4 sm:$0xff]  }
 0x2c3   :  { %5326 = vmatprep.subr.bf16.mxu1 %v10457_v38  ;;  %v10446_v38 = vld [vmem:[#allocation5 + $0x4c0] ss:$16 sps:$4 sm:$0xff]  }
 0x2c4   :  { %5163 = vmatpush1.bf16.msra.mxu0 %v10361_v39  ;;  %v10454_v39 = vld [vmem:[#allocation5 + $0x4e4] ss:$16 sps:$4 sm:$0xff]  }
 0x2c5   :  { %5164 = vmatprep.subr.bf16.mxu0 %v10369_v26  ;;  %v10539_v26 = vld [vmem:[#allocation5 + $0x4c8] ss:$16 sps:$4 sm:$0xff]  }
 0x2c6   :  { %5327 = vmatpush1.bf16.msra.mxu1 %v10455_v41  ;;  %v10547_v41 = vld [vmem:[#allocation5 + $0x4ec] ss:$16 sps:$4 sm:$0xff]  }
 0x2c7   :  { %5328 = vmatprep.subr.bf16.mxu1 %v10463_v42  ;;  %v10452_v42 = vld [vmem:[#allocation5 + $0x4e0] ss:$16 sps:$4 sm:$0xff]  }
 0x2c8   :  { %5165 = vmatpush1.bf16.msra.mxu0 %v10367_v44  ;;  %v10460_v44 = vld [vmem:[#allocation5 + $0x504] ss:$16 sps:$4 sm:$0xff]  }
 0x2c9   :  { %5166 = vmatprep.subr.bf16.mxu0 %v10375_v45  ;;  %v10545_v45 = vld [vmem:[#allocation5 + $0x4e8] ss:$16 sps:$4 sm:$0xff]  }
 0x2ca   :  { %5329 = vmatpush1.bf16.msra.mxu1 %v10461_v29  ;;  %v10553_v29 = vld [vmem:[#allocation5 + $0x50c] ss:$16 sps:$4 sm:$0xff]  }
 0x2cb   :  { %5330 = vmatprep.subr.bf16.mxu1 %v10469_v46  ;;  %v10458_v46 = vld [vmem:[#allocation5 + $0x500] ss:$16 sps:$4 sm:$0xff]  }
 0x2cc   :  { %5167 = vmatpush1.bf16.msra.mxu0 %v10373_v25  ;;  %v10466_v25 = vld [vmem:[#allocation5 + $0x524] ss:$16 sps:$4 sm:$0xff]  }
 0x2cd   :  { %5168 = vmatprep.subr.bf16.mxu0 %v10381_v48  ;;  %v10551_v48 = vld [vmem:[#allocation5 + $0x508] ss:$16 sps:$4 sm:$0xff]  }
 0x2ce   :  { %5331 = vmatpush1.bf16.msra.mxu1 %v10467_v51  ;;  %v10559_v51 = vld [vmem:[#allocation5 + $0x52c] ss:$16 sps:$4 sm:$0xff]  }
 0x2cf   :  { %5332 = vmatprep.subr.bf16.mxu1 %v10475_v52  ;;  %v10464_v52 = vld [vmem:[#allocation5 + $0x520] ss:$16 sps:$4 sm:$0xff]  }
 0x2d0   :  { %5169 = vmatpush1.bf16.msra.mxu0 %v10379_v53  ;;  %v10472_v53 = vld [vmem:[#allocation5 + $0x544] ss:$16 sps:$4 sm:$0xff]  }
 0x2d1   :  { %5170 = vmatprep.subr.bf16.mxu0 %v10387_v55  ;;  %v10557_v55 = vld [vmem:[#allocation5 + $0x528] ss:$16 sps:$4 sm:$0xff]  }
 0x2d2   :  { %5333 = vmatpush1.bf16.msra.mxu1 %v10473_v56  ;;  %v10565_v56 = vld [vmem:[#allocation5 + $0x54c] ss:$16 sps:$4 sm:$0xff]  }
 0x2d3   :  { %5334 = vmatprep.subr.bf16.mxu1 %v10481_v57  ;;  %v10470_v57 = vld [vmem:[#allocation5 + $0x540] ss:$16 sps:$4 sm:$0xff]  }
 0x2d4   :  { %5171 = vmatpush1.bf16.msra.mxu0 %v10385_v32  ;;  %v10478_v32 = vld [vmem:[#allocation5 + $0x564] ss:$16 sps:$4 sm:$0xff]  }
 0x2d5   :  { %5172 = vmatprep.subr.bf16.mxu0 %v10393_v58  ;;  %v10563_v58 = vld [vmem:[#allocation5 + $0x548] ss:$16 sps:$4 sm:$0xff]  }
 0x2d6   :  { %5335 = vmatpush1.bf16.msra.mxu1 %v10479_v59  ;;  %v10571_v59 = vld [vmem:[#allocation5 + $0x56c] ss:$16 sps:$4 sm:$0xff]  }
 0x2d7   :  { %5336 = vmatprep.subr.bf16.mxu1 %v10487_v61  ;;  %v10476_v61 = vld [vmem:[#allocation5 + $0x560] ss:$16 sps:$4 sm:$0xff]  }
 0x2d8   :  { %5173 = vmatpush1.bf16.msra.mxu0 %v10391_v40  ;;  %v10484_v40 = vld [vmem:[#allocation5 + $0x584] ss:$16 sps:$4 sm:$0xff]  }
 0x2d9   :  { %5174 = vmatprep.subr.bf16.mxu0 %v10399_v62  ;;  %v10569_v62 = vld [vmem:[#allocation5 + $0x568] ss:$16 sps:$4 sm:$0xff]  }
 0x2da   :  { %5337 = vmatpush1.bf16.msra.mxu1 %v10485_v50  ;;  %v10577_v50 = vld [vmem:[#allocation5 + $0x58c] ss:$16 sps:$4 sm:$0xff]  }
 0x2db   :  { %5338 = vmatprep.subr.bf16.mxu1 %v10493_v0  ;;  %v10482_v0 = vld [vmem:[#allocation5 + $0x580] ss:$16 sps:$4 sm:$0xff]  }
 0x2dc   :  { %5175 = vmatpush1.bf16.msra.mxu0 %v10397_v1  ;;  %v10490_v1 = vld [vmem:[#allocation5 + $0x5a4] ss:$16 sps:$4 sm:$0xff]  }
 0x2dd   :  { %5176 = vmatprep.subr.bf16.mxu0 %v10405_v3  ;;  %v10575_v3 = vld [vmem:[#allocation5 + $0x588] ss:$16 sps:$4 sm:$0xff]  }
 0x2de   :  { %5339 = vmatpush1.bf16.msra.mxu1 %v10491_v4  ;;  %v10583_v4 = vld [vmem:[#allocation5 + $0x5ac] ss:$16 sps:$4 sm:$0xff]  }
 0x2df   :  { %5340 = vmatprep.subr.bf16.mxu1 %v10499_v47  ;;  %v10488_v47 = vld [vmem:[#allocation5 + $0x5a0] ss:$16 sps:$4 sm:$0xff]  }
 0x2e0   :  { %5177 = vmatpush1.bf16.msra.mxu0 %v10403_v5  ;;  %v3536_v5 = vcombine.high %v11775_v63, %v11775_v63 }
 0x2e1   :  { %5187 = vmatprep.subr.bf16.mxu0 %v10412_v7  ;;  %v10581_v7 = vld [vmem:[#allocation5 + $0x5a8] ss:$16 sps:$4 sm:$0xff]  }
 0x2e2   :  { %5341 = vmatpush1.bf16.msra.mxu1 %v10497_v8  ;;  %v10589_v8 = vld [vmem:[#allocation5 + $0x5cc] ss:$16 sps:$4 sm:$0xff]  }
 0x2e3   :  { %5179 = vmatmul.mubr.bf16.vlgmr.msra.gmra.mrb[4].mxu0 %v3563_v10  ;;  %5351 = vmatprep.subr.bf16.mxu1 %v10505_v11  ;;  %v11788_v11 = vrot.slane %v3536_v5, %v11686_v49  ;;  %v10602_v49 = vld [vmem:[#allocation5 + $0x60c] ss:$16 sps:$4 sm:$0xff]  }
 0x2e4   :  { %5188 = vmatpush1.bf16.msra.mxu0 %v10410_v54  ;;  %5219 = vmatprep.mubr.bf16.mxu0 %v3566_v12  ;;  %v10502_v54 = vld [vmem:[#allocation5 + $0x5e4] ss:$16 sps:$4 sm:$0xff]   ;;  %v10662_v5 = vld [vmem:[#allocation5 + $0x74c] ss:$16 sps:$4 sm:$0xff]  }
 0x2e5   :  { %5189 = vmatprep.subr.bf16.mxu0 %v10418_v13  ;;  %5343 = vmatmul.mubr.bf16.vlgmr.msra.gmra.mrb[4].mxu1 %v3563_v10  ;;  %v10494_v10 = vld [vmem:[#allocation5 + $0x5c0] ss:$16 sps:$4 sm:$0xff]   ;;  %v10595_v13 = vld [vmem:[#allocation5 + $0x5ec] ss:$16 sps:$4 sm:$0xff]   ;;  %v3552_v63 = vcombine.high %v11788_v11, %v11788_v11 }
 0x2e6   :  { %5352 = vmatpush1.bf16.msra.mxu1 %v10503_v14  ;;  %5383 = vmatprep.mubr.bf16.mxu1 %v3566_v12  ;;  %v10587_v12 = vld [vmem:[#allocation5 + $0x5c8] ss:$16 sps:$4 sm:$0xff]   ;;  %v10500_v14 = vld [vmem:[#allocation5 + $0x5e0] ss:$16 sps:$4 sm:$0xff]  }
 0x2e7   :  { %5353 = vmatprep.subr.bf16.mxu1 %v10511_v15  ;;  %v10508_v15 = vld [vmem:[#allocation5 + $0x604] ss:$16 sps:$4 sm:$0xff]  }
 0x2e8   :  { %5190 = vmatpush1.bf16.msra.mxu0 %v10416_v16  ;;  %v10593_v16 = vld [vmem:[#allocation5 + $0x5e8] ss:$16 sps:$4 sm:$0xff]  }
 0x2e9   :  { %5191 = vmatprep.subr.bf16.mxu0 %v10424_v17  ;;  %v3565_v17 = vpack.c.bf16 %v11779_v2, %v11779_v2  ;;  %v10606_v2 = vld [vmem:[#allocation5 + $0x628] ss:$16 sps:$4 sm:$0xff]  }
 0x2ea   :  { %5354 = vmatpush1.bf16.msra.mxu1 %v10509_v60  ;;  %v10506_v60 = vld [vmem:[#allocation5 + $0x600] ss:$16 sps:$4 sm:$0xff]  }
 0x2eb   :  { %5355 = vmatprep.subr.bf16.mxu1 %v10517_v18  ;;  %v3568_v18 = vpack.c.bf16 %v3552_v63, %v3552_v63  ;;  %v10578_v63 = vld [vmem:[#allocation5 + $0x780] ss:$16 sps:$4 sm:$0xff]  }
 0x2ec   :  { %5192 = vmatpush1.bf16.msra.mxu0 %v10422_v19  ;;  %v10514_v19 = vld [vmem:[#allocation5 + $0x624] ss:$16 sps:$4 sm:$0xff]  }
 0x2ed   :  { %5193 = vmatprep.subr.bf16.mxu0 %v10430_v20  ;;  %v10600_v20 = vld [vmem:[#allocation5 + $0x608] ss:$16 sps:$4 sm:$0xff]  }
 0x2ee   :  { %5356 = vmatpush1.bf16.msra.mxu1 %v10515_v21  ;;  %v10608_v21 = vld [vmem:[#allocation5 + $0x62c] ss:$16 sps:$4 sm:$0xff]  }
 0x2ef   :  { %5357 = vmatprep.subr.bf16.mxu1 %v10523_v22  ;;  %v10512_v22 = vld [vmem:[#allocation5 + $0x620] ss:$16 sps:$4 sm:$0xff]  }
 0x2f0   :  { %5194 = vmatpush1.bf16.msra.mxu0 %v10428_v24  ;;  %v10520_v24 = vld [vmem:[#allocation5 + $0x644] ss:$16 sps:$4 sm:$0xff]  }
 0x2f1   :  { %5195 = vmatprep.subr.bf16.mxu0 %v10436_v9  ;;  %v10614_v9 = vld [vmem:[#allocation5 + $0x64c] ss:$16 sps:$4 sm:$0xff]  }
 0x2f2   :  { %5358 = vmatpush1.bf16.msra.mxu1 %v10521_v27  ;;  %v10518_v27 = vld [vmem:[#allocation5 + $0x640] ss:$16 sps:$4 sm:$0xff]  }
 0x2f3   :  { %5359 = vmatprep.subr.bf16.mxu1 %v10529_v28  ;;  %v10526_v28 = vld [vmem:[#allocation5 + $0x664] ss:$16 sps:$4 sm:$0xff]  }
 0x2f4   :  { %5196 = vmatpush1.bf16.msra.mxu0 %v10434_v23  ;;  %v10612_v23 = vld [vmem:[#allocation5 + $0x648] ss:$16 sps:$4 sm:$0xff]  }
 0x2f5   :  { %5197 = vmatprep.subr.bf16.mxu0 %v10442_v30  ;;  %v10620_v30 = vld [vmem:[#allocation5 + $0x66c] ss:$16 sps:$4 sm:$0xff]  }
 0x2f6   :  { %5360 = vmatpush1.bf16.msra.mxu1 %v10527_v31  ;;  %v10524_v31 = vld [vmem:[#allocation5 + $0x660] ss:$16 sps:$4 sm:$0xff]  }
 0x2f7   :  { %5361 = vmatprep.subr.bf16.mxu1 %v10535_v33  ;;  %v10532_v33 = vld [vmem:[#allocation5 + $0x684] ss:$16 sps:$4 sm:$0xff]  }
 0x2f8   :  { %5198 = vmatpush1.bf16.msra.mxu0 %v10440_v34  ;;  %v10618_v34 = vld [vmem:[#allocation5 + $0x668] ss:$16 sps:$4 sm:$0xff]  }
 0x2f9   :  { %5199 = vmatprep.subr.bf16.mxu0 %v10448_v35  ;;  %v10626_v35 = vld [vmem:[#allocation5 + $0x68c] ss:$16 sps:$4 sm:$0xff]  }
 0x2fa   :  { %5362 = vmatpush1.bf16.msra.mxu1 %v10533_v36  ;;  %v10530_v36 = vld [vmem:[#allocation5 + $0x680] ss:$16 sps:$4 sm:$0xff]  }
 0x2fb   :  { %5363 = vmatprep.subr.bf16.mxu1 %v10541_v37  ;;  %v10538_v37 = vld [vmem:[#allocation5 + $0x6a4] ss:$16 sps:$4 sm:$0xff]  }
 0x2fc   :  { %5200 = vmatpush1.bf16.msra.mxu0 %v10446_v38  ;;  %v10624_v38 = vld [vmem:[#allocation5 + $0x688] ss:$16 sps:$4 sm:$0xff]  }
 0x2fd   :  { %5201 = vmatprep.subr.bf16.mxu0 %v10454_v39  ;;  %v10632_v39 = vld [vmem:[#allocation5 + $0x6ac] ss:$16 sps:$4 sm:$0xff]  }
 0x2fe   :  { %5364 = vmatpush1.bf16.msra.mxu1 %v10539_v26  ;;  %v10536_v26 = vld [vmem:[#allocation5 + $0x6a0] ss:$16 sps:$4 sm:$0xff]  }
 0x2ff   :  { %5365 = vmatprep.subr.bf16.mxu1 %v10547_v41  ;;  %v10544_v41 = vld [vmem:[#allocation5 + $0x6c4] ss:$16 sps:$4 sm:$0xff]  }
 0x300   :  { %5202 = vmatpush1.bf16.msra.mxu0 %v10452_v42 }
 0x301   :  { %5203 = vmatprep.subr.bf16.mxu0 %v10460_v44 }
 0x302   :  { %5366 = vmatpush1.bf16.msra.mxu1 %v10545_v45  ;;  %v10630_v45 = vld [vmem:[#allocation5 + $0x6a8] ss:$16 sps:$4 sm:$0xff]  }
 0x303   :  { %5367 = vmatprep.subr.bf16.mxu1 %v10553_v29 }
 0x304   :  { %5204 = vmatpush1.bf16.msra.mxu0 %v10458_v46 }
 0x305   :  { %5205 = vmatprep.subr.bf16.mxu0 %v10466_v25  ;;  %v10638_v25 = vld [vmem:[#allocation5 + $0x6cc] ss:$16 sps:$4 sm:$0xff]  }
 0x306   :  { %5368 = vmatpush1.bf16.msra.mxu1 %v10551_v48 }
 0x307   :  { %5369 = vmatprep.subr.bf16.mxu1 %v10559_v51 }
 0x308   :  { %5206 = vmatpush1.bf16.msra.mxu0 %v10464_v52  ;;  %v10542_v52 = vld [vmem:[#allocation5 + $0x6c0] ss:$16 sps:$4 sm:$0xff]  }
 0x309   :  { %5207 = vmatprep.subr.bf16.mxu0 %v10472_v53 }
 0x30a   :  { %5370 = vmatpush1.bf16.msra.mxu1 %v10557_v55 }
 0x30b   :  { %5371 = vmatprep.subr.bf16.mxu1 %v10565_v56  ;;  %v10550_v56 = vld [vmem:[#allocation5 + $0x6e4] ss:$16 sps:$4 sm:$0xff]  }
 0x30c   :  { %5208 = vmatpush1.bf16.msra.mxu0 %v10470_v57  ;;  %v10636_v57 = vld [vmem:[#allocation5 + $0x6c8] ss:$16 sps:$4 sm:$0xff]  }
 0x30d   :  { %5209 = vmatprep.subr.bf16.mxu0 %v10478_v32  ;;  %v10644_v32 = vld [vmem:[#allocation5 + $0x6ec] ss:$16 sps:$4 sm:$0xff]  }
 0x30e   :  { %5372 = vmatpush1.bf16.msra.mxu1 %v10563_v58  ;;  %v10548_v58 = vld [vmem:[#allocation5 + $0x6e0] ss:$16 sps:$4 sm:$0xff]  }
 0x30f   :  { %5373 = vmatprep.subr.bf16.mxu1 %v10571_v59  ;;  %v10556_v59 = vld [vmem:[#allocation5 + $0x704] ss:$16 sps:$4 sm:$0xff]  }
 0x310   :  { %5210 = vmatpush1.bf16.msra.mxu0 %v10476_v61  ;;  %v10642_v61 = vld [vmem:[#allocation5 + $0x6e8] ss:$16 sps:$4 sm:$0xff]  }
 0x311   :  { %5211 = vmatprep.subr.bf16.mxu0 %v10484_v40  ;;  %v10650_v40 = vld [vmem:[#allocation5 + $0x70c] ss:$16 sps:$4 sm:$0xff]  }
 0x312   :  { %5374 = vmatpush1.bf16.msra.mxu1 %v10569_v62  ;;  %v10554_v62 = vld [vmem:[#allocation5 + $0x700] ss:$16 sps:$4 sm:$0xff]  }
 0x313   :  { %5375 = vmatprep.subr.bf16.mxu1 %v10577_v50  ;;  %v10562_v50 = vld [vmem:[#allocation5 + $0x724] ss:$16 sps:$4 sm:$0xff]  }
 0x314   :  { %5212 = vmatpush1.bf16.msra.mxu0 %v10482_v0  ;;  %v10648_v0 = vld [vmem:[#allocation5 + $0x708] ss:$16 sps:$4 sm:$0xff]  }
 0x315   :  { %5213 = vmatprep.subr.bf16.mxu0 %v10490_v1  ;;  %v10656_v1 = vld [vmem:[#allocation5 + $0x72c] ss:$16 sps:$4 sm:$0xff]  }
 0x316   :  { %5376 = vmatpush1.bf16.msra.mxu1 %v10575_v3  ;;  %v10560_v3 = vld [vmem:[#allocation5 + $0x720] ss:$16 sps:$4 sm:$0xff]  }
 0x317   :  { %5377 = vmatprep.subr.bf16.mxu1 %v10583_v4  ;;  %v10568_v4 = vld [vmem:[#allocation5 + $0x744] ss:$16 sps:$4 sm:$0xff]  }
 0x318   :  { %5214 = vmatpush1.bf16.msra.mxu0 %v10488_v47  ;;  %v10654_v47 = vld [vmem:[#allocation5 + $0x728] ss:$16 sps:$4 sm:$0xff]  }
 0x319   :  { %5215 = vmatprep.subr.bf16.mxu0 %v10496_v6  ;;  %v10566_v6 = vld [vmem:[#allocation5 + $0x740] ss:$16 sps:$4 sm:$0xff]  }
 0x31a   :  { %5378 = vmatpush1.bf16.msra.mxu1 %v10581_v7  ;;  %v10574_v7 = vld [vmem:[#allocation5 + $0x764] ss:$16 sps:$4 sm:$0xff]  }
 0x31b   :  { %5379 = vmatprep.subr.bf16.mxu1 %v10589_v8  ;;  %v10660_v8 = vld [vmem:[#allocation5 + $0x748] ss:$16 sps:$4 sm:$0xff]  }
 0x31c   :  { %5216 = vmatpush1.bf16.msra.mxu0 %v10494_v10  ;;  %v10668_v10 = vld [vmem:[#allocation5 + $0x76c] ss:$16 sps:$4 sm:$0xff]  }
 0x31d   :  { %5217 = vmatprep.subr.bf16.mxu0 %v10502_v54  ;;  %v10572_v54 = vld [vmem:[#allocation5 + $0x760] ss:$16 sps:$4 sm:$0xff]  }
 0x31e   :  { %5380 = vmatpush1.bf16.msra.mxu1 %v10587_v12  ;;  %v10580_v12 = vld [vmem:[#allocation5 + $0x784] ss:$16 sps:$4 sm:$0xff]  }
 0x31f   :  { %5381 = vmatprep.subr.bf16.mxu1 %v10595_v13  ;;  %v10666_v13 = vld [vmem:[#allocation5 + $0x768] ss:$16 sps:$4 sm:$0xff]  }
 0x320   :  { %5218 = vmatpush1.bf16.msra.mxu0 %v10500_v14  ;;  %v10674_v14 = vld [vmem:[#allocation5 + $0x78c] ss:$16 sps:$4 sm:$0xff]  }
 0x321   :  { %5228 = vmatprep.subr.bf16.mxu0 %v10508_v15  ;;  %v10586_v15 = vld [vmem:[#allocation5 + $0x7a4] ss:$16 sps:$4 sm:$0xff]  }
 0x322   :  { %5382 = vmatpush1.bf16.msra.mxu1 %v10593_v16  ;;  %v10672_v16 = vld [vmem:[#allocation5 + $0x788] ss:$16 sps:$4 sm:$0xff]  }
 0x323   :  { %5220 = vmatmul.mubr.bf16.vlgmr.msra.gmra.mrb[4].mxu0 %v3565_v17  ;;  %5392 = vmatprep.subr.bf16.mxu1 %v10602_v49  ;;  %v10584_v49 = vld [vmem:[#allocation5 + $0x7a0] ss:$16 sps:$4 sm:$0xff]  }
 0x324   :  { %5229 = vmatpush1.bf16.msra.mxu0 %v10506_v60  ;;  %5260 = vmatprep.mubr.bf16.mxu0 %v3568_v18  ;;  %v10592_v60 = vld [vmem:[#allocation5 + $0x7c4] ss:$16 sps:$4 sm:$0xff]  }
 0x325   :  { %5230 = vmatprep.subr.bf16.mxu0 %v10514_v19  ;;  %5384 = vmatmul.mubr.bf16.vlgmr.msra.gmra.mrb[4].mxu1 %v3565_v17  ;;  %v10680_v17 = vld [vmem:[#allocation5 + $0x7ac] ss:$16 sps:$4 sm:$0xff]  }
 0x326   :  { %5393 = vmatpush1.bf16.msra.mxu1 %v10600_v20  ;;  %5424 = vmatprep.mubr.bf16.mxu1 %v3568_v18  ;;  %v10678_v18 = vld [vmem:[#allocation5 + $0x7a8] ss:$16 sps:$4 sm:$0xff]   ;;  %v10686_v19 = vld [vmem:[#allocation5 + $0x7cc] ss:$16 sps:$4 sm:$0xff]   ;;  %v10590_v20 = vld [vmem:[#allocation5 + $0x7c0] ss:$16 sps:$4 sm:$0xff]  }
 0x327   :  { %5394 = vmatprep.subr.bf16.mxu1 %v10608_v21  ;;  %v10598_v21 = vld [vmem:[#allocation5 + $0x7e4] ss:$16 sps:$4 sm:$0xff]  }
 0x328   :  { %5231 = vmatpush1.bf16.msra.mxu0 %v10512_v22  ;;  %v10684_v22 = vld [vmem:[#allocation5 + $0x7c8] ss:$16 sps:$4 sm:$0xff]  }
 0x329   :  { %5232 = vmatprep.subr.bf16.mxu0 %v10520_v24  ;;  %v10692_v24 = vld [vmem:[#allocation5 + $0x7ec] ss:$16 sps:$4 sm:$0xff]  }
 0x32a   :  { %5395 = vmatpush1.bf16.msra.mxu1 %v10606_v2  ;;  %v10596_v2 = vld [vmem:[#allocation5 + $0x7e0] ss:$16 sps:$4 sm:$0xff]  }
 0x32b   :  { %5396 = vmatprep.subr.bf16.mxu1 %v10614_v9  ;;  %v10605_v9 = vld [vmem:[#allocation7 + $0x4] ss:$8 sps:$4 sm:$0xff]  }
 0x32c   :  { %5233 = vmatpush1.bf16.msra.mxu0 %v10518_v27 }
 0x32d   :  { %5234 = vmatprep.subr.bf16.mxu0 %v10526_v28  ;;  %v10690_v28 = vld [vmem:[#allocation5 + $0x7e8] ss:$16 sps:$4 sm:$0xff]  }
 0x32e   :  { %5397 = vmatpush1.bf16.msra.mxu1 %v10612_v23  ;;  %v3567_v23 = vpack.c.bf16 %v11788_v11, %v11788_v11  ;;  %v10747_v11 = vld [vmem:[#allocation10 + $0x10] ss:$8 sps:$4 sm:$0xff]  }
 0x32f   :  { %5398 = vmatprep.subr.bf16.mxu1 %v10620_v30  ;;  %v10603_v30 = vld [vmem:[#allocation7] ss:$8 sps:$4 sm:$0xff]  }
 0x330   :  { %5235 = vmatpush1.bf16.msra.mxu0 %v10524_v31  ;;  %v10611_v31 = vld [vmem:[#allocation7 + $0x14] ss:$8 sps:$4 sm:$0xff]  }
 0x331   :  { %5236 = vmatprep.subr.bf16.mxu0 %v10532_v33 }
 0x332   :  { %5399 = vmatpush1.bf16.msra.mxu1 %v10618_v34  ;;  %v10744_v34 = vld [vmem:[#allocation10] ss:$8 sps:$4 sm:$0xff]  }
 0x333   :  { %5400 = vmatprep.subr.bf16.mxu1 %v10626_v35  ;;  %v10746_v35 = vld [vmem:[#allocation10 + $0x4] ss:$8 sps:$4 sm:$0xff]  }
 0x334   :  { %5237 = vmatpush1.bf16.msra.mxu0 %v10530_v36  ;;  %v10609_v36 = vld [vmem:[#allocation7 + $0x10] ss:$8 sps:$4 sm:$0xff]  }
 0x335   :  { %5238 = vmatprep.subr.bf16.mxu0 %v10538_v37  ;;  %v10749_v37 = vld [vmem:[#allocation10 + $0x14] ss:$8 sps:$4 sm:$0xff]  }
 0x336   :  { %v11794_v42 = vpop.f32.mrb[0].mxu0  ;;  %v11796_v44 = vpop.f32.mrb[0].mxu1  ;;  %5401 = vmatpush1.bf16.msra.mxu1 %v10624_v38  ;;  %v10617_v38 = vld [vmem:[#allocation7 + $0x24] ss:$8 sps:$4 sm:$0xff]  }
 0x337   :  { %v11798_v29 = vpop.f32.mrb[1].mxu0  ;;  %v11800_v46 = vpop.f32.mrb[1].mxu1  ;;  %5402 = vmatprep.subr.bf16.mxu1 %v10632_v39  ;;  %v10615_v39 = vld [vmem:[#allocation7 + $0x20] ss:$8 sps:$4 sm:$0xff]  }
 0x338   :  { %v3221_v48 = vpop.f32.mrb[2].mxu0  ;;  %v3508_v51 = vpop.f32.mrb[2].mxu1  ;;  %5239 = vmatpush1.bf16.msra.mxu0 %v10536_v26  ;;  %v3512_v27 = vmax.f32 %v11798_v29, 0.0  ;;  %v10752_v26 = vld [vmem:[#allocation10 + $0x24] ss:$8 sps:$4 sm:$0xff]  }
 0x339   :  { %v3222_v53 = vpop.f32.mrb[3].mxu0  ;;  %v3509_v55 = vpop.f32.mrb[3].mxu1  ;;  %5240 = vmatprep.subr.bf16.mxu0 %v10544_v41  ;;  %v10623_v41 = vld [vmem:[#allocation7 + $0x34] ss:$8 sps:$4 sm:$0xff]   ;;  %v10621_v29 = vld [vmem:[#allocation7 + $0x30] ss:$8 sps:$4 sm:$0xff]  }
 0x33a   :  { %5403 = vmatpush1.bf16.msra.mxu1 %v10630_v45  ;;  %v5438_v33 = vpack.c.bf16 %v3512_v27, %v3512_v27  ;;  %v10750_v45 = vld [vmem:[#allocation10 + $0x20] ss:$8 sps:$4 sm:$0xff]   ;;  %v10753_v51 = vld [vmem:[#allocation10 + $0x30] ss:$8 sps:$4 sm:$0xff]   ;;  %v10758_v53 = vld [vmem:[#allocation10 + $0x44] ss:$8 sps:$4 sm:$0xff]  }
 0x33b   :  { %5404 = vmatprep.subr.bf16.mxu1 %v10638_v25  ;;  %v10755_v25 = vld [vmem:[#allocation10 + $0x34] ss:$8 sps:$4 sm:$0xff]   ;;  %v10629_v48 = vld [vmem:[#allocation7 + $0x44] ss:$8 sps:$4 sm:$0xff]  }
 0x33c   :  { %5241 = vmatpush1.bf16.msra.mxu0 %v10542_v52  ;;  %v10627_v52 = vld [vmem:[#allocation7 + $0x40] ss:$8 sps:$4 sm:$0xff]   ;;  %v10635_v55 = vld [vmem:[#allocation7 + $0x54] ss:$8 sps:$4 sm:$0xff]  }
 0x33d   :  { %5242 = vmatprep.subr.bf16.mxu0 %v10550_v56  ;;  %v10756_v56 = vld [vmem:[#allocation10 + $0x40] ss:$8 sps:$4 sm:$0xff]  }
 0x33e   :  { %5405 = vmatpush1.bf16.msra.mxu1 %v10636_v57  ;;  %v10633_v57 = vld [vmem:[#allocation7 + $0x50] ss:$8 sps:$4 sm:$0xff]   ;;  %v10687_v27 = vld [vmem:[#allocation7 + $0xe0] ss:$8 sps:$4 sm:$0xff]  }
 0x33f   :  { %5406 = vmatprep.subr.bf16.mxu1 %v10644_v32  ;;  %v10761_v32 = vld [vmem:[#allocation10 + $0x54] ss:$8 sps:$4 sm:$0xff]  }
 0x340   :  { %5243 = vmatpush1.bf16.msra.mxu0 %v10548_v58  ;;  %v10641_v58 = vld [vmem:[#allocation7 + $0x64] ss:$8 sps:$4 sm:$0xff]  }
 0x341   :  { %5244 = vmatprep.subr.bf16.mxu0 %v10556_v59  ;;  %v10759_v59 = vld [vmem:[#allocation10 + $0x50] ss:$8 sps:$4 sm:$0xff]  }
 0x342   :  { %5407 = vmatpush1.bf16.msra.mxu1 %v10642_v61  ;;  %v10639_v61 = vld [vmem:[#allocation7 + $0x60] ss:$8 sps:$4 sm:$0xff]  }
 0x343   :  { %5408 = vmatprep.subr.bf16.mxu1 %v10650_v40  ;;  %v10764_v40 = vld [vmem:[#allocation10 + $0x64] ss:$8 sps:$4 sm:$0xff]  }
 0x344   :  { %5245 = vmatpush1.bf16.msra.mxu0 %v10554_v62  ;;  %v10647_v62 = vld [vmem:[#allocation7 + $0x74] ss:$8 sps:$4 sm:$0xff]  }
 0x345   :  { %5246 = vmatprep.subr.bf16.mxu0 %v10562_v50  ;;  %v10762_v50 = vld [vmem:[#allocation10 + $0x60] ss:$8 sps:$4 sm:$0xff]  }
 0x346   :  { %5409 = vmatpush1.bf16.msra.mxu1 %v10648_v0  ;;  %v10645_v0 = vld [vmem:[#allocation7 + $0x70] ss:$8 sps:$4 sm:$0xff]  }
 0x347   :  { %5410 = vmatprep.subr.bf16.mxu1 %v10656_v1  ;;  %v10767_v1 = vld [vmem:[#allocation10 + $0x74] ss:$8 sps:$4 sm:$0xff]  }
 0x348   :  { %5247 = vmatpush1.bf16.msra.mxu0 %v10560_v3  ;;  %v10653_v3 = vld [vmem:[#allocation7 + $0x84] ss:$8 sps:$4 sm:$0xff]  }
 0x349   :  { %5248 = vmatprep.subr.bf16.mxu0 %v10568_v4  ;;  %v10765_v4 = vld [vmem:[#allocation10 + $0x70] ss:$8 sps:$4 sm:$0xff]  }
 0x34a   :  { %5411 = vmatpush1.bf16.msra.mxu1 %v10654_v47  ;;  %v10651_v47 = vld [vmem:[#allocation7 + $0x80] ss:$8 sps:$4 sm:$0xff]  }
 0x34b   :  { %5412 = vmatprep.subr.bf16.mxu1 %v10662_v5  ;;  %v10770_v5 = vld [vmem:[#allocation10 + $0x84] ss:$8 sps:$4 sm:$0xff]  }
 0x34c   :  { %5249 = vmatpush1.bf16.msra.mxu0 %v10566_v6  ;;  %v10659_v6 = vld [vmem:[#allocation7 + $0x94] ss:$8 sps:$4 sm:$0xff]  }
 0x34d   :  { %5250 = vmatprep.subr.bf16.mxu0 %v10574_v7  ;;  %v10768_v7 = vld [vmem:[#allocation10 + $0x80] ss:$8 sps:$4 sm:$0xff]  }
 0x34e   :  { %5413 = vmatpush1.bf16.msra.mxu1 %v10660_v8  ;;  %v10657_v8 = vld [vmem:[#allocation7 + $0x90] ss:$8 sps:$4 sm:$0xff]  }
 0x34f   :  { %5414 = vmatprep.subr.bf16.mxu1 %v10668_v10  ;;  %v10773_v10 = vld [vmem:[#allocation10 + $0x94] ss:$8 sps:$4 sm:$0xff]  }
 0x350   :  { %5251 = vmatpush1.bf16.msra.mxu0 %v10572_v54  ;;  %v10665_v54 = vld [vmem:[#allocation7 + $0xa4] ss:$8 sps:$4 sm:$0xff]  }
 0x351   :  { %5252 = vmatprep.subr.bf16.mxu0 %v10580_v12  ;;  %v10771_v12 = vld [vmem:[#allocation10 + $0x90] ss:$8 sps:$4 sm:$0xff]  }
 0x352   :  { %5415 = vmatpush1.bf16.msra.mxu1 %v10666_v13  ;;  %v10663_v13 = vld [vmem:[#allocation7 + $0xa0] ss:$8 sps:$4 sm:$0xff]  }
 0x353   :  { %5416 = vmatprep.subr.bf16.mxu1 %v10674_v14  ;;  %v10776_v14 = vld [vmem:[#allocation10 + $0xa4] ss:$8 sps:$4 sm:$0xff]  }
 0x354   :  { %5253 = vmatpush1.bf16.msra.mxu0 %v10578_v63  ;;  %v10671_v63 = vld [vmem:[#allocation7 + $0xb4] ss:$8 sps:$4 sm:$0xff]  }
 0x355   :  { %5254 = vmatprep.subr.bf16.mxu0 %v10586_v15  ;;  %v10774_v15 = vld [vmem:[#allocation10 + $0xa0] ss:$8 sps:$4 sm:$0xff]  }
 0x356   :  { %5417 = vmatpush1.bf16.msra.mxu1 %v10672_v16  ;;  %v10669_v16 = vld [vmem:[#allocation7 + $0xb0] ss:$8 sps:$4 sm:$0xff]  }
 0x357   :  { %5418 = vmatprep.subr.bf16.mxu1 %v10680_v17  ;;  %v10779_v17 = vld [vmem:[#allocation10 + $0xb4] ss:$8 sps:$4 sm:$0xff]  }
 0x358   :  { %5255 = vmatpush1.bf16.msra.mxu0 %v10584_v49  ;;  %v10677_v49 = vld [vmem:[#allocation7 + $0xc4] ss:$8 sps:$4 sm:$0xff]  }
 0x359   :  { %5256 = vmatprep.subr.bf16.mxu0 %v10592_v60  ;;  %v10777_v60 = vld [vmem:[#allocation10 + $0xb0] ss:$8 sps:$4 sm:$0xff]  }
 0x35a   :  { %5419 = vmatpush1.bf16.msra.mxu1 %v10678_v18  ;;  %v10675_v18 = vld [vmem:[#allocation7 + $0xc0] ss:$8 sps:$4 sm:$0xff]  }
 0x35b   :  { %5420 = vmatprep.subr.bf16.mxu1 %v10686_v19  ;;  %v10782_v19 = vld [vmem:[#allocation10 + $0xc4] ss:$8 sps:$4 sm:$0xff]  }
 0x35c   :  { %5257 = vmatpush1.bf16.msra.mxu0 %v10590_v20  ;;  %v10683_v20 = vld [vmem:[#allocation7 + $0xd4] ss:$8 sps:$4 sm:$0xff]  }
 0x35d   :  { %5258 = vmatprep.subr.bf16.mxu0 %v10598_v21  ;;  %v10780_v21 = vld [vmem:[#allocation10 + $0xc0] ss:$8 sps:$4 sm:$0xff]  }
 0x35e   :  { %5421 = vmatpush1.bf16.msra.mxu1 %v10684_v22  ;;  %v10681_v22 = vld [vmem:[#allocation7 + $0xd0] ss:$8 sps:$4 sm:$0xff]  }
 0x35f   :  { %5422 = vmatprep.subr.bf16.mxu1 %v10692_v24  ;;  %v10785_v24 = vld [vmem:[#allocation10 + $0xd4] ss:$8 sps:$4 sm:$0xff]  }
 0x360   :  { %5259 = vmatpush1.bf16.msra.mxu0 %v10596_v2  ;;  %v10689_v2 = vld [vmem:[#allocation7 + $0xe4] ss:$8 sps:$4 sm:$0xff]  }
 0x361   :  { %5837 = vmatprep.subr.bf16.mxu0 %v10605_v9  ;;  %v10783_v9 = vld [vmem:[#allocation10 + $0xd0] ss:$8 sps:$4 sm:$0xff]  }
 0x362   :  { %5423 = vmatpush1.bf16.msra.mxu1 %v10690_v28  ;;  %v10788_v28 = vld [vmem:[#allocation10 + $0xe4] ss:$8 sps:$4 sm:$0xff]  }
 0x363   :  { %5261 = vmatmul.mubr.bf16.vlgmr.msra.gmra.mrb[4].mxu0 %v3567_v23  ;;  %6319 = vmatprep.subr.bf16.mxu1 %v10746_v35  ;;  %v3514_v35 = vmax.f32 %v11800_v46, 0.0  ;;  %v10710_v46 = vld [vmem:[#allocation7 + $0x144] ss:$8 sps:$4 sm:$0xff]  }
 0x364   :  { %5838 = vmatpush1.bf16.msra.mxu0 %v10603_v30  ;;  %5869 = vmatprep.mubr.bf16.mxu0 %v5438_v33  ;;  %v10786_v30 = vld [vmem:[#allocation10 + $0xe0] ss:$8 sps:$4 sm:$0xff]   ;;  %v3511_v33 = vmax.f32 %v11794_v42, 0.0  ;;  %v10707_v42 = vld [vmem:[#allocation7 + $0x134] ss:$8 sps:$4 sm:$0xff]  }
 0x365   :  { %5839 = vmatprep.subr.bf16.mxu0 %v10611_v31  ;;  %5425 = vmatmul.mubr.bf16.vlgmr.msra.gmra.mrb[4].mxu1 %v3567_v23  ;;  %v10695_v23 = vld [vmem:[#allocation7 + $0xf4] ss:$8 sps:$4 sm:$0xff]   ;;  %v10693_v31 = vld [vmem:[#allocation7 + $0xf0] ss:$8 sps:$4 sm:$0xff]  }
 0x366   :  { %6320 = vmatpush1.bf16.msra.mxu1 %v10744_v34  ;;  %v10698_v34 = vld [vmem:[#allocation7 + $0x104] ss:$8 sps:$4 sm:$0xff]  }
 0x367   :  { %6321 = vmatprep.subr.bf16.mxu1 %v10749_v37  ;;  %v5437_v37 = vpack.c.bf16 %v3511_v33, %v3511_v33  ;;  %v10804_v33 = vld [vmem:[#allocation10 + $0x140] ss:$8 sps:$4 sm:$0xff]  }
 0x368   :  { %5840 = vmatpush1.bf16.msra.mxu0 %v10609_v36  ;;  %v10696_v36 = vld [vmem:[#allocation7 + $0x100] ss:$8 sps:$4 sm:$0xff]  }
 0x369   :  { %5841 = vmatprep.subr.bf16.mxu0 %v10617_v38  ;;  %v10701_v38 = vld [vmem:[#allocation7 + $0x114] ss:$8 sps:$4 sm:$0xff]  }
 0x36a   :  { %6322 = vmatpush1.bf16.msra.mxu1 %v10747_v11  ;;  %v5440_v11 = vpack.c.bf16 %v3514_v35, %v3514_v35  ;;  %v10807_v35 = vld [vmem:[#allocation10 + $0x150] ss:$8 sps:$4 sm:$0xff]  }
 0x36b   :  { %6323 = vmatprep.subr.bf16.mxu1 %v10752_v26  ;;  %v10704_v26 = vld [vmem:[#allocation7 + $0x124] ss:$8 sps:$4 sm:$0xff]  }
 0x36c   :  { %5842 = vmatpush1.bf16.msra.mxu0 %v10615_v39  ;;  %v10699_v39 = vld [vmem:[#allocation7 + $0x110] ss:$8 sps:$4 sm:$0xff]  }
 0x36d   :  { %5843 = vmatprep.subr.bf16.mxu0 %v10623_v41  ;;  %v10702_v41 = vld [vmem:[#allocation7 + $0x120] ss:$8 sps:$4 sm:$0xff]  }
 0x36e   :  { %6324 = vmatpush1.bf16.msra.mxu1 %v10750_v45  ;;  %v10705_v45 = vld [vmem:[#allocation7 + $0x130] ss:$8 sps:$4 sm:$0xff]  }
 0x36f   :  { %6325 = vmatprep.subr.bf16.mxu1 %v10755_v25  ;;  %v10713_v25 = vld [vmem:[#allocation7 + $0x154] ss:$8 sps:$4 sm:$0xff]  }
 0x370   :  { %5844 = vmatpush1.bf16.msra.mxu0 %v10621_v29  ;;  %v10708_v29 = vld [vmem:[#allocation7 + $0x140] ss:$8 sps:$4 sm:$0xff]  }
 0x371   :  { %5845 = vmatprep.subr.bf16.mxu0 %v10629_v48  ;;  %v10711_v48 = vld [vmem:[#allocation7 + $0x150] ss:$8 sps:$4 sm:$0xff]  }
 0x372   :  { %6326 = vmatpush1.bf16.msra.mxu1 %v10753_v51  ;;  %v10716_v51 = vld [vmem:[#allocation7 + $0x164] ss:$8 sps:$4 sm:$0xff]  }
 0x373   :  { %6327 = vmatprep.subr.bf16.mxu1 %v10758_v53  ;;  %v10789_v53 = vld [vmem:[#allocation10 + $0xf0] ss:$8 sps:$4 sm:$0xff]  }
 0x374   :  { %5846 = vmatpush1.bf16.msra.mxu0 %v10627_v52  ;;  %v10791_v52 = vld [vmem:[#allocation10 + $0xf4] ss:$8 sps:$4 sm:$0xff]  }
 0x375   :  { %5847 = vmatprep.subr.bf16.mxu0 %v10635_v55  ;;  %v10714_v55 = vld [vmem:[#allocation7 + $0x160] ss:$8 sps:$4 sm:$0xff]  }
 0x376   :  { %6328 = vmatpush1.bf16.msra.mxu1 %v10756_v56  ;;  %v10719_v56 = vld [vmem:[#allocation7 + $0x174] ss:$8 sps:$4 sm:$0xff]  }
 0x377   :  { %6329 = vmatprep.subr.bf16.mxu1 %v10761_v32  ;;  %v10717_v32 = vld [vmem:[#allocation7 + $0x170] ss:$8 sps:$4 sm:$0xff]  }
 0x378   :  { %5848 = vmatpush1.bf16.msra.mxu0 %v10633_v57  ;;  %v10794_v57 = vld [vmem:[#allocation10 + $0x104] ss:$8 sps:$4 sm:$0xff]  }
 0x379   :  { %5849 = vmatprep.subr.bf16.mxu0 %v10641_v58  ;;  %v10722_v58 = vld [vmem:[#allocation7 + $0x184] ss:$8 sps:$4 sm:$0xff]  }
 0x37a   :  { %6330 = vmatpush1.bf16.msra.mxu1 %v10759_v59  ;;  %v10720_v59 = vld [vmem:[#allocation7 + $0x180] ss:$8 sps:$4 sm:$0xff]  }
 0x37b   :  { %6331 = vmatprep.subr.bf16.mxu1 %v10764_v40  ;;  %v10723_v40 = vld [vmem:[#allocation7 + $0x190] ss:$8 sps:$4 sm:$0xff]  }
 0x37c   :  { %5850 = vmatpush1.bf16.msra.mxu0 %v10639_v61  ;;  %v10725_v61 = vld [vmem:[#allocation7 + $0x194] ss:$8 sps:$4 sm:$0xff]  }
 0x37d   :  { %5851 = vmatprep.subr.bf16.mxu0 %v10647_v62  ;;  %v10728_v62 = vld [vmem:[#allocation7 + $0x1a4] ss:$8 sps:$4 sm:$0xff]  }
 0x37e   :  { %6332 = vmatpush1.bf16.msra.mxu1 %v10762_v50  ;;  %v10726_v50 = vld [vmem:[#allocation7 + $0x1a0] ss:$8 sps:$4 sm:$0xff]  }
 0x37f   :  { %6333 = vmatprep.subr.bf16.mxu1 %v10767_v1  ;;  %v10729_v1 = vld [vmem:[#allocation7 + $0x1b0] ss:$8 sps:$4 sm:$0xff]  }
 0x380   :  { %5852 = vmatpush1.bf16.msra.mxu0 %v10645_v0  ;;  %v10731_v0 = vld [vmem:[#allocation7 + $0x1b4] ss:$8 sps:$4 sm:$0xff]  }
 0x381   :  { %5853 = vmatprep.subr.bf16.mxu0 %v10653_v3  ;;  %v10734_v3 = vld [vmem:[#allocation7 + $0x1c4] ss:$8 sps:$4 sm:$0xff]  }
 0x382   :  { %6334 = vmatpush1.bf16.msra.mxu1 %v10765_v4  ;;  %v10732_v4 = vld [vmem:[#allocation7 + $0x1c0] ss:$8 sps:$4 sm:$0xff]  }
 0x383   :  { %6335 = vmatprep.subr.bf16.mxu1 %v10770_v5  ;;  %v10735_v5 = vld [vmem:[#allocation7 + $0x1d0] ss:$8 sps:$4 sm:$0xff]  }
 0x384   :  { %5854 = vmatpush1.bf16.msra.mxu0 %v10651_v47  ;;  %v10737_v47 = vld [vmem:[#allocation7 + $0x1d4] ss:$8 sps:$4 sm:$0xff]  }
 0x385   :  { %5855 = vmatprep.subr.bf16.mxu0 %v10659_v6  ;;  %v10740_v6 = vld [vmem:[#allocation7 + $0x1e4] ss:$8 sps:$4 sm:$0xff]  }
 0x386   :  { %6336 = vmatpush1.bf16.msra.mxu1 %v10768_v7  ;;  %v10738_v7 = vld [vmem:[#allocation7 + $0x1e0] ss:$8 sps:$4 sm:$0xff]  }
 0x387   :  { %6337 = vmatprep.subr.bf16.mxu1 %v10773_v10  ;;  %v10741_v10 = vld [vmem:[#allocation7 + $0x1f0] ss:$8 sps:$4 sm:$0xff]  }
 0x388   :  { %5856 = vmatpush1.bf16.msra.mxu0 %v10657_v8  ;;  %v10743_v8 = vld [vmem:[#allocation7 + $0x1f4] ss:$8 sps:$4 sm:$0xff]  }
 0x389   :  { %5857 = vmatprep.subr.bf16.mxu0 %v10665_v54  ;;  %v3513_v54 = vmax.f32 %v11796_v44, 0.0 }
 0x38a   :  { %6338 = vmatpush1.bf16.msra.mxu1 %v10771_v12 }
 0x38b   :  { %6339 = vmatprep.subr.bf16.mxu1 %v10776_v14  ;;  %v5439_v12 = vpack.c.bf16 %v3513_v54, %v3513_v54 }
 0x38c   :  { %5858 = vmatpush1.bf16.msra.mxu0 %v10663_v13 }
 0x38d   :  { %5859 = vmatprep.subr.bf16.mxu0 %v10671_v63 }
 0x38e   :  { %6340 = vmatpush1.bf16.msra.mxu1 %v10774_v15 }
 0x38f   :  { %6341 = vmatprep.subr.bf16.mxu1 %v10779_v17 }
 0x390   :  { %5860 = vmatpush1.bf16.msra.mxu0 %v10669_v16 }
 0x391   :  { %5861 = vmatprep.subr.bf16.mxu0 %v10677_v49 }
 0x392   :  { %6342 = vmatpush1.bf16.msra.mxu1 %v10777_v60 }
 0x393   :  { %6343 = vmatprep.subr.bf16.mxu1 %v10782_v19  ;;  %v10792_v19 = vld [vmem:[#allocation10 + $0x100] ss:$8 sps:$4 sm:$0xff]  }
 0x394   :  { %5862 = vmatpush1.bf16.msra.mxu0 %v10675_v18 }
 0x395   :  { %5863 = vmatprep.subr.bf16.mxu0 %v10683_v20 }
 0x396   :  { %6344 = vmatpush1.bf16.msra.mxu1 %v10780_v21 }
 0x397   :  { %6345 = vmatprep.subr.bf16.mxu1 %v10785_v24  ;;  %v10797_v24 = vld [vmem:[#allocation10 + $0x114] ss:$8 sps:$4 sm:$0xff]  }
 0x398   :  { %5864 = vmatpush1.bf16.msra.mxu0 %v10681_v22 }
 0x399   :  { %5865 = vmatprep.subr.bf16.mxu0 %v10689_v2 }
 0x39a   :  { %6346 = vmatpush1.bf16.msra.mxu1 %v10783_v9  ;;  %v10795_v9 = vld [vmem:[#allocation10 + $0x110] ss:$8 sps:$4 sm:$0xff]  }
 0x39b   :  { %6347 = vmatprep.subr.bf16.mxu1 %v10788_v28  ;;  %v10798_v28 = vld [vmem:[#allocation10 + $0x120] ss:$8 sps:$4 sm:$0xff]  }
 0x39c   :  { %5866 = vmatpush1.bf16.msra.mxu0 %v10687_v27  ;;  %v10800_v27 = vld [vmem:[#allocation10 + $0x124] ss:$8 sps:$4 sm:$0xff]  }
 0x39d   :  { %5867 = vmatprep.subr.bf16.mxu0 %v10695_v23  ;;  %v10803_v23 = vld [vmem:[#allocation10 + $0x134] ss:$8 sps:$4 sm:$0xff]  }
 0x39e   :  { %6348 = vmatpush1.bf16.msra.mxu1 %v10786_v30  ;;  %v10801_v30 = vld [vmem:[#allocation10 + $0x130] ss:$8 sps:$4 sm:$0xff]  }
 0x39f   :  { %6349 = vmatprep.subr.bf16.mxu1 %v10791_v52  ;;  %v10833_v52 = vld [vmem:[#allocation10 + $0x1d4] ss:$8 sps:$4 sm:$0xff]  }
 0x3a0   :  { %5868 = vmatpush1.bf16.msra.mxu0 %v10693_v31  ;;  %v10806_v31 = vld [vmem:[#allocation10 + $0x144] ss:$8 sps:$4 sm:$0xff]  }
 0x3a1   :  { %5878 = vmatprep.subr.bf16.mxu0 %v10698_v34  ;;  %v10809_v34 = vld [vmem:[#allocation10 + $0x154] ss:$8 sps:$4 sm:$0xff]  }
 0x3a2   :  { %6350 = vmatpush1.bf16.msra.mxu1 %v10789_v53  ;;  %v10831_v53 = vld [vmem:[#allocation10 + $0x1d0] ss:$8 sps:$4 sm:$0xff]  }
 0x3a3   :  { %5870 = vmatmul.mubr.bf16.vlgmr.msra.gmra.mrb[8].mxu0 %v5437_v37  ;;  %6360 = vmatprep.subr.bf16.mxu1 %v10794_v57  ;;  %v10810_v37 = vld [vmem:[#allocation10 + $0x160] ss:$8 sps:$4 sm:$0xff]   ;;  %v10839_v57 = vld [vmem:[#allocation10 + $0x1f4] ss:$8 sps:$4 sm:$0xff]  }
 0x3a4   :  { %5879 = vmatpush1.bf16.msra.mxu0 %v10696_v36  ;;  %5910 = vmatprep.mubr.bf16.mxu0 %v5440_v11  ;;  %v10812_v36 = vld [vmem:[#allocation10 + $0x164] ss:$8 sps:$4 sm:$0xff]   ;;  %v10813_v11 = vld [vmem:[#allocation10 + $0x170] ss:$8 sps:$4 sm:$0xff]  }
 0x3a5   :  { %5880 = vmatprep.subr.bf16.mxu0 %v10701_v38  ;;  %v10815_v38 = vld [vmem:[#allocation10 + $0x174] ss:$8 sps:$4 sm:$0xff]  }
 0x3a8   :  { %5881 = vmatpush1.bf16.msra.mxu0 %v10699_v39  ;;  %v10818_v39 = vld [vmem:[#allocation10 + $0x184] ss:$8 sps:$4 sm:$0xff]  }
 0x3a9   :  { %5882 = vmatprep.subr.bf16.mxu0 %v10704_v26  ;;  %v10816_v26 = vld [vmem:[#allocation10 + $0x180] ss:$8 sps:$4 sm:$0xff]  }
 0x3ac   :  { %5883 = vmatpush1.bf16.msra.mxu0 %v10702_v41  ;;  %v10821_v41 = vld [vmem:[#allocation10 + $0x194] ss:$8 sps:$4 sm:$0xff]  }
 0x3ad   :  { %5884 = vmatprep.subr.bf16.mxu0 %v10707_v42  ;;  %v10819_v42 = vld [vmem:[#allocation10 + $0x190] ss:$8 sps:$4 sm:$0xff]  }
 0x3b0   :  { %5885 = vmatpush1.bf16.msra.mxu0 %v10705_v45  ;;  %v10824_v45 = vld [vmem:[#allocation10 + $0x1a4] ss:$8 sps:$4 sm:$0xff]  }
 0x3b1   :  { %5886 = vmatprep.subr.bf16.mxu0 %v10710_v46  ;;  %v10822_v46 = vld [vmem:[#allocation10 + $0x1a0] ss:$8 sps:$4 sm:$0xff]  }
 0x3b4   :  { %5887 = vmatpush1.bf16.msra.mxu0 %v10708_v29  ;;  %v10827_v29 = vld [vmem:[#allocation10 + $0x1b4] ss:$8 sps:$4 sm:$0xff]  }
 0x3b5   :  { %5888 = vmatprep.subr.bf16.mxu0 %v10713_v25  ;;  %v10825_v25 = vld [vmem:[#allocation10 + $0x1b0] ss:$8 sps:$4 sm:$0xff]  }
 0x3b8   :  { %5889 = vmatpush1.bf16.msra.mxu0 %v10711_v48  ;;  %v10830_v48 = vld [vmem:[#allocation10 + $0x1c4] ss:$8 sps:$4 sm:$0xff]  }
 0x3b9   :  { %5890 = vmatprep.subr.bf16.mxu0 %v10716_v51  ;;  %v10828_v51 = vld [vmem:[#allocation10 + $0x1c0] ss:$8 sps:$4 sm:$0xff]  }
 0x3bc   :  { %5891 = vmatpush1.bf16.msra.mxu0 %v10714_v55  ;;  %v10836_v55 = vld [vmem:[#allocation10 + $0x1e4] ss:$8 sps:$4 sm:$0xff]  }
 0x3bd   :  { %5892 = vmatprep.subr.bf16.mxu0 %v10719_v56  ;;  %v10834_v56 = vld [vmem:[#allocation10 + $0x1e0] ss:$8 sps:$4 sm:$0xff]  }
 0x3c0   :  { %5893 = vmatpush1.bf16.msra.mxu0 %v10717_v32 }
 0x3c1   :  { %5894 = vmatprep.subr.bf16.mxu0 %v10722_v58  ;;  %v10837_v58 = vld [vmem:[#allocation10 + $0x1f0] ss:$8 sps:$4 sm:$0xff]  }
 0x3c4   :  { %5895 = vmatpush1.bf16.msra.mxu0 %v10720_v59 }
 0x3c5   :  { %5896 = vmatprep.subr.bf16.mxu0 %v10725_v61  ;;  %v11492_v61 = vmov 0  }
 0x3c6   :  { %9545 = vset.pattern.permute.xlu1 %v11492_v61 }
 0x3c8   :  { %5897 = vmatpush1.bf16.msra.mxu0 %v10723_v40  ;;  %v11813_v40 = vsub.s32 0, %v11683_v43 }
 0x3c9   :  { %5898 = vmatprep.subr.bf16.mxu0 %v10728_v62  ;;  %v5505_v62 = vld [vmem:[#allocation8] sm:$0x3] }
 0x3ca   :  { %13698 = vst [vmem:[#allocation25_spill] sm:$0xff] %v11813_v40 }
 0x3cc   :  { %5899 = vmatpush1.bf16.msra.mxu0 %v10726_v50  ;;  %v11815_v50 = vld [vmem:[#allocation13] sm:$0xff] }
 0x3cd   :  { %5900 = vmatprep.subr.bf16.mxu0 %v10731_v0  ;;  %v5510_v0 = vrot.slane %v5505_v62, %v11813_v40 }
 0x3d0   :  { %5901 = vmatpush1.bf16.msra.mxu0 %v10729_v1  ;;  %v11819_v1 = vsub.s32 1, %v11683_v43 }
 0x3d1   :  { %5902 = vmatprep.subr.bf16.mxu0 %v10734_v3  ;;  %v6406_v3 = vrot.slane %v11815_v50, %v11813_v40 }
 0x3d2   :  { %13699 = vst [vmem:[#allocation26_spill] sm:$0xff] %v11819_v1 }
 0x3d4   :  { %5903 = vmatpush1.bf16.msra.mxu0 %v10732_v4 }
 0x3d5   :  { %5904 = vmatprep.subr.bf16.mxu0 %v10737_v47 }
 0x3d8   :  { %5905 = vmatpush1.bf16.msra.mxu0 %v10735_v5 }
 0x3d9   :  { %5906 = vmatprep.subr.bf16.mxu0 %v10740_v6  ;;  %v6416_v6 = vrot.slane %v11815_v50, %v11819_v1 }
 0x3dc   :  { %5907 = vmatpush1.bf16.msra.mxu0 %v10738_v7 }
 0x3dd   :  { %5908 = vmatprep.subr.bf16.mxu0 %v10743_v8 }
 0x3e0   :  { %5909 = vmatpush1.bf16.msra.mxu0 %v10741_v10 }
 0x3e3   :  { %5911 = vmatmul.mubr.bf16.vlgmr.msra.gmra.mrb[8].mxu0 %v5439_v12  ;;  %v5514_v12 = vrot.slane %v5505_v62, %v11819_v1 }
 0x436   :  { %v5262_v13 = vpop.f32.mrb[4].mxu0 }
 0x437   :  { %v5433_v14 = vmax.f32 %v5262_v13, 0.0  ;;  %v5264_v63 = vpop.f32.mrb[5].mxu0  ;;  %v11826_v13 = vld [vmem:[#allocation13 + $0x8] sm:$0xff] }
 0x438   :  { %v5434_v15 = vmax.f32 %v5264_v63, 0.0  ;;  %v5266_v16 = vpop.f32.mrb[6].mxu0  ;;  %v11808_v17 = vpop.f32.mrb[4].mxu1  ;;  %v6410_v63 = vrot.slane %v11826_v13, %v11813_v40 }
 0x439   :  { %v5267_v49 = vpop.f32.mrb[7].mxu0  ;;  %v5428_v60 = vpop.f32.mrb[5].mxu1  ;;  %v5919_v22 = vpack.c.bf16 %v5433_v14, %v5433_v14  ;;  %v5435_v32 = vmax.f32 %v11808_v17, 0.0  ;;  %v6420_v16 = vrot.slane %v11826_v13, %v11819_v1 }
 0x43a   :  { %v5920_v18 = vpack.c.bf16 %v5434_v15, %v5434_v15  ;;  %v5436_v20 = vmax.f32 %v5428_v60, 0.0  ;;  %v5430_v21 = vpop.f32.mrb[6].mxu1  ;;  %v11493_v49 = vmov 1  }
 0x43b   :  { %v5431_v44 = vpop.f32.mrb[7].mxu1  ;;  %v5921_v59 = vpack.c.bf16 %v5435_v32, %v5435_v32  ;;  %v6425_v32 = vsub.s32 2, %v11683_v43 }
 0x43c   :  { %6351 = vmatprep.mubr.bf16.mxu1 %v5920_v18  ;;  %v5922_v2 = vpack.c.bf16 %v5436_v20, %v5436_v20 }
 0x43d   :  { %6352 = vmatmul.mubr.bf16.vlgmr.msra.gmra.mrb[8].mxu1 %v5919_v22  ;;  %v6426_v62 = vrot.slane %v11815_v50, %v6425_v32 }
 0x43e   :  { %6361 = vmatpush1.bf16.msra.mxu1 %v10792_v19  ;;  %6392 = vmatprep.mubr.bf16.mxu1 %v5922_v2 }
 0x43f   :  { %6362 = vmatprep.subr.bf16.mxu1 %v10797_v24 }
 0x442   :  { %6363 = vmatpush1.bf16.msra.mxu1 %v10795_v9 }
 0x443   :  { %6364 = vmatprep.subr.bf16.mxu1 %v10800_v27 }
 0x446   :  { %6365 = vmatpush1.bf16.msra.mxu1 %v10798_v28 }
 0x447   :  { %6366 = vmatprep.subr.bf16.mxu1 %v10803_v23 }
 0x44a   :  { %6367 = vmatpush1.bf16.msra.mxu1 %v10801_v30 }
 0x44b   :  { %6368 = vmatprep.subr.bf16.mxu1 %v10806_v31 }
 0x44e   :  { %6369 = vmatpush1.bf16.msra.mxu1 %v10804_v33 }
 0x44f   :  { %6370 = vmatprep.subr.bf16.mxu1 %v10809_v34 }
 0x452   :  { %6371 = vmatpush1.bf16.msra.mxu1 %v10807_v35 }
 0x453   :  { %6372 = vmatprep.subr.bf16.mxu1 %v10812_v36 }
 0x456   :  { %6373 = vmatpush1.bf16.msra.mxu1 %v10810_v37 }
 0x457   :  { %6374 = vmatprep.subr.bf16.mxu1 %v10815_v38 }
 0x45a   :  { %6375 = vmatpush1.bf16.msra.mxu1 %v10813_v11 }
 0x45b   :  { %6376 = vmatprep.subr.bf16.mxu1 %v10818_v39 }
 0x45e   :  { %6377 = vmatpush1.bf16.msra.mxu1 %v10816_v26 }
 0x45f   :  { %6378 = vmatprep.subr.bf16.mxu1 %v10821_v41 }
 0x462   :  { %6379 = vmatpush1.bf16.msra.mxu1 %v10819_v42 }
 0x463   :  { %6380 = vmatprep.subr.bf16.mxu1 %v10824_v45 }
 0x466   :  { %6381 = vmatpush1.bf16.msra.mxu1 %v10822_v46 }
 0x467   :  { %6382 = vmatprep.subr.bf16.mxu1 %v10827_v29 }
 0x46a   :  { %6383 = vmatpush1.bf16.msra.mxu1 %v10825_v25 }
 0x46b   :  { %6384 = vmatprep.subr.bf16.mxu1 %v10830_v48 }
 0x46e   :  { %6385 = vmatpush1.bf16.msra.mxu1 %v10828_v51 }
 0x46f   :  { %6386 = vmatprep.subr.bf16.mxu1 %v10833_v52 }
 0x472   :  { %6387 = vmatpush1.bf16.msra.mxu1 %v10831_v53 }
 0x473   :  { %6388 = vmatprep.subr.bf16.mxu1 %v10836_v55 }
 0x476   :  { %6389 = vmatpush1.bf16.msra.mxu1 %v10834_v56 }
 0x477   :  { %6390 = vmatprep.subr.bf16.mxu1 %v10839_v57  ;;  %v5987_v57 = vld [vmem:[#allocation11] sm:$0x3] }
 0x47a   :  { %6391 = vmatpush1.bf16.msra.mxu1 %v10837_v58  ;;  %v5992_v58 = vrot.slane %v5987_v57, %v11813_v40 }
 0x47d   :  { %6393 = vmatmul.mubr.bf16.vlgmr.msra.gmra.mrb[8].mxu1 %v5921_v59  ;;  %v5996_v59 = vrot.slane %v5987_v57, %v11819_v1 }
 0x4b6   :  { %v5912_v4 = vpop.f32.mrb[8].mxu0 }
 0x4b7   :  { %v9441_v47 = vadd.f32 %v5912_v4, %v5510_v0  ;;  %v5914_v5 = vpop.f32.mrb[9].mxu0 }
 0x4b8   :  { %v5916_v7 = vpop.f32.mrb[10].mxu0  ;;  %v9442_v14 = vadd.f32 %v5914_v5, %v5514_v12 }
 0x4b9   :  { %v5917_v8 = vpop.f32.mrb[11].mxu0  ;;  %v6411_v10 = vmul.f32 %v9441_v47, %v6406_v3  ;;  %v6435_v3 = vsub.s32 3, %v11683_v43  ;;  %v6430_v47 = vrot.slane %v11826_v13, %v6425_v32 }
 0x4ba   :  { %v6412_v15 = vmul.f32 %v9442_v14, %v6410_v63 }
 0x4bb   :  { %v6421_v54 = vadd.f32 %v6416_v6, %v6411_v10  ;;  %v6436_v6 = vrot.slane %v11815_v50, %v6435_v3  ;;  %v6440_v8 = vrot.slane %v11826_v13, %v6435_v3 }
 0x4bc   :  { %v6422_v17 = vadd.f32 %v6420_v16, %v6412_v15 }
 0x4bd   :  { %6463 = vxpose.xlu0.b32.start.end [1/1] (short) %v6421_v54, 128 }
 0x4fa   :  { %6495 = vxpose.xlu0.b32.start.end [1/1] (short) %v6422_v17, 128 }
 0x523   :  { %9546 = vset.pattern.permute.xlu0 %v11493_v49 }
 0x53d   :  { %v6479_v60 = vpop.trf.xlu0 }
 0x53e   :  { %6529 = vperm.xlu1 %9545, %v6479_v60  }
 0x541   :  { %v6480_v18 = vpop.trf.xlu0 }
 0x545   :  { %v6481_v19 = vpop.trf.xlu0 }
 0x549   :  { %v6482_v20 = vpop.trf.xlu0 }
 0x54d   :  { %v11833_v21 = vpop.trf.xlu0 }
 0x550   :  { %v11835_v22 = vpop.f32.mrb[8].mxu1 }
 0x551   :  { %v11837_v24 = vpop.f32.mrb[9].mxu1  ;;  %v11839_v44 = vpop.trf.xlu0  ;;  %v11918_v0 = vadd.f32 %v11835_v22, %v5992_v58 }
 0x552   :  { %v6398_v2 = vpop.f32.mrb[10].mxu1  ;;  %v11922_v4 = vadd.f32 %v11837_v24, %v5996_v59 }
 0x553   :  { %v6399_v9 = vpop.f32.mrb[11].mxu1  ;;  %13700 = vst [vmem:[#allocation27_spill] sm:$0xff] %v11918_v0  ;;  %v6431_v5 = vmul.f32 %v11918_v0, %v6426_v62 }
 0x554   :  { %13701 = vst [vmem:[#allocation28_spill] sm:$0xff] %v11922_v4  ;;  %v6432_v7 = vmul.f32 %v11922_v4, %v6430_v47 }
 0x555   :  { %v11841_v27 = vpop.trf.xlu0  ;;  %v6441_v10 = vadd.f32 %v6436_v6, %v6431_v5 }
 0x556   :  { %v6442_v54 = vadd.f32 %v6440_v8, %v6432_v7 }
 0x557   :  { %v11936_v12 = vrot.slane %v6441_v10, %v11819_v1  ;;  %v11962_v17 = vrot.slane %v6441_v10, %v11813_v40 }
 0x558   :  { %v11939_v14 = vrot.slane %v6442_v54, %v11819_v1 }
 0x559   :  { %v11843_v28 = vpop.trf.xlu0 }
 0x55d   :  { %v11845_v23 = vpop.trf.xlu0 }
 0x55f   :  { %7408 = vperm.xlu0 %9546, %v6479_v60   ;;  %v11965_v60 = vrot.slane %v6442_v54, %v11813_v40 }
 0x561   :  { %v11847_v30 = vpop.trf.xlu0 }
 0x563   :  { %9550 = vset.pattern.permute.xlu0 %v11492_v61 }
 0x565   :  { %v11850_v31 = vpop.trf.xlu0 }
 0x569   :  { %v11852_v33 = vpop.trf.xlu0 }
 0x56d   :  { %v11854_v34 = vpop.trf.xlu0 }
 0x571   :  { %v11856_v35 = vpop.trf.xlu0 }
 0x575   :  { %v11858_v36 = vpop.trf.xlu0 }
 0x579   :  { %v11860_v37 = vpop.trf.xlu0 }
 0x57d   :  { %v6511_v38 = vpop.trf.xlu0 }
 0x57e   :  { %6609 = vperm.xlu1 %9545, %v6511_v38  }
 0x581   :  { %v6512_v11 = vpop.trf.xlu0 }
 0x582   :  { %9547 = vset.pattern.permute.xlu1 %v11493_v49  ;;  %6614 = vperm.xlu0 %9550, %v6512_v11  }
 0x583   :  { %7472 = vperm.xlu1 %9547, %v6511_v38  }
 0x585   :  { %v6513_v39 = vpop.trf.xlu0 }
 0x586   :  { %9566 = vset.pattern.permute.xlu0 %v11493_v49 }
 0x587   :  { %9548 = vset.pattern.permute.xlu1 %v11492_v61 }
 0x588   :  { %6534 = vperm.xlu1 %9548, %v6480_v18  }
 0x589   :  { %v6514_v26 = vpop.trf.xlu0 }
 0x58c   :  { %9549 = vset.pattern.permute.xlu1 %v11493_v49 }
 0x58d   :  { %7412 = vperm.xlu1 %9549, %v6480_v18   ;;  %v6515_v41 = vpop.trf.xlu0 }
 0x591   :  { %7476 = vperm.xlu1 %9549, %v6512_v11   ;;  %v11866_v42 = vpop.trf.xlu0 }
 0x592   :  { %7492 = vperm.xlu0 %9566, %v11866_v42  }
 0x595   :  { %9551 = vset.pattern.permute.xlu1 %v11492_v61  ;;  %v11870_v45 = vpop.trf.xlu0 }
 0x596   :  { %6539 = vperm.xlu1 %9551, %v6481_v19   ;;  %7496 = vperm.xlu0 %9566, %v11870_v45  }
 0x599   :  { %v11873_v46 = vpop.trf.xlu0 }
 0x59a   :  { %9552 = vset.pattern.permute.xlu1 %v11493_v49  ;;  %7500 = vperm.xlu0 %9566, %v11873_v46  }
 0x59b   :  { %7416 = vperm.xlu1 %9552, %v6481_v19  }
 0x59d   :  { %v11877_v29 = vpop.trf.xlu0 }
 0x59e   :  { %7504 = vperm.xlu0 %9566, %v11877_v29  }
 0x59f   :  { %9553 = vset.pattern.permute.xlu1 %v11492_v61 }
 0x5a0   :  { %6619 = vperm.xlu1 %9553, %v6513_v39  }
 0x5a1   :  { %v11881_v25 = vpop.trf.xlu0 }
 0x5a2   :  { %7508 = vperm.xlu0 %9566, %v11881_v25  }
 0x5a4   :  { %9554 = vset.pattern.permute.xlu1 %v11493_v49 }
 0x5a5   :  { %7480 = vperm.xlu1 %9554, %v6513_v39   ;;  %v11885_v48 = vpop.trf.xlu0 }
 0x5a6   :  { %7512 = vperm.xlu0 %9566, %v11885_v48  }
 0x5a9   :  { %9555 = vset.pattern.permute.xlu1 %v11492_v61  ;;  %v11889_v51 = vpop.trf.xlu0 }
 0x5aa   :  { %6544 = vperm.xlu1 %9555, %v6482_v20   ;;  %7516 = vperm.xlu0 %9566, %v11889_v51  }
 0x5ad   :  { %v11892_v52 = vpop.trf.xlu0 }
 0x5ae   :  { %9556 = vset.pattern.permute.xlu1 %v11493_v49  ;;  %7520 = vperm.xlu0 %9566, %v11892_v52  }
 0x5af   :  { %7420 = vperm.xlu1 %9556, %v6482_v20  }
 0x5b1   :  { %v11896_v53 = vpop.trf.xlu0 }
 0x5b2   :  { %7524 = vperm.xlu0 %9566, %v11896_v53  }
 0x5b3   :  { %9557 = vset.pattern.permute.xlu1 %v11492_v61 }
 0x5b4   :  { %6624 = vperm.xlu1 %9557, %v6514_v26  }
 0x5b5   :  { %v11900_v55 = vpop.trf.xlu0 }
 0x5b6   :  { %7528 = vperm.xlu0 %9566, %v11900_v55  }
 0x5b8   :  { %9558 = vset.pattern.permute.xlu1 %v11493_v49 }
 0x5b9   :  { %7484 = vperm.xlu1 %9558, %v6514_v26   ;;  %v11904_v56 = vpop.trf.xlu0 }
 0x5ba   :  { %7532 = vperm.xlu0 %9566, %v11904_v56  }
 0x5bd   :  { %9559 = vset.pattern.permute.xlu1 %v11492_v61  ;;  %v11959_v16 = vpop.permute.xlu1 %6529 }
 0x5be   :  { %6549 = vperm.xlu1 %9559, %v11833_v21  }
 0x5c2   :  { %9560 = vset.pattern.permute.xlu1 %v11493_v49 }
 0x5c3   :  { %7424 = vperm.xlu1 %9560, %v11833_v21  }
 0x5c7   :  { %9561 = vset.pattern.permute.xlu1 %v11492_v61 }
 0x5c8   :  { %6629 = vperm.xlu1 %9561, %v6515_v41  }
 0x5cc   :  { %9562 = vset.pattern.permute.xlu1 %v11493_v49 }
 0x5cd   :  { %7488 = vperm.xlu1 %9562, %v6515_v41  }
 0x5d1   :  { %9563 = vset.pattern.permute.xlu1 %v11492_v61 }
 0x5d2   :  { %6554 = vperm.xlu1 %9563, %v11839_v44  }
 0x5d6   :  { %9564 = vset.pattern.permute.xlu1 %v11493_v49 }
 0x5d7   :  { %7428 = vperm.xlu1 %9564, %v11839_v44  }
 0x5db   :  { %9565 = vset.pattern.permute.xlu1 %v11492_v61 }
 0x5dc   :  { %6634 = vperm.xlu1 %9565, %v11866_v42  }
 0x5de   :  { %v7409_v50 = vpop.permute.xlu0 %7408 }
 0x5df   :  { %v11942_v63 = vmul.f32 %v11936_v12, %v7409_v50  ;;  %v11945_v13 = vmul.f32 %v11939_v14, %v7409_v50 }
 0x5e0   :  { %6559 = vperm.xlu1 %9565, %v11841_v27  }
 0x5e1   :  { %v7607_v15 = vmax.f32 %v11942_v63, %v11945_v13 }
 0x5e3   :  { %7608 = vmax.xlane.f32.xlu0 %v7607_v15 }
 0x5e4   :  { %9567 = vset.pattern.permute.xlu1 %v11493_v49 }
 0x5e5   :  { %7432 = vperm.xlu1 %9567, %v11841_v27  }
 0x5e9   :  { %9568 = vset.pattern.permute.xlu1 %v11492_v61 }
 0x5ea   :  { %6639 = vperm.xlu1 %9568, %v11870_v45  }
 0x5ee   :  { %6564 = vperm.xlu1 %9568, %v11843_v28  }
 0x5f2   :  { %9569 = vset.pattern.permute.xlu1 %v11493_v49 }
 0x5f3   :  { %7436 = vperm.xlu1 %9569, %v11843_v28  }
 0x5f7   :  { %9570 = vset.pattern.permute.xlu1 %v11492_v61 }
 0x5f8   :  { %6644 = vperm.xlu1 %9570, %v11873_v46  }
 0x5fc   :  { %6569 = vperm.xlu1 %9570, %v11845_v23  }
 0x5fd   :  { %v6610_v18 = vpop.permute.xlu1 %6609 }
 0x5fe   :  { %v11969_v19 = vmul.f32 %v11962_v17, %v6610_v18  ;;  %v11972_v20 = vmul.f32 %v11965_v60, %v6610_v18 }
 0x600   :  { %9571 = vset.pattern.permute.xlu1 %v11493_v49  ;;  %v6807_v21 = vmax.f32 %v11969_v19, %v11972_v20 }
 0x601   :  { %7440 = vperm.xlu1 %9571, %v11845_v23   ;;  %v6615_v44 = vpop.permute.xlu0 %6614 }
 0x602   :  { %v11978_v22 = vpop.permute.xlu1 %7472  ;;  %6808 = vmax.xlane.f32.xlu0 %v6807_v21  ;;  %v11996_v23 = vmul.f32 %v11962_v17, %v6615_v44  ;;  %v11999_v38 = vmul.f32 %v11965_v60, %v6615_v44 }
 0x603   :  { %v12175_v1 = vmul.f32 %v11939_v14, %v11978_v22 }
 0x604   :  { %v6810_v39 = vmax.f32 %v11996_v23, %v11999_v38 }
 0x605   :  { %9572 = vset.pattern.permute.xlu1 %v11492_v61 }
 0x606   :  { %6649 = vperm.xlu1 %9572, %v11877_v29  }
 0x607   :  { %v11982_v24 = vpop.permute.xlu1 %6534 }
 0x608   :  { %v12181_v4 = vmul.f32 %v11962_v17, %v11982_v24 }
 0x60a   :  { %6574 = vperm.xlu1 %9572, %v11847_v30  }
 0x60c   :  { %v7413_v2 = vpop.permute.xlu1 %7412 }
 0x60d   :  { %v11986_v9 = vmul.f32 %v11936_v12, %v7413_v2  ;;  %v11989_v27 = vmul.f32 %v11939_v14, %v7413_v2 }
 0x60e   :  { %9573 = vset.pattern.permute.xlu1 %v11493_v49 }
 0x60f   :  { %7444 = vperm.xlu1 %9573, %v11847_v30   ;;  %v7610_v28 = vmax.f32 %v11986_v9, %v11989_v27 }
 0x610   :  { %v12001_v11 = vpop.permute.xlu1 %7476 }
 0x611   :  { %7611 = vmax.xlane.f32.xlu0 %v7610_v28 }
 0x613   :  { %9574 = vset.pattern.permute.xlu1 %v11492_v61 }
 0x614   :  { %6654 = vperm.xlu1 %9574, %v11881_v25  }
 0x615   :  { %v12007_v30 = vpop.permute.xlu1 %6539  ;;  %6811 = vmax.xlane.f32.xlu0 %v6810_v39 }
 0x618   :  { %6579 = vperm.xlu1 %9574, %v11850_v31  }
 0x61a   :  { %v12010_v26 = vpop.permute.xlu1 %7416 }
 0x61c   :  { %9575 = vset.pattern.permute.xlu1 %v11493_v49 }
 0x61d   :  { %7448 = vperm.xlu1 %9575, %v11850_v31  }
 0x61f   :  { %v12014_v41 = vpop.permute.xlu1 %6619 }
 0x621   :  { %9576 = vset.pattern.permute.xlu1 %v11492_v61 }
 0x622   :  { %6659 = vperm.xlu1 %9576, %v11885_v48  }
 0x624   :  { %v7481_v42 = vpop.permute.xlu1 %7480 }
 0x625   :  { %v12019_v45 = vmul.f32 %v11936_v12, %v7481_v42  ;;  %v12022_v46 = vmul.f32 %v11939_v14, %v7481_v42 }
 0x626   :  { %6584 = vperm.xlu1 %9576, %v11852_v33  }
 0x627   :  { %v7661_v29 = vmax.f32 %v12019_v45, %v12022_v46 }
 0x629   :  { %v6545_v25 = vpop.permute.xlu1 %6544  ;;  %7662 = vmax.xlane.f32.xlu0 %v7661_v29 }
 0x62a   :  { %v12028_v31 = vmul.f32 %v11962_v17, %v6545_v25  ;;  %v12031_v57 = vmul.f32 %v11965_v60, %v6545_v25  ;;  %9577 = vset.pattern.permute.xlu1 %v11493_v49 }
 0x62b   :  { %7452 = vperm.xlu1 %9577, %v11852_v33  }
 0x62c   :  { %v6768_v48 = vmax.f32 %v12028_v31, %v12031_v57 }
 0x62e   :  { %v7421_v32 = vpop.permute.xlu1 %7420  ;;  %6769 = vmax.xlane.f32.xlu0 %v6768_v48 }
 0x62f   :  { %v12038_v58 = vmul.f32 %v11936_v12, %v7421_v32  ;;  %v12041_v59 = vmul.f32 %v11939_v14, %v7421_v32  ;;  %9578 = vset.pattern.permute.xlu1 %v11492_v61 }
 0x630   :  { %6664 = vperm.xlu1 %9578, %v11889_v51  }
 0x631   :  { %v7616_v62 = vmax.f32 %v12038_v58, %v12041_v59 }
 0x633   :  { %v6625_v3 = vpop.permute.xlu1 %6624  ;;  %7617 = vmax.xlane.f32.xlu0 %v7616_v62 }
 0x634   :  { %v12048_v33 = vmul.f32 %v11962_v17, %v6625_v3  ;;  %v12051_v47 = vmul.f32 %v11965_v60, %v6625_v3  ;;  %6589 = vperm.xlu1 %9578, %v11854_v34  }
 0x636   :  { %v6816_v5 = vmax.f32 %v12048_v33, %v12051_v47 }
 0x638   :  { %v12056_v6 = vpop.permute.xlu1 %7484  ;;  %9579 = vset.pattern.permute.xlu1 %v11493_v49  ;;  %6817 = vmax.xlane.f32.xlu0 %v6816_v5 }
 0x639   :  { %7456 = vperm.xlu1 %9579, %v11854_v34  }
 0x63d   :  { %v12060_v51 = vpop.permute.xlu1 %6549  ;;  %9580 = vset.pattern.permute.xlu1 %v11492_v61 }
 0x63e   :  { %6669 = vperm.xlu1 %9580, %v11892_v52  }
 0x642   :  { %v12064_v7 = vpop.permute.xlu1 %7424  ;;  %6594 = vperm.xlu1 %9580, %v11856_v35  }
 0x646   :  { %9581 = vset.pattern.permute.xlu1 %v11493_v49 }
 0x647   :  { %v12068_v8 = vpop.permute.xlu1 %6629  ;;  %7460 = vperm.xlu1 %9581, %v11856_v35   ;;  %v12085_v35 = vpop.permute.xlu0 %7492 }
 0x64b   :  { %9582 = vset.pattern.permute.xlu1 %v11492_v61  ;;  %v7497_v44 = vpop.permute.xlu0 %7496 }
 0x64c   :  { %v7489_v10 = vpop.permute.xlu1 %7488  ;;  %6674 = vperm.xlu1 %9582, %v11896_v53   ;;  %v12105_v39 = vmul.f32 %v11936_v12, %v7497_v44  ;;  %v12108_v42 = vmul.f32 %v11939_v14, %v7497_v44 }
 0x64d   :  { %v12074_v34 = vmul.f32 %v11936_v12, %v7489_v10  ;;  %v12077_v52 = vmul.f32 %v11939_v14, %v7489_v10 }
 0x64e   :  { %13708 = vst [vmem:[#allocation35_spill] sm:$0xff] %v12105_v39  ;;  %13709 = vst [vmem:[#allocation36_spill] sm:$0xff] %v12108_v42  ;;  %v7673_v25 = vmax.f32 %v12105_v39, %v12108_v42 }
 0x64f   :  { %13702 = vst [vmem:[#allocation29_spill] sm:$0xff] %v12074_v34  ;;  %13703 = vst [vmem:[#allocation30_spill] sm:$0xff] %v12077_v52  ;;  %v7667_v54 = vmax.f32 %v12074_v34, %v12077_v52  ;;  %v12127_v3 = vpop.permute.xlu0 %7500 }
 0x650   :  { %6599 = vperm.xlu1 %9582, %v11858_v36  }
 0x651   :  { %v12082_v50 = vpop.permute.xlu1 %6554  ;;  %7668 = vmax.xlane.f32.xlu0 %v7667_v54 }
 0x653   :  { %v7505_v54 = vpop.permute.xlu0 %7504 }
 0x654   :  { %9583 = vset.pattern.permute.xlu1 %v11493_v49  ;;  %v12147_v44 = vmul.f32 %v11939_v14, %v7505_v54 }
 0x655   :  { %7464 = vperm.xlu1 %9583, %v11858_v36  }
 0x656   :  { %v7429_v53 = vpop.permute.xlu1 %7428  ;;  %13715 = vst [vmem:[#allocation42_spill] sm:$0xff] %v12147_v44 }
 0x657   :  { %v12089_v15 = vmul.f32 %v11936_v12, %v7429_v53  ;;  %v12092_v18 = vmul.f32 %v11939_v14, %v7429_v53 }
 0x659   :  { %13704 = vst [vmem:[#allocation31_spill] sm:$0xff] %v12089_v15  ;;  %13705 = vst [vmem:[#allocation32_spill] sm:$0xff] %v12092_v18  ;;  %9584 = vset.pattern.permute.xlu1 %v11492_v61  ;;  %v7622_v21 = vmax.f32 %v12089_v15, %v12092_v18  ;;  %v12271_v18 = vmul.f32 %v11939_v14, %v12056_v6 }
 0x65a   :  { %6679 = vperm.xlu1 %9584, %v11900_v55  }
 0x65b   :  { %v6635_v2 = vpop.permute.xlu1 %6634  ;;  %7623 = vmax.xlane.f32.xlu0 %v7622_v21  ;;  %v12144_v21 = vmul.f32 %v11936_v12, %v7505_v54  ;;  %v12165_v54 = vmul.f32 %v11965_v60, %v11959_v16  ;;  %13724 = vst [vmem:[#allocation51_spill] sm:$0xff] %v12271_v18 }
 0x65c   :  { %v12099_v28 = vmul.f32 %v11962_v17, %v6635_v2  ;;  %v12102_v36 = vmul.f32 %v11965_v60, %v6635_v2 }
 0x65d   :  { %13714 = vst [vmem:[#allocation41_spill] sm:$0xff] %v12144_v21 }
 0x65e   :  { %13706 = vst [vmem:[#allocation33_spill] sm:$0xff] %v12099_v28  ;;  %13707 = vst [vmem:[#allocation34_spill] sm:$0xff] %v12102_v36  ;;  %6604 = vperm.xlu1 %9584, %v11860_v37   ;;  %v6822_v55 = vmax.f32 %v12099_v28, %v12102_v36 }
 0x65f   :  { %v12113_v29 = vpop.permute.xlu1 %6559 }
 0x660   :  { %6823 = vmax.xlane.f32.xlu0 %v6822_v55 }
 0x662   :  { %9585 = vset.pattern.permute.xlu1 %v11493_v49 }
 0x663   :  { %7468 = vperm.xlu1 %9585, %v11860_v37  }
 0x664   :  { %v12119_v48 = vpop.permute.xlu1 %7432  ;;  %7674 = vmax.xlane.f32.xlu0 %v7673_v25  ;;  %v7679_v25 = vmax.f32 %v12144_v21, %v12147_v44  ;;  %v12199_v21 = vmul.f32 %v11936_v12, %v12001_v11 }
 0x667   :  { %9586 = vset.pattern.permute.xlu1 %v11492_v61 }
 0x668   :  { %6684 = vperm.xlu1 %9586, %v11904_v56  }
 0x669   :  { %v12123_v32 = vpop.permute.xlu1 %6639 }
 0x66d   :  { %v12125_v62 = vpop.permute.xlu1 %6564 }
 0x672   :  { %v7437_v5 = vpop.permute.xlu1 %7436 }
 0x673   :  { %v12130_v49 = vmul.f32 %v11936_v12, %v7437_v5  ;;  %v12133_v10 = vmul.f32 %v11939_v14, %v7437_v5 }
 0x675   :  { %13710 = vst [vmem:[#allocation37_spill] sm:$0xff] %v12130_v49  ;;  %13711 = vst [vmem:[#allocation38_spill] sm:$0xff] %v12133_v10  ;;  %v7628_v37 = vmax.f32 %v12130_v49, %v12133_v10 }
 0x677   :  { %v6645_v61 = vpop.permute.xlu1 %6644  ;;  %7629 = vmax.xlane.f32.xlu0 %v7628_v37 }
 0x678   :  { %v12138_v56 = vmul.f32 %v11962_v17, %v6645_v61  ;;  %v12141_v53 = vmul.f32 %v11965_v60, %v6645_v61  ;;  %v12161_v61 = vmul.f32 %v11962_v17, %v11959_v16  ;;  %v12185_v16 = vmul.f32 %v11965_v60, %v11982_v24 }
 0x679   :  { %v12203_v24 = vmul.f32 %v11939_v14, %v12001_v11  ;;  %v12219_v11 = vmul.f32 %v11965_v60, %v12007_v30 }
 0x67a   :  { %13712 = vst [vmem:[#allocation39_spill] sm:$0xff] %v12138_v56  ;;  %13713 = vst [vmem:[#allocation40_spill] sm:$0xff] %v12141_v53  ;;  %v6828_v2 = vmax.f32 %v12138_v56, %v12141_v53  ;;  %v6762_v53 = vmax.f32 %v12181_v4, %v12185_v16 }
 0x67b   :  { %v12151_v55 = vpop.permute.xlu1 %6569 }
 0x67c   :  { %6829 = vmax.xlane.f32.xlu0 %v6828_v2  ;;  %v12171_v2 = vmul.f32 %v11936_v12, %v11978_v22 }
 0x67e   :  { %v7655_v43 = vmax.f32 %v12171_v2, %v12175_v1 }
 0x680   :  { %v12155_v5 = vpop.permute.xlu1 %7440  ;;  %7680 = vmax.xlane.f32.xlu0 %v7679_v25  ;;  %v6759_v25 = vmax.f32 %v12161_v61, %v12165_v54 }
 0x685   :  { %v12157_v37 = vpop.permute.xlu1 %6649 }
 0x689   :  { %v12167_v40 = vpop.permute.xlu1 %6574 }
 0x68c   :  { %6760 = vmax.xlane.f32.xlu1 %v6759_v25 }
 0x68e   :  { %v7445_v0 = vpop.permute.xlu1 %7444 }
 0x68f   :  { %v12190_v44 = vmul.f32 %v11936_v12, %v7445_v0  ;;  %v12193_v22 = vmul.f32 %v11939_v14, %v7445_v0 }
 0x690   :  { %7656 = vmax.xlane.f32.xlu1 %v7655_v43 }
 0x691   :  { %13716 = vst [vmem:[#allocation43_spill] sm:$0xff] %v12190_v44  ;;  %13717 = vst [vmem:[#allocation44_spill] sm:$0xff] %v12193_v22  ;;  %v7634_v25 = vmax.f32 %v12190_v44, %v12193_v22  ;;  %v12215_v22 = vmul.f32 %v11962_v17, %v12007_v30  ;;  %v12221_v44 = vpop.permute.xlu0 %7508  ;;  %v12235_v30 = vmul.f32 %v11939_v14, %v12010_v26 }
 0x693   :  { %v6655_v56 = vpop.permute.xlu1 %6654  ;;  %7635 = vmax.xlane.f32.xlu0 %v7634_v25  ;;  %v7658_v25 = vmax.f32 %v12199_v21, %v12203_v24 }
 0x694   :  { %v12208_v0 = vmul.f32 %v11962_v17, %v6655_v56  ;;  %v12211_v43 = vmul.f32 %v11965_v60, %v6655_v56  ;;  %6763 = vmax.xlane.f32.xlu1 %v6762_v53  ;;  %v12231_v56 = vmul.f32 %v11936_v12, %v12010_v26  ;;  %v6765_v53 = vmax.f32 %v12215_v22, %v12219_v11 }
 0x695   :  { %v7513_v42 = vpop.permute.xlu0 %7512  ;;  %v12251_v26 = vmul.f32 %v11965_v60, %v12014_v41 }
 0x696   :  { %13718 = vst [vmem:[#allocation45_spill] sm:$0xff] %v12208_v0  ;;  %13719 = vst [vmem:[#allocation46_spill] sm:$0xff] %v12211_v43  ;;  %v6834_v10 = vmax.f32 %v12208_v0, %v12211_v43  ;;  %v7613_v0 = vmax.f32 %v12231_v56, %v12235_v30  ;;  %v12256_v36 = vmul.f32 %v11936_v12, %v7513_v42 }
 0x697   :  { %v12227_v49 = vpop.permute.xlu1 %6579 }
 0x698   :  { %7659 = vmax.xlane.f32.xlu1 %v7658_v25  ;;  %6835 = vmax.xlane.f32.xlu0 %v6834_v10  ;;  %v12247_v10 = vmul.f32 %v11962_v17, %v12014_v41  ;;  %13722 = vst [vmem:[#allocation49_spill] sm:$0xff] %v12256_v36  ;;  %v12267_v41 = vmul.f32 %v11936_v12, %v12056_v6 }
 0x69a   :  { %v6813_v15 = vmax.f32 %v12247_v10, %v12251_v26  ;;  %v7664_v6 = vmax.f32 %v12267_v41, %v12271_v18  ;;  %v12315_v18 = vmul.f32 %v11962_v17, %v12068_v8 }
 0x69c   :  { %v7449_v39 = vpop.permute.xlu1 %7448  ;;  %6766 = vmax.xlane.f32.xlu1 %v6765_v53  ;;  %v12259_v53 = vmul.f32 %v11939_v14, %v7513_v42  ;;  %13732 = vst [vmem:[#allocation59_spill] sm:$0xff] %v12315_v18 }
 0x69d   :  { %v12240_v43 = vmul.f32 %v11936_v12, %v7449_v39  ;;  %v12243_v25 = vmul.f32 %v11939_v14, %v7449_v39 }
 0x69e   :  { %13723 = vst [vmem:[#allocation50_spill] sm:$0xff] %v12259_v53  ;;  %v7685_v42 = vmax.f32 %v12256_v36, %v12259_v53  ;;  %v12291_v53 = vmul.f32 %v11936_v12, %v12064_v7 }
 0x69f   :  { %13720 = vst [vmem:[#allocation47_spill] sm:$0xff] %v12240_v43  ;;  %13721 = vst [vmem:[#allocation48_spill] sm:$0xff] %v12243_v25  ;;  %v7637_v39 = vmax.f32 %v12240_v43, %v12243_v25  ;;  %v7517_v43 = vpop.permute.xlu0 %7516 }
 0x6a0   :  { %7614 = vmax.xlane.f32.xlu1 %v7613_v0  ;;  %v12281_v0 = vmul.f32 %v11962_v17, %v12060_v51  ;;  %v12309_v34 = vmul.f32 %v11939_v14, %v7517_v43 }
 0x6a1   :  { %v12263_v28 = vpop.permute.xlu1 %6659  ;;  %7638 = vmax.xlane.f32.xlu0 %v7637_v39  ;;  %v12285_v39 = vmul.f32 %v11965_v60, %v12060_v51 }
 0x6a2   :  { %13725 = vst [vmem:[#allocation52_spill] sm:$0xff] %v12281_v0  ;;  %13731 = vst [vmem:[#allocation58_spill] sm:$0xff] %v12309_v34 }
 0x6a3   :  { %13726 = vst [vmem:[#allocation53_spill] sm:$0xff] %v12285_v39  ;;  %v6771_v36 = vmax.f32 %v12281_v0, %v12285_v39  ;;  %v12319_v39 = vmul.f32 %v11965_v60, %v12068_v8 }
 0x6a4   :  { %6814 = vmax.xlane.f32.xlu1 %v6813_v15  ;;  %v12295_v15 = vmul.f32 %v11939_v14, %v12064_v7 }
 0x6a5   :  { %v12277_v25 = vpop.permute.xlu1 %6584  ;;  %7686 = vmax.xlane.f32.xlu0 %v7685_v42  ;;  %13733 = vst [vmem:[#allocation60_spill] sm:$0xff] %v12319_v39  ;;  %v6819_v8 = vmax.f32 %v12315_v18, %v12319_v39 }
 0x6a6   :  { %13727 = vst [vmem:[#allocation54_spill] sm:$0xff] %v12295_v15 }
 0x6a8   :  { %7665 = vmax.xlane.f32.xlu1 %v7664_v6  ;;  %v12306_v6 = vmul.f32 %v11936_v12, %v7517_v43 }
 0x6aa   :  { %v7453_v42 = vpop.permute.xlu1 %7452  ;;  %13730 = vst [vmem:[#allocation57_spill] sm:$0xff] %v12306_v6  ;;  %v7688_v43 = vmax.f32 %v12306_v6, %v12309_v34 }
 0x6ab   :  { %v12300_v51 = vmul.f32 %v11936_v12, %v7453_v42  ;;  %v12303_v52 = vmul.f32 %v11939_v14, %v7453_v42 }
 0x6ac   :  { %6772 = vmax.xlane.f32.xlu1 %v6771_v36  ;;  %v7619_v36 = vmax.f32 %v12291_v53, %v12295_v15 }
 0x6ad   :  { %13728 = vst [vmem:[#allocation55_spill] sm:$0xff] %v12300_v51  ;;  %13729 = vst [vmem:[#allocation56_spill] sm:$0xff] %v12303_v52  ;;  %v7640_v7 = vmax.f32 %v12300_v51, %v12303_v52  ;;  %v12329_v52 = vmul.f32 %v11962_v17, %v12082_v50  ;;  %v12333_v51 = vmul.f32 %v11965_v60, %v12082_v50  ;;  %v7521_v50 = vpop.permute.xlu0 %7520 }
 0x6af   :  { %v12323_v42 = vpop.permute.xlu1 %6664  ;;  %7641 = vmax.xlane.f32.xlu0 %v7640_v7  ;;  %13734 = vst [vmem:[#allocation61_spill] sm:$0xff] %v12329_v52  ;;  %13735 = vst [vmem:[#allocation62_spill] sm:$0xff] %v12333_v51  ;;  %v12341_v7 = vmul.f32 %v11936_v12, %v12085_v35  ;;  %v6774_v34 = vmax.f32 %v12329_v52, %v12333_v51  ;;  %v12366_v52 = vmul.f32 %v11936_v12, %v7521_v50 }
 0x6b0   :  { %7620 = vmax.xlane.f32.xlu1 %v7619_v36  ;;  %v12345_v36 = vmul.f32 %v11939_v14, %v12085_v35  ;;  %v12361_v35 = vmul.f32 %v11965_v60, %v12113_v29 }
 0x6b1   :  { %13736 = vst [vmem:[#allocation63_spill] sm:$0xff] %v12341_v7  ;;  %13742 = vst [vmem:[#allocation69_spill] sm:$0xff] %v12366_v52 }
 0x6b2   :  { %13737 = vst [vmem:[#allocation64_spill] sm:$0xff] %v12345_v36  ;;  %13741 = vst [vmem:[#allocation68_spill] sm:$0xff] %v12361_v35  ;;  %v7670_v51 = vmax.f32 %v12341_v7, %v12345_v36  ;;  %v12381_v36 = vmul.f32 %v11939_v14, %v12119_v48 }
 0x6b3   :  { %v12337_v0 = vpop.permute.xlu1 %6589  ;;  %7689 = vmax.xlane.f32.xlu0 %v7688_v43 }
 0x6b4   :  { %6820 = vmax.xlane.f32.xlu1 %v6819_v8  ;;  %v12357_v8 = vmul.f32 %v11962_v17, %v12113_v29  ;;  %v12377_v29 = vmul.f32 %v11936_v12, %v12119_v48  ;;  %13745 = vst [vmem:[#allocation72_spill] sm:$0xff] %v12381_v36 }
 0x6b6   :  { %13740 = vst [vmem:[#allocation67_spill] sm:$0xff] %v12357_v8  ;;  %13744 = vst [vmem:[#allocation71_spill] sm:$0xff] %v12377_v29  ;;  %v6777_v7 = vmax.f32 %v12357_v8, %v12361_v35  ;;  %v7625_v48 = vmax.f32 %v12377_v29, %v12381_v36  ;;  %v12425_v29 = vmul.f32 %v11936_v12, %v12127_v3 }
 0x6b8   :  { %v7457_v6 = vpop.permute.xlu1 %7456  ;;  %6775 = vmax.xlane.f32.xlu1 %v6774_v34  ;;  %v12369_v34 = vmul.f32 %v11939_v14, %v7521_v50  ;;  %13754 = vst [vmem:[#allocation81_spill] sm:$0xff] %v12425_v29 }
 0x6b9   :  { %v12350_v39 = vmul.f32 %v11936_v12, %v7457_v6  ;;  %v12353_v43 = vmul.f32 %v11939_v14, %v7457_v6 }
 0x6ba   :  { %13743 = vst [vmem:[#allocation70_spill] sm:$0xff] %v12369_v34  ;;  %v7691_v50 = vmax.f32 %v12366_v52, %v12369_v34  ;;  %v12401_v34 = vmul.f32 %v11962_v17, %v12125_v62 }
 0x6bb   :  { %13738 = vst [vmem:[#allocation65_spill] sm:$0xff] %v12350_v39  ;;  %13739 = vst [vmem:[#allocation66_spill] sm:$0xff] %v12353_v43  ;;  %v7643_v6 = vmax.f32 %v12350_v39, %v12353_v43  ;;  %v7525_v39 = vpop.permute.xlu0 %7524 }
 0x6bc   :  { %7671 = vmax.xlane.f32.xlu1 %v7670_v51  ;;  %v12391_v51 = vmul.f32 %v11962_v17, %v12123_v32  ;;  %13748 = vst [vmem:[#allocation75_spill] sm:$0xff] %v12401_v34  ;;  %v12419_v36 = vmul.f32 %v11939_v14, %v7525_v39 }
 0x6bd   :  { %v12373_v18 = vpop.permute.xlu1 %6669  ;;  %7644 = vmax.xlane.f32.xlu0 %v7643_v6  ;;  %v12395_v6 = vmul.f32 %v11965_v60, %v12123_v32 }
 0x6be   :  { %13746 = vst [vmem:[#allocation73_spill] sm:$0xff] %v12391_v51  ;;  %13753 = vst [vmem:[#allocation80_spill] sm:$0xff] %v12419_v36 }
 0x6bf   :  { %13747 = vst [vmem:[#allocation74_spill] sm:$0xff] %v12395_v6  ;;  %v6825_v52 = vmax.f32 %v12391_v51, %v12395_v6  ;;  %v12429_v6 = vmul.f32 %v11939_v14, %v12127_v3 }
 0x6c0   :  { %6778 = vmax.xlane.f32.xlu1 %v6777_v7  ;;  %v12405_v7 = vmul.f32 %v11965_v60, %v12125_v62 }
 0x6c1   :  { %v12387_v43 = vpop.permute.xlu1 %6594  ;;  %7692 = vmax.xlane.f32.xlu0 %v7691_v50  ;;  %13755 = vst [vmem:[#allocation82_spill] sm:$0xff] %v12429_v6  ;;  %v7676_v3 = vmax.f32 %v12425_v29, %v12429_v6 }
 0x6c2   :  { %13749 = vst [vmem:[#allocation76_spill] sm:$0xff] %v12405_v7 }
 0x6c4   :  { %7626 = vmax.xlane.f32.xlu1 %v7625_v48  ;;  %v12416_v48 = vmul.f32 %v11936_v12, %v7525_v39 }
 0x6c6   :  { %v7461_v50 = vpop.permute.xlu1 %7460  ;;  %13752 = vst [vmem:[#allocation79_spill] sm:$0xff] %v12416_v48  ;;  %v7694_v39 = vmax.f32 %v12416_v48, %v12419_v36 }
 0x6c7   :  { %v12410_v32 = vmul.f32 %v11936_v12, %v7461_v50  ;;  %v12413_v35 = vmul.f32 %v11939_v14, %v7461_v50  ;;  %v7529_v50 = vpop.permute.xlu0 %7528 }
 0x6c8   :  { %6826 = vmax.xlane.f32.xlu1 %v6825_v52  ;;  %v6780_v52 = vmax.f32 %v12401_v34, %v12405_v7 }
 0x6c9   :  { %13750 = vst [vmem:[#allocation77_spill] sm:$0xff] %v12410_v32  ;;  %13751 = vst [vmem:[#allocation78_spill] sm:$0xff] %v12413_v35  ;;  %v7646_v62 = vmax.f32 %v12410_v32, %v12413_v35  ;;  %v12439_v35 = vmul.f32 %v11962_v17, %v12151_v55  ;;  %v12443_v32 = vmul.f32 %v11965_v60, %v12151_v55 }
 0x6cb   :  { %v12433_v51 = vpop.permute.xlu1 %6674  ;;  %7647 = vmax.xlane.f32.xlu0 %v7646_v62  ;;  %13756 = vst [vmem:[#allocation83_spill] sm:$0xff] %v12439_v35  ;;  %13757 = vst [vmem:[#allocation84_spill] sm:$0xff] %v12443_v32  ;;  %v7533_v7 = vpop.permute.xlu0 %7532  ;;  %v12451_v62 = vmul.f32 %v11936_v12, %v12155_v5  ;;  %v6783_v55 = vmax.f32 %v12439_v35, %v12443_v32  ;;  %v12476_v35 = vmul.f32 %v11936_v12, %v7529_v50 }
 0x6cc   :  { %6781 = vmax.xlane.f32.xlu1 %v6780_v52  ;;  %v12455_v52 = vmul.f32 %v11939_v14, %v12155_v5  ;;  %v12471_v5 = vmul.f32 %v11965_v60, %v12157_v37 }
 0x6cd   :  { %13761 = vst [vmem:[#allocation88_spill] sm:$0xff] %v12476_v35 }
 0x6ce   :  { %13758 = vst [vmem:[#allocation85_spill] sm:$0xff] %v12455_v52  ;;  %v7631_v32 = vmax.f32 %v12451_v62, %v12455_v52  ;;  %v12493_v52 = vmul.f32 %v11965_v60, %v12167_v40 }
 0x6cf   :  { %v12447_v8 = vpop.permute.xlu1 %6599  ;;  %7695 = vmax.xlane.f32.xlu0 %v7694_v39  ;;  %v7609_v36 = vpop.xlane.xlu0 %7608 }
 0x6d0   :  { %7677 = vmax.xlane.f32.xlu1 %v7676_v3  ;;  %v12467_v3 = vmul.f32 %v11962_v17, %v12157_v37  ;;  %v7704_v34 = vsub.f32 %v11945_v13, %v7609_v36  ;;  %v12489_v37 = vmul.f32 %v11962_v17, %v12167_v40 }
 0x6d2   :  { %v7769_v13 = vmul.f32 1.442695, %v7704_v34  ;;  %v6786_v40 = vmax.f32 %v12489_v37, %v12493_v52  ;;  %v12511_v34 = vmul.f32 %v11962_v17, %v12227_v49 }
 0x6d4   :  { %v7465_v48 = vpop.permute.xlu1 %7464  ;;  %6784 = vmax.xlane.f32.xlu1 %v6783_v55  ;;  %v12479_v55 = vmul.f32 %v11939_v14, %v7529_v50 }
 0x6d5   :  { %v12460_v6 = vmul.f32 %v11936_v12, %v7465_v48  ;;  %v12463_v39 = vmul.f32 %v11939_v14, %v7465_v48  ;;  %v7703_v48 = vsub.f32 %v11942_v63, %v7609_v36  ;;  %v6831_v63 = vmax.f32 %v12467_v3, %v12471_v5 }
 0x6d6   :  { %13762 = vst [vmem:[#allocation89_spill] sm:$0xff] %v12479_v55 }
 0x6d7   :  { %13759 = vst [vmem:[#allocation86_spill] sm:$0xff] %v12460_v6  ;;  %13760 = vst [vmem:[#allocation87_spill] sm:$0xff] %v12463_v39  ;;  %v7649_v29 = vmax.f32 %v12460_v6, %v12463_v39  ;;  %v7767_v50 = vmul.f32 1.442695, %v7703_v48  ;;  %v7697_v39 = vmax.f32 %v12476_v35, %v12479_v55  ;;  %v12539_v35 = vmul.f32 %v11965_v60, %v12263_v28 }
 0x6d8   :  { %7632 = vmax.xlane.f32.xlu1 %v7631_v32  ;;  %v12505_v32 = vmul.f32 %v11939_v14, %v12221_v44 }
 0x6d9   :  { %v12485_v15 = vpop.permute.xlu1 %6679  ;;  %7650 = vmax.xlane.f32.xlu0 %v7649_v29  ;;  %v12501_v29 = vmul.f32 %v11936_v12, %v12221_v44  ;;  %10856 = vpow2.f32 %v7767_v50  ;;  %v12526_v50 = vmul.f32 %v11936_v12, %v7533_v7 }
 0x6da   :  { %10858 = vpow2.f32 %v7769_v13  ;;  %v12529_v13 = vmul.f32 %v11939_v14, %v7533_v7 }
 0x6db   :  { %13765 = vst [vmem:[#allocation92_spill] sm:$0xff] %v12526_v50 }
 0x6dc   :  { %6832 = vmax.xlane.f32.xlu1 %v6831_v63  ;;  %v7682_v63 = vmax.f32 %v12501_v29, %v12505_v32  ;;  %13766 = vst [vmem:[#allocation93_spill] sm:$0xff] %v12529_v13 }
 0x6dd   :  { %v6605_v36 = vpop.permute.xlu1 %6604  ;;  %7698 = vmax.xlane.f32.xlu0 %v7697_v39  ;;  %v12515_v39 = vmul.f32 %v11965_v60, %v12227_v49 }
 0x6e0   :  { %6787 = vmax.xlane.f32.xlu1 %v6786_v40  ;;  %v12535_v40 = vmul.f32 %v11962_v17, %v12263_v28  ;;  %v12555_v28 = vmul.f32 %v11965_v60, %v12277_v25 }
 0x6e2   :  { %v7469_v48 = vpop.permute.xlu1 %7468 }
 0x6e3   :  { %v12520_v44 = vmul.f32 %v11936_v12, %v7469_v48  ;;  %v12523_v55 = vmul.f32 %v11939_v14, %v7469_v48  ;;  %v6789_v48 = vmax.f32 %v12511_v34, %v12515_v39  ;;  %v12543_v12 = vpop.eup %10856  ;;  %v7700_v14 = vmax.f32 %v12526_v50, %v12529_v13 }
 0x6e4   :  { %7683 = vmax.xlane.f32.xlu1 %v7682_v63  ;;  %13767 = vst [vmem:[#allocation94_spill] sm:$0xff] %v12543_v12  ;;  %v12547_v7 = vpop.eup %10858  ;;  %v12551_v63 = vmul.f32 %v11962_v17, %v12277_v25  ;;  %v12567_v13 = vmul.f32 %v11965_v60, %v12323_v42  ;;  %v12607_v50 = vmul.f32 %v11965_v60, %v12433_v51 }
 0x6e5   :  { %13763 = vst [vmem:[#allocation90_spill] sm:$0xff] %v12520_v44  ;;  %13764 = vst [vmem:[#allocation91_spill] sm:$0xff] %v12523_v55  ;;  %v7652_v49 = vmax.f32 %v12520_v44, %v12523_v55  ;;  %v6837_v55 = vmax.f32 %v12535_v40, %v12539_v35  ;;  %v12617_v44 = vmul.f32 %v11965_v60, %v12447_v8 }
 0x6e6   :  { %13768 = vst [vmem:[#allocation95_spill] sm:$0xff] %v12547_v7  ;;  %v6792_v25 = vmax.f32 %v12551_v63, %v12555_v28  ;;  %13774 = vst [vmem:[#allocation101_spill] sm:$0xff] %v12607_v50 }
 0x6e7   :  { %7653 = vmax.xlane.f32.xlu0 %v7652_v49  ;;  %v7895_v49 = vadd.f32 %v12547_v7, %v12543_v12  ;;  %v12597_v12 = vmul.f32 %v11965_v60, %v12387_v43  ;;  %13776 = vst [vmem:[#allocation103_spill] sm:$0xff] %v12617_v44 }
 0x6e8   :  { %6790 = vmax.xlane.f32.xlu1 %v6789_v48  ;;  %v12563_v48 = vmul.f32 %v11962_v17, %v12323_v42  ;;  %v12583_v42 = vmul.f32 %v11962_v17, %v12373_v18 }
 0x6e9   :  { %13772 = vst [vmem:[#allocation99_spill] sm:$0xff] %v12597_v12 }
 0x6ea   :  { %v6840_v7 = vmax.f32 %v12563_v48, %v12567_v13  ;;  %13769 = vst [vmem:[#allocation96_spill] sm:$0xff] %v12583_v42 }
 0x6eb   :  { %7701 = vmax.xlane.f32.xlu0 %v7700_v14  ;;  %v12573_v14 = vmul.f32 %v11962_v17, %v12337_v0 }
 0x6ec   :  { %6838 = vmax.xlane.f32.xlu1 %v6837_v55  ;;  %v12577_v55 = vmul.f32 %v11965_v60, %v12337_v0  ;;  %v12593_v0 = vmul.f32 %v11962_v17, %v12387_v43  ;;  %v12613_v43 = vmul.f32 %v11962_v17, %v12447_v8  ;;  %v12635_v8 = vmul.f32 %v11965_v60, %v6605_v36 }
 0x6ee   :  { %13771 = vst [vmem:[#allocation98_spill] sm:$0xff] %v12593_v0  ;;  %13775 = vst [vmem:[#allocation102_spill] sm:$0xff] %v12613_v43 }
 0x6ef   :  { %7896 = vadd.xlane.f32.xlu0 %v7895_v49  ;;  %v12587_v49 = vmul.f32 %v11965_v60, %v12373_v18  ;;  %v12603_v18 = vmul.f32 %v11962_v17, %v12433_v51  ;;  %v12623_v51 = vmul.f32 %v11962_v17, %v12485_v15  ;;  %13780 = vst [vmem:[#allocation107_spill] sm:$0xff] %v12635_v8 }
 0x6f0   :  { %6793 = vmax.xlane.f32.xlu1 %v6792_v25  ;;  %v6795_v25 = vmax.f32 %v12573_v14, %v12577_v55 }
 0x6f1   :  { %13770 = vst [vmem:[#allocation97_spill] sm:$0xff] %v12587_v49  ;;  %13773 = vst [vmem:[#allocation100_spill] sm:$0xff] %v12603_v18 }
 0x6f2   :  { %13777 = vst [vmem:[#allocation104_spill] sm:$0xff] %v12623_v51 }
 0x6f4   :  { %6841 = vmax.xlane.f32.xlu1 %v6840_v7  ;;  %v6843_v7 = vmax.f32 %v12583_v42, %v12587_v49 }
 0x6f8   :  { %6796 = vmax.xlane.f32.xlu1 %v6795_v25  ;;  %v6798_v25 = vmax.f32 %v12593_v0, %v12597_v12  ;;  %v12627_v12 = vmul.f32 %v11965_v60, %v12485_v15  ;;  %v12632_v0 = vmul.f32 %v11962_v17, %v6605_v36 }
 0x6fa   :  { %13778 = vst [vmem:[#allocation105_spill] sm:$0xff] %v12627_v12  ;;  %13779 = vst [vmem:[#allocation106_spill] sm:$0xff] %v12632_v0 }
 0x6fc   :  { %6844 = vmax.xlane.f32.xlu1 %v6843_v7  ;;  %v6846_v7 = vmax.f32 %v12603_v18, %v12607_v50  ;;  %v6685_v50 = vpop.permute.xlu1 %6684  ;;  %v6809_v18 = vpop.xlane.xlu0 %6808 }
 0x6fd   :  { %v12640_v6 = vmul.f32 %v11962_v17, %v6685_v50  ;;  %v12643_v15 = vmul.f32 %v11965_v60, %v6685_v50 }
 0x6ff   :  { %13781 = vst [vmem:[#allocation108_spill] sm:$0xff] %v12643_v15  ;;  %v6852_v36 = vmax.f32 %v12640_v6, %v12643_v15 }
 0x700   :  { %6799 = vmax.xlane.f32.xlu1 %v6798_v25  ;;  %v6801_v25 = vmax.f32 %v12613_v43, %v12617_v44  ;;  %v7612_v44 = vpop.xlane.xlu0 %7611 }
 0x704   :  { %6847 = vmax.xlane.f32.xlu1 %v6846_v7  ;;  %v6849_v7 = vmax.f32 %v12623_v51, %v12627_v12  ;;  %v6887_v12 = vsub.f32 %v11969_v19, %v6809_v18  ;;  %v6812_v51 = vpop.xlane.xlu0 %6811 }
 0x705   :  { %v6889_v15 = vsub.f32 %v11996_v23, %v6812_v51 }
 0x706   :  { %v6983_v43 = vmul.f32 1.442695, %v6887_v12 }
 0x708   :  { %6802 = vmax.xlane.f32.xlu1 %v6801_v25  ;;  %v6804_v25 = vmax.f32 %v12632_v0, %v12635_v8  ;;  %v12651_v49 = vpop.xlane.xlu0 %7662  ;;  %10860 = vpow2.f32 %v6983_v43  ;;  %v6890_v43 = vsub.f32 %v11999_v38, %v6812_v51 }
 0x70c   :  { %6850 = vmax.xlane.f32.xlu1 %v6849_v7  ;;  %v6888_v7 = vsub.f32 %v11972_v20, %v6809_v18 }
 0x70e   :  { %v6985_v8 = vmul.f32 1.442695, %v6888_v7 }
 0x710   :  { %6805 = vmax.xlane.f32.xlu1 %v6804_v25  ;;  %v7705_v25 = vsub.f32 %v11986_v9, %v7612_v44 }
 0x714   :  { %6853 = vmax.xlane.f32.xlu1 %v6852_v36  ;;  %v7706_v36 = vsub.f32 %v11989_v27, %v7612_v44  ;;  %v6987_v27 = vmul.f32 1.442695, %v6889_v15 }
 0x716   :  { %v7773_v7 = vmul.f32 1.442695, %v7706_v36 }
 0x719   :  { %v6761_v17 = vpop.xlane.xlu1 %6760 }
 0x71a   :  { %v6855_v60 = vsub.f32 %v12161_v61, %v6761_v17  ;;  %v6856_v50 = vsub.f32 %v12165_v54, %v6761_v17  ;;  %v7771_v61 = vmul.f32 1.442695, %v7705_v25  ;;  %v12660_v54 = vpop.xlane.xlu0 %6769 }
 0x71c   :  { %v6919_v0 = vmul.f32 1.442695, %v6855_v60  ;;  %v6921_v42 = vmul.f32 1.442695, %v6856_v50 }
 0x71d   :  { %v7657_v19 = vpop.xlane.xlu1 %7656 }
 0x71e   :  { %10862 = vpow2.f32 %v6919_v0  ;;  %v7735_v20 = vsub.f32 %v12171_v2, %v7657_v19  ;;  %v7736_v12 = vsub.f32 %v12175_v1, %v7657_v19  ;;  %v7739_v0 = vsub.f32 %v12019_v45, %v12651_v49  ;;  %v12667_v60 = vpop.xlane.xlu0 %7617 }
 0x71f   :  { %10864 = vpow2.f32 %v6921_v42  ;;  %v6989_v42 = vmul.f32 1.442695, %v6890_v43  ;;  %v7740_v45 = vsub.f32 %v12022_v46, %v12651_v49 }
 0x720   :  { %10866 = vpow2.f32 %v6985_v8  ;;  %v7831_v18 = vmul.f32 1.442695, %v7735_v20  ;;  %v7833_v9 = vmul.f32 1.442695, %v7736_v12  ;;  %v7839_v36 = vmul.f32 1.442695, %v7739_v0 }
 0x721   :  { %v6764_v17 = vpop.xlane.xlu1 %6763  ;;  %v7841_v43 = vmul.f32 1.442695, %v7740_v45 }
 0x722   :  { %10868 = vpow2.f32 %v7831_v18  ;;  %v6857_v23 = vsub.f32 %v12181_v4, %v6764_v17  ;;  %v6858_v44 = vsub.f32 %v12185_v16, %v6764_v17  ;;  %v12671_v4 = vpop.eup %10860  ;;  %v6861_v18 = vsub.f32 %v12028_v31, %v12660_v54 }
 0x723   :  { %10870 = vpow2.f32 %v7833_v9  ;;  %v6818_v9 = vpop.xlane.xlu0 %6817 }
 0x724   :  { %10872 = vpow2.f32 %v7771_v61  ;;  %v6923_v1 = vmul.f32 1.442695, %v6857_v23  ;;  %v6925_v2 = vmul.f32 1.442695, %v6858_v44 }
 0x725   :  { %10874 = vpow2.f32 %v7773_v7  ;;  %v7660_v8 = vpop.xlane.xlu1 %7659 }
 0x726   :  { %10876 = vpow2.f32 %v6987_v27  ;;  %v7737_v38 = vsub.f32 %v12199_v21, %v7660_v8  ;;  %v7738_v51 = vsub.f32 %v12203_v24, %v7660_v8 }
 0x727   :  { %10878 = vpow2.f32 %v6923_v1 }
 0x728   :  { %v12673_v16 = vpop.eup %10862  ;;  %10880 = vpow2.f32 %v6925_v2  ;;  %v7835_v15 = vmul.f32 1.442695, %v7737_v38  ;;  %v7837_v50 = vmul.f32 1.442695, %v7738_v51  ;;  %v7710_v38 = vsub.f32 %v12041_v59, %v12667_v60 }
 0x729   :  { %v12675_v25 = vpop.eup %10864  ;;  %10882 = vpow2.f32 %v6989_v42  ;;  %v6767_v19 = vpop.xlane.xlu1 %6766  ;;  %v6893_v51 = vsub.f32 %v12048_v33, %v6818_v9 }
 0x72a   :  { %v12679_v20 = vpop.eup %10866  ;;  %10884 = vpow2.f32 %v7835_v15  ;;  %v6859_v21 = vsub.f32 %v12215_v22, %v6767_v19  ;;  %v6860_v24 = vsub.f32 %v12219_v11, %v6767_v19  ;;  %v7047_v12 = vadd.f32 %v12675_v25, %v12673_v16  ;;  %v12707_v42 = vpop.xlane.xlu0 %7668 }
 0x72b   :  { %10886 = vpow2.f32 %v7837_v50  ;;  %v6862_v22 = vsub.f32 %v12031_v57, %v12660_v54  ;;  %v7095_v17 = vadd.f32 %v12679_v20, %v12671_v4  ;;  %v6931_v57 = vmul.f32 1.442695, %v6861_v18 }
 0x72c   :  { %v12685_v61 = vpop.eup %10868  ;;  %v6927_v46 = vmul.f32 1.442695, %v6859_v21  ;;  %v6929_v49 = vmul.f32 1.442695, %v6860_v24  ;;  %7048 = vadd.xlane.f32.xlu1 %v7047_v12  ;;  %10888 = vpow2.f32 %v7839_v36  ;;  %v7709_v54 = vsub.f32 %v12038_v58, %v12667_v60 }
 0x72d   :  { %v12689_v7 = vpop.eup %10870  ;;  %v7615_v11 = vpop.xlane.xlu1 %7614  ;;  %v6894_v21 = vsub.f32 %v12051_v47, %v6818_v9  ;;  %v7781_v18 = vmul.f32 1.442695, %v7710_v38  ;;  %v13785_v38 = vld [vmem:[#allocation52_spill] sm:$0xff] }
 0x72e   :  { %v12695_v27 = vpop.eup %10872  ;;  %10890 = vpow2.f32 %v6927_v46  ;;  %v7707_v31 = vsub.f32 %v12231_v56, %v7615_v11  ;;  %v7708_v23 = vsub.f32 %v12235_v30, %v7615_v11  ;;  %v7943_v44 = vadd.f32 %v12689_v7, %v12685_v61  ;;  %v12727_v24 = vpop.xlane.xlu0 %7623 }
 0x72f   :  { %v12701_v1 = vpop.eup %10874  ;;  %10892 = vpow2.f32 %v6929_v49  ;;  %v6933_v30 = vmul.f32 1.442695, %v6862_v22  ;;  %v7779_v60 = vmul.f32 1.442695, %v7709_v54  ;;  %v6995_v46 = vmul.f32 1.442695, %v6893_v51 }
 0x730   :  { %v12703_v2 = vpop.eup %10876  ;;  %v7775_v0 = vmul.f32 1.442695, %v7707_v31  ;;  %v7777_v8 = vmul.f32 1.442695, %v7708_v23  ;;  %7944 = vadd.xlane.f32.xlu0 %v7943_v44  ;;  %7096 = vadd.xlane.f32.xlu1 %v7095_v17  ;;  %10894 = vpow2.f32 %v7841_v43  ;;  %v7898_v36 = vadd.f32 %v12701_v1, %v12695_v27  ;;  %v13782_v49 = vld [vmem:[#allocation51_spill] sm:$0xff]  ;;  %v13784_v31 = vld [vmem:[#allocation29_spill] sm:$0xff] }
 0x731   :  { %v12709_v56 = vpop.eup %10878  ;;  %v6815_v15 = vpop.xlane.xlu1 %6814  ;;  %v6997_v17 = vmul.f32 1.442695, %v6894_v21  ;;  %v7743_v23 = vsub.f32 %v13784_v31, %v12707_v42 }
 0x732   :  { %v12714_v50 = vpop.eup %10880  ;;  %10896 = vpow2.f32 %v7775_v0  ;;  %v6891_v58 = vsub.f32 %v12247_v10, %v6815_v15  ;;  %v6892_v45 = vsub.f32 %v12251_v26, %v6815_v15  ;;  %v13786_v15 = vld [vmem:[#allocation53_spill] sm:$0xff] }
 0x733   :  { %v12720_v19 = vpop.eup %10882  ;;  %10898 = vpow2.f32 %v7777_v8  ;;  %v7050_v59 = vadd.f32 %v12714_v50, %v12709_v56  ;;  %v7847_v21 = vmul.f32 1.442695, %v7743_v23 }
 0x734   :  { %v12725_v33 = vpop.eup %10884  ;;  %10900 = vpow2.f32 %v6931_v57  ;;  %v6991_v10 = vmul.f32 1.442695, %v6891_v58  ;;  %v6993_v12 = vmul.f32 1.442695, %v6892_v45  ;;  %7899 = vadd.xlane.f32.xlu0 %v7898_v36  ;;  %v7098_v44 = vadd.f32 %v12720_v19, %v12703_v2 }
 0x735   :  { %v12729_v26 = vpop.eup %10886  ;;  %10902 = vpow2.f32 %v6933_v30  ;;  %7051 = vadd.xlane.f32.xlu1 %v7050_v59  ;;  %v7666_v47 = vpop.xlane.xlu1 %7665 }
 0x736   :  { %10904 = vpow2.f32 %v6991_v10  ;;  %v7741_v9 = vsub.f32 %v12267_v41, %v7666_v47  ;;  %v7742_v43 = vsub.f32 %v13782_v49, %v7666_v47  ;;  %v7946_v22 = vadd.f32 %v12729_v26, %v12725_v33  ;;  %v12735_v11 = vpop.eup %10888  ;;  %v12745_v30 = vpop.xlane.xlu0 %6823  ;;  %v13790_v49 = vld [vmem:[#allocation31_spill] sm:$0xff] }
 0x737   :  { %13783 = vst [vmem:[#allocation51_spill] sm:$0xff] %v12735_v11  ;;  %10906 = vpow2.f32 %v6993_v12  ;;  %v13788_v12 = vld [vmem:[#allocation30_spill] sm:$0xff] }
 0x738   :  { %v12741_v57 = vpop.eup %10890  ;;  %10908 = vpow2.f32 %v7779_v60  ;;  %v7843_v54 = vmul.f32 1.442695, %v7741_v9  ;;  %7947 = vadd.xlane.f32.xlu0 %v7946_v22  ;;  %v7845_v0 = vmul.f32 1.442695, %v7742_v43  ;;  %v7713_v43 = vsub.f32 %v13790_v49, %v12727_v24 }
 0x739   :  { %v12743_v41 = vpop.eup %10892  ;;  %10910 = vpow2.f32 %v7781_v18  ;;  %7099 = vadd.xlane.f32.xlu1 %v7098_v44  ;;  %v6773_v8 = vpop.xlane.xlu1 %6772  ;;  %v7744_v18 = vsub.f32 %v13788_v12, %v12707_v42 }
 0x73a   :  { %10912 = vpow2.f32 %v6995_v46  ;;  %v6863_v51 = vsub.f32 %v13785_v38, %v6773_v8  ;;  %v6864_v58 = vsub.f32 %v13786_v15, %v6773_v8  ;;  %v7053_v45 = vadd.f32 %v12743_v41, %v12741_v57  ;;  %v12751_v36 = vpop.eup %10894 }
 0x73b   :  { %13787 = vst [vmem:[#allocation29_spill] sm:$0xff] %v12751_v36  ;;  %10914 = vpow2.f32 %v6997_v17  ;;  %v13791_v17 = vld [vmem:[#allocation54_spill] sm:$0xff]  ;;  %v7787_v12 = vmul.f32 1.442695, %v7713_v43 }
 0x73c   :  { %v12753_v59 = vpop.eup %10896  ;;  %10916 = vpow2.f32 %v7843_v54  ;;  %v6935_v60 = vmul.f32 1.442695, %v6863_v51  ;;  %v6937_v46 = vmul.f32 1.442695, %v6864_v58  ;;  %v12771_v54 = vpop.xlane.xlu0 %7674  ;;  %v7849_v51 = vmul.f32 1.442695, %v7744_v18 }
 0x73d   :  { %v12755_v10 = vpop.eup %10898  ;;  %10918 = vpow2.f32 %v7845_v0  ;;  %7054 = vadd.xlane.f32.xlu1 %v7053_v45  ;;  %v7621_v47 = vpop.xlane.xlu1 %7620  ;;  %v7949_v45 = vadd.f32 %v12751_v36, %v12735_v11  ;;  %v13799_v18 = vld [vmem:[#allocation33_spill] sm:$0xff] }
 0x73e   :  { %v12759_v9 = vpop.eup %10900  ;;  %v7711_v22 = vsub.f32 %v12291_v53, %v7621_v47  ;;  %v7712_v31 = vsub.f32 %v13791_v17, %v7621_v47  ;;  %v7901_v23 = vadd.f32 %v12755_v10, %v12753_v59  ;;  %10920 = vpow2.f32 %v7847_v21  ;;  %v13794_v53 = vld [vmem:[#allocation32_spill] sm:$0xff]  ;;  %v13796_v47 = vld [vmem:[#allocation59_spill] sm:$0xff] }
 0x73f   :  { %13789 = vst [vmem:[#allocation52_spill] sm:$0xff] %v12759_v9  ;;  %v12767_v44 = vpop.eup %10902  ;;  %10922 = vpow2.f32 %v6935_v60  ;;  %v7714_v15 = vsub.f32 %v13794_v53, %v12727_v24  ;;  %v13797_v60 = vld [vmem:[#allocation60_spill] sm:$0xff]  ;;  %v6897_v24 = vsub.f32 %v13799_v18, %v12745_v30 }
 0x740   :  { %13792 = vst [vmem:[#allocation53_spill] sm:$0xff] %v12767_v44  ;;  %v12769_v42 = vpop.eup %10904  ;;  %v7783_v0 = vmul.f32 1.442695, %v7711_v22  ;;  %v7785_v8 = vmul.f32 1.442695, %v7712_v31  ;;  %7902 = vadd.xlane.f32.xlu0 %v7901_v23  ;;  %10924 = vpow2.f32 %v6937_v46  ;;  %v12791_v23 = vpop.xlane.xlu0 %7629 }
 0x741   :  { %v12773_v38 = vpop.eup %10906  ;;  %v6821_v58 = vpop.xlane.xlu1 %6820 }
 0x742   :  { %13793 = vst [vmem:[#allocation30_spill] sm:$0xff] %v12773_v38  ;;  %v12779_v21 = vpop.eup %10908  ;;  %v6895_v49 = vsub.f32 %v13796_v47, %v6821_v58  ;;  %v6896_v22 = vsub.f32 %v13797_v60, %v6821_v58  ;;  %v7101_v17 = vadd.f32 %v12773_v38, %v12769_v42  ;;  %10926 = vpow2.f32 %v7783_v0  ;;  %v13802_v60 = vld [vmem:[#allocation34_spill] sm:$0xff]  ;;  %v13804_v38 = vld [vmem:[#allocation61_spill] sm:$0xff] }
 0x743   :  { %13795 = vst [vmem:[#allocation31_spill] sm:$0xff] %v12779_v21  ;;  %v12785_v31 = vpop.eup %10910  ;;  %10928 = vpow2.f32 %v7785_v8  ;;  %v7789_v58 = vmul.f32 1.442695, %v7714_v15  ;;  %v6898_v36 = vsub.f32 %v13802_v60, %v12745_v30  ;;  %v7056_v0 = vadd.f32 %v12767_v44, %v12759_v9  ;;  %v13807_v30 = vld [vmem:[#allocation35_spill] sm:$0xff] }
 0x744   :  { %13798 = vst [vmem:[#allocation54_spill] sm:$0xff] %v12785_v31  ;;  %v12789_v46 = vpop.eup %10912  ;;  %v6999_v53 = vmul.f32 1.442695, %v6895_v49  ;;  %v7001_v43 = vmul.f32 1.442695, %v6896_v22  ;;  %7102 = vadd.xlane.f32.xlu1 %v7101_v17  ;;  %7950 = vadd.xlane.f32.xlu0 %v7949_v45  ;;  %10930 = vpow2.f32 %v7849_v51  ;;  %v13805_v49 = vld [vmem:[#allocation62_spill] sm:$0xff]  ;;  %v7904_v45 = vadd.f32 %v12785_v31, %v12779_v21  ;;  %v12817_v21 = vpop.xlane.xlu0 %6829 }
 0x745   :  { %13800 = vst [vmem:[#allocation32_spill] sm:$0xff] %v12789_v46  ;;  %v12793_v47 = vpop.eup %10914  ;;  %v6776_v11 = vpop.xlane.xlu1 %6775  ;;  %10932 = vpow2.f32 %v7787_v12  ;;  %v7003_v51 = vmul.f32 1.442695, %v6897_v24  ;;  %v7747_v15 = vsub.f32 %v13807_v30, %v12771_v54 }
 0x746   :  { %13801 = vst [vmem:[#allocation59_spill] sm:$0xff] %v12793_v47  ;;  %v12799_v18 = vpop.eup %10916  ;;  %v6865_v8 = vsub.f32 %v13804_v38, %v6776_v11  ;;  %v6866_v22 = vsub.f32 %v13805_v49, %v6776_v11  ;;  %10934 = vpow2.f32 %v6999_v53  ;;  %v7005_v38 = vmul.f32 1.442695, %v6898_v36  ;;  %v13809_v11 = vld [vmem:[#allocation36_spill] sm:$0xff] }
 0x747   :  { %13803 = vst [vmem:[#allocation60_spill] sm:$0xff] %v12799_v18  ;;  %v12805_v17 = vpop.eup %10918  ;;  %10936 = vpow2.f32 %v7001_v43  ;;  %v7748_v49 = vsub.f32 %v13809_v11, %v12771_v54  ;;  %v7104_v24 = vadd.f32 %v12793_v47, %v12789_v46  ;;  %v13811_v43 = vld [vmem:[#allocation63_spill] sm:$0xff]  ;;  %v7855_v54 = vmul.f32 1.442695, %v7747_v15 }
 0x748   :  { %13806 = vst [vmem:[#allocation33_spill] sm:$0xff] %v12805_v17  ;;  %v6939_v60 = vmul.f32 1.442695, %v6865_v8  ;;  %v6941_v44 = vmul.f32 1.442695, %v6866_v22  ;;  %7057 = vadd.xlane.f32.xlu1 %v7056_v0  ;;  %7905 = vadd.xlane.f32.xlu0 %v7904_v45  ;;  %v12809_v12 = vpop.eup %10920  ;;  %10938 = vpow2.f32 %v7789_v58  ;;  %v13812_v0 = vld [vmem:[#allocation64_spill] sm:$0xff]  ;;  %v7952_v58 = vadd.f32 %v12805_v17, %v12799_v18 }
 0x749   :  { %13808 = vst [vmem:[#allocation34_spill] sm:$0xff] %v12809_v12  ;;  %v7672_v31 = vpop.xlane.xlu1 %7671  ;;  %v12815_v53 = vpop.eup %10922  ;;  %v13817_v17 = vld [vmem:[#allocation67_spill] sm:$0xff] }
 0x74a   :  { %13810 = vst [vmem:[#allocation61_spill] sm:$0xff] %v12815_v53  ;;  %10940 = vpow2.f32 %v6939_v60  ;;  %v7745_v8 = vsub.f32 %v13811_v43, %v7672_v31  ;;  %v7746_v22 = vsub.f32 %v13812_v0, %v7672_v31  ;;  %v12823_v36 = vpop.eup %10924  ;;  %v7857_v60 = vmul.f32 1.442695, %v7748_v49  ;;  %v13815_v43 = vld [vmem:[#allocation37_spill] sm:$0xff] }
 0x74b   :  { %13813 = vst [vmem:[#allocation62_spill] sm:$0xff] %v12823_v36  ;;  %10942 = vpow2.f32 %v6941_v44  ;;  %v7717_v47 = vsub.f32 %v13815_v43, %v12791_v23  ;;  %v13818_v44 = vld [vmem:[#allocation68_spill] sm:$0xff]  ;;  %v7059_v15 = vadd.f32 %v12823_v36, %v12815_v53 }
 0x74c   :  { %10944 = vpow2.f32 %v7003_v51  ;;  %v7851_v45 = vmul.f32 1.442695, %v7745_v8  ;;  %v7853_v30 = vmul.f32 1.442695, %v7746_v22  ;;  %7953 = vadd.xlane.f32.xlu0 %v7952_v58  ;;  %7105 = vadd.xlane.f32.xlu1 %v7104_v24  ;;  %v12825_v11 = vpop.eup %10926  ;;  %v13821_v24 = vld [vmem:[#allocation38_spill] sm:$0xff]  ;;  %v12843_v58 = vpop.xlane.xlu0 %7680 }
 0x74d   :  { %13814 = vst [vmem:[#allocation35_spill] sm:$0xff] %v12825_v11  ;;  %10946 = vpow2.f32 %v7005_v38  ;;  %v6779_v31 = vpop.xlane.xlu1 %6778  ;;  %v12829_v0 = vpop.eup %10928  ;;  %v7718_v22 = vsub.f32 %v13821_v24, %v12791_v23  ;;  %v13826_v23 = vld [vmem:[#allocation72_spill] sm:$0xff] }
 0x74e   :  { %13816 = vst [vmem:[#allocation36_spill] sm:$0xff] %v12829_v0  ;;  %10948 = vpow2.f32 %v7851_v45  ;;  %v6867_v18 = vsub.f32 %v13817_v17, %v6779_v31  ;;  %v6868_v51 = vsub.f32 %v13818_v44, %v6779_v31  ;;  %v12835_v8 = vpop.eup %10930  ;;  %v7907_v38 = vadd.f32 %v12829_v0, %v12825_v11 }
 0x74f   :  { %13819 = vst [vmem:[#allocation63_spill] sm:$0xff] %v12835_v8  ;;  %10950 = vpow2.f32 %v7853_v30  ;;  %v12839_v49 = vpop.eup %10932  ;;  %v7795_v31 = vmul.f32 1.442695, %v7717_v47  ;;  %v13823_v30 = vld [vmem:[#allocation39_spill] sm:$0xff]  ;;  %v7955_v47 = vadd.f32 %v12835_v8, %v12809_v12 }
 0x750   :  { %13820 = vst [vmem:[#allocation64_spill] sm:$0xff] %v12839_v49  ;;  %10952 = vpow2.f32 %v7855_v54  ;;  %v6943_v17 = vmul.f32 1.442695, %v6867_v18  ;;  %v6945_v45 = vmul.f32 1.442695, %v6868_v51  ;;  %7060 = vadd.xlane.f32.xlu1 %v7059_v15  ;;  %v12845_v43 = vpop.eup %10934  ;;  %v6901_v44 = vsub.f32 %v13823_v30, %v12817_v21  ;;  %7908 = vadd.xlane.f32.xlu0 %v7907_v38  ;;  %v13825_v54 = vld [vmem:[#allocation71_spill] sm:$0xff] }
 0x751   :  { %13822 = vst [vmem:[#allocation37_spill] sm:$0xff] %v12845_v43  ;;  %10954 = vpow2.f32 %v7857_v60  ;;  %v7627_v0 = vpop.xlane.xlu1 %7626  ;;  %v12849_v11 = vpop.eup %10936  ;;  %v7797_v51 = vmul.f32 1.442695, %v7718_v22  ;;  %v13829_v15 = vld [vmem:[#allocation40_spill] sm:$0xff]  ;;  %v13833_v22 = vld [vmem:[#allocation73_spill] sm:$0xff] }
 0x752   :  { %13824 = vst [vmem:[#allocation67_spill] sm:$0xff] %v12849_v11  ;;  %10956 = vpow2.f32 %v6943_v17  ;;  %v7715_v36 = vsub.f32 %v13825_v54, %v7627_v0  ;;  %v7716_v24 = vsub.f32 %v13826_v23, %v7627_v0  ;;  %v12853_v53 = vpop.eup %10938  ;;  %v7107_v18 = vadd.f32 %v12849_v11, %v12845_v43  ;;  %v12863_v17 = vpop.xlane.xlu0 %7635  ;;  %v13831_v23 = vld [vmem:[#allocation41_spill] sm:$0xff] }
 0x753   :  { %13827 = vst [vmem:[#allocation68_spill] sm:$0xff] %v12853_v53  ;;  %10958 = vpow2.f32 %v6945_v45  ;;  %v6902_v38 = vsub.f32 %v13829_v15, %v12817_v21  ;;  %v7011_v45 = vmul.f32 1.442695, %v6901_v44  ;;  %v7751_v11 = vsub.f32 %v13831_v23, %v12843_v58  ;;  %v13834_v21 = vld [vmem:[#allocation74_spill] sm:$0xff] }
 0x754   :  { %v12859_v60 = vpop.eup %10940  ;;  %v7791_v30 = vmul.f32 1.442695, %v7715_v36  ;;  %v7793_v54 = vmul.f32 1.442695, %v7716_v24  ;;  %10960 = vpow2.f32 %v7795_v31  ;;  %7108 = vadd.xlane.f32.xlu1 %v7107_v18  ;;  %7956 = vadd.xlane.f32.xlu0 %v7955_v47  ;;  %v7910_v31 = vadd.f32 %v12853_v53, %v12839_v49 }
 0x755   :  { %13828 = vst [vmem:[#allocation38_spill] sm:$0xff] %v12859_v60  ;;  %v12865_v0 = vpop.eup %10942  ;;  %v6827_v8 = vpop.xlane.xlu1 %6826  ;;  %v7013_v18 = vmul.f32 1.442695, %v6902_v38  ;;  %v13842_v38 = vld [vmem:[#allocation76_spill] sm:$0xff] }
 0x756   :  { %13830 = vst [vmem:[#allocation39_spill] sm:$0xff] %v12865_v0  ;;  %v12869_v12 = vpop.eup %10944  ;;  %10962 = vpow2.f32 %v7791_v30  ;;  %v6899_v43 = vsub.f32 %v13833_v22, %v6827_v8  ;;  %v6900_v15 = vsub.f32 %v13834_v21, %v6827_v8  ;;  %v7062_v36 = vadd.f32 %v12865_v0, %v12859_v60  ;;  %v13838_v8 = vld [vmem:[#allocation42_spill] sm:$0xff]  ;;  %v13839_v0 = vld [vmem:[#allocation43_spill] sm:$0xff]  ;;  %v6836_v49 = vpop.xlane.xlu0 %6835 }
 0x757   :  { %13832 = vst [vmem:[#allocation71_spill] sm:$0xff] %v12869_v12  ;;  %v12875_v24 = vpop.eup %10946  ;;  %10964 = vpow2.f32 %v7793_v54  ;;  %v7752_v22 = vsub.f32 %v13838_v8, %v12843_v58  ;;  %v7863_v21 = vmul.f32 1.442695, %v7751_v11  ;;  %v7721_v60 = vsub.f32 %v13839_v0, %v12863_v17  ;;  %v13846_v8 = vld [vmem:[#allocation44_spill] sm:$0xff] }
 0x758   :  { %13835 = vst [vmem:[#allocation72_spill] sm:$0xff] %v12875_v24  ;;  %v12879_v44 = vpop.eup %10948  ;;  %10966 = vpow2.f32 %v7797_v51  ;;  %v7007_v47 = vmul.f32 1.442695, %v6899_v43  ;;  %v7009_v23 = vmul.f32 1.442695, %v6900_v15  ;;  %7063 = vadd.xlane.f32.xlu1 %v7062_v36  ;;  %7911 = vadd.xlane.f32.xlu0 %v7910_v31  ;;  %v13841_v51 = vld [vmem:[#allocation75_spill] sm:$0xff]  ;;  %v7110_v11 = vadd.f32 %v12875_v24, %v12869_v12 }
 0x759   :  { %13836 = vst [vmem:[#allocation40_spill] sm:$0xff] %v12879_v44  ;;  %v12881_v30 = vpop.eup %10950  ;;  %10968 = vpow2.f32 %v7011_v45  ;;  %v6782_v54 = vpop.xlane.xlu1 %6781  ;;  %v13848_v24 = vld [vmem:[#allocation82_spill] sm:$0xff] }
 0x75a   :  { %13837 = vst [vmem:[#allocation41_spill] sm:$0xff] %v12881_v30  ;;  %v12887_v53 = vpop.eup %10952  ;;  %10970 = vpow2.f32 %v7007_v47  ;;  %v6869_v43 = vsub.f32 %v13841_v51, %v6782_v54  ;;  %v6870_v15 = vsub.f32 %v13842_v38, %v6782_v54  ;;  %v7958_v45 = vadd.f32 %v12881_v30, %v12879_v44  ;;  %v13847_v30 = vld [vmem:[#allocation81_spill] sm:$0xff] }
 0x75b   :  { %13840 = vst [vmem:[#allocation73_spill] sm:$0xff] %v12887_v53  ;;  %v12893_v46 = vpop.eup %10954  ;;  %10972 = vpow2.f32 %v7009_v23  ;;  %v7865_v47 = vmul.f32 1.442695, %v7752_v22  ;;  %v7722_v54 = vsub.f32 %v13846_v8, %v12863_v17  ;;  %v7803_v38 = vmul.f32 1.442695, %v7721_v60  ;;  %v7639_v23 = vpop.xlane.xlu0 %7638 }
 0x75c   :  { %13843 = vst [vmem:[#allocation74_spill] sm:$0xff] %v12893_v46  ;;  %v12897_v58 = vpop.eup %10956  ;;  %10974 = vpow2.f32 %v7013_v18  ;;  %v6947_v0 = vmul.f32 1.442695, %v6869_v43  ;;  %v6949_v36 = vmul.f32 1.442695, %v6870_v15  ;;  %7959 = vadd.xlane.f32.xlu0 %v7958_v45  ;;  %7111 = vadd.xlane.f32.xlu1 %v7110_v11  ;;  %v13849_v15 = vld [vmem:[#allocation45_spill] sm:$0xff] }
 0x75d   :  { %13844 = vst [vmem:[#allocation42_spill] sm:$0xff] %v12897_v58  ;;  %v12899_v31 = vpop.eup %10958  ;;  %10976 = vpow2.f32 %v7863_v21  ;;  %v7678_v51 = vpop.xlane.xlu1 %7677  ;;  %v6905_v21 = vsub.f32 %v13849_v15, %v6836_v49  ;;  %v7805_v60 = vmul.f32 1.442695, %v7722_v54  ;;  %v13855_v15 = vld [vmem:[#allocation84_spill] sm:$0xff]  ;;  %v13856_v54 = vld [vmem:[#allocation47_spill] sm:$0xff] }
 0x75e   :  { %13845 = vst [vmem:[#allocation43_spill] sm:$0xff] %v12899_v31  ;;  %v7749_v44 = vsub.f32 %v13847_v30, %v7678_v51  ;;  %v7750_v12 = vsub.f32 %v13848_v24, %v7678_v51  ;;  %v7065_v18 = vadd.f32 %v12899_v31, %v12897_v58  ;;  %v12907_v43 = vpop.eup %10960  ;;  %10978 = vpow2.f32 %v6947_v0  ;;  %v13852_v30 = vld [vmem:[#allocation46_spill] sm:$0xff]  ;;  %v13854_v31 = vld [vmem:[#allocation83_spill] sm:$0xff] }
 0x75f   :  { %10980 = vpow2.f32 %v6949_v36  ;;  %v6906_v8 = vsub.f32 %v13852_v30, %v6836_v49  ;;  %v7723_v49 = vsub.f32 %v13856_v54, %v7639_v23 }
 0x760   :  { %v12910_v22 = vpop.eup %10962  ;;  %v7859_v17 = vmul.f32 1.442695, %v7749_v44  ;;  %v7861_v45 = vmul.f32 1.442695, %v7750_v12  ;;  %10982 = vpow2.f32 %v7865_v47  ;;  %7066 = vadd.xlane.f32.xlu1 %v7065_v18  ;;  %v7019_v12 = vmul.f32 1.442695, %v6905_v21  ;;  %v7687_v18 = vpop.xlane.xlu0 %7686 }
 0x761   :  { %13850 = vst [vmem:[#allocation75_spill] sm:$0xff] %v12910_v22  ;;  %v12912_v11 = vpop.eup %10964  ;;  %v6785_v24 = vpop.xlane.xlu1 %6784  ;;  %10984 = vpow2.f32 %v7803_v38  ;;  %v7961_v21 = vadd.f32 %v12893_v46, %v12887_v53 }
 0x762   :  { %13851 = vst [vmem:[#allocation76_spill] sm:$0xff] %v12912_v11  ;;  %v12915_v51 = vpop.eup %10966  ;;  %v6871_v58 = vsub.f32 %v13854_v31, %v6785_v24  ;;  %v6872_v0 = vsub.f32 %v13855_v15, %v6785_v24  ;;  %v7913_v36 = vadd.f32 %v12912_v11, %v12910_v22  ;;  %10986 = vpow2.f32 %v7859_v17  ;;  %v13857_v24 = vld [vmem:[#allocation48_spill] sm:$0xff]  ;;  %v13859_v22 = vld [vmem:[#allocation85_spill] sm:$0xff] }
 0x763   :  { %13853 = vst [vmem:[#allocation44_spill] sm:$0xff] %v12915_v51  ;;  %v12921_v44 = vpop.eup %10968  ;;  %10988 = vpow2.f32 %v7861_v45  ;;  %v7021_v31 = vmul.f32 1.442695, %v6906_v8  ;;  %v7724_v15 = vsub.f32 %v13857_v24, %v7639_v23 }
 0x764   :  { %v12923_v47 = vpop.eup %10970  ;;  %v6951_v30 = vmul.f32 1.442695, %v6871_v58  ;;  %v6953_v9 = vmul.f32 1.442695, %v6872_v0  ;;  %7914 = vadd.xlane.f32.xlu0 %v7913_v36  ;;  %10990 = vpow2.f32 %v7805_v60  ;;  %v7807_v60 = vmul.f32 1.442695, %v7723_v49  ;;  %v7642_v23 = vpop.xlane.xlu0 %7641 }
 0x765   :  { %v12926_v38 = vpop.eup %10972  ;;  %v7633_v11 = vpop.xlane.xlu1 %7632 }
 0x766   :  { %v12931_v17 = vpop.eup %10974  ;;  %10992 = vpow2.f32 %v6951_v30  ;;  %v7719_v54 = vsub.f32 %v12451_v62, %v7633_v11  ;;  %v7720_v45 = vsub.f32 %v13859_v22, %v7633_v11  ;;  %v7113_v58 = vadd.f32 %v12926_v38, %v12923_v47  ;;  %v13860_v62 = vld [vmem:[#allocation49_spill] sm:$0xff] }
 0x767   :  { %13858 = vst [vmem:[#allocation81_spill] sm:$0xff] %v12931_v17  ;;  %v12937_v0 = vpop.eup %10976  ;;  %10994 = vpow2.f32 %v6953_v9  ;;  %v7809_v30 = vmul.f32 1.442695, %v7724_v15  ;;  %v7755_v46 = vsub.f32 %v13860_v62, %v7687_v18 }
 0x768   :  { %10996 = vpow2.f32 %v7019_v12  ;;  %v7799_v8 = vmul.f32 1.442695, %v7719_v54  ;;  %v7801_v36 = vmul.f32 1.442695, %v7720_v45  ;;  %7114 = vadd.xlane.f32.xlu1 %v7113_v58  ;;  %7962 = vadd.xlane.f32.xlu0 %v7961_v21  ;;  %v12939_v24 = vpop.eup %10978  ;;  %v7916_v12 = vadd.f32 %v12915_v51, %v12907_v43  ;;  %v13864_v21 = vld [vmem:[#allocation50_spill] sm:$0xff]  ;;  %v7690_v51 = vpop.xlane.xlu0 %7689 }
 0x769   :  { %10998 = vpow2.f32 %v7021_v31  ;;  %v6833_v22 = vpop.xlane.xlu1 %6832  ;;  %v12942_v11 = vpop.eup %10980  ;;  %v7756_v54 = vsub.f32 %v13864_v21, %v7687_v18 }
 0x76a   :  { %13861 = vst [vmem:[#allocation82_spill] sm:$0xff] %v12942_v11  ;;  %11000 = vpow2.f32 %v7799_v8  ;;  %v6903_v53 = vsub.f32 %v12467_v3, %v6833_v22  ;;  %v6904_v9 = vsub.f32 %v12471_v5, %v6833_v22  ;;  %v12948_v49 = vpop.eup %10982  ;;  %v7068_v31 = vadd.f32 %v12942_v11, %v12939_v24  ;;  %v13866_v8 = vld [vmem:[#allocation55_spill] sm:$0xff] }
 0x76b   :  { %13862 = vst [vmem:[#allocation45_spill] sm:$0xff] %v12948_v49  ;;  %11002 = vpow2.f32 %v7801_v36  ;;  %v12952_v15 = vpop.eup %10984  ;;  %v7871_v5 = vmul.f32 1.442695, %v7755_v46  ;;  %v7725_v62 = vsub.f32 %v13866_v8, %v7642_v23  ;;  %v7116_v46 = vadd.f32 %v12931_v17, %v12921_v44 }
 0x76c   :  { %13863 = vst [vmem:[#allocation46_spill] sm:$0xff] %v12952_v15  ;;  %11004 = vpow2.f32 %v7807_v60  ;;  %v7015_v45 = vmul.f32 1.442695, %v6903_v53  ;;  %v7017_v58 = vmul.f32 1.442695, %v6904_v9  ;;  %7917 = vadd.xlane.f32.xlu0 %v7916_v12  ;;  %v12955_v3 = vpop.eup %10986  ;;  %7069 = vadd.xlane.f32.xlu1 %v7068_v31  ;;  %v13869_v12 = vld [vmem:[#allocation56_spill] sm:$0xff] }
 0x76d   :  { %13865 = vst [vmem:[#allocation83_spill] sm:$0xff] %v12955_v3  ;;  %11006 = vpow2.f32 %v7809_v30  ;;  %v6788_v22 = vpop.xlane.xlu1 %6787  ;;  %v12958_v36 = vpop.eup %10988  ;;  %v7873_v9 = vmul.f32 1.442695, %v7756_v54  ;;  %v7726_v31 = vsub.f32 %v13869_v12, %v7642_v23  ;;  %v13874_v12 = vld [vmem:[#allocation58_spill] sm:$0xff] }
 0x76e   :  { %13867 = vst [vmem:[#allocation84_spill] sm:$0xff] %v12958_v36  ;;  %11008 = vpow2.f32 %v7015_v45  ;;  %v6873_v11 = vsub.f32 %v12489_v37, %v6788_v22  ;;  %v6874_v60 = vsub.f32 %v12493_v52, %v6788_v22  ;;  %v12962_v18 = vpop.eup %10990  ;;  %v7964_v53 = vadd.f32 %v12958_v36, %v12955_v3  ;;  %v13871_v37 = vld [vmem:[#allocation57_spill] sm:$0xff]  ;;  %v7645_v3 = vpop.xlane.xlu0 %7644 }
 0x76f   :  { %13868 = vst [vmem:[#allocation47_spill] sm:$0xff] %v12962_v18  ;;  %11010 = vpow2.f32 %v7017_v58  ;;  %v7811_v52 = vmul.f32 1.442695, %v7725_v62  ;;  %v7757_v22 = vsub.f32 %v13871_v37, %v7690_v51  ;;  %v7813_v62 = vmul.f32 1.442695, %v7726_v31  ;;  %v13875_v37 = vld [vmem:[#allocation65_spill] sm:$0xff] }
 0x770   :  { %v12968_v30 = vpop.eup %10992  ;;  %v6955_v21 = vmul.f32 1.442695, %v6873_v11  ;;  %v6957_v45 = vmul.f32 1.442695, %v6874_v60  ;;  %11012 = vpow2.f32 %v7871_v5  ;;  %7965 = vadd.xlane.f32.xlu0 %v7964_v53  ;;  %7117 = vadd.xlane.f32.xlu1 %v7116_v46 }
 0x771   :  { %v12971_v8 = vpop.eup %10994  ;;  %v7684_v58 = vpop.xlane.xlu1 %7683 }
 0x772   :  { %13870 = vst [vmem:[#allocation48_spill] sm:$0xff] %v12971_v8  ;;  %v12974_v36 = vpop.eup %10996  ;;  %11014 = vpow2.f32 %v6955_v21  ;;  %v7753_v17 = vsub.f32 %v12501_v29, %v7684_v58  ;;  %v7754_v54 = vsub.f32 %v12505_v32, %v7684_v58  ;;  %v7071_v23 = vadd.f32 %v12971_v8, %v12968_v30 }
 0x773   :  { %v12980_v11 = vpop.eup %10998  ;;  %11016 = vpow2.f32 %v6957_v45  ;;  %v7758_v21 = vsub.f32 %v13874_v12, %v7690_v51  ;;  %v7875_v29 = vmul.f32 1.442695, %v7757_v22  ;;  %v7727_v32 = vsub.f32 %v13875_v37, %v7645_v3  ;;  %v7693_v51 = vpop.xlane.xlu0 %7692 }
 0x774   :  { %13872 = vst [vmem:[#allocation85_spill] sm:$0xff] %v12980_v11  ;;  %v12982_v5 = vpop.eup %11000  ;;  %11018 = vpow2.f32 %v7873_v9  ;;  %v7867_v60 = vmul.f32 1.442695, %v7753_v17  ;;  %v7869_v53 = vmul.f32 1.442695, %v7754_v54  ;;  %7072 = vadd.xlane.f32.xlu1 %v7071_v23  ;;  %v7967_v37 = vadd.f32 %v12948_v49, %v12937_v0 }
 0x775   :  { %v12984_v46 = vpop.eup %11002  ;;  %11020 = vpow2.f32 %v7811_v52  ;;  %v6791_v58 = vpop.xlane.xlu1 %6790 }
 0x776   :  { %13873 = vst [vmem:[#allocation49_spill] sm:$0xff] %v12984_v46  ;;  %v12988_v8 = vpop.eup %11004  ;;  %11022 = vpow2.f32 %v7867_v60  ;;  %v6875_v45 = vsub.f32 %v12511_v34, %v6791_v58  ;;  %v6876_v9 = vsub.f32 %v12515_v39, %v6791_v58  ;;  %v7919_v17 = vadd.f32 %v12984_v46, %v12982_v5  ;;  %v13877_v34 = vld [vmem:[#allocation66_spill] sm:$0xff] }
 0x777   :  { %v12994_v31 = vpop.eup %11006  ;;  %11024 = vpow2.f32 %v7869_v53  ;;  %v7877_v60 = vmul.f32 1.442695, %v7758_v21  ;;  %v7728_v12 = vsub.f32 %v13877_v34, %v7645_v3  ;;  %v7815_v58 = vmul.f32 1.442695, %v7727_v32  ;;  %v7648_v21 = vpop.xlane.xlu0 %7647  ;;  %v13879_v32 = vld [vmem:[#allocation69_spill] sm:$0xff] }
 0x778   :  { %13876 = vst [vmem:[#allocation50_spill] sm:$0xff] %v12994_v31  ;;  %v12996_v52 = vpop.eup %11008  ;;  %11026 = vpow2.f32 %v7813_v62  ;;  %v6959_v22 = vmul.f32 1.442695, %v6875_v45  ;;  %v6961_v54 = vmul.f32 1.442695, %v6876_v9  ;;  %7920 = vadd.xlane.f32.xlu0 %v7919_v17 }
 0x779   :  { %v12998_v23 = vpop.eup %11010  ;;  %11028 = vpow2.f32 %v7875_v29  ;;  %v6839_v39 = vpop.xlane.xlu1 %6838 }
 0x77a   :  { %v6907_v53 = vsub.f32 %v12535_v40, %v6839_v39  ;;  %v6908_v46 = vsub.f32 %v12539_v35, %v6839_v39  ;;  %v7119_v62 = vadd.f32 %v12998_v23, %v12996_v52  ;;  %v13007_v45 = vpop.eup %11012  ;;  %11030 = vpow2.f32 %v6959_v22 }
 0x77b   :  { %11032 = vpow2.f32 %v6961_v54  ;;  %v7817_v40 = vmul.f32 1.442695, %v7728_v12  ;;  %v7759_v35 = vsub.f32 %v13879_v32, %v7693_v51  ;;  %v7922_v39 = vadd.f32 %v12962_v18, %v12952_v15  ;;  %v13880_v12 = vld [vmem:[#allocation70_spill] sm:$0xff] }
 0x77c   :  { %v13009_v9 = vpop.eup %11014  ;;  %v7023_v3 = vmul.f32 1.442695, %v6907_v53  ;;  %v7025_v29 = vmul.f32 1.442695, %v6908_v46  ;;  %7120 = vadd.xlane.f32.xlu1 %v7119_v62  ;;  %7968 = vadd.xlane.f32.xlu0 %v7967_v37  ;;  %11034 = vpow2.f32 %v7877_v60  ;;  %v7760_v53 = vsub.f32 %v13880_v12, %v7693_v51 }
 0x77d   :  { %v13011_v17 = vpop.eup %11016  ;;  %v6794_v34 = vpop.xlane.xlu1 %6793  ;;  %11036 = vpow2.f32 %v7815_v58  ;;  %v7122_v15 = vadd.f32 %v12980_v11, %v12974_v36 }
 0x77e   :  { %13878 = vst [vmem:[#allocation55_spill] sm:$0xff] %v13011_v17  ;;  %v13016_v49 = vpop.eup %11018  ;;  %v6877_v22 = vsub.f32 %v12551_v63, %v6794_v34  ;;  %v6878_v54 = vsub.f32 %v12555_v28, %v6794_v34  ;;  %v7074_v46 = vadd.f32 %v13011_v17, %v13009_v9  ;;  %11038 = vpow2.f32 %v7023_v3  ;;  %v13882_v28 = vld [vmem:[#allocation77_spill] sm:$0xff]  ;;  %v7696_v17 = vpop.xlane.xlu0 %7695 }
 0x77f   :  { %v13022_v37 = vpop.eup %11020  ;;  %11040 = vpow2.f32 %v7025_v29  ;;  %v7879_v63 = vmul.f32 1.442695, %v7759_v35  ;;  %v7729_v34 = vsub.f32 %v13882_v28, %v7648_v21  ;;  %v13885_v35 = vld [vmem:[#allocation78_spill] sm:$0xff] }
 0x780   :  { %v13024_v60 = vpop.eup %11022  ;;  %v6963_v62 = vmul.f32 1.442695, %v6877_v22  ;;  %v6965_v32 = vmul.f32 1.442695, %v6878_v54  ;;  %7075 = vadd.xlane.f32.xlu1 %v7074_v46  ;;  %7923 = vadd.xlane.f32.xlu0 %v7922_v39  ;;  %11042 = vpow2.f32 %v7817_v40  ;;  %v7881_v40 = vmul.f32 1.442695, %v7760_v53 }
 0x781   :  { %v13027_v58 = vpop.eup %11024  ;;  %v6842_v18 = vpop.xlane.xlu1 %6841  ;;  %v7730_v54 = vsub.f32 %v13885_v35, %v7648_v21  ;;  %v7925_v21 = vadd.f32 %v12994_v31, %v12988_v8 }
 0x782   :  { %13881 = vst [vmem:[#allocation56_spill] sm:$0xff] %v13027_v58  ;;  %v13032_v3 = vpop.eup %11026  ;;  %11044 = vpow2.f32 %v6963_v62  ;;  %v6909_v51 = vsub.f32 %v12563_v48, %v6842_v18  ;;  %v6910_v29 = vsub.f32 %v12567_v13, %v6842_v18  ;;  %v7970_v39 = vadd.f32 %v13027_v58, %v13024_v60  ;;  %v13887_v48 = vld [vmem:[#allocation79_spill] sm:$0xff] }
 0x783   :  { %13883 = vst [vmem:[#allocation57_spill] sm:$0xff] %v13032_v3  ;;  %v13038_v22 = vpop.eup %11028  ;;  %11046 = vpow2.f32 %v6965_v32  ;;  %v7819_v62 = vmul.f32 1.442695, %v7729_v34  ;;  %v7761_v11 = vsub.f32 %v13887_v48, %v7696_v17 }
 0x784   :  { %13884 = vst [vmem:[#allocation58_spill] sm:$0xff] %v13038_v22  ;;  %v7027_v46 = vmul.f32 1.442695, %v6909_v51  ;;  %v7029_v12 = vmul.f32 1.442695, %v6910_v29  ;;  %7971 = vadd.xlane.f32.xlu0 %v7970_v39  ;;  %7123 = vadd.xlane.f32.xlu1 %v7122_v15  ;;  %v13041_v28 = vpop.eup %11030  ;;  %11048 = vpow2.f32 %v7879_v63  ;;  %v7651_v15 = vpop.xlane.xlu0 %7650 }
 0x785   :  { %13886 = vst [vmem:[#allocation65_spill] sm:$0xff] %v13041_v28  ;;  %v6797_v13 = vpop.xlane.xlu1 %6796  ;;  %v13044_v18 = vpop.eup %11032  ;;  %v7821_v51 = vmul.f32 1.442695, %v7730_v54 }
 0x786   :  { %13888 = vst [vmem:[#allocation66_spill] sm:$0xff] %v13044_v18  ;;  %11050 = vpow2.f32 %v7027_v46  ;;  %v6879_v58 = vsub.f32 %v12573_v14, %v6797_v13  ;;  %v6880_v53 = vsub.f32 %v12577_v55, %v6797_v13  ;;  %v13050_v32 = vpop.eup %11034  ;;  %v7077_v63 = vadd.f32 %v13044_v18, %v13041_v28  ;;  %v13892_v55 = vld [vmem:[#allocation80_spill] sm:$0xff]  ;;  %v13895_v28 = vld [vmem:[#allocation97_spill] sm:$0xff] }
 0x787   :  { %13889 = vst [vmem:[#allocation69_spill] sm:$0xff] %v13050_v32  ;;  %11052 = vpow2.f32 %v7029_v12  ;;  %v13054_v34 = vpop.eup %11036  ;;  %v7762_v35 = vsub.f32 %v13892_v55, %v7696_v17  ;;  %v7883_v46 = vmul.f32 1.442695, %v7761_v11  ;;  %v13894_v12 = vld [vmem:[#allocation96_spill] sm:$0xff]  ;;  %v13898_v11 = vld [vmem:[#allocation86_spill] sm:$0xff] }
 0x788   :  { %13890 = vst [vmem:[#allocation70_spill] sm:$0xff] %v13054_v34  ;;  %11054 = vpow2.f32 %v7881_v40  ;;  %v6967_v29 = vmul.f32 1.442695, %v6879_v58  ;;  %v6969_v39 = vmul.f32 1.442695, %v6880_v53  ;;  %7926 = vadd.xlane.f32.xlu0 %v7925_v21  ;;  %v13056_v14 = vpop.eup %11038  ;;  %7078 = vadd.xlane.f32.xlu1 %v7077_v63  ;;  %v7973_v58 = vadd.f32 %v13016_v49, %v13007_v45 }
 0x789   :  { %13891 = vst [vmem:[#allocation77_spill] sm:$0xff] %v13056_v14  ;;  %11056 = vpow2.f32 %v7819_v62  ;;  %v6845_v48 = vpop.xlane.xlu1 %6844  ;;  %v13059_v13 = vpop.eup %11040  ;;  %v7731_v62 = vsub.f32 %v13898_v11, %v7651_v15 }
 0x78a   :  { %13893 = vst [vmem:[#allocation78_spill] sm:$0xff] %v13059_v13  ;;  %11058 = vpow2.f32 %v6967_v29  ;;  %v6911_v18 = vsub.f32 %v13894_v12, %v6845_v48  ;;  %v6912_v31 = vsub.f32 %v13895_v28, %v6845_v48  ;;  %v13065_v40 = vpop.eup %11042  ;;  %v7125_v54 = vadd.f32 %v13059_v13, %v13056_v14  ;;  %v13900_v29 = vld [vmem:[#allocation87_spill] sm:$0xff]  ;;  %v7699_v48 = vpop.xlane.xlu0 %7698  ;;  %v13901_v13 = vld [vmem:[#allocation98_spill] sm:$0xff] }
 0x78b   :  { %13896 = vst [vmem:[#allocation79_spill] sm:$0xff] %v13065_v40  ;;  %11060 = vpow2.f32 %v6969_v39  ;;  %v7885_v28 = vmul.f32 1.442695, %v7762_v35  ;;  %v7732_v55 = vsub.f32 %v13900_v29, %v7651_v15  ;;  %v7928_v12 = vadd.f32 %v13032_v3, %v13022_v37  ;;  %v13902_v14 = vld [vmem:[#allocation99_spill] sm:$0xff] }
 0x78c   :  { %v13069_v17 = vpop.eup %11044  ;;  %11062 = vpow2.f32 %v7821_v51  ;;  %v7031_v53 = vmul.f32 1.442695, %v6911_v18  ;;  %v7033_v21 = vmul.f32 1.442695, %v6912_v31  ;;  %7974 = vadd.xlane.f32.xlu0 %v7973_v58  ;;  %7126 = vadd.xlane.f32.xlu1 %v7125_v54  ;;  %v7823_v15 = vmul.f32 1.442695, %v7731_v62 }
 0x78d   :  { %13897 = vst [vmem:[#allocation80_spill] sm:$0xff] %v13069_v17  ;;  %v13072_v63 = vpop.eup %11046  ;;  %11064 = vpow2.f32 %v7883_v46  ;;  %v6800_v39 = vpop.xlane.xlu1 %6799  ;;  %v13903_v46 = vld [vmem:[#allocation88_spill] sm:$0xff] }
 0x78e   :  { %13899 = vst [vmem:[#allocation96_spill] sm:$0xff] %v13072_v63  ;;  %11066 = vpow2.f32 %v7031_v53  ;;  %v6881_v51 = vsub.f32 %v13901_v13, %v6800_v39  ;;  %v6882_v11 = vsub.f32 %v13902_v14, %v6800_v39  ;;  %v7080_v31 = vadd.f32 %v13072_v63, %v13069_v17  ;;  %v13081_v18 = vpop.eup %11048  ;;  %v13905_v53 = vld [vmem:[#allocation89_spill] sm:$0xff]  ;;  %v7654_v17 = vpop.xlane.xlu0 %7653  ;;  %v13907_v62 = vld [vmem:[#allocation100_spill] sm:$0xff] }
 0x78f   :  { %11068 = vpow2.f32 %v7033_v21  ;;  %v7763_v58 = vsub.f32 %v13903_v46, %v7699_v48  ;;  %v7825_v13 = vmul.f32 1.442695, %v7732_v55  ;;  %v7764_v14 = vsub.f32 %v13905_v53, %v7699_v48 }
 0x790   :  { %v13083_v35 = vpop.eup %11050  ;;  %v6971_v54 = vmul.f32 1.442695, %v6881_v51  ;;  %v6973_v29 = vmul.f32 1.442695, %v6882_v11  ;;  %7929 = vadd.xlane.f32.xlu0 %v7928_v12  ;;  %11070 = vpow2.f32 %v7885_v28  ;;  %7081 = vadd.xlane.f32.xlu1 %v7080_v31  ;;  %v7976_v63 = vadd.f32 %v13050_v32, %v13038_v22  ;;  %v13908_v51 = vld [vmem:[#allocation101_spill] sm:$0xff] }
 0x791   :  { %v13086_v3 = vpop.eup %11052  ;;  %v6848_v39 = vpop.xlane.xlu1 %6847  ;;  %v7887_v48 = vmul.f32 1.442695, %v7763_v58  ;;  %v13915_v58 = vld [vmem:[#allocation103_spill] sm:$0xff] }
 0x792   :  { %13904 = vst [vmem:[#allocation97_spill] sm:$0xff] %v13086_v3  ;;  %v13091_v21 = vpop.eup %11054  ;;  %11072 = vpow2.f32 %v6971_v54  ;;  %v6913_v46 = vsub.f32 %v13907_v62, %v6848_v39  ;;  %v6914_v11 = vsub.f32 %v13908_v51, %v6848_v39  ;;  %v7128_v12 = vadd.f32 %v13086_v3, %v13083_v35  ;;  %v13912_v62 = vld [vmem:[#allocation90_spill] sm:$0xff] }
 0x793   :  { %13906 = vst [vmem:[#allocation86_spill] sm:$0xff] %v13091_v21  ;;  %v13097_v28 = vpop.eup %11056  ;;  %11074 = vpow2.f32 %v6973_v29  ;;  %v7889_v54 = vmul.f32 1.442695, %v7764_v14  ;;  %v7733_v22 = vsub.f32 %v13912_v62, %v7654_v17  ;;  %v7931_v51 = vadd.f32 %v13065_v40, %v13054_v34  ;;  %v13914_v29 = vld [vmem:[#allocation102_spill] sm:$0xff]  ;;  %v13918_v14 = vld [vmem:[#allocation91_spill] sm:$0xff]  ;;  %v7702_v62 = vpop.xlane.xlu0 %7701 }
 0x794   :  { %13909 = vst [vmem:[#allocation87_spill] sm:$0xff] %v13097_v28  ;;  %v13099_v55 = vpop.eup %11058  ;;  %11076 = vpow2.f32 %v7823_v15  ;;  %v7035_v31 = vmul.f32 1.442695, %v6913_v46  ;;  %v7037_v53 = vmul.f32 1.442695, %v6914_v11  ;;  %7977 = vadd.xlane.f32.xlu0 %v7976_v63  ;;  %7129 = vadd.xlane.f32.xlu1 %v7128_v12  ;;  %v7734_v12 = vsub.f32 %v13918_v14, %v7654_v17 }
 0x795   :  { %13910 = vst [vmem:[#allocation98_spill] sm:$0xff] %v13099_v55  ;;  %v13101_v32 = vpop.eup %11060  ;;  %11078 = vpow2.f32 %v7825_v13  ;;  %v6803_v39 = vpop.xlane.xlu1 %6802 }
 0x796   :  { %13911 = vst [vmem:[#allocation99_spill] sm:$0xff] %v13101_v32  ;;  %v13106_v3 = vpop.eup %11062  ;;  %11080 = vpow2.f32 %v7035_v31  ;;  %v6883_v15 = vsub.f32 %v13914_v29, %v6803_v39  ;;  %v6884_v46 = vsub.f32 %v13915_v58, %v6803_v39  ;;  %v7083_v63 = vadd.f32 %v13101_v32, %v13099_v55  ;;  %v13921_v55 = vld [vmem:[#allocation105_spill] sm:$0xff] }
 0x797   :  { %13913 = vst [vmem:[#allocation88_spill] sm:$0xff] %v13106_v3  ;;  %v13112_v11 = vpop.eup %11064  ;;  %11082 = vpow2.f32 %v7037_v53  ;;  %v7827_v29 = vmul.f32 1.442695, %v7733_v22  ;;  %v7979_v58 = vadd.f32 %v13091_v21, %v13081_v18  ;;  %v13920_v53 = vld [vmem:[#allocation104_spill] sm:$0xff] }
 0x798   :  { %13916 = vst [vmem:[#allocation89_spill] sm:$0xff] %v13112_v11  ;;  %v13114_v13 = vpop.eup %11066  ;;  %11084 = vpow2.f32 %v7887_v48  ;;  %v6975_v40 = vmul.f32 1.442695, %v6883_v15  ;;  %v6977_v34 = vmul.f32 1.442695, %v6884_v46  ;;  %7932 = vadd.xlane.f32.xlu0 %v7931_v51  ;;  %7084 = vadd.xlane.f32.xlu1 %v7083_v63  ;;  %v13924_v22 = vld [vmem:[#allocation92_spill] sm:$0xff] }
 0x799   :  { %13917 = vst [vmem:[#allocation100_spill] sm:$0xff] %v13114_v13  ;;  %v13117_v31 = vpop.eup %11068  ;;  %11086 = vpow2.f32 %v7889_v54  ;;  %v6851_v39 = vpop.xlane.xlu1 %6850  ;;  %v7829_v54 = vmul.f32 1.442695, %v7734_v12  ;;  %v7765_v46 = vsub.f32 %v13924_v22, %v7702_v62  ;;  %v13927_v12 = vld [vmem:[#allocation106_spill] sm:$0xff]  ;;  %v13928_v22 = vld [vmem:[#allocation107_spill] sm:$0xff] }
 0x79a   :  { %13919 = vst [vmem:[#allocation101_spill] sm:$0xff] %v13117_v31  ;;  %11088 = vpow2.f32 %v6975_v40  ;;  %v6915_v32 = vsub.f32 %v13920_v53, %v6851_v39  ;;  %v6916_v48 = vsub.f32 %v13921_v55, %v6851_v39  ;;  %v7131_v17 = vadd.f32 %v13117_v31, %v13114_v13  ;;  %v13125_v15 = vpop.eup %11070  ;;  %v13926_v40 = vld [vmem:[#allocation93_spill] sm:$0xff] }
 0x79b   :  { %13922 = vst [vmem:[#allocation90_spill] sm:$0xff] %v13125_v15  ;;  %11090 = vpow2.f32 %v6977_v34  ;;  %v7766_v53 = vsub.f32 %v13926_v40, %v7702_v62  ;;  %v7934_v39 = vadd.f32 %v13106_v3, %v13097_v28  ;;  %v7897_v34 = vpop.xlane.xlu0 %7896  ;;  %v7891_v40 = vmul.f32 1.442695, %v7765_v46 }
 0x79c   :  { %v13127_v51 = vpop.eup %11072  ;;  %v7039_v63 = vmul.f32 1.442695, %v6915_v32  ;;  %v7041_v14 = vmul.f32 1.442695, %v6916_v48  ;;  %7980 = vadd.xlane.f32.xlu0 %v7979_v58  ;;  %11092 = vpow2.f32 %v7827_v29  ;;  %7132 = vadd.xlane.f32.xlu1 %v7131_v17  ;;  %v13929_v29 = vld [vmem:[#allocation24_spill] sm:$0xff] }
 0x79d   :  { %13923 = vst [vmem:[#allocation102_spill] sm:$0xff] %v13127_v51  ;;  %v13130_v21 = vpop.eup %11074  ;;  %v6806_v55 = vpop.xlane.xlu1 %6805  ;;  %v6445_v62 = vsub.s32 4, %v13929_v29 }
 0x79e   :  { %13925 = vst [vmem:[#allocation103_spill] sm:$0xff] %v13130_v21  ;;  %v13135_v31 = vpop.eup %11076  ;;  %11094 = vpow2.f32 %v7039_v63  ;;  %v6885_v13 = vsub.f32 %v13927_v12, %v6806_v55  ;;  %v6886_v32 = vsub.f32 %v13928_v22, %v6806_v55  ;;  %v7086_v58 = vadd.f32 %v13130_v21, %v13127_v51  ;;  %v13931_v51 = vld [vmem:[#allocation108_spill] sm:$0xff] }
 0x79f   :  { %v13141_v48 = vpop.eup %11078  ;;  %11096 = vpow2.f32 %v7041_v14  ;;  %v7893_v12 = vmul.f32 1.442695, %v7766_v53  ;;  %v7982_v22 = vadd.f32 %v13125_v15, %v13112_v11 }
 0x7a0   :  { %v13144_v17 = vpop.eup %11080  ;;  %11098 = vpow2.f32 %v7829_v54  ;;  %v6979_v3 = vmul.f32 1.442695, %v6885_v13  ;;  %v6981_v28 = vmul.f32 1.442695, %v6886_v32  ;;  %7935 = vadd.xlane.f32.xlu0 %v7934_v39  ;;  %7087 = vadd.xlane.f32.xlu1 %v7086_v58  ;;  %v11240_v39 = vld [vmem:[#allocation13] sm:$0xff]  ;;  %v11241_v58 = vld [vmem:[#allocation13 + $0x8] sm:$0xff] }
 0x7a1   :  { %v13146_v63 = vpop.eup %11082  ;;  %11100 = vrcp.f32 %v7897_v34  ;;  %v6854_v55 = vpop.xlane.xlu1 %6853  ;;  %v6446_v53 = vrot.slane %v11240_v39, %v6445_v62  ;;  %v6455_v34 = vsub.s32 5, %v13929_v29  ;;  %v6450_v15 = vrot.slane %v11241_v58, %v6445_v62  ;;  %v13935_v62 = vld [vmem:[#allocation27_spill] sm:$0xff] }
 0x7a2   :  { %13930 = vst [vmem:[#allocation91_spill] sm:$0xff] %v13146_v63  ;;  %v13150_v21 = vpop.eup %11084  ;;  %11102 = vpow2.f32 %v6979_v3  ;;  %v6917_v14 = vsub.f32 %v12640_v6, %v6854_v55  ;;  %v6918_v54 = vsub.f32 %v13931_v51, %v6854_v55  ;;  %v7134_v13 = vadd.f32 %v13146_v63, %v13144_v17 }
 0x7a3   :  { %v13156_v46 = vpop.eup %11086  ;;  %11104 = vpow2.f32 %v6981_v28  ;;  %v7937_v55 = vadd.f32 %v13141_v48, %v13135_v31  ;;  %v6460_v63 = vrot.slane %v11241_v58, %v6455_v34 }
 0x7a4   :  { %v13159_v32 = vpop.eup %11088  ;;  %11106 = vpow2.f32 %v7891_v40  ;;  %v7043_v3 = vmul.f32 1.442695, %v6917_v14  ;;  %v7045_v11 = vmul.f32 1.442695, %v6918_v54  ;;  %7983 = vadd.xlane.f32.xlu0 %v7982_v22  ;;  %7135 = vadd.xlane.f32.xlu1 %v7134_v13  ;;  %v6451_v40 = vmul.f32 %v13935_v62, %v6446_v53  ;;  %v13936_v22 = vld [vmem:[#allocation28_spill] sm:$0xff] }
 0x7a5   :  { %13932 = vst [vmem:[#allocation104_spill] sm:$0xff] %v13159_v32  ;;  %v13161_v6 = vpop.eup %11090  ;;  %11108 = vpow2.f32 %v7893_v12  ;;  %v6456_v14 = vrot.slane %v11240_v39, %v6455_v34  ;;  %v6452_v54 = vmul.f32 %v13936_v22, %v6450_v15  ;;  %v13942_v22 = vld [vmem:[#allocation95_spill] sm:$0xff] }
 0x7a6   :  { %13933 = vst [vmem:[#allocation105_spill] sm:$0xff] %v13161_v6  ;;  %11110 = vpow2.f32 %v7043_v3  ;;  %v7089_v51 = vadd.f32 %v13161_v6, %v13159_v32  ;;  %v13167_v28 = vpop.eup %11092 }
 0x7a7   :  { %11112 = vpow2.f32 %v7045_v11  ;;  %v7985_v11 = vadd.f32 %v13156_v46, %v13150_v21  ;;  %v6461_v53 = vadd.f32 %v6456_v14, %v6451_v40  ;;  %v6462_v39 = vadd.f32 %v6460_v63, %v6452_v54  ;;  %v13945_v63 = vld [vmem:[#allocation26_spill] sm:$0xff] }
 0x7a8   :  { %v13169_v29 = vpop.eup %11094  ;;  %7938 = vadd.xlane.f32.xlu0 %v7937_v55  ;;  %7090 = vadd.xlane.f32.xlu1 %v7089_v51  ;;  %v13941_v55 = vld [vmem:[#allocation94_spill] sm:$0xff] }
 0x7a9   :  { %13934 = vst [vmem:[#allocation92_spill] sm:$0xff] %v13169_v29  ;;  %v13173_v12 = vpop.eup %11096  ;;  %v13198_v14 = vrot.slane %v6461_v53, %v13945_v63  ;;  %v13201_v54 = vrot.slane %v6462_v39, %v13945_v63 }
 0x7aa   :  { %13937 = vst [vmem:[#allocation93_spill] sm:$0xff] %v13173_v12  ;;  %v13175_v13 = vpop.eup %11098  ;;  %v7137_v3 = vadd.f32 %v13173_v12, %v13169_v29 }
 0x7ab   :  { %13938 = vst [vmem:[#allocation106_spill] sm:$0xff] %v13175_v13  ;;  %v11101_v6 = vpop.eup %11100  ;;  %v7940_v51 = vadd.f32 %v13175_v13, %v13167_v28 }
 0x7ac   :  { %v13181_v32 = vpop.eup %11102  ;;  %7986 = vadd.xlane.f32.xlu0 %v7985_v11  ;;  %7138 = vadd.xlane.f32.xlu1 %v7137_v3  ;;  %v7992_v62 = vmul.f32 %v11101_v6, %v13941_v55  ;;  %v7993_v12 = vmul.f32 %v11101_v6, %v13942_v22 }
 0x7ad   :  { %13939 = vst [vmem:[#allocation107_spill] sm:$0xff] %v13181_v32  ;;  %v13183_v15 = vpop.eup %11104 }
 0x7ae   :  { %13940 = vst [vmem:[#allocation108_spill] sm:$0xff] %v13183_v15  ;;  %v13185_v34 = vpop.eup %11106  ;;  %v7092_v58 = vadd.f32 %v13183_v15, %v13181_v32  ;;  %v8095_v55 = vmul.f32 %v13198_v14, %v7992_v62  ;;  %v8096_v22 = vmul.f32 %v13201_v54, %v7993_v12 }
 0x7af   :  { %v13193_v29 = vpop.eup %11108 }
 0x7b0   :  { %13943 = vst [vmem:[#allocation27_spill] sm:$0xff] %v13193_v29  ;;  %v13195_v40 = vpop.eup %11110  ;;  %7941 = vadd.xlane.f32.xlu0 %v7940_v51  ;;  %7093 = vadd.xlane.f32.xlu1 %v7092_v58  ;;  %v7988_v6 = vadd.f32 %v13193_v29, %v13185_v34  ;;  %v8159_v15 = vadd.f32 %v8096_v22, %v8095_v55 }
 0x7b1   :  { %13944 = vst [vmem:[#allocation28_spill] sm:$0xff] %v13195_v40  ;;  %v13203_v3 = vpop.eup %11112 }
 0x7b2   :  { %13946 = vst [vmem:[#allocation94_spill] sm:$0xff] %v13203_v3  ;;  %v7140_v11 = vadd.f32 %v13203_v3, %v13195_v40  ;;  %v13947_v40 = vld [vmem:[#allocation25_spill] sm:$0xff] }
 0x7b3   :  { %v13212_v29 = vrot.slane %v6461_v53, %v13947_v40  ;;  %v13215_v12 = vrot.slane %v6462_v39, %v13947_v40 }
 0x7b4   :  { %7989 = vadd.xlane.f32.xlu0 %v7988_v6  ;;  %7141 = vadd.xlane.f32.xlu1 %v7140_v11 }
 0x7b8   :  { %8160 = vadd.xlane.f32.xlu0 %v8159_v15 }
 0x7b9   :  { %v7049_v63 = vpop.xlane.xlu1 %7048 }
 0x7ba   :  { %11114 = vrcp.f32 %v7049_v63 }
 0x7bd   :  { %v7097_v51 = vpop.xlane.xlu1 %7096  ;;  %v7945_v32 = vpop.xlane.xlu0 %7944 }
 0x7be   :  { %11116 = vrcp.f32 %v7097_v51 }
 0x7bf   :  { %11118 = vrcp.f32 %v7945_v32 }
 0x7c1   :  { %v7900_v58 = vpop.xlane.xlu0 %7899 }
 0x7c2   :  { %v7052_v13 = vpop.xlane.xlu1 %7051  ;;  %11120 = vrcp.f32 %v7900_v58 }
 0x7c3   :  { %11122 = vrcp.f32 %v7052_v13 }
 0x7c4   :  { %v11115_v3 = vpop.eup %11114 }
 0x7c5   :  { %v7948_v62 = vpop.xlane.xlu0 %7947  ;;  %v7144_v15 = vmul.f32 %v11115_v3, %v12673_v16  ;;  %v7145_v11 = vmul.f32 %v11115_v3, %v12675_v25 }
 0x7c6   :  { %v7100_v6 = vpop.xlane.xlu1 %7099  ;;  %11124 = vrcp.f32 %v7948_v62 }
 0x7c7   :  { %11126 = vrcp.f32 %v7100_v6  ;;  %v7247_v32 = vmul.f32 %v13212_v29, %v7144_v15  ;;  %v7248_v55 = vmul.f32 %v13215_v12, %v7145_v11 }
 0x7c8   :  { %v11117_v13 = vpop.eup %11116 }
 0x7c9   :  { %v11119_v22 = vpop.eup %11118  ;;  %v7311_v63 = vadd.f32 %v7248_v55, %v7247_v32  ;;  %v7192_v53 = vmul.f32 %v11117_v13, %v12671_v4  ;;  %v7193_v39 = vmul.f32 %v11117_v13, %v12679_v20 }
 0x7ca   :  { %v7055_v40 = vpop.xlane.xlu1 %7054  ;;  %v8040_v51 = vmul.f32 %v11119_v22, %v12685_v61  ;;  %v8041_v16 = vmul.f32 %v11119_v22, %v12689_v7 }
 0x7cb   :  { %11128 = vrcp.f32 %v7055_v40  ;;  %7312 = vadd.xlane.f32.xlu1 %v7311_v63  ;;  %v7279_v25 = vmul.f32 %v13212_v29, %v7192_v53  ;;  %v7280_v3 = vmul.f32 %v13215_v12, %v7193_v39 }
 0x7cc   :  { %v11121_v58 = vpop.eup %11120  ;;  %v8127_v62 = vmul.f32 %v13198_v14, %v8040_v51  ;;  %v8128_v15 = vmul.f32 %v13201_v54, %v8041_v16 }
 0x7cd   :  { %v11123_v11 = vpop.eup %11122  ;;  %v7903_v4 = vpop.xlane.xlu0 %7902  ;;  %v7359_v6 = vadd.f32 %v7280_v3, %v7279_v25  ;;  %v7995_v20 = vmul.f32 %v11121_v58, %v12695_v27  ;;  %v7996_v61 = vmul.f32 %v11121_v58, %v12701_v1 }
 0x7ce   :  { %11130 = vrcp.f32 %v7903_v4  ;;  %v8207_v7 = vadd.f32 %v8128_v15, %v8127_v62  ;;  %v7147_v32 = vmul.f32 %v11123_v11, %v12709_v56  ;;  %v7148_v55 = vmul.f32 %v11123_v11, %v12714_v50 }
 0x7cf   :  { %7360 = vadd.xlane.f32.xlu1 %v7359_v6  ;;  %v8097_v13 = vmul.f32 %v13198_v14, %v7995_v20  ;;  %v8098_v22 = vmul.f32 %v13201_v54, %v7996_v61 }
 0x7d0   :  { %v11125_v63 = vpop.eup %11124  ;;  %8208 = vadd.xlane.f32.xlu0 %v8207_v7  ;;  %v7249_v53 = vmul.f32 %v13212_v29, %v7147_v32  ;;  %v7250_v39 = vmul.f32 %v13215_v12, %v7148_v55 }
 0x7d1   :  { %v11127_v27 = vpop.eup %11126  ;;  %v7103_v40 = vpop.xlane.xlu1 %7102  ;;  %v8162_v51 = vadd.f32 %v8098_v22, %v8097_v13  ;;  %v8043_v16 = vmul.f32 %v11125_v63, %v12725_v33  ;;  %v8044_v56 = vmul.f32 %v11125_v63, %v12729_v26 }
 0x7d2   :  { %v7951_v1 = vpop.xlane.xlu0 %7950  ;;  %11132 = vrcp.f32 %v7103_v40  ;;  %v7314_v50 = vadd.f32 %v7250_v39, %v7249_v53  ;;  %v7195_v25 = vmul.f32 %v11127_v27, %v12703_v2  ;;  %v7196_v3 = vmul.f32 %v11127_v27, %v12720_v19 }
 0x7d3   :  { %11134 = vrcp.f32 %v7951_v1  ;;  %v8129_v58 = vmul.f32 %v13198_v14, %v8043_v16  ;;  %v8130_v62 = vmul.f32 %v13201_v54, %v8044_v56  ;;  %v13948_v16 = vld [vmem:[#allocation30_spill] sm:$0xff] }
 0x7d4   :  { %7315 = vadd.xlane.f32.xlu1 %v7314_v50  ;;  %8163 = vadd.xlane.f32.xlu0 %v8162_v51  ;;  %v7281_v15 = vmul.f32 %v13212_v29, %v7195_v25  ;;  %v7282_v11 = vmul.f32 %v13215_v12, %v7196_v3  ;;  %v13949_v50 = vld [vmem:[#allocation51_spill] sm:$0xff]  ;;  %v13950_v25 = vld [vmem:[#allocation29_spill] sm:$0xff] }
 0x7d5   :  { %v11129_v33 = vpop.eup %11128  ;;  %v7058_v4 = vpop.xlane.xlu1 %7057  ;;  %v8210_v6 = vadd.f32 %v8130_v62, %v8129_v58 }
 0x7d6   :  { %v7906_v26 = vpop.xlane.xlu0 %7905  ;;  %11136 = vrcp.f32 %v7058_v4  ;;  %v7362_v20 = vadd.f32 %v7282_v11, %v7281_v15  ;;  %v7150_v2 = vmul.f32 %v11129_v33, %v12741_v57  ;;  %v7151_v19 = vmul.f32 %v11129_v33, %v12743_v41 }
 0x7d7   :  { %11138 = vrcp.f32 %v7906_v26  ;;  %v13951_v26 = vld [vmem:[#allocation52_spill] sm:$0xff] }
 0x7d8   :  { %v11131_v61 = vpop.eup %11130  ;;  %7363 = vadd.xlane.f32.xlu1 %v7362_v20  ;;  %8211 = vadd.xlane.f32.xlu0 %v8210_v6  ;;  %v7251_v7 = vmul.f32 %v13212_v29, %v7150_v2  ;;  %v7252_v32 = vmul.f32 %v13215_v12, %v7151_v19  ;;  %v13952_v20 = vld [vmem:[#allocation53_spill] sm:$0xff] }
 0x7d9   :  { %v7106_v55 = vpop.xlane.xlu1 %7105  ;;  %v7998_v22 = vmul.f32 %v11131_v61, %v12753_v59  ;;  %v7999_v63 = vmul.f32 %v11131_v61, %v12755_v10 }
 0x7da   :  { %v7954_v13 = vpop.xlane.xlu0 %7953  ;;  %11140 = vrcp.f32 %v7106_v55  ;;  %v7317_v53 = vadd.f32 %v7252_v32, %v7251_v7  ;;  %v13953_v32 = vld [vmem:[#allocation31_spill] sm:$0xff] }
 0x7db   :  { %11142 = vrcp.f32 %v7954_v13  ;;  %v8099_v57 = vmul.f32 %v13198_v14, %v7998_v22  ;;  %v8100_v41 = vmul.f32 %v13201_v54, %v7999_v63  ;;  %v13954_v13 = vld [vmem:[#allocation54_spill] sm:$0xff] }
 0x7dc   :  { %v11133_v39 = vpop.eup %11132  ;;  %7318 = vadd.xlane.f32.xlu1 %v7317_v53 }
 0x7dd   :  { %v11135_v27 = vpop.eup %11134  ;;  %v7061_v40 = vpop.xlane.xlu1 %7060  ;;  %v8165_v1 = vadd.f32 %v8100_v41, %v8099_v57  ;;  %v7198_v51 = vmul.f32 %v11133_v39, %v12769_v42  ;;  %v7199_v56 = vmul.f32 %v11133_v39, %v13948_v16  ;;  %v13956_v16 = vld [vmem:[#allocation59_spill] sm:$0xff] }
 0x7de   :  { %11144 = vrcp.f32 %v7061_v40  ;;  %v7909_v59 = vpop.xlane.xlu0 %7908  ;;  %v8046_v10 = vmul.f32 %v11135_v27, %v13949_v50  ;;  %v8047_v3 = vmul.f32 %v11135_v27, %v13950_v25  ;;  %v13957_v25 = vld [vmem:[#allocation60_spill] sm:$0xff] }
 0x7df   :  { %11146 = vrcp.f32 %v7909_v59  ;;  %8166 = vadd.xlane.f32.xlu0 %v8165_v1  ;;  %v7283_v58 = vmul.f32 %v13212_v29, %v7198_v51  ;;  %v7284_v62 = vmul.f32 %v13215_v12, %v7199_v56  ;;  %v13955_v1 = vld [vmem:[#allocation32_spill] sm:$0xff] }
 0x7e0   :  { %v11137_v15 = vpop.eup %11136  ;;  %v8131_v11 = vmul.f32 %v13198_v14, %v8046_v10  ;;  %v8132_v33 = vmul.f32 %v13201_v54, %v8047_v3 }
 0x7e1   :  { %v11139_v42 = vpop.eup %11138  ;;  %v7365_v4 = vadd.f32 %v7284_v62, %v7283_v58  ;;  %v7153_v6 = vmul.f32 %v11137_v15, %v13951_v26  ;;  %v7154_v2 = vmul.f32 %v11137_v15, %v13952_v20  ;;  %v7109_v19 = vpop.xlane.xlu1 %7108  ;;  %v13958_v58 = vld [vmem:[#allocation33_spill] sm:$0xff] }
 0x7e2   :  { %v7957_v61 = vpop.xlane.xlu0 %7956  ;;  %v8213_v7 = vadd.f32 %v8132_v33, %v8131_v11  ;;  %v8001_v55 = vmul.f32 %v11139_v42, %v13953_v32  ;;  %v8002_v22 = vmul.f32 %v11139_v42, %v13954_v13  ;;  %11148 = vrcp.f32 %v7109_v19  ;;  %v13959_v20 = vld [vmem:[#allocation61_spill] sm:$0xff]  ;;  %v13960_v19 = vld [vmem:[#allocation62_spill] sm:$0xff]  ;;  %v13961_v13 = vld [vmem:[#allocation35_spill] sm:$0xff] }
 0x7e3   :  { %7366 = vadd.xlane.f32.xlu1 %v7365_v4  ;;  %v7253_v63 = vmul.f32 %v13212_v29, %v7153_v6  ;;  %v7254_v53 = vmul.f32 %v13215_v12, %v7154_v2  ;;  %11150 = vrcp.f32 %v7957_v61 }
 0x7e4   :  { %v11141_v57 = vpop.eup %11140  ;;  %8214 = vadd.xlane.f32.xlu0 %v8213_v7  ;;  %v8101_v41 = vmul.f32 %v13198_v14, %v8001_v55  ;;  %v8102_v39 = vmul.f32 %v13201_v54, %v8002_v22 }
 0x7e5   :  { %v11143_v27 = vpop.eup %11142  ;;  %v7320_v40 = vadd.f32 %v7254_v53, %v7253_v63  ;;  %v7201_v51 = vmul.f32 %v11141_v57, %v13955_v1  ;;  %v7202_v56 = vmul.f32 %v11141_v57, %v13956_v16  ;;  %v7064_v59 = vpop.xlane.xlu1 %7063  ;;  %v13962_v63 = vld [vmem:[#allocation36_spill] sm:$0xff] }
 0x7e6   :  { %v7912_v50 = vpop.xlane.xlu0 %7911  ;;  %v8168_v10 = vadd.f32 %v8102_v39, %v8101_v41  ;;  %v8049_v3 = vmul.f32 %v11143_v27, %v13957_v25  ;;  %v8050_v62 = vmul.f32 %v11143_v27, %v13958_v58  ;;  %11152 = vrcp.f32 %v7064_v59  ;;  %v13963_v59 = vld [vmem:[#allocation37_spill] sm:$0xff] }
 0x7e7   :  { %7321 = vadd.xlane.f32.xlu1 %v7320_v40  ;;  %v7285_v15 = vmul.f32 %v13212_v29, %v7201_v51  ;;  %v7286_v11 = vmul.f32 %v13215_v12, %v7202_v56  ;;  %11154 = vrcp.f32 %v7912_v50 }
 0x7e8   :  { %v11145_v33 = vpop.eup %11144  ;;  %8169 = vadd.xlane.f32.xlu0 %v8168_v10  ;;  %v8133_v42 = vmul.f32 %v13198_v14, %v8049_v3  ;;  %v8134_v4 = vmul.f32 %v13201_v54, %v8050_v62  ;;  %v13964_v10 = vld [vmem:[#allocation67_spill] sm:$0xff]  ;;  %v13965_v3 = vld [vmem:[#allocation34_spill] sm:$0xff] }
 0x7e9   :  { %v11147_v26 = vpop.eup %11146  ;;  %v7368_v6 = vadd.f32 %v7286_v11, %v7285_v15  ;;  %v7156_v2 = vmul.f32 %v11145_v33, %v13959_v20  ;;  %v7157_v61 = vmul.f32 %v11145_v33, %v13960_v19  ;;  %v7112_v7 = vpop.xlane.xlu1 %7111  ;;  %v13966_v62 = vld [vmem:[#allocation63_spill] sm:$0xff]  ;;  %v13967_v19 = vld [vmem:[#allocation38_spill] sm:$0xff] }
 0x7ea   :  { %v7960_v32 = vpop.xlane.xlu0 %7959  ;;  %v8216_v55 = vadd.f32 %v8134_v4, %v8133_v42  ;;  %v8004_v22 = vmul.f32 %v11147_v26, %v13961_v13  ;;  %v8005_v53 = vmul.f32 %v11147_v26, %v13962_v63  ;;  %11156 = vrcp.f32 %v7112_v7  ;;  %v13968_v7 = vld [vmem:[#allocation39_spill] sm:$0xff]  ;;  %v13969_v13 = vld [vmem:[#allocation64_spill] sm:$0xff] }
 0x7eb   :  { %7369 = vadd.xlane.f32.xlu1 %v7368_v6  ;;  %v7255_v57 = vmul.f32 %v13212_v29, %v7156_v2  ;;  %v7256_v41 = vmul.f32 %v13215_v12, %v7157_v61  ;;  %11158 = vrcp.f32 %v7960_v32  ;;  %v13970_v63 = vld [vmem:[#allocation68_spill] sm:$0xff] }
 0x7ec   :  { %8217 = vadd.xlane.f32.xlu0 %v8216_v55  ;;  %v8103_v39 = vmul.f32 %v13198_v14, %v8004_v22  ;;  %v8104_v27 = vmul.f32 %v13201_v54, %v8005_v53  ;;  %v11149_v40 = vpop.eup %11148 }
 0x7ed   :  { %v7323_v1 = vadd.f32 %v7256_v41, %v7255_v57  ;;  %v11151_v51 = vpop.eup %11150  ;;  %v7067_v16 = vpop.xlane.xlu1 %7066  ;;  %v7204_v50 = vmul.f32 %v11149_v40, %v13963_v59  ;;  %v7205_v25 = vmul.f32 %v11149_v40, %v13964_v10  ;;  %v13971_v59 = vld [vmem:[#allocation71_spill] sm:$0xff]  ;;  %v13972_v10 = vld [vmem:[#allocation72_spill] sm:$0xff] }
 0x7ee   :  { %v8171_v56 = vadd.f32 %v8104_v27, %v8103_v39  ;;  %11160 = vrcp.f32 %v7067_v16  ;;  %v8052_v58 = vmul.f32 %v11151_v51, %v13965_v3  ;;  %v8053_v15 = vmul.f32 %v11151_v51, %v13966_v62 }
 0x7ef   :  { %7324 = vadd.xlane.f32.xlu1 %v7323_v1  ;;  %v7287_v11 = vmul.f32 %v13212_v29, %v7204_v50  ;;  %v7288_v33 = vmul.f32 %v13215_v12, %v7205_v25 }
 0x7f0   :  { %8172 = vadd.xlane.f32.xlu0 %v8171_v56  ;;  %v11153_v42 = vpop.eup %11152  ;;  %v8135_v26 = vmul.f32 %v13198_v14, %v8052_v58  ;;  %v8136_v6 = vmul.f32 %v13201_v54, %v8053_v15  ;;  %v13973_v58 = vld [vmem:[#allocation40_spill] sm:$0xff]  ;;  %v13974_v15 = vld [vmem:[#allocation41_spill] sm:$0xff] }
 0x7f1   :  { %v7915_v4 = vpop.xlane.xlu0 %7914  ;;  %v11155_v20 = vpop.eup %11154  ;;  %v7371_v2 = vadd.f32 %v7288_v33, %v7287_v11  ;;  %v7159_v61 = vmul.f32 %v11153_v42, %v13967_v19  ;;  %v7160_v32 = vmul.f32 %v11153_v42, %v13968_v7 }
 0x7f2   :  { %11162 = vrcp.f32 %v7915_v4  ;;  %v8219_v55 = vadd.f32 %v8136_v6, %v8135_v26  ;;  %v8007_v22 = vmul.f32 %v11155_v20, %v13969_v13  ;;  %v8008_v53 = vmul.f32 %v11155_v20, %v13970_v63 }
 0x7f3   :  { %7372 = vadd.xlane.f32.xlu1 %v7371_v2  ;;  %v7257_v57 = vmul.f32 %v13212_v29, %v7159_v61  ;;  %v7258_v41 = vmul.f32 %v13215_v12, %v7160_v32  ;;  %v13975_v61 = vld [vmem:[#allocation42_spill] sm:$0xff]  ;;  %v13976_v32 = vld [vmem:[#allocation43_spill] sm:$0xff] }
 0x7f4   :  { %v11157_v39 = vpop.eup %11156  ;;  %8220 = vadd.xlane.f32.xlu0 %v8219_v55  ;;  %v8105_v1 = vmul.f32 %v13198_v14, %v8007_v22  ;;  %v8106_v51 = vmul.f32 %v13201_v54, %v8008_v53 }
 0x7f5   :  { %v7115_v27 = vpop.xlane.xlu1 %7114  ;;  %v7963_v40 = vpop.xlane.xlu0 %7962  ;;  %v7326_v56 = vadd.f32 %v7258_v41, %v7257_v57  ;;  %v7207_v50 = vmul.f32 %v11157_v39, %v13971_v59  ;;  %v7208_v25 = vmul.f32 %v11157_v39, %v13972_v10  ;;  %v13977_v57 = vld [vmem:[#allocation75_spill] sm:$0xff]  ;;  %v13978_v39 = vld [vmem:[#allocation76_spill] sm:$0xff] }
 0x7f6   :  { %v11159_v16 = vpop.eup %11158  ;;  %11164 = vrcp.f32 %v7115_v27  ;;  %v8174_v3 = vadd.f32 %v8106_v51, %v8105_v1 }
 0x7f7   :  { %11166 = vrcp.f32 %v7963_v40  ;;  %v8055_v62 = vmul.f32 %v11159_v16, %v13973_v58  ;;  %v8056_v11 = vmul.f32 %v11159_v16, %v13974_v15  ;;  %7327 = vadd.xlane.f32.xlu1 %v7326_v56  ;;  %v7289_v33 = vmul.f32 %v13212_v29, %v7207_v50 }
 0x7f8   :  { %v7290_v42 = vmul.f32 %v13215_v12, %v7208_v25  ;;  %v11161_v4 = vpop.eup %11160  ;;  %8175 = vadd.xlane.f32.xlu0 %v8174_v3 }
 0x7f9   :  { %v7918_v26 = vpop.xlane.xlu0 %7917  ;;  %v8137_v6 = vmul.f32 %v13198_v14, %v8055_v62  ;;  %v8138_v20 = vmul.f32 %v13201_v54, %v8056_v11  ;;  %v7070_v2 = vpop.xlane.xlu1 %7069  ;;  %v7162_v7 = vmul.f32 %v11161_v4, %v13975_v61  ;;  %v7163_v55 = vmul.f32 %v11161_v4, %v13976_v32  ;;  %v13979_v62 = vld [vmem:[#allocation73_spill] sm:$0xff]  ;;  %v13980_v11 = vld [vmem:[#allocation74_spill] sm:$0xff]  ;;  %v13981_v61 = vld [vmem:[#allocation44_spill] sm:$0xff] }
 0x7fa   :  { %11168 = vrcp.f32 %v7918_v26  ;;  %v7374_v19 = vadd.f32 %v7290_v42, %v7289_v33 }
 0x7fb   :  { %11170 = vrcp.f32 %v7070_v2  ;;  %v8222_v13 = vadd.f32 %v8138_v20, %v8137_v6  ;;  %v7259_v63 = vmul.f32 %v13212_v29, %v7162_v7  ;;  %v7260_v53 = vmul.f32 %v13215_v12, %v7163_v55 }
 0x7fc   :  { %v11163_v22 = vpop.eup %11162  ;;  %7375 = vadd.xlane.f32.xlu1 %v7374_v19 }
 0x7fd   :  { %8223 = vadd.xlane.f32.xlu0 %v8222_v13  ;;  %v8010_v41 = vmul.f32 %v11163_v22, %v13977_v57  ;;  %v8011_v27 = vmul.f32 %v11163_v22, %v13978_v39  ;;  %v7118_v40 = vpop.xlane.xlu1 %7117  ;;  %v7966_v1 = vpop.xlane.xlu0 %7965  ;;  %v7329_v51 = vadd.f32 %v7260_v53, %v7259_v63  ;;  %v13982_v13 = vld [vmem:[#allocation82_spill] sm:$0xff] }
 0x7fe   :  { %11172 = vrcp.f32 %v7118_v40 }
 0x7ff   :  { %v8107_v16 = vmul.f32 %v13198_v14, %v8010_v41  ;;  %v8108_v56 = vmul.f32 %v13201_v54, %v8011_v27  ;;  %11174 = vrcp.f32 %v7966_v1 }
 0x800   :  { %v11165_v59 = vpop.eup %11164  ;;  %7330 = vadd.xlane.f32.xlu1 %v7329_v51 }
 0x801   :  { %v11167_v50 = vpop.eup %11166  ;;  %v8177_v10 = vadd.f32 %v8108_v56, %v8107_v16  ;;  %v7210_v25 = vmul.f32 %v11165_v59, %v12923_v47  ;;  %v7211_v3 = vmul.f32 %v11165_v59, %v12926_v38  ;;  %v7073_v58 = vpop.xlane.xlu1 %7072  ;;  %v13983_v16 = vld [vmem:[#allocation81_spill] sm:$0xff]  ;;  %v13984_v59 = vld [vmem:[#allocation83_spill] sm:$0xff] }
 0x802   :  { %v8058_v15 = vmul.f32 %v11167_v50, %v13979_v62  ;;  %v8059_v33 = vmul.f32 %v11167_v50, %v13980_v11  ;;  %11176 = vrcp.f32 %v7073_v58 }
 0x803   :  { %8178 = vadd.xlane.f32.xlu0 %v8177_v10  ;;  %v7291_v42 = vmul.f32 %v13212_v29, %v7210_v25  ;;  %v7292_v4 = vmul.f32 %v13215_v12, %v7211_v3  ;;  %v13985_v10 = vld [vmem:[#allocation84_spill] sm:$0xff] }
 0x804   :  { %v11169_v26 = vpop.eup %11168  ;;  %v8139_v6 = vmul.f32 %v13198_v14, %v8058_v15  ;;  %v8140_v20 = vmul.f32 %v13201_v54, %v8059_v33 }
 0x805   :  { %v11171_v2 = vpop.eup %11170  ;;  %v7921_v47 = vpop.xlane.xlu0 %7920  ;;  %v7377_v19 = vadd.f32 %v7292_v4, %v7291_v42  ;;  %v8013_v38 = vmul.f32 %v11169_v26, %v12907_v43  ;;  %v8014_v7 = vmul.f32 %v11169_v26, %v13981_v61  ;;  %v13986_v26 = vld [vmem:[#allocation48_spill] sm:$0xff] }
 0x806   :  { %11178 = vrcp.f32 %v7921_v47  ;;  %v8225_v32 = vadd.f32 %v8140_v20, %v8139_v6  ;;  %v7165_v55 = vmul.f32 %v11171_v2, %v12939_v24  ;;  %v7166_v22 = vmul.f32 %v11171_v2, %v13982_v13 }
 0x807   :  { %7378 = vadd.xlane.f32.xlu1 %v7377_v19  ;;  %v8109_v63 = vmul.f32 %v13198_v14, %v8013_v38  ;;  %v8110_v53 = vmul.f32 %v13201_v54, %v8014_v7 }
 0x808   :  { %8226 = vadd.xlane.f32.xlu0 %v8225_v32  ;;  %v7261_v57 = vmul.f32 %v13212_v29, %v7165_v55  ;;  %v7262_v41 = vmul.f32 %v13215_v12, %v7166_v22  ;;  %v11173_v39 = vpop.eup %11172  ;;  %v13987_v32 = vld [vmem:[#allocation49_spill] sm:$0xff] }
 0x809   :  { %v7121_v43 = vpop.xlane.xlu1 %7120  ;;  %v7969_v27 = vpop.xlane.xlu0 %7968  ;;  %v8180_v40 = vadd.f32 %v8110_v53, %v8109_v63  ;;  %v7213_v24 = vmul.f32 %v11173_v39, %v12921_v44  ;;  %v7214_v56 = vmul.f32 %v11173_v39, %v13983_v16 }
 0x80a   :  { %v11175_v1 = vpop.eup %11174  ;;  %11180 = vrcp.f32 %v7121_v43  ;;  %v7332_v51 = vadd.f32 %v7262_v41, %v7261_v57 }
 0x80b   :  { %11182 = vrcp.f32 %v7969_v27  ;;  %v8061_v50 = vmul.f32 %v11175_v1, %v13984_v59  ;;  %v8062_v25 = vmul.f32 %v11175_v1, %v13985_v10  ;;  %v7293_v3 = vmul.f32 %v13212_v29, %v7213_v24 }
 0x80c   :  { %7333 = vadd.xlane.f32.xlu1 %v7332_v51  ;;  %8181 = vadd.xlane.f32.xlu0 %v8180_v40  ;;  %v7294_v58 = vmul.f32 %v13215_v12, %v7214_v56  ;;  %v11177_v62 = vpop.eup %11176  ;;  %v13988_v40 = vld [vmem:[#allocation45_spill] sm:$0xff] }
 0x80d   :  { %v7076_v15 = vpop.xlane.xlu1 %7075  ;;  %v7924_v11 = vpop.xlane.xlu0 %7923  ;;  %v8141_v33 = vmul.f32 %v13198_v14, %v8061_v50  ;;  %v8142_v44 = vmul.f32 %v13201_v54, %v8062_v25  ;;  %v7168_v4 = vmul.f32 %v11177_v62, %v12968_v30  ;;  %v7169_v6 = vmul.f32 %v11177_v62, %v13986_v26  ;;  %v13989_v25 = vld [vmem:[#allocation55_spill] sm:$0xff]  ;;  %v13990_v62 = vld [vmem:[#allocation46_spill] sm:$0xff] }
 0x80e   :  { %11184 = vrcp.f32 %v7076_v15  ;;  %v7380_v42 = vadd.f32 %v7294_v58, %v7293_v3 }
 0x80f   :  { %11186 = vrcp.f32 %v7924_v11  ;;  %v8228_v20 = vadd.f32 %v8142_v44, %v8141_v33  ;;  %v7263_v47 = vmul.f32 %v13212_v29, %v7168_v4  ;;  %v7264_v19 = vmul.f32 %v13215_v12, %v7169_v6  ;;  %v13991_v11 = vld [vmem:[#allocation47_spill] sm:$0xff] }
 0x810   :  { %v11179_v2 = vpop.eup %11178  ;;  %7381 = vadd.xlane.f32.xlu1 %v7380_v42 }
 0x811   :  { %8229 = vadd.xlane.f32.xlu0 %v8228_v20  ;;  %v7124_v38 = vpop.xlane.xlu1 %7123  ;;  %v7972_v61 = vpop.xlane.xlu0 %7971  ;;  %v8016_v7 = vmul.f32 %v11179_v2, %v12982_v5  ;;  %v8017_v55 = vmul.f32 %v11179_v2, %v13987_v32  ;;  %v7335_v13 = vadd.f32 %v7264_v19, %v7263_v47  ;;  %v13992_v19 = vld [vmem:[#allocation85_spill] sm:$0xff] }
 0x812   :  { %11188 = vrcp.f32 %v7124_v38 }
 0x813   :  { %11190 = vrcp.f32 %v7972_v61  ;;  %v8111_v30 = vmul.f32 %v13198_v14, %v8016_v7  ;;  %v8112_v22 = vmul.f32 %v13201_v54, %v8017_v55  ;;  %v13993_v55 = vld [vmem:[#allocation56_spill] sm:$0xff] }
 0x814   :  { %v11181_v63 = vpop.eup %11180  ;;  %7336 = vadd.xlane.f32.xlu1 %v7335_v13 }
 0x815   :  { %v11183_v53 = vpop.eup %11182  ;;  %v7927_v57 = vpop.xlane.xlu0 %7926  ;;  %v8183_v41 = vadd.f32 %v8112_v22, %v8111_v30  ;;  %v7216_v39 = vmul.f32 %v11181_v63, %v12996_v52  ;;  %v7217_v43 = vmul.f32 %v11181_v63, %v12998_v23 }
 0x816   :  { %v7079_v27 = vpop.xlane.xlu1 %7078  ;;  %11192 = vrcp.f32 %v7927_v57  ;;  %v8064_v5 = vmul.f32 %v11183_v53, %v12937_v0  ;;  %v8065_v1 = vmul.f32 %v11183_v53, %v13988_v40 }
 0x817   :  { %11194 = vrcp.f32 %v7079_v27  ;;  %8184 = vadd.xlane.f32.xlu0 %v8183_v41  ;;  %v7295_v51 = vmul.f32 %v13212_v29, %v7216_v39  ;;  %v7296_v24 = vmul.f32 %v13215_v12, %v7217_v43 }
 0x818   :  { %v11185_v16 = vpop.eup %11184  ;;  %v8143_v56 = vmul.f32 %v13198_v14, %v8064_v5  ;;  %v8144_v59 = vmul.f32 %v13201_v54, %v8065_v1  ;;  %v13995_v1 = vld [vmem:[#allocation65_spill] sm:$0xff] }
 0x819   :  { %v11187_v52 = vpop.eup %11186  ;;  %v7975_v50 = vpop.xlane.xlu0 %7974  ;;  %v7383_v23 = vadd.f32 %v7296_v24, %v7295_v51  ;;  %v7171_v10 = vmul.f32 %v11185_v16, %v13009_v9  ;;  %v7172_v0 = vmul.f32 %v11185_v16, %v13989_v25  ;;  %v13996_v24 = vld [vmem:[#allocation66_spill] sm:$0xff] }
 0x81a   :  { %v7127_v3 = vpop.xlane.xlu1 %7126  ;;  %11196 = vrcp.f32 %v7975_v50  ;;  %v8231_v58 = vadd.f32 %v8144_v59, %v8143_v56  ;;  %v8019_v15 = vmul.f32 %v11187_v52, %v13990_v62  ;;  %v8020_v33 = vmul.f32 %v11187_v52, %v13991_v11 }
 0x81b   :  { %11198 = vrcp.f32 %v7127_v3  ;;  %7384 = vadd.xlane.f32.xlu1 %v7383_v23  ;;  %v7265_v44 = vmul.f32 %v13212_v29, %v7171_v10  ;;  %v7266_v42 = vmul.f32 %v13215_v12, %v7172_v0 }
 0x81c   :  { %v11189_v4 = vpop.eup %11188  ;;  %8232 = vadd.xlane.f32.xlu0 %v8231_v58  ;;  %v8113_v26 = vmul.f32 %v13198_v14, %v8019_v15  ;;  %v8114_v9 = vmul.f32 %v13201_v54, %v8020_v33  ;;  %v13997_v15 = vld [vmem:[#allocation77_spill] sm:$0xff]  ;;  %v13998_v33 = vld [vmem:[#allocation78_spill] sm:$0xff] }
 0x81d   :  { %v11191_v6 = vpop.eup %11190  ;;  %v7930_v20 = vpop.xlane.xlu0 %7929  ;;  %v7338_v2 = vadd.f32 %v7266_v42, %v7265_v44  ;;  %v7219_v47 = vmul.f32 %v11189_v4, %v12974_v36  ;;  %v7220_v38 = vmul.f32 %v11189_v4, %v13992_v19 }
 0x81e   :  { %v7082_v61 = vpop.xlane.xlu1 %7081  ;;  %11200 = vrcp.f32 %v7930_v20  ;;  %v8186_v7 = vadd.f32 %v8114_v9, %v8113_v26  ;;  %v8067_v32 = vmul.f32 %v11191_v6, %v13024_v60  ;;  %v8068_v13 = vmul.f32 %v11191_v6, %v13993_v55  ;;  %v13994_v60 = vld [vmem:[#allocation50_spill] sm:$0xff]  ;;  %v14001_v55 = vld [vmem:[#allocation96_spill] sm:$0xff] }
 0x81f   :  { %11202 = vrcp.f32 %v7082_v61  ;;  %7339 = vadd.xlane.f32.xlu1 %v7338_v2  ;;  %v7297_v30 = vmul.f32 %v13212_v29, %v7219_v47  ;;  %v7298_v22 = vmul.f32 %v13215_v12, %v7220_v38  ;;  %v13999_v47 = vld [vmem:[#allocation57_spill] sm:$0xff] }
 0x820   :  { %v11193_v63 = vpop.eup %11192  ;;  %8187 = vadd.xlane.f32.xlu0 %v8186_v7  ;;  %v8145_v53 = vmul.f32 %v13198_v14, %v8067_v32  ;;  %v8146_v36 = vmul.f32 %v13201_v54, %v8068_v13  ;;  %v14000_v7 = vld [vmem:[#allocation80_spill] sm:$0xff] }
 0x821   :  { %v11195_v57 = vpop.eup %11194  ;;  %v7978_v41 = vpop.xlane.xlu0 %7977  ;;  %v7386_v39 = vadd.f32 %v7298_v22, %v7297_v30  ;;  %v8022_v43 = vmul.f32 %v11193_v63, %v12988_v8  ;;  %v8023_v27 = vmul.f32 %v11193_v63, %v13994_v60  ;;  %v14003_v60 = vld [vmem:[#allocation69_spill] sm:$0xff] }
 0x822   :  { %v7130_v5 = vpop.xlane.xlu1 %7129  ;;  %11204 = vrcp.f32 %v7978_v41  ;;  %v8234_v40 = vadd.f32 %v8146_v36, %v8145_v53  ;;  %v7174_v51 = vmul.f32 %v11195_v57, %v13995_v1  ;;  %v7175_v16 = vmul.f32 %v11195_v57, %v13996_v24 }
 0x823   :  { %11206 = vrcp.f32 %v7130_v5  ;;  %7387 = vadd.xlane.f32.xlu1 %v7386_v39  ;;  %v8115_v56 = vmul.f32 %v13198_v14, %v8022_v43  ;;  %v8116_v59 = vmul.f32 %v13201_v54, %v8023_v27  ;;  %v14002_v39 = vld [vmem:[#allocation58_spill] sm:$0xff] }
 0x824   :  { %v11197_v52 = vpop.eup %11196  ;;  %8235 = vadd.xlane.f32.xlu0 %v8234_v40  ;;  %v7267_v50 = vmul.f32 %v13212_v29, %v7174_v51  ;;  %v7268_v8 = vmul.f32 %v13215_v12, %v7175_v16  ;;  %v14004_v51 = vld [vmem:[#allocation97_spill] sm:$0xff] }
 0x825   :  { %v11199_v23 = vpop.eup %11198  ;;  %v7933_v10 = vpop.xlane.xlu0 %7932  ;;  %v8189_v25 = vadd.f32 %v8116_v59, %v8115_v56  ;;  %v8070_v0 = vmul.f32 %v11197_v52, %v13007_v45  ;;  %v8071_v3 = vmul.f32 %v11197_v52, %v13016_v49 }
 0x826   :  { %v7085_v58 = vpop.xlane.xlu1 %7084  ;;  %11208 = vrcp.f32 %v7933_v10  ;;  %v7341_v62 = vadd.f32 %v7268_v8, %v7267_v50  ;;  %v7222_v11 = vmul.f32 %v11199_v23, %v13997_v15  ;;  %v7223_v44 = vmul.f32 %v11199_v23, %v13998_v33  ;;  %v14007_v15 = vld [vmem:[#allocation98_spill] sm:$0xff]  ;;  %v14008_v33 = vld [vmem:[#allocation99_spill] sm:$0xff] }
 0x827   :  { %11210 = vrcp.f32 %v7085_v58  ;;  %v8147_v42 = vmul.f32 %v13198_v14, %v8070_v0  ;;  %v8148_v4 = vmul.f32 %v13201_v54, %v8071_v3 }
 0x828   :  { %v11201_v26 = vpop.eup %11200  ;;  %7342 = vadd.xlane.f32.xlu1 %v7341_v62  ;;  %8190 = vadd.xlane.f32.xlu0 %v8189_v25  ;;  %v7299_v9 = vmul.f32 %v13212_v29, %v7222_v11  ;;  %v7300_v45 = vmul.f32 %v13215_v12, %v7223_v44  ;;  %v14005_v25 = vld [vmem:[#allocation70_spill] sm:$0xff] }
 0x829   :  { %v11203_v49 = vpop.eup %11202  ;;  %v7981_v6 = vpop.xlane.xlu0 %7980  ;;  %v8237_v20 = vadd.f32 %v8148_v4, %v8147_v42  ;;  %v8025_v2 = vmul.f32 %v11201_v26, %v13022_v37  ;;  %v8026_v19 = vmul.f32 %v11201_v26, %v13999_v47  ;;  %v14009_v47 = vld [vmem:[#allocation86_spill] sm:$0xff] }
 0x82a   :  { %v7133_v38 = vpop.xlane.xlu1 %7132  ;;  %11212 = vrcp.f32 %v7981_v6  ;;  %v7389_v61 = vadd.f32 %v7300_v45, %v7299_v9  ;;  %v7177_v32 = vmul.f32 %v11203_v49, %v14000_v7  ;;  %v7178_v13 = vmul.f32 %v11203_v49, %v14001_v55  ;;  %v14010_v7 = vld [vmem:[#allocation100_spill] sm:$0xff]  ;;  %v14011_v55 = vld [vmem:[#allocation101_spill] sm:$0xff] }
 0x82b   :  { %11214 = vrcp.f32 %v7133_v38  ;;  %v8117_v30 = vmul.f32 %v13198_v14, %v8025_v2  ;;  %v8118_v22 = vmul.f32 %v13201_v54, %v8026_v19 }
 0x82c   :  { %v11205_v63 = vpop.eup %11204  ;;  %7390 = vadd.xlane.f32.xlu1 %v7389_v61  ;;  %8238 = vadd.xlane.f32.xlu0 %v8237_v20  ;;  %v7269_v53 = vmul.f32 %v13212_v29, %v7177_v32  ;;  %v7270_v37 = vmul.f32 %v13215_v12, %v7178_v13 }
 0x82d   :  { %v11207_v36 = vpop.eup %11206  ;;  %v7936_v57 = vpop.xlane.xlu0 %7935  ;;  %v8192_v41 = vadd.f32 %v8118_v22, %v8117_v30  ;;  %v8073_v43 = vmul.f32 %v11205_v63, %v14002_v39  ;;  %v8074_v27 = vmul.f32 %v11205_v63, %v14003_v60 }
 0x82e   :  { %v7088_v5 = vpop.xlane.xlu1 %7087  ;;  %11216 = vrcp.f32 %v7936_v57  ;;  %v7344_v40 = vadd.f32 %v7270_v37, %v7269_v53  ;;  %v7225_v1 = vmul.f32 %v11207_v36, %v13083_v35  ;;  %v7226_v24 = vmul.f32 %v11207_v36, %v14004_v51  ;;  %v14006_v35 = vld [vmem:[#allocation79_spill] sm:$0xff] }
 0x82f   :  { %11218 = vrcp.f32 %v7088_v5  ;;  %v8149_v16 = vmul.f32 %v13198_v14, %v8073_v43  ;;  %v8150_v56 = vmul.f32 %v13201_v54, %v8074_v27  ;;  %v14013_v43 = vld [vmem:[#allocation88_spill] sm:$0xff]  ;;  %v14015_v51 = vld [vmem:[#allocation103_spill] sm:$0xff] }
 0x830   :  { %v11209_v59 = vpop.eup %11208  ;;  %7345 = vadd.xlane.f32.xlu1 %v7344_v40  ;;  %8193 = vadd.xlane.f32.xlu0 %v8192_v41  ;;  %v7301_v52 = vmul.f32 %v13212_v29, %v7225_v1  ;;  %v7302_v50 = vmul.f32 %v13215_v12, %v7226_v24  ;;  %v14012_v41 = vld [vmem:[#allocation87_spill] sm:$0xff]  ;;  %v14014_v40 = vld [vmem:[#allocation102_spill] sm:$0xff] }
 0x831   :  { %v11211_v8 = vpop.eup %11210  ;;  %v7984_v23 = vpop.xlane.xlu0 %7983  ;;  %v8240_v10 = vadd.f32 %v8150_v56, %v8149_v16  ;;  %v8028_v0 = vmul.f32 %v11209_v59, %v14005_v25  ;;  %v8029_v3 = vmul.f32 %v11209_v59, %v14006_v35  ;;  %v14016_v25 = vld [vmem:[#allocation89_spill] sm:$0xff]  ;;  %v14017_v35 = vld [vmem:[#allocation90_spill] sm:$0xff] }
 0x832   :  { %v7136_v58 = vpop.xlane.xlu1 %7135  ;;  %11220 = vrcp.f32 %v7984_v23  ;;  %v7392_v62 = vadd.f32 %v7302_v50, %v7301_v52  ;;  %v7180_v11 = vmul.f32 %v11211_v8, %v14007_v15  ;;  %v7181_v44 = vmul.f32 %v11211_v8, %v14008_v33 }
 0x833   :  { %11222 = vrcp.f32 %v7136_v58  ;;  %v8119_v42 = vmul.f32 %v13198_v14, %v8028_v0  ;;  %v8120_v4 = vmul.f32 %v13201_v54, %v8029_v3 }
 0x834   :  { %v11213_v26 = vpop.eup %11212  ;;  %7393 = vadd.xlane.f32.xlu1 %v7392_v62  ;;  %8241 = vadd.xlane.f32.xlu0 %v8240_v10  ;;  %v7271_v9 = vmul.f32 %v13212_v29, %v7180_v11  ;;  %v7272_v45 = vmul.f32 %v13215_v12, %v7181_v44  ;;  %v14018_v11 = vld [vmem:[#allocation91_spill] sm:$0xff] }
 0x835   :  { %v11215_v49 = vpop.eup %11214  ;;  %v7939_v6 = vpop.xlane.xlu0 %7938  ;;  %v8195_v20 = vadd.f32 %v8120_v4, %v8119_v42  ;;  %v8076_v2 = vmul.f32 %v11213_v26, %v13081_v18  ;;  %v8077_v19 = vmul.f32 %v11213_v26, %v14009_v47 }
 0x836   :  { %v7091_v38 = vpop.xlane.xlu1 %7090  ;;  %11224 = vrcp.f32 %v7939_v6  ;;  %v7347_v61 = vadd.f32 %v7272_v45, %v7271_v9  ;;  %v7228_v32 = vmul.f32 %v11215_v49, %v14010_v7  ;;  %v7229_v13 = vmul.f32 %v11215_v49, %v14011_v55 }
 0x837   :  { %11226 = vrcp.f32 %v7091_v38  ;;  %v8151_v30 = vmul.f32 %v13198_v14, %v8076_v2  ;;  %v8152_v22 = vmul.f32 %v13201_v54, %v8077_v19  ;;  %v14019_v19 = vld [vmem:[#allocation104_spill] sm:$0xff] }
 0x838   :  { %v11217_v63 = vpop.eup %11216  ;;  %7348 = vadd.xlane.f32.xlu1 %v7347_v61  ;;  %8196 = vadd.xlane.f32.xlu0 %v8195_v20  ;;  %v7303_v53 = vmul.f32 %v13212_v29, %v7228_v32  ;;  %v7304_v18 = vmul.f32 %v13215_v12, %v7229_v13  ;;  %v14020_v61 = vld [vmem:[#allocation105_spill] sm:$0xff] }
 0x839   :  { %v11219_v37 = vpop.eup %11218  ;;  %v7987_v36 = vpop.xlane.xlu0 %7986  ;;  %v8243_v57 = vadd.f32 %v8152_v22, %v8151_v30  ;;  %v8031_v39 = vmul.f32 %v11217_v63, %v14012_v41  ;;  %v8032_v60 = vmul.f32 %v11217_v63, %v14013_v43 }
 0x83a   :  { %v7139_v27 = vpop.xlane.xlu1 %7138  ;;  %11228 = vrcp.f32 %v7987_v36  ;;  %v7395_v5 = vadd.f32 %v7304_v18, %v7303_v53  ;;  %v7183_v1 = vmul.f32 %v11219_v37, %v14014_v40  ;;  %v7184_v24 = vmul.f32 %v11219_v37, %v14015_v51  ;;  %v14021_v37 = vld [vmem:[#allocation92_spill] sm:$0xff] }
 0x83b   :  { %11230 = vrcp.f32 %v7139_v27  ;;  %v8121_v16 = vmul.f32 %v13198_v14, %v8031_v39  ;;  %v8122_v56 = vmul.f32 %v13201_v54, %v8032_v60 }
 0x83c   :  { %v11221_v59 = vpop.eup %11220  ;;  %7396 = vadd.xlane.f32.xlu1 %v7395_v5  ;;  %8244 = vadd.xlane.f32.xlu0 %v8243_v57  ;;  %v7273_v52 = vmul.f32 %v13212_v29, %v7183_v1  ;;  %v7274_v50 = vmul.f32 %v13215_v12, %v7184_v24  ;;  %v14022_v57 = vld [vmem:[#allocation93_spill] sm:$0xff]  ;;  %v14023_v1 = vld [vmem:[#allocation106_spill] sm:$0xff] }
 0x83d   :  { %v11223_v8 = vpop.eup %11222  ;;  %v7942_v23 = vpop.xlane.xlu0 %7941  ;;  %v8198_v10 = vadd.f32 %v8122_v56, %v8121_v16  ;;  %v8079_v0 = vmul.f32 %v11221_v59, %v14016_v25  ;;  %v8080_v3 = vmul.f32 %v11221_v59, %v14017_v35  ;;  %v14024_v16 = vld [vmem:[#allocation107_spill] sm:$0xff]  ;;  %v14025_v59 = vld [vmem:[#allocation108_spill] sm:$0xff] }
 0x83e   :  { %v7094_v58 = vpop.xlane.xlu1 %7093  ;;  %11232 = vrcp.f32 %v7942_v23  ;;  %v7350_v62 = vadd.f32 %v7274_v50, %v7273_v52  ;;  %v7231_v15 = vmul.f32 %v11223_v8, %v13144_v17  ;;  %v7232_v33 = vmul.f32 %v11223_v8, %v14018_v11 }
 0x83f   :  { %11234 = vrcp.f32 %v7094_v58  ;;  %v8153_v44 = vmul.f32 %v13198_v14, %v8079_v0  ;;  %v8154_v42 = vmul.f32 %v13201_v54, %v8080_v3  ;;  %v14026_v3 = vld [vmem:[#allocation27_spill] sm:$0xff] }
 0x840   :  { %v11225_v4 = vpop.eup %11224  ;;  %7351 = vadd.xlane.f32.xlu1 %v7350_v62  ;;  %8199 = vadd.xlane.f32.xlu0 %v8198_v10  ;;  %v7305_v26 = vmul.f32 %v13212_v29, %v7231_v15  ;;  %v7306_v9 = vmul.f32 %v13215_v12, %v7232_v33  ;;  %v14027_v15 = vld [vmem:[#allocation28_spill] sm:$0xff]  ;;  %v14028_v33 = vld [vmem:[#allocation94_spill] sm:$0xff] }
 0x841   :  { %v11227_v45 = vpop.eup %11226  ;;  %v7990_v49 = vpop.xlane.xlu0 %7989  ;;  %v8246_v6 = vadd.f32 %v8154_v42, %v8153_v44  ;;  %v8034_v20 = vmul.f32 %v11225_v4, %v13135_v31  ;;  %v8035_v17 = vmul.f32 %v11225_v4, %v13141_v48 }
 0x842   :  { %v7142_v2 = vpop.xlane.xlu1 %7141  ;;  %11236 = vrcp.f32 %v7990_v49  ;;  %v7398_v47 = vadd.f32 %v7306_v9, %v7305_v26  ;;  %v7186_v38 = vmul.f32 %v11227_v45, %v14019_v19  ;;  %v7187_v7 = vmul.f32 %v11227_v45, %v14020_v61  ;;  %v10840_v19 = vld [vmem:[#allocation14 + $0x40] sm:$0xff]   ;;  %v10843_v61 = vld [vmem:[#allocation14 + $0x8] sm:$0xff]  }
 0x843   :  { %11238 = vrcp.f32 %v7142_v2  ;;  %v8123_v32 = vmul.f32 %v13198_v14, %v8034_v20  ;;  %v8124_v55 = vmul.f32 %v13201_v54, %v8035_v17  ;;  %9419 = vmatprep.subr.bf16.mxu0 %v10840_v19  ;;  %v10855_v19 = vld [vmem:[#allocation14 + $0x38] sm:$0xff]  }
 0x844   :  { %v11229_v13 = vpop.eup %11228  ;;  %7399 = vadd.xlane.f32.xlu1 %v7398_v47  ;;  %8247 = vadd.xlane.f32.xlu0 %v8246_v6  ;;  %v7275_v30 = vmul.f32 %v13212_v29, %v7186_v38  ;;  %v7276_v31 = vmul.f32 %v13215_v12, %v7187_v7  ;;  %v10842_v38 = vld [vmem:[#allocation14 + $0x48] sm:$0xff]   ;;  %v10845_v7 = vld [vmem:[#allocation14 + $0x10] sm:$0xff]  }
 0x845   :  { %v11231_v48 = vpop.eup %11230  ;;  %v8201_v22 = vadd.f32 %v8124_v55, %v8123_v32  ;;  %v8082_v63 = vmul.f32 %v11229_v13, %v13150_v21  ;;  %v8083_v53 = vmul.f32 %v11229_v13, %v13156_v46  ;;  %v8161_v6 = vpop.xlane.xlu0 %8160  ;;  %v10846_v32 = vld [vmem:[#allocation14 + $0x58] sm:$0xff]  }
 0x846   :  { %v7353_v18 = vadd.f32 %v7276_v31, %v7275_v30  ;;  %v7234_v36 = vmul.f32 %v11231_v48, %v14021_v37  ;;  %v7235_v41 = vmul.f32 %v11231_v48, %v14022_v57  ;;  %v10847_v30 = vld [vmem:[#allocation14 + $0x18] sm:$0xff]   ;;  %v10848_v31 = vld [vmem:[#allocation14 + $0x60] sm:$0xff]   ;;  %v10852_v57 = vld [vmem:[#allocation14 + $0x70] sm:$0xff]  }
 0x847   :  { %v8155_v39 = vmul.f32 %v13198_v14, %v8082_v63  ;;  %v8156_v43 = vmul.f32 %v13201_v54, %v8083_v53  ;;  %v10849_v63 = vld [vmem:[#allocation14 + $0x20] sm:$0xff]   ;;  %v10850_v53 = vld [vmem:[#allocation14 + $0x68] sm:$0xff]  }
 0x848   :  { %v11233_v60 = vpop.eup %11232  ;;  %7354 = vadd.xlane.f32.xlu1 %v7353_v18  ;;  %8202 = vadd.xlane.f32.xlu0 %v8201_v22  ;;  %v7307_v27 = vmul.f32 %v13212_v29, %v7234_v36  ;;  %v7308_v5 = vmul.f32 %v13215_v12, %v7235_v41  ;;  %v10851_v36 = vld [vmem:[#allocation14 + $0x28] sm:$0xff]  }
 0x849   :  { %v11235_v40 = vpop.eup %11234  ;;  %v8249_v21 = vadd.f32 %v8156_v43, %v8155_v39  ;;  %v8037_v46 = vmul.f32 %v11233_v60, %v13167_v28  ;;  %v8038_v51 = vmul.f32 %v11233_v60, %v14023_v1 }
 0x84a   :  { %v7401_v24 = vadd.f32 %v7308_v5, %v7307_v27  ;;  %v7189_v56 = vmul.f32 %v11235_v40, %v14024_v16  ;;  %v7190_v52 = vmul.f32 %v11235_v40, %v14025_v59 }
 0x84b   :  { %v8125_v50 = vmul.f32 %v13198_v14, %v8037_v46  ;;  %v8126_v8 = vmul.f32 %v13201_v54, %v8038_v51 }
 0x84c   :  { %v11237_v23 = vpop.eup %11236  ;;  %7402 = vadd.xlane.f32.xlu1 %v7401_v24  ;;  %8250 = vadd.xlane.f32.xlu0 %v8249_v21  ;;  %v7277_v10 = vmul.f32 %v13212_v29, %v7189_v56  ;;  %v7278_v25 = vmul.f32 %v13215_v12, %v7190_v52 }
 0x84d   :  { %v11239_v0 = vpop.eup %11238  ;;  %v8204_v28 = vadd.f32 %v8126_v8, %v8125_v50  ;;  %v8085_v35 = vmul.f32 %v11237_v23, %v13185_v34  ;;  %v8086_v58 = vmul.f32 %v11237_v23, %v14026_v3 }
 0x84e   :  { %v7356_v62 = vadd.f32 %v7278_v25, %v7277_v10  ;;  %v7237_v11 = vmul.f32 %v11239_v0, %v14027_v15  ;;  %v7238_v44 = vmul.f32 %v11239_v0, %v14028_v33 }
 0x84f   :  { %v8157_v42 = vmul.f32 %v13198_v14, %v8085_v35  ;;  %v8158_v4 = vmul.f32 %v13201_v54, %v8086_v58  ;;  %v10841_v14 = vld [vmem:[#allocation14] sm:$0xff]  }
 0x850   :  { %7357 = vadd.xlane.f32.xlu1 %v7356_v62  ;;  %8205 = vadd.xlane.f32.xlu0 %v8204_v28  ;;  %v7309_v26 = vmul.f32 %v13212_v29, %v7237_v11  ;;  %v7310_v9 = vmul.f32 %v13215_v12, %v7238_v44  ;;  %v10844_v29 = vld [vmem:[#allocation14 + $0x50] sm:$0xff]  }
 0x851   :  { %v8252_v45 = vadd.f32 %v8158_v4, %v8157_v42  ;;  %9420 = vmatpush3.bf16.msra.mxu0 %v10841_v14 }
 0x852   :  { %v7404_v49 = vadd.f32 %v7310_v9, %v7309_v26  ;;  %9421 = vmatprep.subr.bf16.mxu0 %v10842_v38 }
 0x854   :  { %7405 = vadd.xlane.f32.xlu1 %v7404_v49  ;;  %8253 = vadd.xlane.f32.xlu0 %v8252_v45 }
 0x855   :  { %9422 = vmatpush3.bf16.msra.mxu0 %v10843_v61 }
 0x856   :  { %9423 = vmatprep.subr.bf16.mxu0 %v10844_v29 }
 0x858   :  { %v7313_v34 = vpop.xlane.xlu1 %7312 }
 0x859   :  { %9424 = vmatpush3.bf16.msra.mxu0 %v10845_v7  ;;  %v8256_v27 = vsel %vm8255_vm0, %v7313_v34, %v8161_v6 }
 0x85a   :  { %9425 = vmatprep.subr.bf16.mxu0 %v10846_v32 }
 0x85c   :  { %v7361_v20 = vpop.xlane.xlu1 %7360 }
 0x85d   :  { %v8209_v17 = vpop.xlane.xlu0 %8208  ;;  %9426 = vmatpush3.bf16.msra.mxu0 %v10847_v30 }
 0x85e   :  { %9427 = vmatprep.subr.bf16.mxu0 %v10848_v31  ;;  %v8272_v1 = vsel %vm8255_vm0, %v7361_v20, %v8209_v17  ;;  %v10853_v20 = vld [vmem:[#allocation14 + $0x30] sm:$0xff]  }
 0x861   :  { %v7316_v2 = vpop.xlane.xlu1 %7315  ;;  %v8164_v47 = vpop.xlane.xlu0 %8163  ;;  %9428 = vmatpush3.bf16.msra.mxu0 %v10849_v63 }
 0x862   :  { %9429 = vmatprep.subr.bf16.mxu0 %v10850_v53  ;;  %v8257_v21 = vsel %vm8255_vm0, %v7316_v2, %v8164_v47  ;;  %v10854_v47 = vld [vmem:[#allocation14 + $0x78] sm:$0xff]  }
 0x865   :  { %v7364_v54 = vpop.xlane.xlu1 %7363  ;;  %v8212_v12 = vpop.xlane.xlu0 %8211  ;;  %9430 = vmatpush3.bf16.msra.mxu0 %v10851_v36 }
 0x866   :  { %9431 = vmatprep.subr.bf16.mxu0 %v10852_v57  ;;  %v8273_v16 = vsel %vm8255_vm0, %v7364_v54, %v8212_v12 }
 0x869   :  { %v7319_v55 = vpop.xlane.xlu1 %7318  ;;  %9432 = vmatpush3.bf16.msra.mxu0 %v10853_v20  ;;  %v9402_v20 = vld [vmem:[#allocation16] ss:$0 sm:$0xff] }
 0x86a   :  { %9433 = vmatprep.subr.bf16.mxu0 %v10854_v47 }
 0x86c   :  { %v8167_v13 = vpop.xlane.xlu0 %8166 }
 0x86d   :  { %v8258_v24 = vsel %vm8255_vm0, %v7319_v55, %v8167_v13  ;;  %9434 = vmatpush3.bf16.msra.mxu0 %v10855_v19 }
 0x870   :  { %v7367_v48 = vpop.xlane.xlu1 %7366 }
 0x871   :  { %v8215_v22 = vpop.xlane.xlu0 %8214 }
 0x872   :  { %v8274_v50 = vsel %vm8255_vm0, %v7367_v48, %v8215_v22 }
 0x874   :  { %v7322_v18 = vpop.xlane.xlu1 %7321 }
 0x875   :  { %v8170_v37 = vpop.xlane.xlu0 %8169 }
 0x876   :  { %v8259_v59 = vsel %vm8255_vm0, %v7322_v18, %v8170_v37 }
 0x878   :  { %v7370_v41 = vpop.xlane.xlu1 %7369 }
 0x879   :  { %v8218_v39 = vpop.xlane.xlu0 %8217 }
 0x87a   :  { %v8275_v25 = vsel %vm8255_vm0, %v7370_v41, %v8218_v39 }
 0x87c   :  { %v7325_v43 = vpop.xlane.xlu1 %7324 }
 0x87d   :  { %v8173_v60 = vpop.xlane.xlu0 %8172 }
 0x87e   :  { %v8260_v8 = vsel %vm8255_vm0, %v7325_v43, %v8173_v60 }
 0x880   :  { %v7373_v5 = vpop.xlane.xlu1 %7372 }
 0x881   :  { %8288 = vxpose.xlu0.b32.start [1/16] (narrow) %v8256_v27, 8  ;;  %v8221_v40 = vpop.xlane.xlu0 %8220 }
 0x882   :  { %v8276_v3 = vsel %vm8255_vm0, %v7373_v5, %v8221_v40 }
 0x884   :  { %v7328_v46 = vpop.xlane.xlu1 %7327 }
 0x885   :  { %8289 = vxpose.xlu0.b32.cont [2/16] (narrow) %v8257_v21, 8  ;;  %v8176_v51 = vpop.xlane.xlu0 %8175 }
 0x886   :  { %v8261_v0 = vsel %vm8255_vm0, %v7328_v46, %v8176_v51 }
 0x887   :  { %8320 = vxpose.xlu1.b32.start [1/16] (narrow) %v8272_v1, 8 }
 0x889   :  { %8290 = vxpose.xlu0.b32.cont [3/16] (narrow) %v8258_v24, 8  ;;  %v7376_v56 = vpop.xlane.xlu1 %7375 }
 0x88a   :  { %v8224_v52 = vpop.xlane.xlu0 %8223 }
 0x88b   :  { %8321 = vxpose.xlu1.b32.cont [2/16] (narrow) %v8273_v16, 8  ;;  %v8277_v11 = vsel %vm8255_vm0, %v7376_v56, %v8224_v52 }
 0x88d   :  { %8291 = vxpose.xlu0.b32.cont [4/16] (narrow) %v8259_v59, 8  ;;  %v7331_v23 = vpop.xlane.xlu1 %7330 }
 0x88f   :  { %8322 = vxpose.xlu1.b32.cont [3/16] (narrow) %v8274_v50, 8 }
 0x890   :  { %v8179_v10 = vpop.xlane.xlu0 %8178 }
 0x891   :  { %8292 = vxpose.xlu0.b32.cont [5/16] (narrow) %v8260_v8, 8  ;;  %v8262_v58 = vsel %vm8255_vm0, %v7331_v23, %v8179_v10 }
 0x893   :  { %8323 = vxpose.xlu1.b32.cont [4/16] (narrow) %v8275_v25, 8 }
 0x894   :  { %v7379_v28 = vpop.xlane.xlu1 %7378 }
 0x895   :  { %8293 = vxpose.xlu0.b32.cont [6/16] (narrow) %v8261_v0, 8  ;;  %v8227_v35 = vpop.xlane.xlu0 %8226  ;;  %v14029_v0 = vld [vmem:[#allocation24_spill] sm:$0xff] }
 0x896   :  { %v8278_v44 = vsel %vm8255_vm0, %v7379_v28, %v8227_v35  ;;  %v8354_v28 = vsub.s32 6, %v14029_v0  ;;  %v8364_v35 = vsub.s32 7, %v14029_v0 }
 0x897   :  { %8324 = vxpose.xlu1.b32.cont [5/16] (narrow) %v8276_v3, 8  ;;  %v11242_v3 = vld [vmem:[#allocation13] sm:$0xff] }
 0x899   :  { %v7334_v62 = vpop.xlane.xlu1 %7333  ;;  %8294 = vxpose.xlu0.b32.cont [7/16] (narrow) %v8262_v58, 8  ;;  %v8182_v15 = vpop.xlane.xlu0 %8181  ;;  %v8355_v58 = vrot.slane %v11242_v3, %v8354_v28 }
 0x89a   :  { %v8263_v33 = vsel %vm8255_vm0, %v7334_v62, %v8182_v15  ;;  %v8365_v62 = vrot.slane %v11242_v3, %v8364_v35 }
 0x89b   :  { %8325 = vxpose.xlu1.b32.cont [6/16] (narrow) %v8277_v11, 8  ;;  %v11243_v11 = vld [vmem:[#allocation13 + $0x8] sm:$0xff] }
 0x89d   :  { %8295 = vxpose.xlu0.b32.cont [8/16] (narrow) %v8263_v33, 8  ;;  %v7382_v42 = vpop.xlane.xlu1 %7381  ;;  %v8359_v33 = vrot.slane %v11243_v11, %v8354_v28 }
 0x89e   :  { %v8230_v4 = vpop.xlane.xlu0 %8229 }
 0x89f   :  { %8326 = vxpose.xlu1.b32.cont [7/16] (narrow) %v8278_v44, 8  ;;  %v8279_v26 = vsel %vm8255_vm0, %v7382_v42, %v8230_v4  ;;  %v8369_v42 = vrot.slane %v11243_v11, %v8364_v35 }
 0x8a1   :  { %v7337_v9 = vpop.xlane.xlu1 %7336 }
 0x8a3   :  { %8327 = vxpose.xlu1.b32.cont [8/16] (narrow) %v8279_v26, 8 }
 0x8a4   :  { %v8185_v45 = vpop.xlane.xlu0 %8184 }
 0x8a5   :  { %v8264_v49 = vsel %vm8255_vm0, %v7337_v9, %v8185_v45 }
 0x8a6   :  { %8296 = vxpose.xlu0.b32.cont [9/16] (narrow) %v8264_v49, 8 }
 0x8a8   :  { %v7385_v34 = vpop.xlane.xlu1 %7384 }
 0x8a9   :  { %v8233_v6 = vpop.xlane.xlu0 %8232 }
 0x8aa   :  { %v8280_v17 = vsel %vm8255_vm0, %v7385_v34, %v8233_v6 }
 0x8ab   :  { %8328 = vxpose.xlu1.b32.cont [9/16] (narrow) %v8280_v17, 8 }
 0x8ac   :  { %v7340_v2 = vpop.xlane.xlu1 %7339 }
 0x8ad   :  { %v8188_v14 = vpop.xlane.xlu0 %8187 }
 0x8ae   :  { %v8265_v38 = vsel %vm8255_vm0, %v7340_v2, %v8188_v14 }
 0x8af   :  { %8297 = vxpose.xlu0.b32.cont [10/16] (narrow) %v8265_v38, 8 }
 0x8b0   :  { %v7388_v54 = vpop.xlane.xlu1 %7387 }
 0x8b1   :  { %v8236_v61 = vpop.xlane.xlu0 %8235 }
 0x8b2   :  { %v8281_v29 = vsel %vm8255_vm0, %v7388_v54, %v8236_v61 }
 0x8b3   :  { %8329 = vxpose.xlu1.b32.cont [10/16] (narrow) %v8281_v29, 8 }
 0x8b5   :  { %v7343_v12 = vpop.xlane.xlu1 %7342  ;;  %v8191_v7 = vpop.xlane.xlu0 %8190 }
 0x8b6   :  { %v8266_v32 = vsel %vm8255_vm0, %v7343_v12, %v8191_v7 }
 0x8b7   :  { %8298 = vxpose.xlu0.b32.cont [11/16] (narrow) %v8266_v32, 8 }
 0x8b9   :  { %v7391_v55 = vpop.xlane.xlu1 %7390  ;;  %v8239_v13 = vpop.xlane.xlu0 %8238 }
 0x8ba   :  { %v8282_v30 = vsel %vm8255_vm0, %v7391_v55, %v8239_v13 }
 0x8bb   :  { %8330 = vxpose.xlu1.b32.cont [11/16] (narrow) %v8282_v30, 8 }
 0x8bd   :  { %v7346_v31 = vpop.xlane.xlu1 %7345  ;;  %v8194_v48 = vpop.xlane.xlu0 %8193 }
 0x8be   :  { %v8267_v22 = vsel %vm8255_vm0, %v7346_v31, %v8194_v48 }
 0x8bf   :  { %8299 = vxpose.xlu0.b32.cont [12/16] (narrow) %v8267_v22, 8 }
 0x8c1   :  { %v7394_v63 = vpop.xlane.xlu1 %7393  ;;  %v8242_v53 = vpop.xlane.xlu0 %8241 }
 0x8c2   :  { %v8283_v18 = vsel %vm8255_vm0, %v7394_v63, %v8242_v53 }
 0x8c3   :  { %8331 = vxpose.xlu1.b32.cont [12/16] (narrow) %v8283_v18, 8 }
 0x8c5   :  { %v7349_v37 = vpop.xlane.xlu1 %7348  ;;  %v8197_v36 = vpop.xlane.xlu0 %8196 }
 0x8c6   :  { %v8268_v57 = vsel %vm8255_vm0, %v7349_v37, %v8197_v36 }
 0x8c7   :  { %8300 = vxpose.xlu0.b32.cont [13/16] (narrow) %v8268_v57, 8 }
 0x8c9   :  { %v7397_v41 = vpop.xlane.xlu1 %7396  ;;  %v8245_v39 = vpop.xlane.xlu0 %8244 }
 0x8ca   :  { %v8284_v43 = vsel %vm8255_vm0, %v7397_v41, %v8245_v39 }
 0x8cb   :  { %8332 = vxpose.xlu1.b32.cont [13/16] (narrow) %v8284_v43, 8 }
 0x8cd   :  { %v7352_v60 = vpop.xlane.xlu1 %7351  ;;  %v8200_v27 = vpop.xlane.xlu0 %8199 }
 0x8ce   :  { %v8269_v5 = vsel %vm8255_vm0, %v7352_v60, %v8200_v27 }
 0x8cf   :  { %8301 = vxpose.xlu0.b32.cont [14/16] (narrow) %v8269_v5, 8 }
 0x8d1   :  { %v7400_v40 = vpop.xlane.xlu1 %7399  ;;  %v8248_v21 = vpop.xlane.xlu0 %8247 }
 0x8d2   :  { %v8285_v46 = vsel %vm8255_vm0, %v7400_v40, %v8248_v21 }
 0x8d3   :  { %8333 = vxpose.xlu1.b32.cont [14/16] (narrow) %v8285_v46, 8 }
 0x8d5   :  { %v7355_v1 = vpop.xlane.xlu1 %7354  ;;  %v8203_v51 = vpop.xlane.xlu0 %8202 }
 0x8d6   :  { %v8270_v24 = vsel %vm8255_vm0, %v7355_v1, %v8203_v51 }
 0x8d7   :  { %8302 = vxpose.xlu0.b32.cont [15/16] (narrow) %v8270_v24, 8 }
 0x8d9   :  { %v7403_v16 = vpop.xlane.xlu1 %7402  ;;  %v8251_v56 = vpop.xlane.xlu0 %8250 }
 0x8da   :  { %v8286_v59 = vsel %vm8255_vm0, %v7403_v16, %v8251_v56 }
 0x8db   :  { %8334 = vxpose.xlu1.b32.cont [15/16] (narrow) %v8286_v59, 8 }
 0x8dd   :  { %v7358_v52 = vpop.xlane.xlu1 %7357  ;;  %v8206_v50 = vpop.xlane.xlu0 %8205 }
 0x8de   :  { %v8271_v8 = vsel %vm8255_vm0, %v7358_v52, %v8206_v50 }
 0x8df   :  { %8303 = vxpose.xlu0.b32.end [16/16] (narrow) %v8271_v8, 8 }
 0x8e1   :  { %v7406_v23 = vpop.xlane.xlu1 %7405  ;;  %v8254_v10 = vpop.xlane.xlu0 %8253 }
 0x8e2   :  { %v8287_v25 = vsel %vm8255_vm0, %v7406_v23, %v8254_v10 }
 0x8e3   :  { %8335 = vxpose.xlu1.b32.end [16/16] (narrow) %v8287_v25, 8 }
 0x923   :  { %v8304_v15 = vpop.trf.xlu0 }
 0x924   :  { %v8360_v44 = vmul.f32 %v8355_v58, %v8304_v15 }
 0x926   :  { %v8370_v26 = vadd.f32 %v8365_v62, %v8360_v44 }
 0x927   :  { %v8336_v4 = vpop.trf.xlu1 }
 0x928   :  { %v8361_v9 = vmul.f32 %v8359_v33, %v8336_v4  ;;  %v8372_v49 = vpack.c.bf16 %v8370_v26, %v8370_v26 }
 0x92a   :  { %v8371_v45 = vadd.f32 %v8369_v42, %v8361_v9 }
 0x92c   :  { %v8373_v34 = vpack.c.bf16 %v8371_v45, %v8371_v45 }
 0x92e   :  { %8541 = vmatprep.mubr.bf16.mxu0 %v8373_v34 }
 0x92f   :  { %8542 = vmatmul.mubr.bf16.vlgmr.msra.gmra.mrb[12].mxu0 %v8372_v49 }
 0xa02   :  { %v9435_v6 = vpop.f32.mrb[12].mxu0 }
 0xa03   :  { %v9436_v17 = vpop.f32.mrb[13].mxu0 }
 0xa04   :  { %v9437_v2 = vadd.f32 %v9436_v17, %v9435_v6  ;;  %v9438_v47 = vpop.f32.mrb[14].mxu0 }
 0xa05   :  { %v9439_v19 = vpop.f32.mrb[15].mxu0 }
 0xa06   :  { %v8544_v14 = vadd.f32 %v9437_v2, %v9402_v20 }
 0xa08   :  { %8549 = vst [vmem:[#allocation17] sm:$0x3] %v8544_v14 }
 0xa09   :  { %11453 = shalt.err (!%p11450_p6)
}
 0xa0a   :  { %s11454_s29 = scalar_lea.hbm %s13526_s11, 32 }
 0xa0b   :  { %p11455_p7 = scmp.ne.s32.totalorder %s13526_s11, %s11454_s29  ;;  %p11458_p8 = scmp.lt.u32.totalorder %s11454_s29, %s13526_s11 }
 0xa0d   :  { %p11460_p9 = pnand %p11458_p8, %p11455_p7 }
 0xa0f   :  { %11463 = shalt.err (!%p11460_p9)
}
 0xa10   :  { %8559 = dma.vmem_to_hbm [thread:$0]  %s8557_s14, 32, %s13526_s11, [#allocation4]  }
 0xa11   :  { %11474 = dma.done.wait [#allocation4], 32  }
 0xa12   :  { %11475 = vsyncadd [#allocation4], 4294967264 }
 0xa13   :  { %8563 = vsyncpa [#allocation3], 1 }
 0xa14   :  { %8564 = vsyncpa [#allocation6], 1 }
 0xa15   :  { %8565 = vsyncpa [#allocation9], 1 }
 0xa16   :  { %8566 = vsyncpa [#allocation12], 1 }
 0xa17   :  { %8567 = vsyncpa [#allocation15], 1 }
 0xa18   :  { %8568 = vsyncpa [#allocation4], 1 }

</bundles_post_ra>
